<compile_context>
chip_gen: v5e
topology: v5e:2x2
jax: 0.10.0
libtpu: 0.0.40
codegen_flags: <defaults>
</compile_context>

<pallas_src>
import jax
import jax.numpy as jnp
from jax import lax
from jax.experimental import pallas as pl
from jax.experimental.pallas import tpu as pltpu


# ----------------------------------------------------------------------------
# Pallas forward
# ----------------------------------------------------------------------------
def _large_kernel_conv_forward(x, wl1, bl1, wl2, bl2, wr1, br1, wr2, br2):
    N, Cin, H, W = x.shape
    Co = wl1.shape[0]
    k0 = wl1.shape[2]               # vertical extent   (conv_l1 / conv_r2)
    k1 = wl2.shape[3]               # horizontal extent (conv_l2 / conv_r1)
    p0 = (k0 - 1) // 2
    p1 = (k1 - 1) // 2
    H1 = H + 2 * p0 - k0 + 1        # output height (== H for odd k0)
    W1 = W + 2 * p1 - k1 + 1        # output width  (== W for odd k1)
    Hp = H + 2 * p0                 # padded input height
    Wp = W + 2 * p1                 # padded input width

    f32 = jnp.float32
    bf16 = jnp.bfloat16

    # ---- thin XLA glue: channels-last layout + per-tap weight matrices ----
    x_nhwc = x.transpose(0, 2, 3, 1).astype(f32)                  # (N, H, W, Cin)

    # per-tap (Cin, Cout) matrices in bf16 (MXU-native operand dtype)
    wl1_t = wl1[:, :, :, 0].transpose(2, 1, 0).astype(bf16)       # (k0, Cin, Co)
    wr1_t = wr1[:, :, 0, :].transpose(2, 1, 0).astype(bf16)       # (k1, Cin, Co)
    wl2_t = wl2[:, :, 0, :].transpose(2, 1, 0).astype(bf16)       # (k1, Co,  Co)
    wr2_t = wr2[:, :, :, 0].transpose(2, 1, 0).astype(bf16)       # (k0, Co,  Co)

    bl1_r = bl1.reshape(1, Co).astype(f32)
    br1_r = br1.reshape(1, Co).astype(f32)
    b2_r = (bl2 + br2).reshape(1, Co).astype(f32)                 # fused stage-2 bias

    def kernel(x_ref, wl1_ref, wr1_ref, wl2_ref, wr2_ref,
               bl1_ref, br1_ref, b2_ref, o_ref,
               xp_s, xl_s, xr_s):
        # Zero the padded scratch buffers every grid step (borders must be 0;
        # cannot rely on a program_id==0 init because "parallel" grid axes are
        # sharded across TensorCores with per-core scratch).  This is tiny VPU
        # work, fully VMEM-resident.
        xp_s[...] = jnp.zeros_like(xp_s)
        xl_s[...] = jnp.zeros_like(xl_s)
        xr_s[...] = jnp.zeros_like(xr_s)

        # in-kernel zero 'same' padding of x (interior write, borders stay 0)
        xp_s[pl.ds(p0, H), pl.ds(p1, W), :] = x_ref[0]

        # ---- stage 1, left branch: conv_l1 (k0 x 1), tap-accumulated ----
        acc_l = jnp.zeros((H1 * W, Co), f32)
        for t in range(k0):
            win = xp_s[pl.ds(t, H1), pl.ds(p1, W), :]             # (H1, W, Cin) f32
            lhs = win.reshape(H1 * W, Cin).astype(bf16)
            acc_l = acc_l + jnp.dot(lhs, wl1_ref[t], preferred_element_type=f32)
        xl_s[:, pl.ds(p1, W), :] = (acc_l + bl1_ref[...]).reshape(H1, W, Co)

        # ---- stage 1, right branch: conv_r1 (1 x k1), tap-accumulated ----
        acc_r = jnp.zeros((H * W1, Co), f32)
        for t in range(k1):
            win = xp_s[pl.ds(p0, H), pl.ds(t, W1), :]             # (H, W1, Cin) f32
            lhs = win.reshape(H * W1, Cin).astype(bf16)
            acc_r = acc_r + jnp.dot(lhs, wr1_ref[t], preferred_element_type=f32)
        xr_s[pl.ds(p0, H), :, :] = (acc_r + br1_ref[...]).reshape(H, W1, Co)

        # ---- stage 2: conv_l2 (1 x k1) + conv_r2 (k0 x 1) + add + biases ----
        acc = jnp.zeros((H1 * W1, Co), f32)
        for t in range(k1):                                       # conv_l2 (along W)
            win = xl_s[:, pl.ds(t, W1), :]                        # (H1, W1, Co) f32
            lhs = win.reshape(H1 * W1, Co).astype(bf16)
            acc = acc + jnp.dot(lhs, wl2_ref[t], preferred_element_type=f32)
        for t in range(k0):                                       # conv_r2 (along H)
            win = xr_s[pl.ds(t, H1), :, :]                        # (H1, W1, Co) f32
            lhs = win.reshape(H1 * W1, Co).astype(bf16)
            acc = acc + jnp.dot(lhs, wr2_ref[t], preferred_element_type=f32)
        o_ref[0] = (acc + b2_ref[...]).reshape(H1, W1, Co)

    out_nhwc = pl.pallas_call(
        kernel,
        out_shape=jax.ShapeDtypeStruct((N, H1, W1, Co), f32),
        grid_spec=pltpu.PrefetchScalarGridSpec(
            num_scalar_prefetch=0,
            grid=(N,),
            in_specs=[
                pl.BlockSpec((1, H, W, Cin), lambda n: (n, 0, 0, 0)),
                pl.BlockSpec((k0, Cin, Co), lambda n: (0, 0, 0)),
                pl.BlockSpec((k1, Cin, Co), lambda n: (0, 0, 0)),
                pl.BlockSpec((k1, Co, Co), lambda n: (0, 0, 0)),
                pl.BlockSpec((k0, Co, Co), lambda n: (0, 0, 0)),
                pl.BlockSpec((1, Co), lambda n: (0, 0)),
                pl.BlockSpec((1, Co), lambda n: (0, 0)),
                pl.BlockSpec((1, Co), lambda n: (0, 0)),
            ],
            out_specs=pl.BlockSpec((1, H1, W1, Co), lambda n: (n, 0, 0, 0)),
            scratch_shapes=[
                pltpu.VMEM((Hp, Wp, Cin), f32),         # zero-padded x
                pltpu.VMEM((H1, W + 2 * p1, Co), f32),  # zero-padded x_l (left stage 1)
                pltpu.VMEM((H + 2 * p0, W1, Co), f32),  # zero-padded x_r (right stage 1)
            ],
        ),
        compiler_params=pltpu.CompilerParams(
            dimension_semantics=("parallel",),          # batch sharded across TCs (v7x)
            vmem_limit_bytes=64 * 1024 * 1024),
    )(x_nhwc, wl1_t, wr1_t, wl2_t, wr2_t, bl1_r, br1_r, b2_r)

    return out_nhwc.transpose(0, 3, 1, 2)               # back to NCHW


large_kernel_conv_forward = jax.jit(_large_kernel_conv_forward)


# ----------------------------------------------------------------------------
# Pure-JAX reference (PyTorch semantics, f32, highest precision)
# ----------------------------------------------------------------------------
def _reference(x, wl1, bl1, wl2, bl2, wr1, br1, wr2, br2):
    hp = lax.Precision.HIGHEST

    def conv(inp, w, ph, pw):
        return lax.conv_general_dilated(
            inp, w, window_strides=(1, 1), padding=((ph, ph), (pw, pw)),
            dimension_numbers=("NCHW", "OIHW", "NCHW"), precision=hp)

    def b(v):
        return v.reshape(1, -1, 1, 1)

    k0 = wl1.shape[2]
    k1 = wl2.shape[3]
    p0 = (k0 - 1) // 2
    p1 = (k1 - 1) // 2
    xl = conv(x, wl1, p0, 0) + b(bl1)
    xl = conv(xl, wl2, 0, p1) + b(bl2)
    xr = conv(x, wr1, 0, p1) + b(br1)
    xr = conv(xr, wr2, p0, 0) + b(br2)
    return xl + xr


reference = jax.jit(_reference)


# ----------------------------------------------------------------------------
# Test
# ----------------------------------------------------------------------------
if __name__ == "__main__":
    key = jax.random.PRNGKey(0)
    ks = jax.random.split(key, 9)

    in_dim, out_dim = 4, 8
    k0, k1 = 7, 7                          # kernel_size = (7, 7)
    N, H, W = 2, 16, 16

    x = jax.random.normal(ks[0], (N, in_dim, H, W), jnp.float32)
    wl1 = 0.1 * jax.random.normal(ks[1], (out_dim, in_dim, k0, 1), jnp.float32)
    bl1 = 0.1 * jax.random.normal(ks[2], (out_dim,), jnp.float32)
    wl2 = 0.1 * jax.random.normal(ks[3], (out_dim, out_dim, 1, k1), jnp.float32)
    bl2 = 0.1 * jax.random.normal(ks[4], (out_dim,), jnp.float32)
    wr1 = 0.1 * jax.random.normal(ks[5], (out_dim, in_dim, 1, k1), jnp.float32)
    br1 = 0.1 * jax.random.normal(ks[6], (out_dim,), jnp.float32)
    wr2 = 0.1 * jax.random.normal(ks[7], (out_dim, out_dim, k0, 1), jnp.float32)
    br2 = 0.1 * jax.random.normal(ks[8], (out_dim,), jnp.float32)

    out = jax.block_until_ready(
        large_kernel_conv_forward(x, wl1, bl1, wl2, bl2, wr1, br1, wr2, br2))
    ref = jax.block_until_ready(
        reference(x, wl1, bl1, wl2, bl2, wr1, br1, wr2, br2))

    assert out.shape == (N, out_dim, H, W), out.shape
    assert ref.shape == out.shape, (ref.shape, out.shape)
    max_err = float(jnp.max(jnp.abs(out - ref)))
    assert max_err < 3e-2, f"max abs error {max_err}"

    print("KERNEL_OK")
</pallas_src>

<mosaic_0001>
module attributes {stable_mosaic.version = 11 : i64} {
  func.func @kernel(%arg0: i32, %arg1: memref<1x16x16x4xf32, #tpu.memory_space<vmem>>, %arg2: memref<7x4x8xbf16, #tpu.memory_space<vmem>>, %arg3: memref<7x4x8xbf16, #tpu.memory_space<vmem>>, %arg4: memref<7x8x8xbf16, #tpu.memory_space<vmem>>, %arg5: memref<7x8x8xbf16, #tpu.memory_space<vmem>>, %arg6: memref<1x8xf32, #tpu.memory_space<vmem>>, %arg7: memref<1x8xf32, #tpu.memory_space<vmem>>, %arg8: memref<1x8xf32, #tpu.memory_space<vmem>>, %arg9: memref<1x16x16x8xf32, #tpu.memory_space<vmem>>, %arg10: memref<22x22x4xf32, #tpu.memory_space<vmem>>, %arg11: memref<16x22x8xf32, #tpu.memory_space<vmem>>, %arg12: memref<22x16x8xf32, #tpu.memory_space<vmem>>) attributes {dimension_semantics = [#tpu.dimension_semantics<parallel>], iteration_bounds = array<i64: 2>, scalar_prefetch = 0 : i64, scratch_operands = 3 : i64, tpu.core_type = #tpu.core_type<tc>, window_params = [{transform_indices = @transform_0, window_bounds = array<i64: 1, 16, 16, 4>}, {pipeline_mode = #tpu.pipeline_mode<synchronous>, transform_indices = @transform_1, window_bounds = array<i64: 7, 4, 8>}, {pipeline_mode = #tpu.pipeline_mode<synchronous>, transform_indices = @transform_2, window_bounds = array<i64: 7, 4, 8>}, {pipeline_mode = #tpu.pipeline_mode<synchronous>, transform_indices = @transform_3, window_bounds = array<i64: 7, 8, 8>}, {pipeline_mode = #tpu.pipeline_mode<synchronous>, transform_indices = @transform_4, window_bounds = array<i64: 7, 8, 8>}, {pipeline_mode = #tpu.pipeline_mode<synchronous>, transform_indices = @transform_5, window_bounds = array<i64: 1, 8>}, {pipeline_mode = #tpu.pipeline_mode<synchronous>, transform_indices = @transform_6, window_bounds = array<i64: 1, 8>}, {pipeline_mode = #tpu.pipeline_mode<synchronous>, transform_indices = @transform_7, window_bounds = array<i64: 1, 8>}, {transform_indices = @transform_8, window_bounds = array<i64: 1, 16, 16, 8>}]} {
    %cst = arith.constant 0.000000e+00 : f32
    %0 = vector.broadcast %cst : f32 to vector<22x22x4xf32>
    %c0 = arith.constant 0 : index
    %c0_0 = arith.constant 0 : index
    %c0_1 = arith.constant 0 : index
    %1 = vector.load %arg10[%c0, %c0_0, %c0_1] : memref<22x22x4xf32, #tpu.memory_space<vmem>>, vector<22x22x4xf32>
    tpu.vector_store %arg10[%c0, %c0_0, %c0_1], %0 {strides = array<i32>} : memref<22x22x4xf32, #tpu.memory_space<vmem>>, vector<22x22x4xf32>,
    %cst_2 = arith.constant 0.000000e+00 : f32
    %2 = vector.broadcast %cst_2 : f32 to vector<16x22x8xf32>
    %c0_3 = arith.constant 0 : index
    %c0_4 = arith.constant 0 : index
    %c0_5 = arith.constant 0 : index
    %3 = vector.load %arg11[%c0_3, %c0_4, %c0_5] : memref<16x22x8xf32, #tpu.memory_space<vmem>>, vector<16x22x8xf32>
    tpu.vector_store %arg11[%c0_3, %c0_4, %c0_5], %2 {strides = array<i32>} : memref<16x22x8xf32, #tpu.memory_space<vmem>>, vector<16x22x8xf32>,
    %cst_6 = arith.constant 0.000000e+00 : f32
    %4 = vector.broadcast %cst_6 : f32 to vector<22x16x8xf32>
    %c0_7 = arith.constant 0 : index
    %c0_8 = arith.constant 0 : index
    %c0_9 = arith.constant 0 : index
    %5 = vector.load %arg12[%c0_7, %c0_8, %c0_9] : memref<22x16x8xf32, #tpu.memory_space<vmem>>, vector<22x16x8xf32>
    tpu.vector_store %arg12[%c0_7, %c0_8, %c0_9], %4 {strides = array<i32>} : memref<22x16x8xf32, #tpu.memory_space<vmem>>, vector<22x16x8xf32>,
    %c0_10 = arith.constant 0 : index
    %c0_11 = arith.constant 0 : index
    %c0_12 = arith.constant 0 : index
    %c0_13 = arith.constant 0 : index
    %6 = vector.load %arg1[%c0_10, %c0_11, %c0_12, %c0_13] : memref<1x16x16x4xf32, #tpu.memory_space<vmem>>, vector<1x16x16x4xf32>
    %7 = vector.shape_cast %6 : vector<1x16x16x4xf32> to vector<16x16x4xf32>
    %c3 = arith.constant 3 : index
    %c3_14 = arith.constant 3 : index
    %c0_15 = arith.constant 0 : index
    %8 = vector.load %arg10[%c3, %c3_14, %c0_15] : memref<22x22x4xf32, #tpu.memory_space<vmem>>, vector<16x16x4xf32>
    tpu.vector_store %arg10[%c3, %c3_14, %c0_15], %7 {strides = array<i32>} : memref<22x22x4xf32, #tpu.memory_space<vmem>>, vector<16x16x4xf32>,
    %cst_16 = arith.constant 0.000000e+00 : f32
    %9 = vector.broadcast %cst_16 : f32 to vector<256x8xf32>
    %c0_17 = arith.constant 0 : index
    %c3_18 = arith.constant 3 : index
    %c0_19 = arith.constant 0 : index
    %10 = vector.load %arg10[%c0_17, %c3_18, %c0_19] : memref<22x22x4xf32, #tpu.memory_space<vmem>>, vector<16x16x4xf32>
    %11 = vector.shape_cast %10 : vector<16x16x4xf32> to vector<256x4xf32>
    %12 = arith.truncf %11 : vector<256x4xf32> to vector<256x4xbf16>
    %c0_20 = arith.constant 0 : index
    %c0_21 = arith.constant 0 : index
    %c0_22 = arith.constant 0 : index
    %13 = vector.load %arg2[%c0_20, %c0_21, %c0_22] : memref<7x4x8xbf16, #tpu.memory_space<vmem>>, vector<1x4x8xbf16>
    %14 = vector.shape_cast %13 : vector<1x4x8xbf16> to vector<4x8xbf16>
    %cst_23 = arith.constant dense<0.000000e+00> : vector<256x8xf32>
    %15 = tpu.matmul %12, %14, %cst_23 {dimension_numbers = #tpu.dot_dimension_numbers<[1], [0], [0], [1], [0, 0, 1, 1], [], []>} : vector<256x4xbf16>, vector<4x8xbf16>, vector<256x8xf32> -> vector<256x8xf32>
    %16 = arith.addf %9, %15 : vector<256x8xf32>
    %c1 = arith.constant 1 : index
    %c3_24 = arith.constant 3 : index
    %c0_25 = arith.constant 0 : index
    %17 = vector.load %arg10[%c1, %c3_24, %c0_25] : memref<22x22x4xf32, #tpu.memory_space<vmem>>, vector<16x16x4xf32>
    %18 = vector.shape_cast %17 : vector<16x16x4xf32> to vector<256x4xf32>
    %19 = arith.truncf %18 : vector<256x4xf32> to vector<256x4xbf16>
    %c1_26 = arith.constant 1 : index
    %c0_27 = arith.constant 0 : index
    %c0_28 = arith.constant 0 : index
    %20 = vector.load %arg2[%c1_26, %c0_27, %c0_28] : memref<7x4x8xbf16, #tpu.memory_space<vmem>>, vector<1x4x8xbf16>
    %21 = vector.shape_cast %20 : vector<1x4x8xbf16> to vector<4x8xbf16>
    %cst_29 = arith.constant dense<0.000000e+00> : vector<256x8xf32>
    %22 = tpu.matmul %19, %21, %cst_29 {dimension_numbers = #tpu.dot_dimension_numbers<[1], [0], [0], [1], [0, 0, 1, 1], [], []>} : vector<256x4xbf16>, vector<4x8xbf16>, vector<256x8xf32> -> vector<256x8xf32>
    %23 = arith.addf %16, %22 : vector<256x8xf32>
    %c2 = arith.constant 2 : index
    %c3_30 = arith.constant 3 : index
    %c0_31 = arith.constant 0 : index
    %24 = vector.load %arg10[%c2, %c3_30, %c0_31] : memref<22x22x4xf32, #tpu.memory_space<vmem>>, vector<16x16x4xf32>
    %25 = vector.shape_cast %24 : vector<16x16x4xf32> to vector<256x4xf32>
    %26 = arith.truncf %25 : vector<256x4xf32> to vector<256x4xbf16>
    %c2_32 = arith.constant 2 : index
    %c0_33 = arith.constant 0 : index
    %c0_34 = arith.constant 0 : index
    %27 = vector.load %arg2[%c2_32, %c0_33, %c0_34] : memref<7x4x8xbf16, #tpu.memory_space<vmem>>, vector<1x4x8xbf16>
    %28 = vector.shape_cast %27 : vector<1x4x8xbf16> to vector<4x8xbf16>
    %cst_35 = arith.constant dense<0.000000e+00> : vector<256x8xf32>
    %29 = tpu.matmul %26, %28, %cst_35 {dimension_numbers = #tpu.dot_dimension_numbers<[1], [0], [0], [1], [0, 0, 1, 1], [], []>} : vector<256x4xbf16>, vector<4x8xbf16>, vector<256x8xf32> -> vector<256x8xf32>
    %30 = arith.addf %23, %29 : vector<256x8xf32>
    %c3_36 = arith.constant 3 : index
    %c3_37 = arith.constant 3 : index
    %c0_38 = arith.constant 0 : index
    %31 = vector.load %arg10[%c3_36, %c3_37, %c0_38] : memref<22x22x4xf32, #tpu.memory_space<vmem>>, vector<16x16x4xf32>
    %32 = vector.shape_cast %31 : vector<16x16x4xf32> to vector<256x4xf32>
    %33 = arith.truncf %32 : vector<256x4xf32> to vector<256x4xbf16>
    %c3_39 = arith.constant 3 : index
    %c0_40 = arith.constant 0 : index
    %c0_41 = arith.constant 0 : index
    %34 = vector.load %arg2[%c3_39, %c0_40, %c0_41] : memref<7x4x8xbf16, #tpu.memory_space<vmem>>, vector<1x4x8xbf16>
    %35 = vector.shape_cast %34 : vector<1x4x8xbf16> to vector<4x8xbf16>
    %cst_42 = arith.constant dense<0.000000e+00> : vector<256x8xf32>
    %36 = tpu.matmul %33, %35, %cst_42 {dimension_numbers = #tpu.dot_dimension_numbers<[1], [0], [0], [1], [0, 0, 1, 1], [], []>} : vector<256x4xbf16>, vector<4x8xbf16>, vector<256x8xf32> -> vector<256x8xf32>
    %37 = arith.addf %30, %36 : vector<256x8xf32>
    %c4 = arith.constant 4 : index
    %c3_43 = arith.constant 3 : index
    %c0_44 = arith.constant 0 : index
    %38 = vector.load %arg10[%c4, %c3_43, %c0_44] : memref<22x22x4xf32, #tpu.memory_space<vmem>>, vector<16x16x4xf32>
    %39 = vector.shape_cast %38 : vector<16x16x4xf32> to vector<256x4xf32>
    %40 = arith.truncf %39 : vector<256x4xf32> to vector<256x4xbf16>
    %c4_45 = arith.constant 4 : index
    %c0_46 = arith.constant 0 : index
    %c0_47 = arith.constant 0 : index
    %41 = vector.load %arg2[%c4_45, %c0_46, %c0_47] : memref<7x4x8xbf16, #tpu.memory_space<vmem>>, vector<1x4x8xbf16>
    %42 = vector.shape_cast %41 : vector<1x4x8xbf16> to vector<4x8xbf16>
    %cst_48 = arith.constant dense<0.000000e+00> : vector<256x8xf32>
    %43 = tpu.matmul %40, %42, %cst_48 {dimension_numbers = #tpu.dot_dimension_numbers<[1], [0], [0], [1], [0, 0, 1, 1], [], []>} : vector<256x4xbf16>, vector<4x8xbf16>, vector<256x8xf32> -> vector<256x8xf32>
    %44 = arith.addf %37, %43 : vector<256x8xf32>
    %c5 = arith.constant 5 : index
    %c3_49 = arith.constant 3 : index
    %c0_50 = arith.constant 0 : index
    %45 = vector.load %arg10[%c5, %c3_49, %c0_50] : memref<22x22x4xf32, #tpu.memory_space<vmem>>, vector<16x16x4xf32>
    %46 = vector.shape_cast %45 : vector<16x16x4xf32> to vector<256x4xf32>
    %47 = arith.truncf %46 : vector<256x4xf32> to vector<256x4xbf16>
    %c5_51 = arith.constant 5 : index
    %c0_52 = arith.constant 0 : index
    %c0_53 = arith.constant 0 : index
    %48 = vector.load %arg2[%c5_51, %c0_52, %c0_53] : memref<7x4x8xbf16, #tpu.memory_space<vmem>>, vector<1x4x8xbf16>
    %49 = vector.shape_cast %48 : vector<1x4x8xbf16> to vector<4x8xbf16>
    %cst_54 = arith.constant dense<0.000000e+00> : vector<256x8xf32>
    %50 = tpu.matmul %47, %49, %cst_54 {dimension_numbers = #tpu.dot_dimension_numbers<[1], [0], [0], [1], [0, 0, 1, 1], [], []>} : vector<256x4xbf16>, vector<4x8xbf16>, vector<256x8xf32> -> vector<256x8xf32>
    %51 = arith.addf %44, %50 : vector<256x8xf32>
    %c6 = arith.constant 6 : index
    %c3_55 = arith.constant 3 : index
    %c0_56 = arith.constant 0 : index
    %52 = vector.load %arg10[%c6, %c3_55, %c0_56] : memref<22x22x4xf32, #tpu.memory_space<vmem>>, vector<16x16x4xf32>
    %53 = vector.shape_cast %52 : vector<16x16x4xf32> to vector<256x4xf32>
    %54 = arith.truncf %53 : vector<256x4xf32> to vector<256x4xbf16>
    %c6_57 = arith.constant 6 : index
    %c0_58 = arith.constant 0 : index
    %c0_59 = arith.constant 0 : index
    %55 = vector.load %arg2[%c6_57, %c0_58, %c0_59] : memref<7x4x8xbf16, #tpu.memory_space<vmem>>, vector<1x4x8xbf16>
    %56 = vector.shape_cast %55 : vector<1x4x8xbf16> to vector<4x8xbf16>
    %cst_60 = arith.constant dense<0.000000e+00> : vector<256x8xf32>
    %57 = tpu.matmul %54, %56, %cst_60 {dimension_numbers = #tpu.dot_dimension_numbers<[1], [0], [0], [1], [0, 0, 1, 1], [], []>} : vector<256x4xbf16>, vector<4x8xbf16>, vector<256x8xf32> -> vector<256x8xf32>
    %58 = arith.addf %51, %57 : vector<256x8xf32>
    %c0_61 = arith.constant 0 : index
    %c0_62 = arith.constant 0 : index
    %59 = vector.load %arg6[%c0_61, %c0_62] : memref<1x8xf32, #tpu.memory_space<vmem>>, vector<1x8xf32>
    %60 = vector.broadcast %59 : vector<1x8xf32> to vector<256x8xf32>
    %61 = arith.addf %58, %60 : vector<256x8xf32>
    %62 = vector.shape_cast %61 : vector<256x8xf32> to vector<16x16x8xf32>
    %c0_63 = arith.constant 0 : index
    %c3_64 = arith.constant 3 : index
    %c0_65 = arith.constant 0 : index
    %63 = vector.load %arg11[%c0_63, %c3_64, %c0_65] : memref<16x22x8xf32, #tpu.memory_space<vmem>>, vector<16x16x8xf32>
    tpu.vector_store %arg11[%c0_63, %c3_64, %c0_65], %62 {strides = array<i32>} : memref<16x22x8xf32, #tpu.memory_space<vmem>>, vector<16x16x8xf32>,
    %cst_66 = arith.constant 0.000000e+00 : f32
    %64 = vector.broadcast %cst_66 : f32 to vector<256x8xf32>
    %c3_67 = arith.constant 3 : index
    %c0_68 = arith.constant 0 : index
    %c0_69 = arith.constant 0 : index
    %65 = vector.load %arg10[%c3_67, %c0_68, %c0_69] : memref<22x22x4xf32, #tpu.memory_space<vmem>>, vector<16x16x4xf32>
    %66 = vector.shape_cast %65 : vector<16x16x4xf32> to vector<256x4xf32>
    %67 = arith.truncf %66 : vector<256x4xf32> to vector<256x4xbf16>
    %c0_70 = arith.constant 0 : index
    %c0_71 = arith.constant 0 : index
    %c0_72 = arith.constant 0 : index
    %68 = vector.load %arg3[%c0_70, %c0_71, %c0_72] : memref<7x4x8xbf16, #tpu.memory_space<vmem>>, vector<1x4x8xbf16>
    %69 = vector.shape_cast %68 : vector<1x4x8xbf16> to vector<4x8xbf16>
    %cst_73 = arith.constant dense<0.000000e+00> : vector<256x8xf32>
    %70 = tpu.matmul %67, %69, %cst_73 {dimension_numbers = #tpu.dot_dimension_numbers<[1], [0], [0], [1], [0, 0, 1, 1], [], []>} : vector<256x4xbf16>, vector<4x8xbf16>, vector<256x8xf32> -> vector<256x8xf32>
    %71 = arith.addf %64, %70 : vector<256x8xf32>
    %c3_74 = arith.constant 3 : index
    %c1_75 = arith.constant 1 : index
    %c0_76 = arith.constant 0 : index
    %72 = vector.load %arg10[%c3_74, %c1_75, %c0_76] : memref<22x22x4xf32, #tpu.memory_space<vmem>>, vector<16x16x4xf32>
    %73 = vector.shape_cast %72 : vector<16x16x4xf32> to vector<256x4xf32>
    %74 = arith.truncf %73 : vector<256x4xf32> to vector<256x4xbf16>
    %c1_77 = arith.constant 1 : index
    %c0_78 = arith.constant 0 : index
    %c0_79 = arith.constant 0 : index
    %75 = vector.load %arg3[%c1_77, %c0_78, %c0_79] : memref<7x4x8xbf16, #tpu.memory_space<vmem>>, vector<1x4x8xbf16>
    %76 = vector.shape_cast %75 : vector<1x4x8xbf16> to vector<4x8xbf16>
    %cst_80 = arith.constant dense<0.000000e+00> : vector<256x8xf32>
    %77 = tpu.matmul %74, %76, %cst_80 {dimension_numbers = #tpu.dot_dimension_numbers<[1], [0], [0], [1], [0, 0, 1, 1], [], []>} : vector<256x4xbf16>, vector<4x8xbf16>, vector<256x8xf32> -> vector<256x8xf32>
    %78 = arith.addf %71, %77 : vector<256x8xf32>
    %c3_81 = arith.constant 3 : index
    %c2_82 = arith.constant 2 : index
    %c0_83 = arith.constant 0 : index
    %79 = vector.load %arg10[%c3_81, %c2_82, %c0_83] : memref<22x22x4xf32, #tpu.memory_space<vmem>>, vector<16x16x4xf32>
    %80 = vector.shape_cast %79 : vector<16x16x4xf32> to vector<256x4xf32>
    %81 = arith.truncf %80 : vector<256x4xf32> to vector<256x4xbf16>
    %c2_84 = arith.constant 2 : index
    %c0_85 = arith.constant 0 : index
    %c0_86 = arith.constant 0 : index
    %82 = vector.load %arg3[%c2_84, %c0_85, %c0_86] : memref<7x4x8xbf16, #tpu.memory_space<vmem>>, vector<1x4x8xbf16>
    %83 = vector.shape_cast %82 : vector<1x4x8xbf16> to vector<4x8xbf16>
    %cst_87 = arith.constant dense<0.000000e+00> : vector<256x8xf32>
    %84 = tpu.matmul %81, %83, %cst_87 {dimension_numbers = #tpu.dot_dimension_numbers<[1], [0], [0], [1], [0, 0, 1, 1], [], []>} : vector<256x4xbf16>, vector<4x8xbf16>, vector<256x8xf32> -> vector<256x8xf32>
    %85 = arith.addf %78, %84 : vector<256x8xf32>
    %c3_88 = arith.constant 3 : index
    %c3_89 = arith.constant 3 : index
    %c0_90 = arith.constant 0 : index
    %86 = vector.load %arg10[%c3_88, %c3_89, %c0_90] : memref<22x22x4xf32, #tpu.memory_space<vmem>>, vector<16x16x4xf32>
    %87 = vector.shape_cast %86 : vector<16x16x4xf32> to vector<256x4xf32>
    %88 = arith.truncf %87 : vector<256x4xf32> to vector<256x4xbf16>
    %c3_91 = arith.constant 3 : index
    %c0_92 = arith.constant 0 : index
    %c0_93 = arith.constant 0 : index
    %89 = vector.load %arg3[%c3_91, %c0_92, %c0_93] : memref<7x4x8xbf16, #tpu.memory_space<vmem>>, vector<1x4x8xbf16>
    %90 = vector.shape_cast %89 : vector<1x4x8xbf16> to vector<4x8xbf16>
    %cst_94 = arith.constant dense<0.000000e+00> : vector<256x8xf32>
    %91 = tpu.matmul %88, %90, %cst_94 {dimension_numbers = #tpu.dot_dimension_numbers<[1], [0], [0], [1], [0, 0, 1, 1], [], []>} : vector<256x4xbf16>, vector<4x8xbf16>, vector<256x8xf32> -> vector<256x8xf32>
    %92 = arith.addf %85, %91 : vector<256x8xf32>
    %c3_95 = arith.constant 3 : index
    %c4_96 = arith.constant 4 : index
    %c0_97 = arith.constant 0 : index
    %93 = vector.load %arg10[%c3_95, %c4_96, %c0_97] : memref<22x22x4xf32, #tpu.memory_space<vmem>>, vector<16x16x4xf32>
    %94 = vector.shape_cast %93 : vector<16x16x4xf32> to vector<256x4xf32>
    %95 = arith.truncf %94 : vector<256x4xf32> to vector<256x4xbf16>
    %c4_98 = arith.constant 4 : index
    %c0_99 = arith.constant 0 : index
    %c0_100 = arith.constant 0 : index
    %96 = vector.load %arg3[%c4_98, %c0_99, %c0_100] : memref<7x4x8xbf16, #tpu.memory_space<vmem>>, vector<1x4x8xbf16>
    %97 = vector.shape_cast %96 : vector<1x4x8xbf16> to vector<4x8xbf16>
    %cst_101 = arith.constant dense<0.000000e+00> : vector<256x8xf32>
    %98 = tpu.matmul %95, %97, %cst_101 {dimension_numbers = #tpu.dot_dimension_numbers<[1], [0], [0], [1], [0, 0, 1, 1], [], []>} : vector<256x4xbf16>, vector<4x8xbf16>, vector<256x8xf32> -> vector<256x8xf32>
    %99 = arith.addf %92, %98 : vector<256x8xf32>
    %c3_102 = arith.constant 3 : index
    %c5_103 = arith.constant 5 : index
    %c0_104 = arith.constant 0 : index
    %100 = vector.load %arg10[%c3_102, %c5_103, %c0_104] : memref<22x22x4xf32, #tpu.memory_space<vmem>>, vector<16x16x4xf32>
    %101 = vector.shape_cast %100 : vector<16x16x4xf32> to vector<256x4xf32>
    %102 = arith.truncf %101 : vector<256x4xf32> to vector<256x4xbf16>
    %c5_105 = arith.constant 5 : index
    %c0_106 = arith.constant 0 : index
    %c0_107 = arith.constant 0 : index
    %103 = vector.load %arg3[%c5_105, %c0_106, %c0_107] : memref<7x4x8xbf16, #tpu.memory_space<vmem>>, vector<1x4x8xbf16>
    %104 = vector.shape_cast %103 : vector<1x4x8xbf16> to vector<4x8xbf16>
    %cst_108 = arith.constant dense<0.000000e+00> : vector<256x8xf32>
    %105 = tpu.matmul %102, %104, %cst_108 {dimension_numbers = #tpu.dot_dimension_numbers<[1], [0], [0], [1], [0, 0, 1, 1], [], []>} : vector<256x4xbf16>, vector<4x8xbf16>, vector<256x8xf32> -> vector<256x8xf32>
    %106 = arith.addf %99, %105 : vector<256x8xf32>
    %c3_109 = arith.constant 3 : index
    %c6_110 = arith.constant 6 : index
    %c0_111 = arith.constant 0 : index
    %107 = vector.load %arg10[%c3_109, %c6_110, %c0_111] : memref<22x22x4xf32, #tpu.memory_space<vmem>>, vector<16x16x4xf32>
    %108 = vector.shape_cast %107 : vector<16x16x4xf32> to vector<256x4xf32>
    %109 = arith.truncf %108 : vector<256x4xf32> to vector<256x4xbf16>
    %c6_112 = arith.constant 6 : index
    %c0_113 = arith.constant 0 : index
    %c0_114 = arith.constant 0 : index
    %110 = vector.load %arg3[%c6_112, %c0_113, %c0_114] : memref<7x4x8xbf16, #tpu.memory_space<vmem>>, vector<1x4x8xbf16>
    %111 = vector.shape_cast %110 : vector<1x4x8xbf16> to vector<4x8xbf16>
    %cst_115 = arith.constant dense<0.000000e+00> : vector<256x8xf32>
    %112 = tpu.matmul %109, %111, %cst_115 {dimension_numbers = #tpu.dot_dimension_numbers<[1], [0], [0], [1], [0, 0, 1, 1], [], []>} : vector<256x4xbf16>, vector<4x8xbf16>, vector<256x8xf32> -> vector<256x8xf32>
    %113 = arith.addf %106, %112 : vector<256x8xf32>
    %c0_116 = arith.constant 0 : index
    %c0_117 = arith.constant 0 : index
    %114 = vector.load %arg7[%c0_116, %c0_117] : memref<1x8xf32, #tpu.memory_space<vmem>>, vector<1x8xf32>
    %115 = vector.broadcast %114 : vector<1x8xf32> to vector<256x8xf32>
    %116 = arith.addf %113, %115 : vector<256x8xf32>
    %117 = vector.shape_cast %116 : vector<256x8xf32> to vector<16x16x8xf32>
    %c3_118 = arith.constant 3 : index
    %c0_119 = arith.constant 0 : index
    %c0_120 = arith.constant 0 : index
    %118 = vector.load %arg12[%c3_118, %c0_119, %c0_120] : memref<22x16x8xf32, #tpu.memory_space<vmem>>, vector<16x16x8xf32>
    tpu.vector_store %arg12[%c3_118, %c0_119, %c0_120], %117 {strides = array<i32>} : memref<22x16x8xf32, #tpu.memory_space<vmem>>, vector<16x16x8xf32>,
    %cst_121 = arith.constant 0.000000e+00 : f32
    %119 = vector.broadcast %cst_121 : f32 to vector<256x8xf32>
    %c0_122 = arith.constant 0 : index
    %c0_123 = arith.constant 0 : index
    %c0_124 = arith.constant 0 : index
    %120 = vector.load %arg11[%c0_122, %c0_123, %c0_124] : memref<16x22x8xf32, #tpu.memory_space<vmem>>, vector<16x16x8xf32>
    %121 = vector.shape_cast %120 : vector<16x16x8xf32> to vector<256x8xf32>
    %122 = arith.truncf %121 : vector<256x8xf32> to vector<256x8xbf16>
    %c0_125 = arith.constant 0 : index
    %c0_126 = arith.constant 0 : index
    %c0_127 = arith.constant 0 : index
    %123 = vector.load %arg4[%c0_125, %c0_126, %c0_127] : memref<7x8x8xbf16, #tpu.memory_space<vmem>>, vector<1x8x8xbf16>
    %124 = vector.shape_cast %123 : vector<1x8x8xbf16> to vector<8x8xbf16>
    %cst_128 = arith.constant dense<0.000000e+00> : vector<256x8xf32>
    %125 = tpu.matmul %122, %124, %cst_128 {dimension_numbers = #tpu.dot_dimension_numbers<[1], [0], [0], [1], [0, 0, 1, 1], [], []>} : vector<256x8xbf16>, vector<8x8xbf16>, vector<256x8xf32> -> vector<256x8xf32>
    %126 = arith.addf %119, %125 : vector<256x8xf32>
    %c0_129 = arith.constant 0 : index
    %c1_130 = arith.constant 1 : index
    %c0_131 = arith.constant 0 : index
    %127 = vector.load %arg11[%c0_129, %c1_130, %c0_131] : memref<16x22x8xf32, #tpu.memory_space<vmem>>, vector<16x16x8xf32>
    %128 = vector.shape_cast %127 : vector<16x16x8xf32> to vector<256x8xf32>
    %129 = arith.truncf %128 : vector<256x8xf32> to vector<256x8xbf16>
    %c1_132 = arith.constant 1 : index
    %c0_133 = arith.constant 0 : index
    %c0_134 = arith.constant 0 : index
    %130 = vector.load %arg4[%c1_132, %c0_133, %c0_134] : memref<7x8x8xbf16, #tpu.memory_space<vmem>>, vector<1x8x8xbf16>
    %131 = vector.shape_cast %130 : vector<1x8x8xbf16> to vector<8x8xbf16>
    %cst_135 = arith.constant dense<0.000000e+00> : vector<256x8xf32>
    %132 = tpu.matmul %129, %131, %cst_135 {dimension_numbers = #tpu.dot_dimension_numbers<[1], [0], [0], [1], [0, 0, 1, 1], [], []>} : vector<256x8xbf16>, vector<8x8xbf16>, vector<256x8xf32> -> vector<256x8xf32>
    %133 = arith.addf %126, %132 : vector<256x8xf32>
    %c0_136 = arith.constant 0 : index
    %c2_137 = arith.constant 2 : index
    %c0_138 = arith.constant 0 : index
    %134 = vector.load %arg11[%c0_136, %c2_137, %c0_138] : memref<16x22x8xf32, #tpu.memory_space<vmem>>, vector<16x16x8xf32>
    %135 = vector.shape_cast %134 : vector<16x16x8xf32> to vector<256x8xf32>
    %136 = arith.truncf %135 : vector<256x8xf32> to vector<256x8xbf16>
    %c2_139 = arith.constant 2 : index
    %c0_140 = arith.constant 0 : index
    %c0_141 = arith.constant 0 : index
    %137 = vector.load %arg4[%c2_139, %c0_140, %c0_141] : memref<7x8x8xbf16, #tpu.memory_space<vmem>>, vector<1x8x8xbf16>
    %138 = vector.shape_cast %137 : vector<1x8x8xbf16> to vector<8x8xbf16>
    %cst_142 = arith.constant dense<0.000000e+00> : vector<256x8xf32>
    %139 = tpu.matmul %136, %138, %cst_142 {dimension_numbers = #tpu.dot_dimension_numbers<[1], [0], [0], [1], [0, 0, 1, 1], [], []>} : vector<256x8xbf16>, vector<8x8xbf16>, vector<256x8xf32> -> vector<256x8xf32>
    %140 = arith.addf %133, %139 : vector<256x8xf32>
    %c0_143 = arith.constant 0 : index
    %c3_144 = arith.constant 3 : index
    %c0_145 = arith.constant 0 : index
    %141 = vector.load %arg11[%c0_143, %c3_144, %c0_145] : memref<16x22x8xf32, #tpu.memory_space<vmem>>, vector<16x16x8xf32>
    %142 = vector.shape_cast %141 : vector<16x16x8xf32> to vector<256x8xf32>
    %143 = arith.truncf %142 : vector<256x8xf32> to vector<256x8xbf16>
    %c3_146 = arith.constant 3 : index
    %c0_147 = arith.constant 0 : index
    %c0_148 = arith.constant 0 : index
    %144 = vector.load %arg4[%c3_146, %c0_147, %c0_148] : memref<7x8x8xbf16, #tpu.memory_space<vmem>>, vector<1x8x8xbf16>
    %145 = vector.shape_cast %144 : vector<1x8x8xbf16> to vector<8x8xbf16>
    %cst_149 = arith.constant dense<0.000000e+00> : vector<256x8xf32>
    %146 = tpu.matmul %143, %145, %cst_149 {dimension_numbers = #tpu.dot_dimension_numbers<[1], [0], [0], [1], [0, 0, 1, 1], [], []>} : vector<256x8xbf16>, vector<8x8xbf16>, vector<256x8xf32> -> vector<256x8xf32>
    %147 = arith.addf %140, %146 : vector<256x8xf32>
    %c0_150 = arith.constant 0 : index
    %c4_151 = arith.constant 4 : index
    %c0_152 = arith.constant 0 : index
    %148 = vector.load %arg11[%c0_150, %c4_151, %c0_152] : memref<16x22x8xf32, #tpu.memory_space<vmem>>, vector<16x16x8xf32>
    %149 = vector.shape_cast %148 : vector<16x16x8xf32> to vector<256x8xf32>
    %150 = arith.truncf %149 : vector<256x8xf32> to vector<256x8xbf16>
    %c4_153 = arith.constant 4 : index
    %c0_154 = arith.constant 0 : index
    %c0_155 = arith.constant 0 : index
    %151 = vector.load %arg4[%c4_153, %c0_154, %c0_155] : memref<7x8x8xbf16, #tpu.memory_space<vmem>>, vector<1x8x8xbf16>
    %152 = vector.shape_cast %151 : vector<1x8x8xbf16> to vector<8x8xbf16>
    %cst_156 = arith.constant dense<0.000000e+00> : vector<256x8xf32>
    %153 = tpu.matmul %150, %152, %cst_156 {dimension_numbers = #tpu.dot_dimension_numbers<[1], [0], [0], [1], [0, 0, 1, 1], [], []>} : vector<256x8xbf16>, vector<8x8xbf16>, vector<256x8xf32> -> vector<256x8xf32>
    %154 = arith.addf %147, %153 : vector<256x8xf32>
    %c0_157 = arith.constant 0 : index
    %c5_158 = arith.constant 5 : index
    %c0_159 = arith.constant 0 : index
    %155 = vector.load %arg11[%c0_157, %c5_158, %c0_159] : memref<16x22x8xf32, #tpu.memory_space<vmem>>, vector<16x16x8xf32>
    %156 = vector.shape_cast %155 : vector<16x16x8xf32> to vector<256x8xf32>
    %157 = arith.truncf %156 : vector<256x8xf32> to vector<256x8xbf16>
    %c5_160 = arith.constant 5 : index
    %c0_161 = arith.constant 0 : index
    %c0_162 = arith.constant 0 : index
    %158 = vector.load %arg4[%c5_160, %c0_161, %c0_162] : memref<7x8x8xbf16, #tpu.memory_space<vmem>>, vector<1x8x8xbf16>
    %159 = vector.shape_cast %158 : vector<1x8x8xbf16> to vector<8x8xbf16>
    %cst_163 = arith.constant dense<0.000000e+00> : vector<256x8xf32>
    %160 = tpu.matmul %157, %159, %cst_163 {dimension_numbers = #tpu.dot_dimension_numbers<[1], [0], [0], [1], [0, 0, 1, 1], [], []>} : vector<256x8xbf16>, vector<8x8xbf16>, vector<256x8xf32> -> vector<256x8xf32>
    %161 = arith.addf %154, %160 : vector<256x8xf32>
    %c0_164 = arith.constant 0 : index
    %c6_165 = arith.constant 6 : index
    %c0_166 = arith.constant 0 : index
    %162 = vector.load %arg11[%c0_164, %c6_165, %c0_166] : memref<16x22x8xf32, #tpu.memory_space<vmem>>, vector<16x16x8xf32>
    %163 = vector.shape_cast %162 : vector<16x16x8xf32> to vector<256x8xf32>
    %164 = arith.truncf %163 : vector<256x8xf32> to vector<256x8xbf16>
    %c6_167 = arith.constant 6 : index
    %c0_168 = arith.constant 0 : index
    %c0_169 = arith.constant 0 : index
    %165 = vector.load %arg4[%c6_167, %c0_168, %c0_169] : memref<7x8x8xbf16, #tpu.memory_space<vmem>>, vector<1x8x8xbf16>
    %166 = vector.shape_cast %165 : vector<1x8x8xbf16> to vector<8x8xbf16>
    %cst_170 = arith.constant dense<0.000000e+00> : vector<256x8xf32>
    %167 = tpu.matmul %164, %166, %cst_170 {dimension_numbers = #tpu.dot_dimension_numbers<[1], [0], [0], [1], [0, 0, 1, 1], [], []>} : vector<256x8xbf16>, vector<8x8xbf16>, vector<256x8xf32> -> vector<256x8xf32>
    %168 = arith.addf %161, %167 : vector<256x8xf32>
    %c0_171 = arith.constant 0 : index
    %c0_172 = arith.constant 0 : index
    %c0_173 = arith.constant 0 : index
    %169 = vector.load %arg12[%c0_171, %c0_172, %c0_173] : memref<22x16x8xf32, #tpu.memory_space<vmem>>, vector<16x16x8xf32>
    %170 = vector.shape_cast %169 : vector<16x16x8xf32> to vector<256x8xf32>
    %171 = arith.truncf %170 : vector<256x8xf32> to vector<256x8xbf16>
    %c0_174 = arith.constant 0 : index
    %c0_175 = arith.constant 0 : index
    %c0_176 = arith.constant 0 : index
    %172 = vector.load %arg5[%c0_174, %c0_175, %c0_176] : memref<7x8x8xbf16, #tpu.memory_space<vmem>>, vector<1x8x8xbf16>
    %173 = vector.shape_cast %172 : vector<1x8x8xbf16> to vector<8x8xbf16>
    %cst_177 = arith.constant dense<0.000000e+00> : vector<256x8xf32>
    %174 = tpu.matmul %171, %173, %cst_177 {dimension_numbers = #tpu.dot_dimension_numbers<[1], [0], [0], [1], [0, 0, 1, 1], [], []>} : vector<256x8xbf16>, vector<8x8xbf16>, vector<256x8xf32> -> vector<256x8xf32>
    %175 = arith.addf %168, %174 : vector<256x8xf32>
    %c1_178 = arith.constant 1 : index
    %c0_179 = arith.constant 0 : index
    %c0_180 = arith.constant 0 : index
    %176 = vector.load %arg12[%c1_178, %c0_179, %c0_180] : memref<22x16x8xf32, #tpu.memory_space<vmem>>, vector<16x16x8xf32>
    %177 = vector.shape_cast %176 : vector<16x16x8xf32> to vector<256x8xf32>
    %178 = arith.truncf %177 : vector<256x8xf32> to vector<256x8xbf16>
    %c1_181 = arith.constant 1 : index
    %c0_182 = arith.constant 0 : index
    %c0_183 = arith.constant 0 : index
    %179 = vector.load %arg5[%c1_181, %c0_182, %c0_183] : memref<7x8x8xbf16, #tpu.memory_space<vmem>>, vector<1x8x8xbf16>
    %180 = vector.shape_cast %179 : vector<1x8x8xbf16> to vector<8x8xbf16>
    %cst_184 = arith.constant dense<0.000000e+00> : vector<256x8xf32>
    %181 = tpu.matmul %178, %180, %cst_184 {dimension_numbers = #tpu.dot_dimension_numbers<[1], [0], [0], [1], [0, 0, 1, 1], [], []>} : vector<256x8xbf16>, vector<8x8xbf16>, vector<256x8xf32> -> vector<256x8xf32>
    %182 = arith.addf %175, %181 : vector<256x8xf32>
    %c2_185 = arith.constant 2 : index
    %c0_186 = arith.constant 0 : index
    %c0_187 = arith.constant 0 : index
    %183 = vector.load %arg12[%c2_185, %c0_186, %c0_187] : memref<22x16x8xf32, #tpu.memory_space<vmem>>, vector<16x16x8xf32>
    %184 = vector.shape_cast %183 : vector<16x16x8xf32> to vector<256x8xf32>
    %185 = arith.truncf %184 : vector<256x8xf32> to vector<256x8xbf16>
    %c2_188 = arith.constant 2 : index
    %c0_189 = arith.constant 0 : index
    %c0_190 = arith.constant 0 : index
    %186 = vector.load %arg5[%c2_188, %c0_189, %c0_190] : memref<7x8x8xbf16, #tpu.memory_space<vmem>>, vector<1x8x8xbf16>
    %187 = vector.shape_cast %186 : vector<1x8x8xbf16> to vector<8x8xbf16>
    %cst_191 = arith.constant dense<0.000000e+00> : vector<256x8xf32>
    %188 = tpu.matmul %185, %187, %cst_191 {dimension_numbers = #tpu.dot_dimension_numbers<[1], [0], [0], [1], [0, 0, 1, 1], [], []>} : vector<256x8xbf16>, vector<8x8xbf16>, vector<256x8xf32> -> vector<256x8xf32>
    %189 = arith.addf %182, %188 : vector<256x8xf32>
    %c3_192 = arith.constant 3 : index
    %c0_193 = arith.constant 0 : index
    %c0_194 = arith.constant 0 : index
    %190 = vector.load %arg12[%c3_192, %c0_193, %c0_194] : memref<22x16x8xf32, #tpu.memory_space<vmem>>, vector<16x16x8xf32>
    %191 = vector.shape_cast %190 : vector<16x16x8xf32> to vector<256x8xf32>
    %192 = arith.truncf %191 : vector<256x8xf32> to vector<256x8xbf16>
    %c3_195 = arith.constant 3 : index
    %c0_196 = arith.constant 0 : index
    %c0_197 = arith.constant 0 : index
    %193 = vector.load %arg5[%c3_195, %c0_196, %c0_197] : memref<7x8x8xbf16, #tpu.memory_space<vmem>>, vector<1x8x8xbf16>
    %194 = vector.shape_cast %193 : vector<1x8x8xbf16> to vector<8x8xbf16>
    %cst_198 = arith.constant dense<0.000000e+00> : vector<256x8xf32>
    %195 = tpu.matmul %192, %194, %cst_198 {dimension_numbers = #tpu.dot_dimension_numbers<[1], [0], [0], [1], [0, 0, 1, 1], [], []>} : vector<256x8xbf16>, vector<8x8xbf16>, vector<256x8xf32> -> vector<256x8xf32>
    %196 = arith.addf %189, %195 : vector<256x8xf32>
    %c4_199 = arith.constant 4 : index
    %c0_200 = arith.constant 0 : index
    %c0_201 = arith.constant 0 : index
    %197 = vector.load %arg12[%c4_199, %c0_200, %c0_201] : memref<22x16x8xf32, #tpu.memory_space<vmem>>, vector<16x16x8xf32>
    %198 = vector.shape_cast %197 : vector<16x16x8xf32> to vector<256x8xf32>
    %199 = arith.truncf %198 : vector<256x8xf32> to vector<256x8xbf16>
    %c4_202 = arith.constant 4 : index
    %c0_203 = arith.constant 0 : index
    %c0_204 = arith.constant 0 : index
    %200 = vector.load %arg5[%c4_202, %c0_203, %c0_204] : memref<7x8x8xbf16, #tpu.memory_space<vmem>>, vector<1x8x8xbf16>
    %201 = vector.shape_cast %200 : vector<1x8x8xbf16> to vector<8x8xbf16>
    %cst_205 = arith.constant dense<0.000000e+00> : vector<256x8xf32>
    %202 = tpu.matmul %199, %201, %cst_205 {dimension_numbers = #tpu.dot_dimension_numbers<[1], [0], [0], [1], [0, 0, 1, 1], [], []>} : vector<256x8xbf16>, vector<8x8xbf16>, vector<256x8xf32> -> vector<256x8xf32>
    %203 = arith.addf %196, %202 : vector<256x8xf32>
    %c5_206 = arith.constant 5 : index
    %c0_207 = arith.constant 0 : index
    %c0_208 = arith.constant 0 : index
    %204 = vector.load %arg12[%c5_206, %c0_207, %c0_208] : memref<22x16x8xf32, #tpu.memory_space<vmem>>, vector<16x16x8xf32>
    %205 = vector.shape_cast %204 : vector<16x16x8xf32> to vector<256x8xf32>
    %206 = arith.truncf %205 : vector<256x8xf32> to vector<256x8xbf16>
    %c5_209 = arith.constant 5 : index
    %c0_210 = arith.constant 0 : index
    %c0_211 = arith.constant 0 : index
    %207 = vector.load %arg5[%c5_209, %c0_210, %c0_211] : memref<7x8x8xbf16, #tpu.memory_space<vmem>>, vector<1x8x8xbf16>
    %208 = vector.shape_cast %207 : vector<1x8x8xbf16> to vector<8x8xbf16>
    %cst_212 = arith.constant dense<0.000000e+00> : vector<256x8xf32>
    %209 = tpu.matmul %206, %208, %cst_212 {dimension_numbers = #tpu.dot_dimension_numbers<[1], [0], [0], [1], [0, 0, 1, 1], [], []>} : vector<256x8xbf16>, vector<8x8xbf16>, vector<256x8xf32> -> vector<256x8xf32>
    %210 = arith.addf %203, %209 : vector<256x8xf32>
    %c6_213 = arith.constant 6 : index
    %c0_214 = arith.constant 0 : index
    %c0_215 = arith.constant 0 : index
    %211 = vector.load %arg12[%c6_213, %c0_214, %c0_215] : memref<22x16x8xf32, #tpu.memory_space<vmem>>, vector<16x16x8xf32>
    %212 = vector.shape_cast %211 : vector<16x16x8xf32> to vector<256x8xf32>
    %213 = arith.truncf %212 : vector<256x8xf32> to vector<256x8xbf16>
    %c6_216 = arith.constant 6 : index
    %c0_217 = arith.constant 0 : index
    %c0_218 = arith.constant 0 : index
    %214 = vector.load %arg5[%c6_216, %c0_217, %c0_218] : memref<7x8x8xbf16, #tpu.memory_space<vmem>>, vector<1x8x8xbf16>
    %215 = vector.shape_cast %214 : vector<1x8x8xbf16> to vector<8x8xbf16>
    %cst_219 = arith.constant dense<0.000000e+00> : vector<256x8xf32>
    %216 = tpu.matmul %213, %215, %cst_219 {dimension_numbers = #tpu.dot_dimension_numbers<[1], [0], [0], [1], [0, 0, 1, 1], [], []>} : vector<256x8xbf16>, vector<8x8xbf16>, vector<256x8xf32> -> vector<256x8xf32>
    %217 = arith.addf %210, %216 : vector<256x8xf32>
    %c0_220 = arith.constant 0 : index
    %c0_221 = arith.constant 0 : index
    %218 = vector.load %arg8[%c0_220, %c0_221] : memref<1x8xf32, #tpu.memory_space<vmem>>, vector<1x8xf32>
    %219 = vector.broadcast %218 : vector<1x8xf32> to vector<256x8xf32>
    %220 = arith.addf %217, %219 : vector<256x8xf32>
    %221 = vector.shape_cast %220 : vector<256x8xf32> to vector<16x16x8xf32>
    %c0_222 = arith.constant 0 : index
    %c0_223 = arith.constant 0 : index
    %c0_224 = arith.constant 0 : index
    %c0_225 = arith.constant 0 : index
    %222 = vector.load %arg9[%c0_222, %c0_223, %c0_224, %c0_225] : memref<1x16x16x8xf32, #tpu.memory_space<vmem>>, vector<1x16x16x8xf32>
    %223 = vector.shape_cast %222 : vector<1x16x16x8xf32> to vector<16x16x8xf32>
    %224 = vector.shape_cast %221 : vector<16x16x8xf32> to vector<1x16x16x8xf32>
    tpu.vector_store %arg9[%c0_222, %c0_223, %c0_224, %c0_225], %224 {strides = array<i32>} : memref<1x16x16x8xf32, #tpu.memory_space<vmem>>, vector<1x16x16x8xf32>,
    return
  }
  func.func @transform_0(%arg0: i32) -> (i32, i32, i32, i32) {
    %c0_i32 = arith.constant 0 : i32
    %c0_i32_0 = arith.constant 0 : i32
    %c0_i32_1 = arith.constant 0 : i32
    %c0_i32_2 = arith.constant 0 : i32
    return %arg0, %c0_i32, %c0_i32_0, %c0_i32_1 : i32, i32, i32, i32
  }
  func.func @transform_1(%arg0: i32) -> (i32, i32, i32) {
    %c0_i32 = arith.constant 0 : i32
    %c0_i32_0 = arith.constant 0 : i32
    %c0_i32_1 = arith.constant 0 : i32
    %c0_i32_2 = arith.constant 0 : i32
    return %c0_i32, %c0_i32_0, %c0_i32_1 : i32, i32, i32
  }
  func.func @transform_2(%arg0: i32) -> (i32, i32, i32) {
    %c0_i32 = arith.constant 0 : i32
    %c0_i32_0 = arith.constant 0 : i32
    %c0_i32_1 = arith.constant 0 : i32
    %c0_i32_2 = arith.constant 0 : i32
    return %c0_i32, %c0_i32_0, %c0_i32_1 : i32, i32, i32
  }
  func.func @transform_3(%arg0: i32) -> (i32, i32, i32) {
    %c0_i32 = arith.constant 0 : i32
    %c0_i32_0 = arith.constant 0 : i32
    %c0_i32_1 = arith.constant 0 : i32
    %c0_i32_2 = arith.constant 0 : i32
    return %c0_i32, %c0_i32_0, %c0_i32_1 : i32, i32, i32
  }
  func.func @transform_4(%arg0: i32) -> (i32, i32, i32) {
    %c0_i32 = arith.constant 0 : i32
    %c0_i32_0 = arith.constant 0 : i32
    %c0_i32_1 = arith.constant 0 : i32
    %c0_i32_2 = arith.constant 0 : i32
    return %c0_i32, %c0_i32_0, %c0_i32_1 : i32, i32, i32
  }
  func.func @transform_5(%arg0: i32) -> (i32, i32) {
    %c0_i32 = arith.constant 0 : i32
    %c0_i32_0 = arith.constant 0 : i32
    %c0_i32_1 = arith.constant 0 : i32
    return %c0_i32, %c0_i32_0 : i32, i32
  }
  func.func @transform_6(%arg0: i32) -> (i32, i32) {
    %c0_i32 = arith.constant 0 : i32
    %c0_i32_0 = arith.constant 0 : i32
    %c0_i32_1 = arith.constant 0 : i32
    return %c0_i32, %c0_i32_0 : i32, i32
  }
  func.func @transform_7(%arg0: i32) -> (i32, i32) {
    %c0_i32 = arith.constant 0 : i32
    %c0_i32_0 = arith.constant 0 : i32
    %c0_i32_1 = arith.constant 0 : i32
    return %c0_i32, %c0_i32_0 : i32, i32
  }
  func.func @transform_8(%arg0: i32) -> (i32, i32, i32, i32) {
    %c0_i32 = arith.constant 0 : i32
    %c0_i32_0 = arith.constant 0 : i32
    %c0_i32_1 = arith.constant 0 : i32
    %c0_i32_2 = arith.constant 0 : i32
    return %arg0, %c0_i32, %c0_i32_0, %c0_i32_1 : i32, i32, i32, i32
  }
}

</mosaic_0001>

<bundles_post_ra>
// kernel: _large_kernel_conv_forward.1
= control target key start
LH: loop header
LB: loop body
LE: loop exit
PB: predicated region body
PF: predicated region fallthrough
CT: control target
= control target key end

     0   :  { %s7379_s27 = smov 0   ;;  %s9446_s0 = inlined_call_operand.vmem [shape: f32[2,16,16,4], index: 0, kind: input, shape index: {}]   ;;  %s9447_s1 = inlined_call_operand.vmem [shape: bf16[7,4,8], index: 1, kind: input, shape index: {}]   ;;  %s9448_s2 = inlined_call_operand.vmem [shape: bf16[7,4,8], index: 2, kind: input, shape index: {}]   ;;  %s9449_s3 = inlined_call_operand.vmem [shape: bf16[7,8,8], index: 3, kind: input, shape index: {}]   ;;  %s9450_s4 = inlined_call_operand.vmem [shape: bf16[7,8,8], index: 4, kind: input, shape index: {}]   ;;  %s9451_s5 = inlined_call_operand.vmem [shape: f32[1,8], index: 5, kind: input, shape index: {}]   ;;  %s9452_s6 = inlined_call_operand.vmem [shape: f32[1,8], index: 6, kind: input, shape index: {}]   ;;  %s9453_s7 = inlined_call_operand.vmem [shape: f32[1,8], index: 7, kind: input, shape index: {}]   ;;  %s9454_s8 = inlined_call_operand.vmem [shape: f32[2,16,16,8], index: 8, kind: output, shape index: {}]  }
   0x1 LB: > { %s6826_s28 = sadd.s32 4294967295, %s7331_s27   ;;  %p6830_p0 = scmp.ge.s32.totalorder %s7331_s27, 1  ;;  %s7331_s27 = sphi %s7379_s27, %s18_s27  }
   0x2   : > { %p262_p1 = scmp.lt.s32.totalorder %s7331_s27, 3 }
   0x4   : > { %p263_p2 = pnand %p6830_p0, %p262_p1 }
   0x5   : > { %p296_p3 = scmp.lt.s32.totalorder (!%p263_p2), %s6826_s28, 1 }
   0x6   : > { %266 = sbr.rel (%p263_p2) target bundleno = 2014 (0x7de), region = 52 }
   0xb   : > { %v6835_v0 = vld [vmem:[%s9447_s1 + $0x2] sm:$0x3]  ;;  %vm682_vm0 = vcmask 1041408   ;;  %v582_v1 = vld [vmem:[%s9447_s1] sm:$0x3]  ;;  %vm307_vm1 = vcmask 31744  }
   0xc   : > { %v684_v2 = vsel %vm682_vm0, %v6835_v0, 0  ;;  %v824_v3 = vsel %vm682_vm0, %v582_v1, 0  ;;  %v6868_v4 = vld [vmem:[%s9447_s1 + $0x4] sm:$0x3]  ;;  %vm310_vm2 = vcmask 29696   ;;  %v7333_v6 = vmov 0.0  }
   0xd   : > { %693 = vmatpush.bf16.msra.mxu0 %v684_v2  ;;  %833 = vmatpush.bf16.msra.mxu1 %v824_v3  ;;  %v1015_v5 = vsel %vm682_vm0, %v6868_v4, 0  ;;  %312 = vst.msk [vmem:[#allocation2 + $0x18] sm:$0xff] %vm307_vm1, %v7333_v6  ;;  %v6885_v7 = vld [vmem:[%s9447_s1 + $0x6] sm:$0x3]  ;;  %v6936_v18 = vld [vmem:[%s9447_s1 + $0xc] sm:$0x3] }
   0xe   : > { %1024 = vmatpush.bf16.msra.mxu2 %v1015_v5  ;;  %313 = vst.msk [vmem:[#allocation2 + $0x20] sm:$0xff] %vm307_vm1, %v7333_v6  ;;  %v1237_v8 = vsel %vm682_vm0, %v6885_v7, 0  ;;  %v1906_v19 = vsel %vm682_vm0, %v6936_v18, 0  ;;  %v6902_v20 = vld [vmem:[%s9447_s1 + $0x8] sm:$0x3]  ;;  %s9456_s28 = smov (!%p296_p3, %s6826_s28), 1 }
   0xf   : > { %314 = vst.msk [vmem:[#allocation2 + $0x28] sm:$0x3f] %vm310_vm2, %v7333_v6  ;;  %1246 = vmatpush.bf16.msra.mxu3 %v1237_v8  ;;  %v6953_v21 = vld [vmem:[%s9448_s2 + $0x2] sm:$0x3]  ;;  %v1460_v22 = vsel %vm682_vm0, %v6902_v20, 0  ;;  %s7309_s23 = sshll.u32 %s9456_s28, 8 }
  0x10   : > { %308 = vst.msk [vmem:[#allocation2] sm:$0xff] %vm307_vm1, %v7333_v6  ;;  %v2245_v23 = vsel %vm682_vm0, %v6953_v21, 0  ;;  %v6919_v24 = vld [vmem:[%s9447_s1 + $0xa] sm:$0x3]  ;;  %s7559_s26 = scalar_lea.vmem %s9446_s0, %s7309_s23  ;;  %vm375_vm3 = vcmask 64512   ;;  %vm378_vm4 = vcmask 62464   ;;  %s9267_s21 = scalar_lea.vmem %s9454_s8, %s7309_s23 }
  0x11   : > { %309 = vst.msk [vmem:[#allocation2 + $0x8] sm:$0xff] %vm307_vm1, %v7333_v6  ;;  %1469 = vmatpush.bf16.msrb.mxu0 %v1460_v22  ;;  %v1683_v25 = vsel %vm682_vm0, %v6919_v24, 0  ;;  %v469_v26 = vld [vmem:[%s7559_s26] sm:$0xff]  ;;  %v470_v27 = vld [vmem:[%s7559_s26 + $0x8] sm:$0xff]  ;;  %v471_v28 = vld [vmem:[%s7559_s26 + $0x10] sm:$0xff]  ;;  %vm3802_vm5 = vcmask 1043456  }
  0x12   : > { %311 = vst.msk [vmem:[#allocation2 + $0x10] sm:$0x3f] %vm310_vm2, %v7333_v6  ;;  %1915 = vmatpush.bf16.msrb.mxu2 %v1906_v19  ;;  %1692 = vmatpush.bf16.msrb.mxu1 %v1683_v25  ;;  %v472_v29 = vld [vmem:[%s7559_s26 + $0x18] sm:$0xff]  ;;  %v473_v30 = vld [vmem:[%s7559_s26 + $0x20] sm:$0xff]  ;;  %v474_v31 = vld [vmem:[%s7559_s26 + $0x28] sm:$0xff] }
  0x13   : > { %315 = vst.msk [vmem:[#allocation2 + $0x30] sm:$0xff] %vm307_vm1, %v7333_v6  ;;  %2254 = vmatpush.bf16.msrb.mxu3 %v2245_v23  ;;  %v475_v35 = vld [vmem:[%s7559_s26 + $0x30] sm:$0xff]  ;;  %v476_v36 = vld [vmem:[%s7559_s26 + $0x38] sm:$0xff]  ;;  %v477_v40 = vld [vmem:[%s7559_s26 + $0x40] sm:$0xff] }
  0x14   : > { %316 = vst.msk [vmem:[#allocation2 + $0x38] sm:$0xff] %vm307_vm1, %v7333_v6  ;;  %v478_v41 = vld [vmem:[%s7559_s26 + $0x48] sm:$0xff]  ;;  %v479_v45 = vld [vmem:[%s7559_s26 + $0x50] sm:$0xff]  ;;  %v480_v46 = vld [vmem:[%s7559_s26 + $0x58] sm:$0xff] }
  0x15   : > { %v584_v9 = vld [vmem:[#allocation2 + $0x1b] sm:$0xff]  ;;  %317 = vst.msk [vmem:[#allocation2 + $0x40] sm:$0x3f] %vm310_vm2, %v7333_v6  ;;  %v482_v51 = vld [vmem:[%s7559_s26 + $0x68] sm:$0xff]  ;;  %v483_v55 = vld [vmem:[%s7559_s26 + $0x70] sm:$0xff] }
  0x16   : > { %v585_v10 = vld [vmem:[#allocation2 + $0x23] sm:$0xff]  ;;  %318 = vst.msk [vmem:[#allocation2 + $0x48] sm:$0xff] %vm307_vm1, %v7333_v6  ;;  %v484_v56 = vld [vmem:[%s7559_s26 + $0x78] sm:$0xff] }
  0x17   : > { %v616_v11 = vpack.c.bf16 %v585_v10, %v584_v9  ;;  %319 = vst.msk [vmem:[#allocation2 + $0x50] sm:$0xff] %vm307_vm1, %v7333_v6  ;;  %v481_v50 = vld [vmem:[%s7559_s26 + $0x60] sm:$0xff]  ;;  %v486_v63 = vld [vmem:[%s7559_s26 + $0x88] sm:$0xff] }
  0x18   : > { %320 = vst.msk [vmem:[#allocation2 + $0x58] sm:$0x3f] %vm310_vm2, %v7333_v6  ;;  %v534_v12 = vld [vmem:[#allocation2 + $0x3] sm:$0xff] }
  0x19   : > { %6836 = vmatmul.msk.bf16.vlgmr.msra.gmra.mxu0 %vm307_vm1, %v616_v11  ;;  %321 = vst.msk [vmem:[#allocation2 + $0x60] sm:$0xff] %vm307_vm1, %v7333_v6  ;;  %v535_v13 = vld [vmem:[#allocation2 + $0xb] sm:$0xff]  ;;  %v485_v62 = vld [vmem:[%s7559_s26 + $0x80] sm:$0xff] }
  0x1a   : > { %322 = vst.msk [vmem:[#allocation2 + $0x68] sm:$0xff] %vm307_vm1, %v7333_v6  ;;  %v566_v14 = vpack.c.bf16 %v535_v13, %v534_v12  ;;  %v488_v12 = vld [vmem:[%s7559_s26 + $0x98] sm:$0xff]  ;;  %v489_v20 = vld [vmem:[%s7559_s26 + $0xa0] sm:$0xff]  ;;  %v490_v21 = vld [vmem:[%s7559_s26 + $0xa8] sm:$0xff] }
  0x1b   : > { %323 = vst.msk [vmem:[#allocation2 + $0x70] sm:$0x3f] %vm310_vm2, %v7333_v6  ;;  %v916_v15 = vld [vmem:[#allocation2 + $0x33] sm:$0xff] }
  0x1c   : > { %324 = vst.msk [vmem:[#allocation2 + $0x78] sm:$0xff] %vm307_vm1, %v7333_v6  ;;  %6852 = vmatmul.msk.bf16.vlgmr.msra.gmra.mxu1 %vm307_vm1, %v566_v14  ;;  %v917_v16 = vld [vmem:[#allocation2 + $0x3b] sm:$0xff] }
  0x1d   : > { %325 = vst.msk [vmem:[#allocation2 + $0x80] sm:$0xff] %vm307_vm1, %v7333_v6  ;;  %v948_v17 = vpack.c.bf16 %v917_v16, %v916_v15 }
  0x1e   : > { %326 = vst.msk [vmem:[#allocation2 + $0x88] sm:$0x3f] %vm310_vm2, %v7333_v6 }
  0x1f   : > { %327 = vst.msk [vmem:[#allocation2 + $0x90] sm:$0xff] %vm307_vm1, %v7333_v6  ;;  %6869 = vmatmul.msk.bf16.vlgmr.msra.gmra.mxu2 %vm307_vm1, %v948_v17 }
  0x20   : > { %328 = vst.msk [vmem:[#allocation2 + $0x98] sm:$0xff] %vm307_vm1, %v7333_v6 }
  0x21   : > { %329 = vst.msk [vmem:[#allocation2 + $0xa0] sm:$0x3f] %vm310_vm2, %v7333_v6 }
  0x22   : > { %330 = vst.msk [vmem:[#allocation2 + $0xa8] sm:$0xff] %vm307_vm1, %v7333_v6 }
  0x23   : > { %331 = vst.msk [vmem:[#allocation2 + $0xb0] sm:$0xff] %vm307_vm1, %v7333_v6 }
  0x24   : > { %332 = vst.msk [vmem:[#allocation2 + $0xb8] sm:$0x3f] %vm310_vm2, %v7333_v6 }
  0x25   : > { %333 = vst.msk [vmem:[#allocation2 + $0xc0] sm:$0xff] %vm307_vm1, %v7333_v6 }
  0x26   : > { %334 = vst.msk [vmem:[#allocation2 + $0xc8] sm:$0xff] %vm307_vm1, %v7333_v6 }
  0x27   : > { %335 = vst.msk [vmem:[#allocation2 + $0xd0] sm:$0x3f] %vm310_vm2, %v7333_v6 }
  0x28   : > { %336 = vst.msk [vmem:[#allocation2 + $0xd8] sm:$0xff] %vm307_vm1, %v7333_v6 }
  0x29   : > { %337 = vst.msk [vmem:[#allocation2 + $0xe0] sm:$0xff] %vm307_vm1, %v7333_v6  ;;  %6837 = vmatmul.msk.bf16.gmra.mxu0 %vm307_vm1, %v948_v17 }
  0x2a   : > { %338 = vst.msk [vmem:[#allocation2 + $0xe8] sm:$0x3f] %vm310_vm2, %v7333_v6 }
  0x2b   : > { %339 = vst.msk [vmem:[#allocation2 + $0xf0] sm:$0xff] %vm307_vm1, %v7333_v6 }
  0x2c   : > { %340 = vst.msk [vmem:[#allocation2 + $0xf8] sm:$0xff] %vm307_vm1, %v7333_v6  ;;  %6853 = vmatmul.msk.bf16.gmra.mxu1 %vm307_vm1, %v616_v11  ;;  %v487_v11 = vld [vmem:[%s7559_s26 + $0x90] sm:$0xff] }
  0x2d   : > { %341 = vst.msk [vmem:[#allocation2 + $0x100] sm:$0x3f] %vm310_vm2, %v7333_v6 }
  0x2e   : > { %342 = vst.msk [vmem:[#allocation2 + $0x108] sm:$0xff] %vm307_vm1, %v7333_v6 }
  0x2f   : > { %343 = vst.msk [vmem:[#allocation2 + $0x110] sm:$0xff] %vm307_vm1, %v7333_v6 }
  0x30   : > { %344 = vst.msk [vmem:[#allocation2 + $0x118] sm:$0x3f] %vm310_vm2, %v7333_v6 }
  0x31   : > { %345 = vst.msk [vmem:[#allocation2 + $0x120] sm:$0xff] %vm307_vm1, %v7333_v6 }
  0x32   : > { %346 = vst.msk [vmem:[#allocation2 + $0x128] sm:$0xff] %vm307_vm1, %v7333_v6 }
  0x33   : > { %347 = vst.msk [vmem:[#allocation2 + $0x130] sm:$0x3f] %vm310_vm2, %v7333_v6 }
  0x34   : > { %348 = vst.msk [vmem:[#allocation2 + $0x138] sm:$0xff] %vm307_vm1, %v7333_v6 }
  0x35   : > { %349 = vst.msk [vmem:[#allocation2 + $0x140] sm:$0xff] %vm307_vm1, %v7333_v6 }
  0x36   : > { %350 = vst.msk [vmem:[#allocation2 + $0x148] sm:$0x3f] %vm310_vm2, %v7333_v6 }
  0x37   : > { %351 = vst.msk [vmem:[#allocation2 + $0x150] sm:$0xff] %vm307_vm1, %v7333_v6 }
  0x38   : > { %352 = vst.msk [vmem:[#allocation2 + $0x158] sm:$0xff] %vm307_vm1, %v7333_v6 }
  0x39   : > { %353 = vst.msk [vmem:[#allocation2 + $0x160] sm:$0x3f] %vm310_vm2, %v7333_v6 }
  0x3a   : > { %354 = vst.msk [vmem:[#allocation2 + $0x168] sm:$0xff] %vm307_vm1, %v7333_v6 }
  0x3b   : > { %355 = vst.msk [vmem:[#allocation2 + $0x170] sm:$0xff] %vm307_vm1, %v7333_v6 }
  0x3c   : > { %356 = vst.msk [vmem:[#allocation2 + $0x178] sm:$0x3f] %vm310_vm2, %v7333_v6  ;;  %6854 = vmatmul.msk.bf16.gmra.mxu1 %vm307_vm1, %v948_v17 }
  0x3d   : > { %357 = vst.msk [vmem:[#allocation2 + $0x180] sm:$0xff] %vm307_vm1, %v7333_v6 }
  0x3e   : > { %358 = vst.msk [vmem:[#allocation2 + $0x188] sm:$0xff] %vm307_vm1, %v7333_v6 }
  0x3f   : > { %359 = vst.msk [vmem:[#allocation2 + $0x190] sm:$0x3f] %vm310_vm2, %v7333_v6 }
  0x40   : > { %360 = vst.msk [vmem:[#allocation2 + $0x198] sm:$0xff] %vm307_vm1, %v7333_v6 }
  0x41   : > { %361 = vst.msk [vmem:[#allocation2 + $0x1a0] sm:$0xff] %vm307_vm1, %v7333_v6 }
  0x42   : > { %362 = vst.msk [vmem:[#allocation2 + $0x1a8] sm:$0x3f] %vm310_vm2, %v7333_v6 }
  0x43   : > { %363 = vst.msk [vmem:[#allocation2 + $0x1b0] sm:$0xff] %vm307_vm1, %v7333_v6 }
  0x44   : > { %364 = vst.msk [vmem:[#allocation2 + $0x1b8] sm:$0xff] %vm307_vm1, %v7333_v6 }
  0x45   : > { %365 = vst.msk [vmem:[#allocation2 + $0x1c0] sm:$0x3f] %vm310_vm2, %v7333_v6 }
  0x46   : > { %366 = vst.msk [vmem:[#allocation2 + $0x1c8] sm:$0xff] %vm307_vm1, %v7333_v6 }
  0x47   : > { %367 = vst.msk [vmem:[#allocation2 + $0x1d0] sm:$0xff] %vm307_vm1, %v7333_v6 }
  0x48   : > { %368 = vst.msk [vmem:[#allocation2 + $0x1d8] sm:$0x3f] %vm310_vm2, %v7333_v6 }
  0x49   : > { %369 = vst.msk [vmem:[#allocation2 + $0x1e0] sm:$0xff] %vm307_vm1, %v7333_v6 }
  0x4a   : > { %370 = vst.msk [vmem:[#allocation2 + $0x1e8] sm:$0xff] %vm307_vm1, %v7333_v6 }
  0x4b   : > { %371 = vst.msk [vmem:[#allocation2 + $0x1f0] sm:$0x3f] %vm310_vm2, %v7333_v6 }
  0x4c   : > { %372 = vst.msk [vmem:[#allocation2 + $0x1f8] sm:$0xff] %vm307_vm1, %v7333_v6 }
  0x4d   : > { %373 = vst.msk [vmem:[#allocation2 + $0x200] sm:$0xff] %vm307_vm1, %v7333_v6 }
  0x4e   : > { %374 = vst.msk [vmem:[#allocation2 + $0x208] sm:$0x3f] %vm310_vm2, %v7333_v6 }
  0x4f   : > { %502 = vst.msk [vmem:[#allocation2 + $0x4b] sm:$0xff] %vm307_vm1, %v469_v26 }
  0x50   : > { %503 = vst.msk [vmem:[#allocation2 + $0x53] sm:$0xff] %vm307_vm1, %v470_v27 }
  0x51   : > { %504 = vst.msk [vmem:[#allocation2 + $0x63] sm:$0xff] %vm307_vm1, %v471_v28 }
  0x52   : > { %505 = vst.msk [vmem:[#allocation2 + $0x6b] sm:$0xff] %vm307_vm1, %v472_v29 }
  0x53   : > { %506 = vst.msk [vmem:[#allocation2 + $0x7b] sm:$0xff] %vm307_vm1, %v473_v30 }
  0x54   : > { %507 = vst.msk [vmem:[#allocation2 + $0x83] sm:$0xff] %vm307_vm1, %v474_v31 }
  0x55   : > { %508 = vst.msk [vmem:[#allocation2 + $0x93] sm:$0xff] %vm307_vm1, %v475_v35  ;;  %v492_v35 = vld [vmem:[%s7559_s26 + $0xb8] sm:$0xff] }
  0x56   : > { %v1138_v32 = vld [vmem:[#allocation2 + $0x4b] sm:$0xff]  ;;  %509 = vst.msk [vmem:[#allocation2 + $0x9b] sm:$0xff] %vm307_vm1, %v476_v36 }
  0x57   : > { %v1139_v33 = vld [vmem:[#allocation2 + $0x53] sm:$0xff]  ;;  %510 = vst.msk [vmem:[#allocation2 + $0xab] sm:$0xff] %vm307_vm1, %v477_v40 }
  0x58   : > { %v1170_v34 = vpack.c.bf16 %v1139_v33, %v1138_v32  ;;  %v1140_v37 = vld [vmem:[#allocation2 + $0x63] sm:$0xff]  ;;  %511 = vst.msk [vmem:[#allocation2 + $0xb3] sm:$0xff] %vm307_vm1, %v478_v41 }
  0x59   : > { %v1141_v38 = vld [vmem:[#allocation2 + $0x6b] sm:$0xff]  ;;  %512 = vst.msk [vmem:[#allocation2 + $0xc3] sm:$0xff] %vm307_vm1, %v479_v45 }
  0x5a   : > { %6886 = vmatmul.msk.bf16.vlgmr.msra.gmra.mxu3 %vm307_vm1, %v1170_v34  ;;  %6870 = vmatmul.msk.bf16.gmra.mxu2 %vm307_vm1, %v1170_v34  ;;  %v7591_v39 = vpack.c.bf16 %v1141_v38, %v1140_v37  ;;  %v1142_v42 = vld [vmem:[#allocation2 + $0x7b] sm:$0xff]  ;;  %513 = vst.msk [vmem:[#allocation2 + $0xcb] sm:$0xff] %vm307_vm1, %v480_v46 }
  0x5b   : > { %6838 = vmatmul.msk.bf16.gmra.mxu0 %vm307_vm1, %v1170_v34  ;;  %6855 = vmatmul.msk.bf16.gmra.mxu1 %vm307_vm1, %v1170_v34  ;;  %v1143_v43 = vld [vmem:[#allocation2 + $0x83] sm:$0xff]  ;;  %514 = vst.msk [vmem:[#allocation2 + $0xdb] sm:$0xff] %vm307_vm1, %v481_v50  ;;  %v491_v34 = vld [vmem:[%s7559_s26 + $0xb0] sm:$0xff] }
  0x5c   : > { %v7605_v44 = vpack.c.bf16 %v1143_v43, %v1142_v42  ;;  %v1144_v47 = vld [vmem:[#allocation2 + $0x93] sm:$0xff]  ;;  %515 = vst.msk [vmem:[#allocation2 + $0xe3] sm:$0xff] %vm307_vm1, %v482_v51 }
  0x5d   : > { %v1145_v48 = vld [vmem:[#allocation2 + $0x9b] sm:$0xff]  ;;  %516 = vst.msk [vmem:[#allocation2 + $0xf3] sm:$0xff] %vm307_vm1, %v483_v55 }
  0x5e   : > { %v7619_v49 = vpack.c.bf16 %v1145_v48, %v1144_v47  ;;  %v1146_v52 = vld [vmem:[#allocation2 + $0xab] sm:$0xff]  ;;  %517 = vst.msk [vmem:[#allocation2 + $0xfb] sm:$0xff] %vm307_vm1, %v484_v56 }
  0x5f   : > { %v1147_v53 = vld [vmem:[#allocation2 + $0xb3] sm:$0xff]  ;;  %518 = vst.msk [vmem:[#allocation2 + $0x10b] sm:$0xff] %vm307_vm1, %v485_v62  ;;  %v494_v62 = vld [vmem:[%s7559_s26 + $0xc8] sm:$0xff] }
  0x60   : > { %v7633_v54 = vpack.c.bf16 %v1147_v53, %v1146_v52  ;;  %v1148_v57 = vld [vmem:[#allocation2 + $0xc3] sm:$0xff]  ;;  %519 = vst.msk [vmem:[#allocation2 + $0x113] sm:$0xff] %vm307_vm1, %v486_v63 }
  0x61   : > { %v1149_v58 = vld [vmem:[#allocation2 + $0xcb] sm:$0xff]  ;;  %520 = vst.msk [vmem:[#allocation2 + $0x123] sm:$0xff] %vm307_vm1, %v487_v11 }
  0x62   : > { %v7647_v59 = vpack.c.bf16 %v1149_v58, %v1148_v57  ;;  %v1150_v3 = vld [vmem:[#allocation2 + $0xdb] sm:$0xff]  ;;  %521 = vst.msk [vmem:[#allocation2 + $0x12b] sm:$0xff] %vm307_vm1, %v488_v12 }
  0x63   : > { %v1151_v4 = vld [vmem:[#allocation2 + $0xe3] sm:$0xff]  ;;  %522 = vst.msk [vmem:[#allocation2 + $0x13b] sm:$0xff] %vm307_vm1, %v489_v20  ;;  %v496_v20 = vld [vmem:[%s7559_s26 + $0xd8] sm:$0xff] }
  0x64   : > { %v7661_v8 = vpack.c.bf16 %v1151_v4, %v1150_v3  ;;  %v1152_v14 = vld [vmem:[#allocation2 + $0xf3] sm:$0xff]  ;;  %523 = vst.msk [vmem:[#allocation2 + $0x143] sm:$0xff] %vm307_vm1, %v490_v21 }
  0x65   : > { %v1153_v15 = vld [vmem:[#allocation2 + $0xfb] sm:$0xff]  ;;  %524 = vst.msk [vmem:[#allocation2 + $0x153] sm:$0xff] %vm307_vm1, %v491_v34 }
  0x66   : > { %v7675_v16 = vpack.c.bf16 %v1153_v15, %v1152_v14  ;;  %v1154_v22 = vld [vmem:[#allocation2 + $0x10b] sm:$0xff]  ;;  %525 = vst.msk [vmem:[#allocation2 + $0x15b] sm:$0xff] %vm307_vm1, %v492_v35 }
  0x67   : > { %v1155_v23 = vld [vmem:[#allocation2 + $0x113] sm:$0xff]  ;;  %527 = vst.msk [vmem:[#allocation2 + $0x173] sm:$0xff] %vm307_vm1, %v494_v62 }
  0x68   : > { %v7689_v25 = vpack.c.bf16 %v1155_v23, %v1154_v22  ;;  %v1156_v40 = vld [vmem:[#allocation2 + $0x123] sm:$0xff]  ;;  %529 = vst.msk [vmem:[#allocation2 + $0x18b] sm:$0xff] %vm307_vm1, %v496_v20 }
  0x69   : > { %v1157_v41 = vld [vmem:[#allocation2 + $0x12b] sm:$0xff]  ;;  %376 = vst.msk [vmem:[#allocation3] sm:$0xff] %vm375_vm3, %v7333_v6 }
  0x6a   : > { %6887 = vmatmul.msk.bf16.gmra.mxu3 %vm307_vm1, %v7591_v39  ;;  %6871 = vmatmul.msk.bf16.gmra.mxu2 %vm307_vm1, %v7591_v39  ;;  %v7707_v48 = vpack.c.bf16 %v1157_v41, %v1156_v40  ;;  %v497_v41 = vld [vmem:[%s7559_s26 + $0xe0] sm:$0xff]  ;;  %377 = vst.msk [vmem:[#allocation3 + $0x8] sm:$0xff] %vm375_vm3, %v7333_v6 }
  0x6b   : > { %6839 = vmatmul.msk.bf16.gmra.mxu0 %vm307_vm1, %v7591_v39  ;;  %6856 = vmatmul.msk.bf16.gmra.mxu1 %vm307_vm1, %v7591_v39  ;;  %530 = vst.msk [vmem:[#allocation2 + $0x19b] sm:$0xff] %vm307_vm1, %v497_v41 }
  0x6c   : > { %v1160_v23 = vld [vmem:[#allocation2 + $0x153] sm:$0xff]  ;;  %380 = vst.msk [vmem:[#allocation3 + $0x18] sm:$0xff] %vm375_vm3, %v7333_v6 }
  0x6d   : > { %381 = vst.msk [vmem:[#allocation3 + $0x20] sm:$0xff] %vm375_vm3, %v7333_v6 }
  0x6e   : > { %383 = vst.msk [vmem:[#allocation3 + $0x30] sm:$0xff] %vm375_vm3, %v7333_v6 }
  0x6f   : > { %384 = vst.msk [vmem:[#allocation3 + $0x38] sm:$0xff] %vm375_vm3, %v7333_v6 }
  0x70   : > { %386 = vst.msk [vmem:[#allocation3 + $0x48] sm:$0xff] %vm375_vm3, %v7333_v6 }
  0x71   : > { %387 = vst.msk [vmem:[#allocation3 + $0x50] sm:$0xff] %vm375_vm3, %v7333_v6 }
  0x72   : > { %389 = vst.msk [vmem:[#allocation3 + $0x60] sm:$0xff] %vm375_vm3, %v7333_v6 }
  0x73   : > { %390 = vst.msk [vmem:[#allocation3 + $0x68] sm:$0xff] %vm375_vm3, %v7333_v6 }
  0x74   : > { %392 = vst.msk [vmem:[#allocation3 + $0x78] sm:$0xff] %vm375_vm3, %v7333_v6 }
  0x75   : > { %393 = vst.msk [vmem:[#allocation3 + $0x80] sm:$0xff] %vm375_vm3, %v7333_v6 }
  0x76   : > { %395 = vst.msk [vmem:[#allocation3 + $0x90] sm:$0xff] %vm375_vm3, %v7333_v6 }
  0x77   : > { %396 = vst.msk [vmem:[#allocation3 + $0x98] sm:$0xff] %vm375_vm3, %v7333_v6 }
  0x78   : > { %398 = vst.msk [vmem:[#allocation3 + $0xa8] sm:$0xff] %vm375_vm3, %v7333_v6 }
  0x79   : > { %399 = vst.msk [vmem:[#allocation3 + $0xb0] sm:$0xff] %vm375_vm3, %v7333_v6 }
  0x7a   : > { %6888 = vmatmul.msk.bf16.gmra.mxu3 %vm307_vm1, %v7605_v44  ;;  %6872 = vmatmul.msk.bf16.gmra.mxu2 %vm307_vm1, %v7605_v44  ;;  %401 = vst.msk [vmem:[#allocation3 + $0xc0] sm:$0xff] %vm375_vm3, %v7333_v6 }
  0x7b   : > { %6840 = vmatmul.msk.bf16.gmra.mxu0 %vm307_vm1, %v7605_v44  ;;  %6857 = vmatmul.msk.bf16.gmra.mxu1 %vm307_vm1, %v7605_v44  ;;  %402 = vst.msk [vmem:[#allocation3 + $0xc8] sm:$0xff] %vm375_vm3, %v7333_v6 }
  0x7c   : > { %404 = vst.msk [vmem:[#allocation3 + $0xd8] sm:$0xff] %vm375_vm3, %v7333_v6 }
  0x7d   : > { %405 = vst.msk [vmem:[#allocation3 + $0xe0] sm:$0xff] %vm375_vm3, %v7333_v6 }
  0x7e   : > { %407 = vst.msk [vmem:[#allocation3 + $0xf0] sm:$0xff] %vm375_vm3, %v7333_v6 }
  0x7f   : > { %408 = vst.msk [vmem:[#allocation3 + $0xf8] sm:$0xff] %vm375_vm3, %v7333_v6 }
  0x80   : > { %410 = vst.msk [vmem:[#allocation3 + $0x108] sm:$0xff] %vm375_vm3, %v7333_v6 }
  0x81   : > { %411 = vst.msk [vmem:[#allocation3 + $0x110] sm:$0xff] %vm375_vm3, %v7333_v6 }
  0x82   : > { %413 = vst.msk [vmem:[#allocation3 + $0x120] sm:$0xff] %vm375_vm3, %v7333_v6 }
  0x83   : > { %414 = vst.msk [vmem:[#allocation3 + $0x128] sm:$0xff] %vm375_vm3, %v7333_v6 }
  0x84   : > { %416 = vst.msk [vmem:[#allocation3 + $0x138] sm:$0xff] %vm375_vm3, %v7333_v6 }
  0x85   : > { %417 = vst.msk [vmem:[#allocation3 + $0x140] sm:$0xff] %vm375_vm3, %v7333_v6 }
  0x86   : > { %419 = vst.msk [vmem:[#allocation3 + $0x150] sm:$0xff] %vm375_vm3, %v7333_v6 }
  0x87   : > { %420 = vst.msk [vmem:[#allocation3 + $0x158] sm:$0xff] %vm375_vm3, %v7333_v6 }
  0x88   : > { %422 = vst.msk [vmem:[#allocation3 + $0x168] sm:$0xff] %vm375_vm3, %v7333_v6 }
  0x89   : > { %423 = vst.msk [vmem:[#allocation3 + $0x170] sm:$0xff] %vm375_vm3, %v7333_v6 }
  0x8a   : > { %6889 = vmatmul.msk.bf16.gmra.mxu3 %vm307_vm1, %v7619_v49  ;;  %6873 = vmatmul.msk.bf16.gmra.mxu2 %vm307_vm1, %v7619_v49  ;;  %425 = vst.msk [vmem:[#allocation4] sm:$0xff] %vm375_vm3, %v7333_v6 }
  0x8b   : > { %6841 = vmatmul.msk.bf16.gmra.mxu0 %vm307_vm1, %v7619_v49  ;;  %6858 = vmatmul.msk.bf16.gmra.mxu1 %vm307_vm1, %v7619_v49  ;;  %426 = vst.msk [vmem:[#allocation4 + $0x8] sm:$0xff] %vm375_vm3, %v7333_v6 }
  0x8c   : > { %427 = vst.msk [vmem:[#allocation4 + $0x10] sm:$0xff] %vm375_vm3, %v7333_v6 }
  0x8d   : > { %428 = vst.msk [vmem:[#allocation4 + $0x18] sm:$0xff] %vm375_vm3, %v7333_v6 }
  0x8e   : > { %429 = vst.msk [vmem:[#allocation4 + $0x20] sm:$0xff] %vm375_vm3, %v7333_v6 }
  0x8f   : > { %430 = vst.msk [vmem:[#allocation4 + $0x28] sm:$0xff] %vm375_vm3, %v7333_v6 }
  0x90   : > { %431 = vst.msk [vmem:[#allocation4 + $0x30] sm:$0xff] %vm375_vm3, %v7333_v6 }
  0x91   : > { %432 = vst.msk [vmem:[#allocation4 + $0x38] sm:$0xff] %vm375_vm3, %v7333_v6 }
  0x92   : > { %433 = vst.msk [vmem:[#allocation4 + $0x40] sm:$0xff] %vm375_vm3, %v7333_v6 }
  0x93   : > { %434 = vst.msk [vmem:[#allocation4 + $0x48] sm:$0xff] %vm375_vm3, %v7333_v6 }
  0x94   : > { %435 = vst.msk [vmem:[#allocation4 + $0x50] sm:$0xff] %vm375_vm3, %v7333_v6 }
  0x95   : > { %436 = vst.msk [vmem:[#allocation4 + $0x58] sm:$0xff] %vm375_vm3, %v7333_v6 }
  0x96   : > { %v695_v60 = vpop.f32.mrf.mxu0  ;;  %437 = vst.msk [vmem:[#allocation4 + $0x60] sm:$0xff] %vm375_vm3, %v7333_v6 }
  0x97   : > { %438 = vst.msk [vmem:[#allocation4 + $0x68] sm:$0xff] %vm375_vm3, %v7333_v6 }
  0x98   : > { %439 = vst.msk [vmem:[#allocation4 + $0x70] sm:$0xff] %vm375_vm3, %v7333_v6 }
  0x99   : > { %v835_v61 = vpop.f32.mrf.mxu1  ;;  %440 = vst.msk [vmem:[#allocation4 + $0x78] sm:$0xff] %vm375_vm3, %v7333_v6 }
  0x9a   : > { %6890 = vmatmul.msk.bf16.gmra.mxu3 %vm307_vm1, %v7633_v54  ;;  %6874 = vmatmul.msk.bf16.gmra.mxu2 %vm307_vm1, %v7633_v54  ;;  %v836_v0 = vadd.f32 %v835_v61, %v695_v60  ;;  %v493_v61 = vld [vmem:[%s7559_s26 + $0xc0] sm:$0xff]  ;;  %441 = vst.msk [vmem:[#allocation4 + $0x80] sm:$0xff] %vm375_vm3, %v7333_v6 }
  0x9b   : > { %6842 = vmatmul.msk.bf16.gmra.mxu0 %vm307_vm1, %v7633_v54  ;;  %6859 = vmatmul.msk.bf16.gmra.mxu1 %vm307_vm1, %v7633_v54  ;;  %526 = vst.msk [vmem:[#allocation2 + $0x16b] sm:$0xff] %vm307_vm1, %v493_v61 }
  0x9c   : > { %442 = vst.msk [vmem:[#allocation4 + $0x88] sm:$0xff] %vm375_vm3, %v7333_v6 }
  0x9d   : > { %443 = vst.msk [vmem:[#allocation4 + $0x90] sm:$0xff] %vm375_vm3, %v7333_v6 }
  0x9e   : > { %v697_v5 = vpop.f32.mrf.mxu0  ;;  %444 = vst.msk [vmem:[#allocation4 + $0x98] sm:$0xff] %vm375_vm3, %v7333_v6 }
  0x9f   : > { %445 = vst.msk [vmem:[#allocation4 + $0xa0] sm:$0xff] %vm375_vm3, %v7333_v6 }
  0xa0   : > { %446 = vst.msk [vmem:[#allocation4 + $0xa8] sm:$0xff] %vm375_vm3, %v7333_v6 }
  0xa1   : > { %v837_v7 = vpop.f32.mrf.mxu1  ;;  %447 = vst.msk [vmem:[#allocation4 + $0xb0] sm:$0xff] %vm375_vm3, %v7333_v6 }
  0xa2   : > { %v1026_v1 = vpop.f32.mrf.mxu2  ;;  %v838_v38 = vadd.f32 %v837_v7, %v697_v5  ;;  %448 = vst.msk [vmem:[#allocation4 + $0xb8] sm:$0xff] %vm375_vm3, %v7333_v6 }
  0xa3   : > { %v1106_v2 = vadd.f32 %v1026_v1, %v836_v0  ;;  %v1158_v1 = vld [vmem:[#allocation2 + $0x13b] sm:$0xff]  ;;  %449 = vst.msk [vmem:[#allocation4 + $0xc0] sm:$0xff] %vm375_vm3, %v7333_v6 }
  0xa4   : > { %450 = vst.msk [vmem:[#allocation4 + $0xc8] sm:$0xff] %vm375_vm3, %v7333_v6 }
  0xa5   : > { %451 = vst.msk [vmem:[#allocation4 + $0xd0] sm:$0xff] %vm375_vm3, %v7333_v6 }
  0xa6   : > { %v700_v9 = vpop.f32.mrf.mxu0  ;;  %452 = vst.msk [vmem:[#allocation4 + $0xd8] sm:$0xff] %vm375_vm3, %v7333_v6 }
  0xa7   : > { %453 = vst.msk [vmem:[#allocation4 + $0xe0] sm:$0xff] %vm375_vm3, %v7333_v6 }
  0xa8   : > { %454 = vst.msk [vmem:[#allocation4 + $0xe8] sm:$0xff] %vm375_vm3, %v7333_v6 }
  0xa9   : > { %v840_v10 = vpop.f32.mrf.mxu1  ;;  %455 = vst.msk [vmem:[#allocation4 + $0xf0] sm:$0xff] %vm375_vm3, %v7333_v6 }
  0xaa   : > { %6891 = vmatmul.msk.bf16.gmra.mxu3 %vm307_vm1, %v7647_v59  ;;  %6875 = vmatmul.msk.bf16.gmra.mxu2 %vm307_vm1, %v7647_v59  ;;  %v841_v13 = vadd.f32 %v840_v10, %v700_v9  ;;  %v1028_v24 = vpop.f32.mrf.mxu2  ;;  %456 = vst.msk [vmem:[#allocation4 + $0xf8] sm:$0xff] %vm375_vm3, %v7333_v6 }
  0xab   : > { %6843 = vmatmul.msk.bf16.gmra.mxu0 %vm307_vm1, %v7647_v59  ;;  %6860 = vmatmul.msk.bf16.gmra.mxu1 %vm307_vm1, %v7647_v59  ;;  %v1107_v42 = vadd.f32 %v1028_v24, %v838_v38  ;;  %v1161_v24 = vld [vmem:[#allocation2 + $0x15b] sm:$0xff]  ;;  %457 = vst.msk [vmem:[#allocation4 + $0x100] sm:$0xff] %vm375_vm3, %v7333_v6 }
  0xac   : > { %458 = vst.msk [vmem:[#allocation4 + $0x108] sm:$0xff] %vm375_vm3, %v7333_v6 }
  0xad   : > { %459 = vst.msk [vmem:[#allocation4 + $0x110] sm:$0xff] %vm375_vm3, %v7333_v6 }
  0xae   : > { %v702_v18 = vpop.f32.mrf.mxu0  ;;  %460 = vst.msk [vmem:[#allocation4 + $0x118] sm:$0xff] %vm375_vm3, %v7333_v6 }
  0xaf   : > { %461 = vst.msk [vmem:[#allocation4 + $0x120] sm:$0xff] %vm375_vm3, %v7333_v6 }
  0xb0   : > { %462 = vst.msk [vmem:[#allocation4 + $0x128] sm:$0xff] %vm375_vm3, %v7333_v6 }
  0xb1   : > { %v842_v17 = vpop.f32.mrf.mxu1  ;;  %463 = vst.msk [vmem:[#allocation4 + $0x130] sm:$0xff] %vm375_vm3, %v7333_v6 }
  0xb2   : > { %v843_v43 = vadd.f32 %v842_v17, %v702_v18  ;;  %464 = vst.msk [vmem:[#allocation4 + $0x138] sm:$0xff] %vm375_vm3, %v7333_v6 }
  0xb3   : > { %465 = vst.msk [vmem:[#allocation4 + $0x140] sm:$0xff] %vm375_vm3, %v7333_v6 }
  0xb4   : > { %466 = vst.msk [vmem:[#allocation4 + $0x148] sm:$0xff] %vm375_vm3, %v7333_v6 }
  0xb5   : > { %467 = vst.msk [vmem:[#allocation4 + $0x150] sm:$0xff] %vm375_vm3, %v7333_v6 }
  0xb6   : > { %468 = vst.msk [vmem:[#allocation4 + $0x158] sm:$0xff] %vm375_vm3, %v7333_v6 }
  0xb7   : > { %379 = vst.msk [vmem:[#allocation3 + $0x10] sm:$0x3f] %vm378_vm4, %v7333_v6 }
  0xb8   : > { %382 = vst.msk [vmem:[#allocation3 + $0x28] sm:$0x3f] %vm378_vm4, %v7333_v6 }
  0xb9   : > { %v845_v19 = vpop.f32.mrf.mxu1  ;;  %385 = vst.msk [vmem:[#allocation3 + $0x40] sm:$0x3f] %vm378_vm4, %v7333_v6 }
  0xba   : > { %6892 = vmatmul.msk.bf16.gmra.mxu3 %vm307_vm1, %v7661_v8  ;;  %6876 = vmatmul.msk.bf16.gmra.mxu2 %vm307_vm1, %v7661_v8  ;;  %388 = vst.msk [vmem:[#allocation3 + $0x58] sm:$0x3f] %vm378_vm4, %v7333_v6 }
  0xbb   : > { %6844 = vmatmul.msk.bf16.gmra.mxu0 %vm307_vm1, %v7661_v8  ;;  %6861 = vmatmul.msk.bf16.gmra.mxu1 %vm307_vm1, %v7661_v8  ;;  %391 = vst.msk [vmem:[#allocation3 + $0x70] sm:$0x3f] %vm378_vm4, %v7333_v6 }
  0xbc   : > { %394 = vst.msk [vmem:[#allocation3 + $0x88] sm:$0x3f] %vm378_vm4, %v7333_v6 }
  0xbd   : > { %397 = vst.msk [vmem:[#allocation3 + $0xa0] sm:$0x3f] %vm378_vm4, %v7333_v6 }
  0xbe   : > { %400 = vst.msk [vmem:[#allocation3 + $0xb8] sm:$0x3f] %vm378_vm4, %v7333_v6 }
  0xbf   : > { %403 = vst.msk [vmem:[#allocation3 + $0xd0] sm:$0x3f] %vm378_vm4, %v7333_v6 }
  0xc0   : > { %406 = vst.msk [vmem:[#allocation3 + $0xe8] sm:$0x3f] %vm378_vm4, %v7333_v6 }
  0xc1   : > { %v847_v26 = vpop.f32.mrf.mxu1  ;;  %409 = vst.msk [vmem:[#allocation3 + $0x100] sm:$0x3f] %vm378_vm4, %v7333_v6 }
  0xc2   : > { %412 = vst.msk [vmem:[#allocation3 + $0x118] sm:$0x3f] %vm378_vm4, %v7333_v6 }
  0xc3   : > { %415 = vst.msk [vmem:[#allocation3 + $0x130] sm:$0x3f] %vm378_vm4, %v7333_v6 }
  0xc4   : > { %418 = vst.msk [vmem:[#allocation3 + $0x148] sm:$0x3f] %vm378_vm4, %v7333_v6 }
  0xc5   : > { %421 = vst.msk [vmem:[#allocation3 + $0x160] sm:$0x3f] %vm378_vm4, %v7333_v6 }
  0xc6   : > { %424 = vst.msk [vmem:[#allocation3 + $0x178] sm:$0x3f] %vm378_vm4, %v7333_v6 }
  0xca   : > { %6893 = vmatmul.msk.bf16.gmra.mxu3 %vm307_vm1, %v7675_v16  ;;  %6877 = vmatmul.msk.bf16.gmra.mxu2 %vm307_vm1, %v7675_v16 }
  0xcb   : > { %6845 = vmatmul.msk.bf16.gmra.mxu0 %vm307_vm1, %v7675_v16  ;;  %6862 = vmatmul.msk.bf16.gmra.mxu1 %vm307_vm1, %v7675_v16 }
  0xd8   : > { %v705_v27 = vpop.f32.mrf.mxu0  ;;  %v850_v33 = vpop.f32.mrf.mxu1 }
  0xd9   : > { %v846_v28 = vadd.f32 %v845_v19, %v705_v27  ;;  %v495_v19 = vld [vmem:[%s7559_s26 + $0xd0] sm:$0xff] }
  0xda   : > { %6894 = vmatmul.msk.bf16.gmra.mxu3 %vm307_vm1, %v7689_v25  ;;  %6878 = vmatmul.msk.bf16.gmra.mxu2 %vm307_vm1, %v7689_v25  ;;  %528 = vst.msk [vmem:[#allocation2 + $0x183] sm:$0xff] %vm307_vm1, %v495_v19 }
  0xdb   : > { %6846 = vmatmul.msk.bf16.gmra.mxu0 %vm307_vm1, %v7689_v25  ;;  %6863 = vmatmul.msk.bf16.gmra.mxu1 %vm307_vm1, %v7689_v25 }
  0xdd   : > { %v1248_v29 = vpop.f32.mrf.mxu3  ;;  %v1031_v30 = vpop.f32.mrf.mxu2 }
  0xde   : > { %v7699_v31 = vadd.f32 %v1248_v29, %v1106_v2  ;;  %v1108_v32 = vadd.f32 %v1031_v30, %v841_v13  ;;  %v1159_v2 = vld [vmem:[#allocation2 + $0x143] sm:$0xff]  ;;  %v7743_v29 = vpack.c.bf16 %v1161_v24, %v1160_v23 }
  0xdf   : > { %v7725_v7 = vpack.c.bf16 %v1159_v2, %v1158_v1 }
  0xe0   : > { %v707_v36 = vpop.f32.mrf.mxu0  ;;  %v852_v51 = vpop.f32.mrf.mxu1 }
  0xe1   : > { %v848_v37 = vadd.f32 %v847_v26, %v707_v36 }
  0xe5   : > { %v1250_v45 = vpop.f32.mrf.mxu3  ;;  %v1033_v46 = vpop.f32.mrf.mxu2 }
  0xe6   : > { %v7705_v47 = vadd.f32 %v1250_v45, %v1107_v42  ;;  %v1109_v50 = vadd.f32 %v1033_v46, %v843_v43  ;;  %v498_v42 = vld [vmem:[%s7559_s26 + $0xe8] sm:$0xff] }
  0xe7   : > { %531 = vst.msk [vmem:[#allocation2 + $0x1a3] sm:$0xff] %vm307_vm1, %v498_v42  ;;  %v1162_v46 = vld [vmem:[#allocation2 + $0x16b] sm:$0xff] }
  0xe8   : > { %v710_v52 = vpop.f32.mrf.mxu0  ;;  %v855_v60 = vpop.f32.mrf.mxu1 }
  0xe9   : > { %v851_v53 = vadd.f32 %v850_v33, %v710_v52 }
  0xea   : > { %6895 = vmatmul.msk.bf16.gmra.mxu3 %vm307_vm1, %v7707_v48  ;;  %6879 = vmatmul.msk.bf16.gmra.mxu2 %vm307_vm1, %v7707_v48 }
  0xeb   : > { %6847 = vmatmul.msk.bf16.gmra.mxu0 %vm307_vm1, %v7707_v48  ;;  %6864 = vmatmul.msk.bf16.gmra.mxu1 %vm307_vm1, %v7707_v48 }
  0xed   : > { %v1253_v55 = vpop.f32.mrf.mxu3  ;;  %v1036_v56 = vpop.f32.mrf.mxu2 }
  0xee   : > { %v7717_v57 = vadd.f32 %v1253_v55, %v1108_v32  ;;  %v1110_v58 = vadd.f32 %v1036_v56, %v846_v28 }
  0xf0   : > { %v712_v63 = vpop.f32.mrf.mxu0  ;;  %v857_v10 = vpop.f32.mrf.mxu1 }
  0xf1   : > { %v853_v0 = vadd.f32 %v852_v51, %v712_v63 }
  0xf5   : > { %v1255_v3 = vpop.f32.mrf.mxu3  ;;  %v1038_v4 = vpop.f32.mrf.mxu2 }
  0xf6   : > { %v7723_v5 = vadd.f32 %v1255_v3, %v1109_v50  ;;  %v1111_v9 = vadd.f32 %v1038_v4, %v848_v37  ;;  %v1163_v50 = vld [vmem:[#allocation2 + $0x173] sm:$0xff] }
  0xf7   : > { %v7761_v55 = vpack.c.bf16 %v1163_v50, %v1162_v46  ;;  %v499_v3 = vld [vmem:[%s7559_s26 + $0xf0] sm:$0xff]  ;;  %v500_v4 = vld [vmem:[%s7559_s26 + $0xf8] sm:$0xff] }
  0xf8   : > { %v715_v11 = vpop.f32.mrf.mxu0  ;;  %v860_v18 = vpop.f32.mrf.mxu1  ;;  %532 = vst.msk [vmem:[#allocation2 + $0x1b3] sm:$0xff] %vm307_vm1, %v499_v3 }
  0xf9   : > { %v856_v12 = vadd.f32 %v855_v60, %v715_v11  ;;  %533 = vst.msk [vmem:[#allocation2 + $0x1bb] sm:$0xff] %vm307_vm1, %v500_v4  ;;  %v1164_v11 = vld [vmem:[#allocation2 + $0x183] sm:$0xff] }
  0xfa   : > { %6896 = vmatmul.msk.bf16.gmra.mxu3 %vm307_vm1, %v7725_v7  ;;  %6880 = vmatmul.msk.bf16.gmra.mxu2 %vm307_vm1, %v7725_v7 }
  0xfb   : > { %6848 = vmatmul.msk.bf16.gmra.mxu0 %vm307_vm1, %v7725_v7  ;;  %6865 = vmatmul.msk.bf16.gmra.mxu1 %vm307_vm1, %v7725_v7 }
  0xfd   : > { %v1258_v13 = vpop.f32.mrf.mxu3  ;;  %v1041_v14 = vpop.f32.mrf.mxu2 }
  0xfe   : > { %v7735_v15 = vadd.f32 %v1258_v13, %v1110_v58  ;;  %v1112_v17 = vadd.f32 %v1041_v14, %v851_v53 }
 0x100   : > { %v717_v21 = vpop.f32.mrf.mxu0  ;;  %v862_v32 = vpop.f32.mrf.mxu1 }
 0x101   : > { %v858_v22 = vadd.f32 %v857_v10, %v717_v21 }
 0x105   : > { %v1260_v26 = vpop.f32.mrf.mxu3  ;;  %v1043_v27 = vpop.f32.mrf.mxu2 }
 0x106   : > { %v7741_v28 = vadd.f32 %v1260_v26, %v1111_v9  ;;  %v1113_v30 = vadd.f32 %v1043_v27, %v853_v0 }
 0x108   : > { %v720_v33 = vpop.f32.mrf.mxu0  ;;  %v865_v40 = vpop.f32.mrf.mxu1 }
 0x109   : > { %v861_v34 = vadd.f32 %v860_v18, %v720_v33 }
 0x10a   : > { %6897 = vmatmul.msk.bf16.gmra.mxu3 %vm307_vm1, %v7743_v29  ;;  %6881 = vmatmul.msk.bf16.gmra.mxu2 %vm307_vm1, %v7743_v29 }
 0x10b   : > { %6849 = vmatmul.msk.bf16.gmra.mxu0 %vm307_vm1, %v7743_v29  ;;  %6866 = vmatmul.msk.bf16.gmra.mxu1 %vm307_vm1, %v7743_v29 }
 0x10d   : > { %v1263_v35 = vpop.f32.mrf.mxu3  ;;  %v1046_v36 = vpop.f32.mrf.mxu2 }
 0x10e   : > { %v7753_v37 = vadd.f32 %v1263_v35, %v1112_v17  ;;  %v1114_v38 = vadd.f32 %v1046_v36, %v856_v12  ;;  %v1165_v12 = vld [vmem:[#allocation2 + $0x18b] sm:$0xff]  ;;  %v1167_v35 = vld [vmem:[#allocation2 + $0x1a3] sm:$0xff] }
 0x10f   : > { %v7779_v18 = vpack.c.bf16 %v1165_v12, %v1164_v11  ;;  %v1169_v11 = vld [vmem:[#allocation2 + $0x1bb] sm:$0xff] }
 0x110   : > { %v722_v43 = vpop.f32.mrf.mxu0  ;;  %v867_v58 = vpop.f32.mrf.mxu1 }
 0x111   : > { %v863_v45 = vadd.f32 %v862_v32, %v722_v43  ;;  %v7003_v43 = vld [vmem:[%s9448_s2 + $0x6] sm:$0x3] }
 0x115   : > { %v1265_v51 = vpop.f32.mrf.mxu3  ;;  %v1048_v52 = vpop.f32.mrf.mxu2 }
 0x116   : > { %v7759_v53 = vadd.f32 %v1265_v51, %v1113_v30  ;;  %v1115_v56 = vadd.f32 %v1048_v52, %v858_v22  ;;  %v2145_v52 = vld [vmem:[%s9448_s2] sm:$0x3] }
 0x118   : > { %v725_v60 = vpop.f32.mrf.mxu0  ;;  %v870_v2 = vpop.f32.mrf.mxu1 }
 0x119   : > { %v866_v61 = vadd.f32 %v865_v40, %v725_v60  ;;  %v2385_v60 = vsel %vm682_vm0, %v2145_v52, 0 }
 0x11a   : > { %6898 = vmatmul.msk.bf16.gmra.mxu3 %vm307_vm1, %v7761_v55  ;;  %6882 = vmatmul.msk.bf16.gmra.mxu2 %vm307_vm1, %v7761_v55 }
 0x11b   : > { %6850 = vmatmul.msk.bf16.gmra.mxu0 %vm307_vm1, %v7761_v55  ;;  %6867 = vmatmul.msk.bf16.gmra.mxu1 %vm307_vm1, %v7761_v55 }
 0x11c   : > { %2394 = vmatpush.bf16.msra.mxu0 %v2385_v60 }
 0x11d   : > { %v1268_v62 = vpop.f32.mrf.mxu3  ;;  %v1051_v63 = vpop.f32.mrf.mxu2 }
 0x11e   : > { %v7771_v0 = vadd.f32 %v1268_v62, %v1114_v38  ;;  %v1116_v1 = vadd.f32 %v1051_v63, %v861_v34  ;;  %v1166_v34 = vld [vmem:[#allocation2 + $0x19b] sm:$0xff] }
 0x11f   : > { %v7793_v41 = vpack.c.bf16 %v1167_v35, %v1166_v34 }
 0x120   : > { %v727_v9 = vpop.f32.mrf.mxu0  ;;  %v872_v20 = vpop.f32.mrf.mxu1 }
 0x121   : > { %v868_v10 = vadd.f32 %v867_v58, %v727_v9  ;;  %v6986_v58 = vld [vmem:[%s9448_s2 + $0x4] sm:$0x3] }
 0x122   : > { %v2575_v62 = vsel %vm682_vm0, %v6986_v58, 0 }
 0x123   : > { %2584 = vmatpush.bf16.msra.mxu1 %v2575_v62 }
 0x125   : > { %v1270_v13 = vpop.f32.mrf.mxu3  ;;  %v1053_v14 = vpop.f32.mrf.mxu2 }
 0x126   : > { %v7777_v17 = vadd.f32 %v1270_v13, %v1115_v56  ;;  %v1117_v19 = vadd.f32 %v1053_v14, %v863_v45  ;;  %v2797_v45 = vsel %vm682_vm0, %v7003_v43, 0  ;;  %v7020_v56 = vld [vmem:[%s9448_s2 + $0x8] sm:$0x3] }
 0x127   : > { %2806 = vmatpush.bf16.msra.mxu2 %v2797_v45 }
 0x128   : > { %v730_v21 = vpop.f32.mrf.mxu0  ;;  %v875_v30 = vpop.f32.mrf.mxu1 }
 0x129   : > { %v871_v22 = vadd.f32 %v870_v2, %v730_v21 }
 0x12a   : > { %6899 = vmatmul.msk.bf16.gmra.mxu3 %vm307_vm1, %v7779_v18  ;;  %6883 = vmatmul.msk.bf16.gmra.mxu2 %vm307_vm1, %v7779_v18 }
 0x12b   : > { %6851 = vmatmul.msk.bf16.gmra.mxu0 %vm307_vm1, %v7779_v18  ;;  %6920 = vmatmul.msk.bf16.vlgmr.msrb.gmra.mxu1 %vm307_vm1, %v7605_v44 }
 0x12d   : > { %v1273_v23 = vpop.f32.mrf.mxu3  ;;  %v1056_v24 = vpop.f32.mrf.mxu2 }
 0x12e   : > { %v7789_v26 = vadd.f32 %v1273_v23, %v1116_v1  ;;  %v1118_v27 = vadd.f32 %v1056_v24, %v866_v61  ;;  %v3019_v61 = vsel %vm682_vm0, %v7020_v56, 0 }
 0x12f   : > { %3028 = vmatpush.bf16.msra.mxu3 %v3019_v61 }
 0x130   : > { %v732_v32 = vpop.f32.mrf.mxu0  ;;  %v877_v46 = vpop.f32.mrf.mxu1 }
 0x131   : > { %v873_v33 = vadd.f32 %v872_v20, %v732_v32 }
 0x135   : > { %v1275_v36 = vpop.f32.mrf.mxu3  ;;  %v1058_v38 = vpop.f32.mrf.mxu2 }
 0x136   : > { %v7791_v40 = vadd.f32 %v1275_v36, %v1117_v19  ;;  %v1119_v42 = vadd.f32 %v1058_v38, %v868_v10  ;;  %v1168_v10 = vld [vmem:[#allocation2 + $0x1b3] sm:$0xff]  ;;  %v2146_v36 = vld [vmem:[#allocation2 + $0x49] sm:$0xff] }
 0x137   : > { %v7823_v19 = vpack.c.bf16 %v1169_v11, %v1168_v10  ;;  %v2147_v38 = vld [vmem:[#allocation2 + $0x51] sm:$0xff] }
 0x138   : > { %v735_v50 = vpop.f32.mrf.mxu0  ;;  %v880_v4 = vpop.f32.mrf.mxu1 }
 0x139   : > { %v876_v51 = vadd.f32 %v875_v30, %v735_v50 }
 0x13a   : > { %6900 = vmatmul.msk.bf16.gmra.mxu3 %vm307_vm1, %v7793_v41  ;;  %6884 = vmatmul.msk.bf16.gmra.mxu2 %vm307_vm1, %v7793_v41 }
 0x13b   : > { %6903 = vmatmul.msk.bf16.vlgmr.msrb.gmra.mxu0 %vm307_vm1, %v7591_v39  ;;  %6921 = vmatmul.msk.bf16.gmra.mxu1 %vm307_vm1, %v7619_v49 }
 0x13d   : > { %v1278_v63 = vpop.f32.mrf.mxu3  ;;  %v1061_v1 = vpop.f32.mrf.mxu2 }
 0x13e   : > { %v7819_v2 = vadd.f32 %v1278_v63, %v1118_v27  ;;  %v1120_v3 = vadd.f32 %v1061_v1, %v871_v22 }
 0x140   : > { %v737_v9 = vpop.f32.mrf.mxu0  ;;  %v882_v21 = vpop.f32.mrf.mxu1 }
 0x141   : > { %v878_v39 = vadd.f32 %v877_v46, %v737_v9  ;;  %v2178_v46 = vpack.c.bf16 %v2147_v38, %v2146_v36 }
 0x145   : > { %v1280_v12 = vpop.f32.mrf.mxu3  ;;  %v1063_v13 = vpop.f32.mrf.mxu2 }
 0x146   : > { %v7821_v14 = vadd.f32 %v1280_v12, %v1119_v42  ;;  %v1121_v20 = vadd.f32 %v1063_v13, %v873_v33 }
 0x148   : > { %v740_v23 = vpop.f32.mrf.mxu0  ;;  %v885_v33 = vpop.f32.mrf.mxu1 }
 0x149   : > { %v881_v24 = vadd.f32 %v880_v4, %v740_v23  ;;  %v2149_v4 = vld [vmem:[#allocation2 + $0x69] sm:$0xff] }
 0x14a   : > { %6901 = vmatmul.msk.bf16.gmra.mxu3 %vm307_vm1, %v7823_v19  ;;  %6937 = vmatmul.msk.bf16.vlgmr.msrb.gmra.mxu2 %vm307_vm1, %v7619_v49 }
 0x14b   : > { %6904 = vmatmul.msk.bf16.gmra.mxu0 %vm307_vm1, %v7605_v44  ;;  %6922 = vmatmul.msk.bf16.gmra.mxu1 %vm307_vm1, %v7633_v54 }
 0x14d   : > { %v1283_v22 = vpop.f32.mrf.mxu3  ;;  %v1066_v27 = vpop.f32.mrf.mxu2 }
 0x14e   : > { %v7833_v30 = vadd.f32 %v1283_v22, %v1120_v3  ;;  %v1122_v32 = vadd.f32 %v1066_v27, %v876_v51  ;;  %v2148_v3 = vld [vmem:[#allocation2 + $0x61] sm:$0xff] }
 0x14f   : > { %v2179_v11 = vpack.c.bf16 %v2149_v4, %v2148_v3  ;;  %v2153_v3 = vld [vmem:[#allocation2 + $0x99] sm:$0xff] }
 0x150   : > { %v742_v34 = vpop.f32.mrf.mxu0  ;;  %v887_v44 = vpop.f32.mrf.mxu1 }
 0x151   : > { %v883_v35 = vadd.f32 %v882_v21, %v742_v34  ;;  %v2150_v34 = vld [vmem:[#allocation2 + $0x79] sm:$0xff] }
 0x155   : > { %v1285_v42 = vpop.f32.mrf.mxu3  ;;  %v1068_v43 = vpop.f32.mrf.mxu2 }
 0x156   : > { %v7835_v45 = vadd.f32 %v1285_v42, %v1121_v20  ;;  %v1123_v50 = vadd.f32 %v1068_v43, %v878_v39 }
 0x158   : > { %v745_v52 = vpop.f32.mrf.mxu0  ;;  %v890_v62 = vpop.f32.mrf.mxu1 }
 0x159   : > { %v886_v56 = vadd.f32 %v885_v33, %v745_v52 }
 0x15a   : > { %6954 = vmatmul.msk.bf16.vlgmr.msrb.gmra.mxu3 %vm307_vm1, %v2178_v46  ;;  %6938 = vmatmul.msk.bf16.gmra.mxu2 %vm307_vm1, %v7633_v54 }
 0x15b   : > { %6905 = vmatmul.msk.bf16.gmra.mxu0 %vm307_vm1, %v7619_v49  ;;  %6923 = vmatmul.msk.bf16.gmra.mxu1 %vm307_vm1, %v7647_v59 }
 0x15d   : > { %v1288_v51 = vpop.f32.mrf.mxu3  ;;  %v1071_v58 = vpop.f32.mrf.mxu2 }
 0x15e   : > { %v7844_v60 = vadd.f32 %v1288_v51, %v1122_v32  ;;  %v1124_v61 = vadd.f32 %v1071_v58, %v881_v24 }
 0x160   : > { %v747_v63 = vpop.f32.mrf.mxu0  ;;  %v892_v49 = vpop.f32.mrf.mxu1 }
 0x161   : > { %v888_v1 = vadd.f32 %v887_v44, %v747_v63 }
 0x165   : > { %v1290_v9 = vpop.f32.mrf.mxu3  ;;  %v1073_v39 = vpop.f32.mrf.mxu2 }
 0x166   : > { %v7846_v10 = vadd.f32 %v1290_v9, %v1123_v50  ;;  %v1125_v12 = vadd.f32 %v1073_v39, %v883_v35  ;;  %v2151_v35 = vld [vmem:[#allocation2 + $0x81] sm:$0xff] }
 0x167   : > { %v2180_v43 = vpack.c.bf16 %v2151_v35, %v2150_v34 }
 0x168   : > { %v750_v13 = vpop.f32.mrf.mxu0  ;;  %v895_v27 = vpop.f32.mrf.mxu1 }
 0x169   : > { %v891_v20 = vadd.f32 %v890_v62, %v750_v13 }
 0x16a   : > { %6955 = vmatmul.msk.bf16.gmra.mxu3 %vm307_vm1, %v2179_v11  ;;  %6939 = vmatmul.msk.bf16.gmra.mxu2 %vm307_vm1, %v7647_v59 }
 0x16b   : > { %6906 = vmatmul.msk.bf16.gmra.mxu0 %vm307_vm1, %v7633_v54  ;;  %6924 = vmatmul.msk.bf16.gmra.mxu1 %vm307_vm1, %v7661_v8 }
 0x16d   : > { %v1293_v21 = vpop.f32.mrf.mxu3  ;;  %v1076_v23 = vpop.f32.mrf.mxu2 }
 0x16e   : > { %v7855_v24 = vadd.f32 %v1293_v21, %v1124_v61  ;;  %v1126_v22 = vadd.f32 %v1076_v23, %v886_v56 }
 0x170   : > { %v752_v32 = vpop.f32.mrf.mxu0  ;;  %v897_v54 = vpop.f32.mrf.mxu1 }
 0x171   : > { %v893_v33 = vadd.f32 %v892_v49, %v752_v32  ;;  %v2154_v32 = vld [vmem:[#allocation2 + $0xa9] sm:$0xff] }
 0x175   : > { %v1295_v36 = vpop.f32.mrf.mxu3  ;;  %v1078_v38 = vpop.f32.mrf.mxu2 }
 0x176   : > { %v7857_v42 = vadd.f32 %v1295_v36, %v1125_v12  ;;  %v1127_v46 = vadd.f32 %v1078_v38, %v888_v1  ;;  %v2152_v1 = vld [vmem:[#allocation2 + $0x91] sm:$0xff] }
 0x177   : > { %v2181_v11 = vpack.c.bf16 %v2153_v3, %v2152_v1 }
 0x178   : > { %v755_v50 = vpop.f32.mrf.mxu0  ;;  %v900_v62 = vpop.f32.mrf.mxu1 }
 0x179   : > { %v896_v44 = vadd.f32 %v895_v27, %v755_v50 }
 0x17a   : > { %6956 = vmatmul.msk.bf16.gmra.mxu3 %vm307_vm1, %v2180_v43  ;;  %6940 = vmatmul.msk.bf16.gmra.mxu2 %vm307_vm1, %v7661_v8 }
 0x17b   : > { %6907 = vmatmul.msk.bf16.gmra.mxu0 %vm307_vm1, %v7647_v59  ;;  %6925 = vmatmul.msk.bf16.gmra.mxu1 %vm307_vm1, %v7675_v16 }
 0x17d   : > { %v1298_v52 = vpop.f32.mrf.mxu3  ;;  %v1081_v56 = vpop.f32.mrf.mxu2 }
 0x17e   : > { %v7866_v51 = vadd.f32 %v1298_v52, %v1126_v22  ;;  %v1128_v58 = vadd.f32 %v1081_v56, %v891_v20 }
 0x180   : > { %v757_v61 = vpop.f32.mrf.mxu0  ;;  %v902_v13 = vpop.f32.mrf.mxu1 }
 0x181   : > { %v898_v63 = vadd.f32 %v897_v54, %v757_v61 }
 0x185   : > { %v1300_v4 = vpop.f32.mrf.mxu3  ;;  %v1083_v9 = vpop.f32.mrf.mxu2 }
 0x186   : > { %v7868_v39 = vadd.f32 %v1300_v4, %v1127_v46  ;;  %v1129_v12 = vadd.f32 %v1083_v9, %v893_v33  ;;  %v2155_v33 = vld [vmem:[#allocation2 + $0xb1] sm:$0xff] }
 0x187   : > { %v2182_v43 = vpack.c.bf16 %v2155_v33, %v2154_v32  ;;  %v2158_v32 = vld [vmem:[#allocation2 + $0xd9] sm:$0xff]  ;;  %v2159_v33 = vld [vmem:[#allocation2 + $0xe1] sm:$0xff] }
 0x188   : > { %v760_v59 = vpop.f32.mrf.mxu0  ;;  %v905_v34 = vpop.f32.mrf.mxu1 }
 0x189   : > { %v901_v49 = vadd.f32 %v900_v62, %v760_v59  ;;  %v2156_v62 = vld [vmem:[#allocation2 + $0xc1] sm:$0xff] }
 0x18a   : > { %6957 = vmatmul.msk.bf16.gmra.mxu3 %vm307_vm1, %v2181_v11  ;;  %6941 = vmatmul.msk.bf16.gmra.mxu2 %vm307_vm1, %v7675_v16 }
 0x18b   : > { %6908 = vmatmul.msk.bf16.gmra.mxu0 %vm307_vm1, %v7661_v8  ;;  %6926 = vmatmul.msk.bf16.gmra.mxu1 %vm307_vm1, %v7689_v25 }
 0x18d   : > { %v1303_v20 = vpop.f32.mrf.mxu3  ;;  %v1086_v21 = vpop.f32.mrf.mxu2 }
 0x18e   : > { %v7877_v23 = vadd.f32 %v1303_v20, %v1128_v58  ;;  %v1130_v22 = vadd.f32 %v1086_v21, %v896_v44 }
 0x190   : > { %v762_v27 = vpop.f32.mrf.mxu0  ;;  %v907_v58 = vpop.f32.mrf.mxu1 }
 0x195   : > { %v1305_v35 = vpop.f32.mrf.mxu3  ;;  %v1088_v36 = vpop.f32.mrf.mxu2 }
 0x196   : > { %v7879_v38 = vadd.f32 %v1305_v35, %v1129_v12  ;;  %v1131_v46 = vadd.f32 %v1088_v36, %v898_v63  ;;  %v2157_v63 = vld [vmem:[#allocation2 + $0xc9] sm:$0xff] }
 0x197   : > { %v2183_v9 = vpack.c.bf16 %v2157_v63, %v2156_v62 }
 0x198   : > { %v765_v54 = vpop.f32.mrf.mxu0  ;;  %v910_v12 = vpop.f32.mrf.mxu1 }
 0x199   : > { %v906_v8 = vadd.f32 %v905_v34, %v765_v54 }
 0x19a   : > { %6958 = vmatmul.msk.bf16.gmra.mxu3 %vm307_vm1, %v2182_v43  ;;  %6942 = vmatmul.msk.bf16.gmra.mxu2 %vm307_vm1, %v7689_v25 }
 0x19b   : > { %6909 = vmatmul.msk.bf16.gmra.mxu0 %vm307_vm1, %v7675_v16  ;;  %6927 = vmatmul.msk.bf16.gmra.mxu1 %vm307_vm1, %v7707_v48 }
 0x19d   : > { %v1308_v50 = vpop.f32.mrf.mxu3  ;;  %v1091_v44 = vpop.f32.mrf.mxu2 }
 0x19e   : > { %v7888_v52 = vadd.f32 %v1308_v50, %v1130_v22  ;;  %v1132_v56 = vadd.f32 %v1091_v44, %v901_v49  ;;  %v903_v22 = vadd.f32 %v902_v13, %v762_v27  ;;  %v2160_v50 = vld [vmem:[#allocation2 + $0xf1] sm:$0xff]  ;;  %v2161_v44 = vld [vmem:[#allocation2 + $0xf9] sm:$0xff] }
 0x1a0   : > { %v767_v61 = vpop.f32.mrf.mxu0 }
 0x1a5   : > { %v1310_v1 = vpop.f32.mrf.mxu3  ;;  %v1093_v3 = vpop.f32.mrf.mxu2 }
 0x1a6   : > { %v7890_v4 = vadd.f32 %v1310_v1, %v1131_v46  ;;  %v1133_v34 = vadd.f32 %v1093_v3, %v903_v22  ;;  %v2184_v46 = vpack.c.bf16 %v2159_v33, %v2158_v32  ;;  %v2162_v22 = vld [vmem:[#allocation2 + $0x109] sm:$0xff]  ;;  %v2163_v32 = vld [vmem:[#allocation2 + $0x111] sm:$0xff] }
 0x1a8   : > { %v770_v11 = vpop.f32.mrf.mxu0 }
 0x1a9   : > { %v911_v16 = vadd.f32 %v910_v12, %v770_v11 }
 0x1aa   : > { %6959 = vmatmul.msk.bf16.gmra.mxu3 %vm307_vm1, %v2183_v9  ;;  %6943 = vmatmul.msk.bf16.gmra.mxu2 %vm307_vm1, %v7707_v48 }
 0x1ab   : > { %6910 = vmatmul.msk.bf16.gmra.mxu0 %vm307_vm1, %v7689_v25  ;;  %6928 = vmatmul.msk.bf16.gmra.mxu1 %vm307_vm1, %v7725_v7 }
 0x1ad   : > { %v1313_v59 = vpop.f32.mrf.mxu3  ;;  %v1096_v49 = vpop.f32.mrf.mxu2 }
 0x1ae   : > { %v7899_v20 = vadd.f32 %v1313_v59, %v1132_v56  ;;  %v1134_v21 = vadd.f32 %v1096_v49, %v906_v8  ;;  %v908_v8 = vadd.f32 %v907_v58, %v767_v61  ;;  %v2185_v58 = vpack.c.bf16 %v2161_v44, %v2160_v50  ;;  %v1603_v50 = vld [vmem:[#allocation2 + $0x15b] sm:$0xff] }
 0x1b0   : > { %v772_v25 = vpop.f32.mrf.mxu0 }
 0x1b5   : > { %v1315_v35 = vpop.f32.mrf.mxu3  ;;  %v1098_v36 = vpop.f32.mrf.mxu2 }
 0x1b6   : > { %v7901_v43 = vadd.f32 %v1315_v35, %v1133_v34  ;;  %v1135_v56 = vadd.f32 %v1098_v36, %v908_v8  ;;  %v2186_v36 = vpack.c.bf16 %v2163_v32, %v2162_v22 }
 0x1b8   : > { %v1471_v62 = vpop.f32.mrf.mxu0 }
 0x1b9   : > { %v1551_v61 = vadd.f32 %v1471_v62, %v7699_v31  ;;  %v7961_v31 = vld [vmem:[%s9451_s5] ss:$0 sm:$0xff] }
 0x1ba   : > { %6960 = vmatmul.msk.bf16.gmra.mxu3 %vm307_vm1, %v2184_v46  ;;  %6944 = vmatmul.msk.bf16.gmra.mxu2 %vm307_vm1, %v7725_v7 }
 0x1bb   : > { %6911 = vmatmul.msk.bf16.gmra.mxu0 %vm307_vm1, %v7707_v48  ;;  %v912_v48 = vpop.f32.mrf.mxu1 }
 0x1bd   : > { %v1318_v13 = vpop.f32.mrf.mxu3  ;;  %v1101_v27 = vpop.f32.mrf.mxu2 }
 0x1be   : > { %v7922_v54 = vadd.f32 %v1318_v13, %v1134_v21  ;;  %v1136_v7 = vadd.f32 %v1101_v27, %v911_v16  ;;  %v913_v21 = vadd.f32 %v912_v48, %v772_v25  ;;  %v1379_v27 = vld [vmem:[#allocation2 + $0x13b] sm:$0xff]  ;;  %v1602_v48 = vld [vmem:[#allocation2 + $0x153] sm:$0xff] }
 0x1bf   : > { %v1625_v44 = vpack.c.bf16 %v1603_v50, %v1602_v48  ;;  %v1607_v50 = vld [vmem:[#allocation2 + $0x18b] sm:$0xff] }
 0x1c0   : > { %v1473_v46 = vpop.f32.mrf.mxu0 }
 0x1c1   : > { %6929 = vmatmul.msk.bf16.gmra.mxu1 %vm307_vm1, %v1625_v44 }
 0x1c3   : > { %v1694_v9 = vpop.f32.mrf.mxu1 }
 0x1c4   : > { %v1774_v11 = vadd.f32 %v1694_v9, %v1551_v61 }
 0x1c5   : > { %v1320_v63 = vpop.f32.mrf.mxu3  ;;  %v1103_v1 = vpop.f32.mrf.mxu2 }
 0x1c6   : > { %v7940_v3 = vadd.f32 %v1320_v63, %v1135_v56  ;;  %v1137_v33 = vadd.f32 %v1103_v1, %v913_v21  ;;  %v1552_v21 = vadd.f32 %v1473_v46, %v7705_v47 }
 0x1c8   : > { %v8032_v56 = vpop.f32.mrf.mxu0 }
 0x1ca   : > { %6961 = vmatmul.msk.bf16.gmra.mxu3 %vm307_vm1, %v2185_v58  ;;  %6945 = vmatmul.msk.bf16.gmra.mxu2 %vm307_vm1, %v7743_v29  ;;  %v2165_v58 = vld [vmem:[#allocation2 + $0x129] sm:$0xff] }
 0x1cb   : > { %v1696_v25 = vpop.f32.mrf.mxu1 }
 0x1cc   : > { %v1775_v47 = vadd.f32 %v1696_v25, %v1552_v21 }
 0x1cd   : > { %v1323_v12 = vpop.f32.mrf.mxu3  ;;  %v1917_v16 = vpop.f32.mrf.mxu2 }
 0x1ce   : > { %v7967_v29 = vadd.f32 %v1323_v12, %v1136_v7  ;;  %v1997_v59 = vadd.f32 %v1917_v16, %v1774_v11  ;;  %v1380_v7 = vld [vmem:[#allocation2 + $0x143] sm:$0xff] }
 0x1cf   : > { %v1402_v8 = vpack.c.bf16 %v1380_v7, %v1379_v27 }
 0x1d0   : > { %v2033_v49 = vadd.f32 %v7961_v31, %v1997_v59  ;;  %v1478_v9 = vpop.f32.mrf.mxu0  ;;  %v1604_v59 = vld [vmem:[#allocation2 + $0x16b] sm:$0xff] }
 0x1d1   : > { %6912 = vmatmul.msk.bf16.gmra.mxu0 %vm307_vm1, %v1402_v8  ;;  %v1606_v8 = vld [vmem:[#allocation2 + $0x183] sm:$0xff] }
 0x1d2   : > { %2065 = vst.msk [vmem:[#allocation3 + $0x3] sm:$0xff] %vm375_vm3, %v2033_v49  ;;  %v1605_v49 = vld [vmem:[#allocation2 + $0x173] sm:$0xff] }
 0x1d3   : > { %v8034_v62 = vpop.f32.mrf.mxu1  ;;  %v1626_v22 = vpack.c.bf16 %v1605_v49, %v1604_v59  ;;  %v1554_v59 = vadd.f32 %v1478_v9, %v7723_v5  ;;  %v2169_v9 = vld [vmem:[#allocation2 + $0x159] sm:$0xff] }
 0x1d5   : > { %v1325_v34 = vpop.f32.mrf.mxu3  ;;  %v1919_v13 = vpop.f32.mrf.mxu2  ;;  %6930 = vmatmul.msk.bf16.gmra.mxu1 %vm307_vm1, %v1626_v22 }
 0x1d6   : > { %v7985_v35 = vadd.f32 %v1325_v34, %v1137_v33  ;;  %v2166_v34 = vld [vmem:[#allocation2 + $0x139] sm:$0xff]  ;;  %v1998_v46 = vadd.f32 %v1919_v13, %v1775_v47 }
 0x1d8   : > { %v1481_v32 = vpop.f32.mrf.mxu0  ;;  %v2034_v25 = vadd.f32 %v7961_v31, %v1998_v46 }
 0x1d9   : > { %v1555_v49 = vadd.f32 %v1481_v32, %v7735_v15 }
 0x1da   : > { %6962 = vmatmul.msk.bf16.gmra.mxu3 %vm307_vm1, %v2186_v36  ;;  %6946 = vmatmul.msk.bf16.gmra.mxu2 %vm307_vm1, %v7761_v55  ;;  %v2167_v36 = vld [vmem:[#allocation2 + $0x141] sm:$0xff]  ;;  %2066 = vst.msk [vmem:[#allocation3 + $0xb] sm:$0xff] %vm375_vm3, %v2034_v25 }
 0x1db   : > { %v8062_v11 = vpop.f32.mrf.mxu1 }
 0x1dc   : > { %v1777_v15 = vadd.f32 %v8062_v11, %v1554_v59 }
 0x1dd   : > { %v8014_v55 = vpop.f32.mrf.mxu3  ;;  %v8046_v1 = vpop.f32.mrf.mxu2 }
 0x1e0   : > { %v1483_v13 = vpop.f32.mrf.mxu0 }
 0x1e1   : > { %6913 = vmatmul.msk.bf16.gmra.mxu0 %vm307_vm1, %v1625_v44  ;;  %v1556_v21 = vadd.f32 %v1483_v13, %v7741_v28 }
 0x1e3   : > { %v1704_v33 = vpop.f32.mrf.mxu1 }
 0x1e5   : > { %v8044_v63 = vpop.f32.mrf.mxu3  ;;  %v8073_v16 = vpop.f32.mrf.mxu2 }
 0x1ea   : > { %6947 = vmatmul.msk.bf16.gmra.mxu2 %vm307_vm1, %v7779_v18  ;;  %v2164_v18 = vld [vmem:[#allocation2 + $0x121] sm:$0xff] }
 0x1eb   : > { %v2187_v61 = vpack.c.bf16 %v2165_v58, %v2164_v18  ;;  %v1706_v48 = vpop.f32.mrf.mxu1  ;;  %v1627_v58 = vpack.c.bf16 %v1607_v50, %v1606_v8 }
 0x1ed   : > { %6963 = vmatmul.msk.bf16.gmra.mxu3 %vm307_vm1, %v2187_v61  ;;  %v8071_v12 = vpop.f32.mrf.mxu3  ;;  %v1927_v7 = vpop.f32.mrf.mxu2  ;;  %v1553_v61 = vadd.f32 %v8032_v56, %v7717_v57  ;;  %6931 = vmatmul.msk.bf16.gmra.mxu1 %vm307_vm1, %v1627_v58  ;;  %v2168_v56 = vld [vmem:[#allocation2 + $0x151] sm:$0xff] }
 0x1ee   : > { %v2189_v46 = vpack.c.bf16 %v2169_v9, %v2168_v56  ;;  %v2170_v9 = vld [vmem:[#allocation2 + $0x169] sm:$0xff] }
 0x1ef   : > { %v1776_v57 = vadd.f32 %v8034_v62, %v1553_v61  ;;  %v1779_v62 = vadd.f32 %v1706_v48, %v1556_v21  ;;  %v1609_v48 = vld [vmem:[#allocation2 + $0x1a3] sm:$0xff]  ;;  %v1834_v61 = vld [vmem:[#allocation2 + $0x1d3] sm:$0xff] }
 0x1f1   : > { %6914 = vmatmul.msk.bf16.gmra.mxu0 %vm307_vm1, %v1626_v22  ;;  %v1486_v22 = vpop.f32.mrf.mxu0  ;;  %v1999_v28 = vadd.f32 %v8046_v1, %v1776_v57 }
 0x1f2   : > { %v1557_v5 = vadd.f32 %v1486_v22, %v7753_v37  ;;  %v2000_v37 = vadd.f32 %v8073_v16, %v1777_v15 }
 0x1f3   : > { %v1709_v47 = vpop.f32.mrf.mxu1 }
 0x1f4   : > { %v2036_v16 = vadd.f32 %v7961_v31, %v2000_v37 }
 0x1f5   : > { %v8096_v27 = vpop.f32.mrf.mxu3  ;;  %v1929_v18 = vpop.f32.mrf.mxu2 }
 0x1f6   : > { %v2002_v1 = vadd.f32 %v1929_v18, %v1779_v62  ;;  %v1833_v18 = vld [vmem:[#allocation2 + $0x1cb] sm:$0xff]  ;;  %2068 = vst.msk [vmem:[#allocation3 + $0x23] sm:$0xff] %vm375_vm3, %v2036_v16 }
 0x1f7   : > { %v8175_v57 = vpack.c.bf16 %v1834_v61, %v1833_v18 }
 0x1f8   : > { %v2038_v59 = vadd.f32 %v7961_v31, %v2002_v1 }
 0x1f9   : > { %v1488_v25 = vpop.f32.mrf.mxu0 }
 0x1fa   : > { %6948 = vmatmul.msk.bf16.gmra.mxu2 %vm307_vm1, %v7793_v41  ;;  %v2188_v41 = vpack.c.bf16 %v2167_v36, %v2166_v34  ;;  %v1780_v36 = vadd.f32 %v1709_v47, %v1557_v5  ;;  %v1558_v50 = vadd.f32 %v1488_v25, %v7759_v53  ;;  %2070 = vst.msk [vmem:[#allocation3 + $0x3b] sm:$0xff] %vm375_vm3, %v2038_v59  ;;  %v1836_v25 = vld [vmem:[#allocation2 + $0x1eb] sm:$0xff] }
 0x1fb   : > { %v1711_v13 = vpop.f32.mrf.mxu1 }
 0x1fc   : > { %v1781_v21 = vadd.f32 %v1711_v13, %v1558_v50 }
 0x1fd   : > { %6964 = vmatmul.msk.bf16.gmra.mxu3 %vm307_vm1, %v2188_v41  ;;  %v8115_v44 = vpop.f32.mrf.mxu3  ;;  %v1932_v34 = vpop.f32.mrf.mxu2 }
 0x1fe   : > { %v2003_v41 = vadd.f32 %v1932_v34, %v1780_v36 }
 0x201   : > { %6915 = vmatmul.msk.bf16.gmra.mxu0 %vm307_vm1, %v1627_v58  ;;  %v1491_v15 = vpop.f32.mrf.mxu0 }
 0x202   : > { %v1559_v58 = vadd.f32 %v1491_v15, %v7771_v0  ;;  %v1835_v0 = vld [vmem:[#allocation2 + $0x1e3] sm:$0xff] }
 0x203   : > { %v1714_v56 = vpop.f32.mrf.mxu1  ;;  %v8195_v50 = vpack.c.bf16 %v1836_v25, %v1835_v0  ;;  %v2174_v0 = vld [vmem:[#allocation2 + $0x199] sm:$0xff]  ;;  %v2175_v25 = vld [vmem:[#allocation2 + $0x1a1] sm:$0xff] }
 0x205   : > { %v8146_v32 = vpop.f32.mrf.mxu3  ;;  %v1934_v47 = vpop.f32.mrf.mxu2 }
 0x206   : > { %v2004_v6 = vadd.f32 %v1934_v47, %v1781_v21  ;;  %v2172_v21 = vld [vmem:[#allocation2 + $0x181] sm:$0xff]  ;;  %v2173_v47 = vld [vmem:[#allocation2 + $0x189] sm:$0xff] }
 0x208   : > { %v2040_v5 = vadd.f32 %v7961_v31, %v2004_v6 }
 0x20a   : > { %6949 = vmatmul.msk.bf16.gmra.mxu2 %vm307_vm1, %v7823_v19  ;;  %v1778_v19 = vadd.f32 %v1704_v33, %v1555_v49  ;;  %v2035_v33 = vadd.f32 %v7961_v31, %v1999_v28  ;;  %v2039_v49 = vadd.f32 %v7961_v31, %v2003_v41  ;;  %2072 = vst.msk [vmem:[#allocation3 + $0x53] sm:$0xff] %vm375_vm3, %v2040_v5  ;;  %v2171_v28 = vld [vmem:[#allocation2 + $0x171] sm:$0xff]  ;;  %v1611_v41 = vld [vmem:[#allocation2 + $0x1bb] sm:$0xff] }
 0x20b   : > { %v1716_v1 = vpop.f32.mrf.mxu1 }
 0x20c   : > { %v2001_v11 = vadd.f32 %v1927_v7, %v1778_v19  ;;  %v1608_v7 = vld [vmem:[#allocation2 + $0x19b] sm:$0xff]  ;;  %2067 = vst.msk [vmem:[#allocation3 + $0x1b] sm:$0xff] %vm375_vm3, %v2035_v33  ;;  %v1782_v19 = vadd.f32 %v1714_v56, %v1559_v58  ;;  %v1610_v33 = vld [vmem:[#allocation2 + $0x1b3] sm:$0xff]  ;;  %v2191_v56 = vpack.c.bf16 %v2173_v47, %v2172_v21  ;;  %v2698_v47 = vld [vmem:[#allocation2 + $0x4b] sm:$0xff] }
 0x20d   : > { %6965 = vmatmul.msk.bf16.gmra.mxu3 %vm307_vm1, %v2189_v46  ;;  %v8171_v22 = vpop.f32.mrf.mxu3  ;;  %v1628_v53 = vpack.c.bf16 %v1609_v48, %v1608_v7  ;;  %2071 = vst.msk [vmem:[#allocation3 + $0x4b] sm:$0xff] %vm375_vm3, %v2039_v49  ;;  %v1937_v37 = vpop.f32.mrf.mxu2 }
 0x20e   : > { %v2037_v8 = vadd.f32 %v7961_v31, %v2001_v11  ;;  %v2005_v62 = vadd.f32 %v1937_v37, %v1782_v19  ;;  %v2190_v11 = vpack.c.bf16 %v2171_v28, %v2170_v9  ;;  %v1493_v46 = vpop.f32.mrf.mxu0  ;;  %v1837_v37 = vld [vmem:[#allocation2 + $0x1fb] sm:$0xff] }
 0x20f   : > { %6932 = vmatmul.msk.bf16.gmra.mxu1 %vm307_vm1, %v1628_v53  ;;  %v1560_v16 = vadd.f32 %v1493_v46, %v7777_v17 }
 0x210   : > { %2069 = vst.msk [vmem:[#allocation3 + $0x33] sm:$0xff] %vm375_vm3, %v2037_v8  ;;  %v2041_v36 = vadd.f32 %v7961_v31, %v2005_v62  ;;  %v1629_v8 = vpack.c.bf16 %v1611_v41, %v1610_v33 }
 0x211   : > { %v1783_v13 = vadd.f32 %v1716_v1, %v1560_v16  ;;  %6916 = vmatmul.msk.bf16.gmra.mxu0 %vm307_vm1, %v1628_v53 }
 0x212   : > { %2073 = vst.msk [vmem:[#allocation3 + $0x63] sm:$0xff] %vm375_vm3, %v2041_v36 }
 0x213   : > { %v1719_v17 = vpop.f32.mrf.mxu1 }
 0x215   : > { %v8186_v34 = vpop.f32.mrf.mxu3  ;;  %v1939_v48 = vpop.f32.mrf.mxu2 }
 0x216   : > { %v2006_v18 = vadd.f32 %v1939_v48, %v1783_v13  ;;  %v1496_v59 = vpop.f32.mrf.mxu0 }
 0x217   : > { %v1561_v49 = vadd.f32 %v1496_v59, %v7789_v26  ;;  %v1838_v26 = vld [vmem:[#allocation2 + $0x203] sm:$0xff] }
 0x218   : > { %v2042_v61 = vadd.f32 %v7961_v31, %v2006_v18  ;;  %v1854_v46 = vpack.c.bf16 %v1838_v26, %v1837_v37  ;;  %v7054_v37 = vld [vmem:[%s9448_s2 + $0xc] sm:$0x3] }
 0x219   : > { %v1784_v53 = vadd.f32 %v1719_v17, %v1561_v49 }
 0x21a   : > { %6950 = vmatmul.msk.bf16.gmra.mxu2 %vm307_vm1, %v8175_v57  ;;  %2074 = vst.msk [vmem:[#allocation3 + $0x6b] sm:$0xff] %vm375_vm3, %v2042_v61  ;;  %v2192_v61 = vpack.c.bf16 %v2175_v25, %v2174_v0 }
 0x21b   : > { %v1721_v28 = vpop.f32.mrf.mxu1 }
 0x21d   : > { %6966 = vmatmul.msk.bf16.gmra.mxu3 %vm307_vm1, %v2190_v11  ;;  %v8192_v7 = vpop.f32.mrf.mxu3  ;;  %v1942_v5 = vpop.f32.mrf.mxu2 }
 0x21e   : > { %v2007_v15 = vadd.f32 %v1942_v5, %v1784_v53  ;;  %v1498_v9 = vpop.f32.mrf.mxu0  ;;  %v7071_v53 = vld [vmem:[%s9449_s3 + $0x4] sm:$0xf] }
 0x21f   : > { %6933 = vmatmul.msk.bf16.gmra.mxu1 %vm307_vm1, %v1629_v8  ;;  %v1562_v19 = vadd.f32 %v1498_v9, %v7791_v40  ;;  %v3804_v5 = vsel %vm3802_vm5, %v7071_v53, 0  ;;  %v2701_v53 = vld [vmem:[#allocation2 + $0x6b] sm:$0xff] }
 0x220   : > { %v2043_v58 = vadd.f32 %v7961_v31, %v2007_v15  ;;  %3813 = vmatpush.bf16.msrb.mxu2 %v3804_v5 }
 0x221   : > { %v1785_v62 = vadd.f32 %v1721_v28, %v1562_v19  ;;  %6917 = vmatmul.msk.bf16.gmra.mxu0 %vm307_vm1, %v1629_v8  ;;  %v3703_v19 = vld [vmem:[%s9449_s3] sm:$0xf] }
 0x222   : > { %2075 = vst.msk [vmem:[#allocation3 + $0x7b] sm:$0xff] %vm375_vm3, %v2043_v58 }
 0x223   : > { %v1724_v16 = vpop.f32.mrf.mxu1 }
 0x225   : > { %v8203_v6 = vpop.f32.mrf.mxu3  ;;  %v1944_v36 = vpop.f32.mrf.mxu2 }
 0x226   : > { %v2008_v1 = vadd.f32 %v1944_v36, %v1785_v62  ;;  %v1501_v41 = vpop.f32.mrf.mxu0  ;;  %v3463_v62 = vsel %vm682_vm0, %v7054_v37, 0 }
 0x227   : > { %v1563_v40 = vadd.f32 %v1501_v41, %v7819_v2  ;;  %v2699_v2 = vld [vmem:[#allocation2 + $0x53] sm:$0xff]  ;;  %3472 = vmatpush.bf16.msrb.mxu1 %v3463_v62 }
 0x228   : > { %v2044_v33 = vadd.f32 %v7961_v31, %v2008_v1  ;;  %v2730_v9 = vpack.c.bf16 %v2699_v2, %v2698_v47  ;;  %v2176_v41 = vld [vmem:[#allocation2 + $0x1b1] sm:$0xff]  ;;  %v2700_v2 = vld [vmem:[#allocation2 + $0x63] sm:$0xff] }
 0x229   : > { %v1786_v13 = vadd.f32 %v1724_v16, %v1563_v40  ;;  %v2177_v16 = vld [vmem:[#allocation2 + $0x1b9] sm:$0xff] }
 0x22a   : > { %6951 = vmatmul.msk.bf16.gmra.mxu2 %vm307_vm1, %v8195_v50  ;;  %2076 = vst.msk [vmem:[#allocation3 + $0x83] sm:$0xff] %vm375_vm3, %v2044_v33  ;;  %v2477_v47 = vld [vmem:[#allocation2 + $0x52] sm:$0xff] }
 0x22b   : > { %v1726_v49 = vpop.f32.mrf.mxu1  ;;  %v2921_v62 = vld [vmem:[#allocation2 + $0x54] sm:$0xff] }
 0x22d   : > { %6967 = vmatmul.msk.bf16.gmra.mxu3 %vm307_vm1, %v2191_v56  ;;  %v8209_v11 = vpop.f32.mrf.mxu3  ;;  %v1947_v8 = vpop.f32.mrf.mxu2 }
 0x22e   : > { %v2009_v18 = vadd.f32 %v1947_v8, %v1786_v13  ;;  %v1503_v17 = vpop.f32.mrf.mxu0  ;;  %v2097_v13 = vld [vmem:[#allocation2 + $0x48] sm:$0xff]  ;;  %v2098_v8 = vld [vmem:[#allocation2 + $0x50] sm:$0xff] }
 0x22f   : > { %6934 = vmatmul.msk.bf16.gmra.mxu1 %vm307_vm1, %v8175_v57  ;;  %v1564_v21 = vadd.f32 %v1503_v17, %v7821_v14  ;;  %v7037_v14 = vld [vmem:[%s9448_s2 + $0xa] sm:$0x3] }
 0x230   : > { %v2045_v59 = vadd.f32 %v7961_v31, %v2009_v18  ;;  %v3241_v28 = vsel %vm682_vm0, %v7037_v14, 0 }
 0x231   : > { %v1787_v15 = vadd.f32 %v1726_v49, %v1564_v21  ;;  %6918 = vmatmul.msk.bf16.gmra.mxu0 %vm307_vm1, %v8175_v57  ;;  %v3944_v57 = vsel %vm3802_vm5, %v3703_v19, 0  ;;  %v2476_v21 = vld [vmem:[#allocation2 + $0x4a] sm:$0xff] }
 0x232   : > { %2077 = vst.msk [vmem:[#allocation3 + $0x93] sm:$0xff] %vm375_vm3, %v2045_v59  ;;  %3250 = vmatpush.bf16.msrb.mxu0 %v3241_v28  ;;  %3953 = vmatpush.bf16.msrb.mxu3 %v3944_v57  ;;  %v2129_v59 = vpack.c.bf16 %v2098_v8, %v2097_v13  ;;  %v2508_v14 = vpack.c.bf16 %v2477_v47, %v2476_v21  ;;  %v2920_v57 = vld [vmem:[#allocation2 + $0x4c] sm:$0xff] }
 0x233   : > { %v1729_v1 = vpop.f32.mrf.mxu1 }
 0x235   : > { %v8218_v48 = vpop.f32.mrf.mxu3  ;;  %v1949_v58 = vpop.f32.mrf.mxu2 }
 0x236   : > { %v2010_v26 = vadd.f32 %v1949_v58, %v1787_v15 }
 0x238   : > { %v2046_v36 = vadd.f32 %v7961_v31, %v2010_v26 }
 0x23a   : > { %6952 = vmatmul.msk.bf16.gmra.mxu2 %vm307_vm1, %v1854_v46  ;;  %v1506_v46 = vpop.f32.mrf.mxu0  ;;  %2078 = vst.msk [vmem:[#allocation3 + $0x9b] sm:$0xff] %vm375_vm3, %v2046_v36 }
 0x23b   : > { %v1565_v33 = vadd.f32 %v1506_v46, %v7833_v30  ;;  %v1731_v49 = vpop.f32.mrf.mxu1 }
 0x23d   : > { %6968 = vmatmul.msk.bf16.gmra.mxu3 %vm307_vm1, %v2192_v61  ;;  %v8228_v56 = vpop.f32.mrf.mxu3  ;;  %v1788_v40 = vadd.f32 %v1729_v1, %v1565_v33  ;;  %v1952_v25 = vpop.f32.mrf.mxu2  ;;  %v2193_v61 = vpack.c.bf16 %v2177_v16, %v2176_v41  ;;  %v2099_v33 = vld [vmem:[#allocation2 + $0x60] sm:$0xff]  ;;  %v2100_v41 = vld [vmem:[#allocation2 + $0x68] sm:$0xff] }
 0x23e   : > { %v2130_v13 = vpack.c.bf16 %v2100_v41, %v2099_v33 }
 0x23f   : > { %6935 = vmatmul.msk.bf16.gmra.mxu1 %vm307_vm1, %v8195_v50  ;;  %v2011_v18 = vadd.f32 %v1952_v25, %v1788_v40  ;;  %v2952_v40 = vpack.c.bf16 %v2921_v62, %v2920_v57  ;;  %v2102_v57 = vld [vmem:[#allocation2 + $0x80] sm:$0xff] }
 0x241   : > { %v2047_v50 = vadd.f32 %v7961_v31, %v2011_v18  ;;  %6970 = vmatmul.msk.bf16.vlgmr.msra.gmra.mxu0 %vm307_vm1, %v2129_v59  ;;  %v2702_v59 = vld [vmem:[#allocation2 + $0x7b] sm:$0xff] }
 0x242   : > { %v1508_v17 = vpop.f32.mrf.mxu0 }
 0x243   : > { %2079 = vst.msk [vmem:[#allocation3 + $0xab] sm:$0xff] %vm375_vm3, %v2047_v50  ;;  %v1566_v30 = vadd.f32 %v1508_v17, %v7835_v45  ;;  %v1734_v26 = vpop.f32.mrf.mxu1  ;;  %v2479_v50 = vld [vmem:[#allocation2 + $0x6a] sm:$0xff] }
 0x244   : > { %v2703_v17 = vld [vmem:[#allocation2 + $0x83] sm:$0xff] }
 0x245   : > { %v8250_v0 = vpop.f32.mrf.mxu3  ;;  %v1789_v5 = vadd.f32 %v1731_v49, %v1566_v30  ;;  %v1954_v58 = vpop.f32.mrf.mxu2 }
 0x247   : > { %v2012_v28 = vadd.f32 %v1954_v58, %v1789_v5 }
 0x249   : > { %v2048_v19 = vadd.f32 %v7961_v31, %v2012_v28  ;;  %v2923_v28 = vld [vmem:[#allocation2 + $0x6c] sm:$0xff] }
 0x24a   : > { %7004 = vmatmul.msk.bf16.vlgmr.msra.gmra.mxu2 %vm307_vm1, %v2730_v9  ;;  %v2731_v9 = vpack.c.bf16 %v2701_v53, %v2700_v2  ;;  %v1511_v37 = vpop.f32.mrf.mxu0  ;;  %v2732_v2 = vpack.c.bf16 %v2703_v17, %v2702_v59 }
 0x24b   : > { %2080 = vst.msk [vmem:[#allocation3 + $0xb3] sm:$0xff] %vm375_vm3, %v2048_v19  ;;  %v1567_v45 = vadd.f32 %v1511_v37, %v7844_v60  ;;  %v1736_v18 = vpop.f32.mrf.mxu1 }
 0x24d   : > { %6969 = vmatmul.msk.bf16.gmra.mxu3 %vm307_vm1, %v2193_v61  ;;  %v8256_v15 = vpop.f32.mrf.mxu3  ;;  %v1790_v36 = vadd.f32 %v1734_v26, %v1567_v45  ;;  %v1957_v1 = vpop.f32.mrf.mxu2  ;;  %v2478_v61 = vld [vmem:[#allocation2 + $0x62] sm:$0xff]  ;;  %v2101_v45 = vld [vmem:[#allocation2 + $0x78] sm:$0xff] }
 0x24e   : > { %v2509_v30 = vpack.c.bf16 %v2479_v50, %v2478_v61  ;;  %v2131_v33 = vpack.c.bf16 %v2102_v57, %v2101_v45 }
 0x24f   : > { %6987 = vmatmul.msk.bf16.vlgmr.msra.gmra.mxu1 %vm307_vm1, %v2508_v14  ;;  %v2013_v16 = vadd.f32 %v1957_v1, %v1790_v36 }
 0x251   : > { %v2049_v25 = vadd.f32 %v7961_v31, %v2013_v16  ;;  %6971 = vmatmul.msk.bf16.gmra.mxu0 %vm307_vm1, %v2130_v13  ;;  %v2704_v13 = vld [vmem:[#allocation2 + $0x93] sm:$0xff] }
 0x252   : > { %v1513_v8 = vpop.f32.mrf.mxu0 }
 0x253   : > { %2081 = vst.msk [vmem:[#allocation3 + $0xc3] sm:$0xff] %vm375_vm3, %v2049_v25  ;;  %v1568_v60 = vadd.f32 %v1513_v8, %v7846_v10  ;;  %v1739_v14 = vpop.f32.mrf.mxu1  ;;  %v2481_v25 = vld [vmem:[#allocation2 + $0x82] sm:$0xff] }
 0x254   : > { %v2705_v8 = vld [vmem:[#allocation2 + $0x9b] sm:$0xff] }
 0x255   : > { %v8264_v46 = vpop.f32.mrf.mxu3  ;;  %v1791_v49 = vadd.f32 %v1736_v18, %v1568_v60  ;;  %v1959_v47 = vpop.f32.mrf.mxu2  ;;  %v2733_v59 = vpack.c.bf16 %v2705_v8, %v2704_v13 }
 0x257   : > { %v2014_v53 = vadd.f32 %v1959_v47, %v1791_v49 }
 0x259   : > { %v2050_v5 = vadd.f32 %v7961_v31, %v2014_v53  ;;  %v2925_v53 = vld [vmem:[#allocation2 + $0x84] sm:$0xff] }
 0x25a   : > { %7005 = vmatmul.msk.bf16.gmra.mxu2 %vm307_vm1, %v2731_v9  ;;  %v1516_v58 = vpop.f32.mrf.mxu0  ;;  %v2922_v9 = vld [vmem:[#allocation2 + $0x64] sm:$0xff] }
 0x25b   : > { %2082 = vst.msk [vmem:[#allocation3 + $0xcb] sm:$0xff] %vm375_vm3, %v2050_v5  ;;  %v1569_v10 = vadd.f32 %v1516_v58, %v7855_v24  ;;  %v2953_v36 = vpack.c.bf16 %v2923_v28, %v2922_v9  ;;  %v1741_v16 = vpop.f32.mrf.mxu1  ;;  %v2104_v9 = vld [vmem:[#allocation2 + $0x98] sm:$0xff] }
 0x25d   : > { %7021 = vmatmul.msk.bf16.vlgmr.msra.gmra.mxu3 %vm307_vm1, %v2952_v40  ;;  %v8270_v21 = vpop.f32.mrf.mxu3  ;;  %v1792_v19 = vadd.f32 %v1739_v14, %v1569_v10  ;;  %v1962_v26 = vpop.f32.mrf.mxu2  ;;  %v2480_v40 = vld [vmem:[#allocation2 + $0x7a] sm:$0xff]  ;;  %v2103_v10 = vld [vmem:[#allocation2 + $0x90] sm:$0xff] }
 0x25e   : > { %v2510_v50 = vpack.c.bf16 %v2481_v25, %v2480_v40  ;;  %v2132_v45 = vpack.c.bf16 %v2104_v9, %v2103_v10 }
 0x25f   : > { %6988 = vmatmul.msk.bf16.gmra.mxu1 %vm307_vm1, %v2509_v30  ;;  %v2015_v62 = vadd.f32 %v1962_v26, %v1792_v19 }
 0x261   : > { %v2051_v1 = vadd.f32 %v7961_v31, %v2015_v62  ;;  %6972 = vmatmul.msk.bf16.gmra.mxu0 %vm307_vm1, %v2131_v33  ;;  %v2706_v33 = vld [vmem:[#allocation2 + $0xab] sm:$0xff] }
 0x262   : > { %v1518_v41 = vpop.f32.mrf.mxu0 }
 0x263   : > { %2083 = vst.msk [vmem:[#allocation3 + $0xdb] sm:$0xff] %vm375_vm3, %v2051_v1  ;;  %v1570_v24 = vadd.f32 %v1518_v41, %v7857_v42  ;;  %v1744_v30 = vpop.f32.mrf.mxu1  ;;  %v2483_v1 = vld [vmem:[#allocation2 + $0x9a] sm:$0xff] }
 0x264   : > { %v2707_v41 = vld [vmem:[#allocation2 + $0xb3] sm:$0xff] }
 0x265   : > { %v8278_v37 = vpop.f32.mrf.mxu3  ;;  %v1793_v18 = vadd.f32 %v1741_v16, %v1570_v24  ;;  %v1964_v61 = vpop.f32.mrf.mxu2  ;;  %v2734_v13 = vpack.c.bf16 %v2707_v41, %v2706_v33 }
 0x267   : > { %v2016_v17 = vadd.f32 %v1964_v61, %v1793_v18 }
 0x269   : > { %v2052_v49 = vadd.f32 %v7961_v31, %v2016_v17  ;;  %v2927_v17 = vld [vmem:[#allocation2 + $0x9c] sm:$0xff] }
 0x26a   : > { %7006 = vmatmul.msk.bf16.gmra.mxu2 %vm307_vm1, %v2732_v2  ;;  %v1521_v47 = vpop.f32.mrf.mxu0  ;;  %v2924_v2 = vld [vmem:[#allocation2 + $0x7c] sm:$0xff] }
 0x26b   : > { %2084 = vst.msk [vmem:[#allocation3 + $0xe3] sm:$0xff] %vm375_vm3, %v2052_v49  ;;  %v1571_v42 = vadd.f32 %v1521_v47, %v7866_v51  ;;  %v2954_v19 = vpack.c.bf16 %v2925_v53, %v2924_v2  ;;  %v1746_v62 = vpop.f32.mrf.mxu1  ;;  %v2106_v2 = vld [vmem:[#allocation2 + $0xb0] sm:$0xff] }
 0x26d   : > { %7022 = vmatmul.msk.bf16.gmra.mxu3 %vm307_vm1, %v2953_v36  ;;  %v1794_v5 = vadd.f32 %v1744_v30, %v1571_v42  ;;  %v1967_v58 = vpop.f32.mrf.mxu2  ;;  %v2482_v36 = vld [vmem:[#allocation2 + $0x92] sm:$0xff]  ;;  %v2105_v42 = vld [vmem:[#allocation2 + $0xa8] sm:$0xff] }
 0x26e   : > { %v2511_v25 = vpack.c.bf16 %v2483_v1, %v2482_v36  ;;  %v2133_v10 = vpack.c.bf16 %v2106_v2, %v2105_v42 }
 0x26f   : > { %6989 = vmatmul.msk.bf16.gmra.mxu1 %vm307_vm1, %v2510_v50  ;;  %v2017_v28 = vadd.f32 %v1967_v58, %v1794_v5 }
 0x270   : > { %v8285_v60 = vpop.f32.mrf.mxu3 }
 0x271   : > { %v2053_v26 = vadd.f32 %v7961_v31, %v2017_v28  ;;  %6973 = vmatmul.msk.bf16.gmra.mxu0 %vm307_vm1, %v2132_v45  ;;  %v2708_v45 = vld [vmem:[#allocation2 + $0xc3] sm:$0xff] }
 0x272   : > { %v1523_v57 = vpop.f32.mrf.mxu0 }
 0x273   : > { %2085 = vst.msk [vmem:[#allocation3 + $0xf3] sm:$0xff] %vm375_vm3, %v2053_v26  ;;  %v1572_v51 = vadd.f32 %v1523_v57, %v7868_v39  ;;  %v1749_v50 = vpop.f32.mrf.mxu1  ;;  %v2485_v26 = vld [vmem:[#allocation2 + $0xb2] sm:$0xff] }
 0x274   : > { %v2709_v57 = vld [vmem:[#allocation2 + $0xcb] sm:$0xff] }
 0x275   : > { %v1795_v16 = vadd.f32 %v1746_v62, %v1572_v51  ;;  %v1969_v40 = vpop.f32.mrf.mxu2  ;;  %v2735_v33 = vpack.c.bf16 %v2709_v57, %v2708_v45 }
 0x277   : > { %v2018_v8 = vadd.f32 %v1969_v40, %v1795_v16 }
 0x278   : > { %v8292_v14 = vpop.f32.mrf.mxu3 }
 0x279   : > { %v2054_v18 = vadd.f32 %v7961_v31, %v2018_v8  ;;  %v2929_v8 = vld [vmem:[#allocation2 + $0xb4] sm:$0xff] }
 0x27a   : > { %7007 = vmatmul.msk.bf16.gmra.mxu2 %vm307_vm1, %v2733_v59  ;;  %v1526_v61 = vpop.f32.mrf.mxu0  ;;  %v2926_v59 = vld [vmem:[#allocation2 + $0x94] sm:$0xff] }
 0x27b   : > { %2086 = vst.msk [vmem:[#allocation3 + $0xfb] sm:$0xff] %vm375_vm3, %v2054_v18  ;;  %v1573_v39 = vadd.f32 %v1526_v61, %v7877_v23  ;;  %v2955_v5 = vpack.c.bf16 %v2927_v17, %v2926_v59  ;;  %v1751_v28 = vpop.f32.mrf.mxu1  ;;  %v2108_v59 = vld [vmem:[#allocation2 + $0xc8] sm:$0xff] }
 0x27d   : > { %7023 = vmatmul.msk.bf16.gmra.mxu3 %vm307_vm1, %v2954_v19  ;;  %v1796_v49 = vadd.f32 %v1749_v50, %v1573_v39  ;;  %v1972_v47 = vpop.f32.mrf.mxu2  ;;  %v2484_v19 = vld [vmem:[#allocation2 + $0xaa] sm:$0xff]  ;;  %v2107_v39 = vld [vmem:[#allocation2 + $0xc0] sm:$0xff] }
 0x27e   : > { %v2512_v1 = vpack.c.bf16 %v2485_v26, %v2484_v19  ;;  %v2134_v42 = vpack.c.bf16 %v2108_v59, %v2107_v39 }
 0x27f   : > { %6990 = vmatmul.msk.bf16.gmra.mxu1 %vm307_vm1, %v2511_v25  ;;  %v2019_v53 = vadd.f32 %v1972_v47, %v1796_v49 }
 0x280   : > { %v8299_v24 = vpop.f32.mrf.mxu3 }
 0x281   : > { %v2055_v58 = vadd.f32 %v7961_v31, %v2019_v53  ;;  %6974 = vmatmul.msk.bf16.gmra.mxu0 %vm307_vm1, %v2133_v10  ;;  %v2710_v10 = vld [vmem:[#allocation2 + $0xdb] sm:$0xff] }
 0x282   : > { %v1528_v9 = vpop.f32.mrf.mxu0 }
 0x283   : > { %2087 = vst.msk [vmem:[#allocation3 + $0x10b] sm:$0xff] %vm375_vm3, %v2055_v58  ;;  %v1574_v23 = vadd.f32 %v1528_v9, %v7879_v38  ;;  %v2487_v58 = vld [vmem:[#allocation2 + $0xca] sm:$0xff] }
 0x284   : > { %v2711_v9 = vld [vmem:[#allocation2 + $0xe3] sm:$0xff] }
 0x285   : > { %v1797_v62 = vadd.f32 %v1751_v28, %v1574_v23  ;;  %v1974_v36 = vpop.f32.mrf.mxu2  ;;  %v2736_v45 = vpack.c.bf16 %v2711_v9, %v2710_v10  ;;  %v8346_v9 = vld [vmem:[%s9451_s5] ss:$0 sm:$0xff] }
 0x287   : > { %v2020_v41 = vadd.f32 %v1974_v36, %v1797_v62 }
 0x288   : > { %v8306_v30 = vpop.f32.mrf.mxu3 }
 0x289   : > { %v2056_v16 = vadd.f32 %v7961_v31, %v2020_v41  ;;  %v2931_v41 = vld [vmem:[#allocation2 + $0xcc] sm:$0xff] }
 0x28a   : > { %7008 = vmatmul.msk.bf16.gmra.mxu2 %vm307_vm1, %v2734_v13  ;;  %v1531_v40 = vpop.f32.mrf.mxu0  ;;  %v2928_v13 = vld [vmem:[#allocation2 + $0xac] sm:$0xff] }
 0x28b   : > { %2088 = vst.msk [vmem:[#allocation3 + $0x113] sm:$0xff] %vm375_vm3, %v2056_v16  ;;  %v1575_v38 = vadd.f32 %v1531_v40, %v7888_v52  ;;  %v2956_v49 = vpack.c.bf16 %v2929_v8, %v2928_v13  ;;  %v2110_v13 = vld [vmem:[#allocation2 + $0xe0] sm:$0xff] }
 0x28c   : > { %v1754_v25 = vpop.f32.mrf.mxu1 }
 0x28d   : > { %7024 = vmatmul.msk.bf16.gmra.mxu3 %vm307_vm1, %v2955_v5  ;;  %v1798_v18 = vadd.f32 %v1754_v25, %v1575_v38  ;;  %v1977_v61 = vpop.f32.mrf.mxu2  ;;  %v2486_v5 = vld [vmem:[#allocation2 + $0xc2] sm:$0xff]  ;;  %v2109_v38 = vld [vmem:[#allocation2 + $0xd8] sm:$0xff] }
 0x28e   : > { %v2513_v26 = vpack.c.bf16 %v2487_v58, %v2486_v5  ;;  %v2135_v39 = vpack.c.bf16 %v2110_v13, %v2109_v38 }
 0x28f   : > { %6991 = vmatmul.msk.bf16.gmra.mxu1 %vm307_vm1, %v2512_v1  ;;  %v2021_v17 = vadd.f32 %v1977_v61, %v1798_v18 }
 0x290   : > { %v8313_v51 = vpop.f32.mrf.mxu3 }
 0x291   : > { %v2057_v47 = vadd.f32 %v7961_v31, %v2021_v17  ;;  %6975 = vmatmul.msk.bf16.gmra.mxu0 %vm307_vm1, %v2134_v42  ;;  %v2712_v42 = vld [vmem:[#allocation2 + $0xf3] sm:$0xff] }
 0x292   : > { %v1533_v2 = vpop.f32.mrf.mxu0 }
 0x293   : > { %2089 = vst.msk [vmem:[#allocation3 + $0x123] sm:$0xff] %vm375_vm3, %v2057_v47  ;;  %v1576_v52 = vadd.f32 %v1533_v2, %v7890_v4  ;;  %v2489_v47 = vld [vmem:[#allocation2 + $0xe2] sm:$0xff] }
 0x294   : > { %v1756_v53 = vpop.f32.mrf.mxu1  ;;  %v2713_v2 = vld [vmem:[#allocation2 + $0xfb] sm:$0xff] }
 0x295   : > { %v1799_v28 = vadd.f32 %v1756_v53, %v1576_v52  ;;  %v1979_v19 = vpop.f32.mrf.mxu2 }
 0x297   : > { %v2022_v57 = vadd.f32 %v1979_v19, %v1799_v28 }
 0x298   : > { %v8320_v50 = vpop.f32.mrf.mxu3 }
 0x299   : > { %v2058_v62 = vadd.f32 %v7961_v31, %v2022_v57  ;;  %v2933_v57 = vld [vmem:[#allocation2 + $0xe4] sm:$0xff] }
 0x29a   : > { %7009 = vmatmul.msk.bf16.gmra.mxu2 %vm307_vm1, %v2735_v33  ;;  %v1536_v36 = vpop.f32.mrf.mxu0  ;;  %v2930_v33 = vld [vmem:[#allocation2 + $0xc4] sm:$0xff] }
 0x29b   : > { %2090 = vst.msk [vmem:[#allocation3 + $0x12b] sm:$0xff] %vm375_vm3, %v2058_v62  ;;  %v1577_v4 = vadd.f32 %v1536_v36, %v7899_v20  ;;  %v2957_v18 = vpack.c.bf16 %v2931_v41, %v2930_v33  ;;  %v2112_v33 = vld [vmem:[#allocation2 + $0xf8] sm:$0xff] }
 0x29c   : > { %v1759_v1 = vpop.f32.mrf.mxu1 }
 0x29d   : > { %7025 = vmatmul.msk.bf16.gmra.mxu3 %vm307_vm1, %v2956_v49  ;;  %v1800_v16 = vadd.f32 %v1759_v1, %v1577_v4  ;;  %v1982_v40 = vpop.f32.mrf.mxu2  ;;  %v2488_v49 = vld [vmem:[#allocation2 + $0xda] sm:$0xff]  ;;  %v2111_v4 = vld [vmem:[#allocation2 + $0xf0] sm:$0xff] }
 0x29e   : > { %v2514_v58 = vpack.c.bf16 %v2489_v47, %v2488_v49  ;;  %v2136_v38 = vpack.c.bf16 %v2112_v33, %v2111_v4 }
 0x29f   : > { %6992 = vmatmul.msk.bf16.gmra.mxu1 %vm307_vm1, %v2513_v26  ;;  %v2023_v8 = vadd.f32 %v1982_v40, %v1800_v16 }
 0x2a0   : > { %v8327_v23 = vpop.f32.mrf.mxu3 }
 0x2a1   : > { %v2059_v61 = vadd.f32 %v7961_v31, %v2023_v8  ;;  %6976 = vmatmul.msk.bf16.gmra.mxu0 %vm307_vm1, %v2135_v39  ;;  %v2737_v31 = vpack.c.bf16 %v2713_v2, %v2712_v42  ;;  %v2714_v39 = vld [vmem:[#allocation2 + $0x10b] sm:$0xff] }
 0x2a2   : > { %v1538_v59 = vpop.f32.mrf.mxu0 }
 0x2a3   : > { %2091 = vst.msk [vmem:[#allocation3 + $0x13b] sm:$0xff] %vm375_vm3, %v2059_v61  ;;  %v1578_v20 = vadd.f32 %v1538_v59, %v7901_v43  ;;  %v2491_v61 = vld [vmem:[#allocation2 + $0xfa] sm:$0xff] }
 0x2a4   : > { %v1761_v17 = vpop.f32.mrf.mxu1  ;;  %v2715_v59 = vld [vmem:[#allocation2 + $0x113] sm:$0xff] }
 0x2a5   : > { %v1801_v53 = vadd.f32 %v1761_v17, %v1578_v20  ;;  %v1984_v5 = vpop.f32.mrf.mxu2  ;;  %v2738_v42 = vpack.c.bf16 %v2715_v59, %v2714_v39 }
 0x2a7   : > { %v2024_v10 = vadd.f32 %v1984_v5, %v1801_v53 }
 0x2a8   : > { %v8334_v25 = vpop.f32.mrf.mxu3 }
 0x2a9   : > { %v2060_v43 = vadd.f32 %v8346_v9, %v2024_v10  ;;  %v2935_v10 = vld [vmem:[#allocation2 + $0xfc] sm:$0xff] }
 0x2aa   : > { %7010 = vmatmul.msk.bf16.gmra.mxu2 %vm307_vm1, %v2736_v45  ;;  %v1541_v28 = vpop.f32.mrf.mxu0  ;;  %v2932_v45 = vld [vmem:[#allocation2 + $0xdc] sm:$0xff] }
 0x2ab   : > { %2092 = vst.msk [vmem:[#allocation3 + $0x143] sm:$0xff] %vm375_vm3, %v2060_v43  ;;  %v1579_v26 = vadd.f32 %v1541_v28, %v7922_v54  ;;  %v2958_v16 = vpack.c.bf16 %v2933_v57, %v2932_v45  ;;  %v2114_v45 = vld [vmem:[#allocation2 + $0x110] sm:$0xff] }
 0x2ac   : > { %v1764_v19 = vpop.f32.mrf.mxu1 }
 0x2ad   : > { %7026 = vmatmul.msk.bf16.gmra.mxu3 %vm307_vm1, %v2957_v18  ;;  %v1802_v62 = vadd.f32 %v1764_v19, %v1579_v26  ;;  %v1987_v36 = vpop.f32.mrf.mxu2  ;;  %v2490_v18 = vld [vmem:[#allocation2 + $0xf2] sm:$0xff]  ;;  %v2113_v26 = vld [vmem:[#allocation2 + $0x108] sm:$0xff] }
 0x2ae   : > { %v2515_v47 = vpack.c.bf16 %v2491_v61, %v2490_v18  ;;  %v2137_v4 = vpack.c.bf16 %v2114_v45, %v2113_v26  ;;  %v2494_v45 = vld [vmem:[#allocation2 + $0x122] sm:$0xff] }
 0x2af   : > { %6993 = vmatmul.msk.bf16.gmra.mxu1 %vm307_vm1, %v2514_v58  ;;  %v2025_v41 = vadd.f32 %v1987_v36, %v1802_v62 }
 0x2b0   : > { %v8341_v52 = vpop.f32.mrf.mxu3 }
 0x2b1   : > { %v2061_v40 = vadd.f32 %v8346_v9, %v2025_v41  ;;  %6977 = vmatmul.msk.bf16.gmra.mxu0 %vm307_vm1, %v2136_v38  ;;  %v2716_v38 = vld [vmem:[#allocation2 + $0x123] sm:$0xff] }
 0x2b2   : > { %v1543_v13 = vpop.f32.mrf.mxu0 }
 0x2b3   : > { %2093 = vst.msk [vmem:[#allocation3 + $0x153] sm:$0xff] %vm375_vm3, %v2061_v40  ;;  %v1580_v54 = vadd.f32 %v1543_v13, %v7940_v3  ;;  %v2493_v40 = vld [vmem:[#allocation2 + $0x112] sm:$0xff] }
 0x2b4   : > { %v1766_v8 = vpop.f32.mrf.mxu1  ;;  %v2717_v13 = vld [vmem:[#allocation2 + $0x12b] sm:$0xff] }
 0x2b5   : > { %v1803_v17 = vadd.f32 %v1766_v8, %v1580_v54  ;;  %v1989_v49 = vpop.f32.mrf.mxu2  ;;  %v2739_v39 = vpack.c.bf16 %v2717_v13, %v2716_v38 }
 0x2b7   : > { %v2026_v2 = vadd.f32 %v1989_v49, %v1803_v17 }
 0x2b8   : > { %v8353_v1 = vpop.f32.mrf.mxu3 }
 0x2b9   : > { %v2062_v53 = vadd.f32 %v8346_v9, %v2026_v2  ;;  %v2937_v2 = vld [vmem:[#allocation2 + $0x114] sm:$0xff] }
 0x2ba   : > { %7011 = vmatmul.msk.bf16.gmra.mxu2 %vm307_vm1, %v2737_v31  ;;  %v1546_v5 = vpop.f32.mrf.mxu0  ;;  %v2934_v31 = vld [vmem:[#allocation2 + $0xf4] sm:$0xff] }
 0x2bb   : > { %2094 = vst.msk [vmem:[#allocation3 + $0x15b] sm:$0xff] %vm375_vm3, %v2062_v53  ;;  %v1581_v3 = vadd.f32 %v1546_v5, %v7967_v29  ;;  %v2959_v62 = vpack.c.bf16 %v2935_v10, %v2934_v31  ;;  %v2116_v31 = vld [vmem:[#allocation2 + $0x128] sm:$0xff] }
 0x2bc   : > { %v1769_v58 = vpop.f32.mrf.mxu1 }
 0x2bd   : > { %7027 = vmatmul.msk.bf16.gmra.mxu3 %vm307_vm1, %v2958_v16  ;;  %v1804_v43 = vadd.f32 %v1769_v58, %v1581_v3  ;;  %v1992_v28 = vpop.f32.mrf.mxu2  ;;  %v2492_v16 = vld [vmem:[#allocation2 + $0x10a] sm:$0xff]  ;;  %v2115_v3 = vld [vmem:[#allocation2 + $0x120] sm:$0xff] }
 0x2be   : > { %v2516_v61 = vpack.c.bf16 %v2493_v40, %v2492_v16 }
 0x2bf   : > { %6994 = vmatmul.msk.bf16.gmra.mxu1 %vm307_vm1, %v2515_v47  ;;  %v2027_v57 = vadd.f32 %v1992_v28, %v1804_v43  ;;  %v2138_v43 = vpack.c.bf16 %v2116_v31, %v2115_v3  ;;  %v2496_v31 = vld [vmem:[#allocation2 + $0x13a] sm:$0xff] }
 0x2c0   : > { %v8360_v20 = vpop.f32.mrf.mxu3 }
 0x2c1   : > { %v2063_v36 = vadd.f32 %v8346_v9, %v2027_v57  ;;  %6978 = vmatmul.msk.bf16.gmra.mxu0 %vm307_vm1, %v2137_v4  ;;  %v2495_v57 = vld [vmem:[#allocation2 + $0x12a] sm:$0xff] }
 0x2c2   : > { %v1548_v33 = vpop.f32.mrf.mxu0 }
 0x2c3   : > { %2095 = vst.msk [vmem:[#allocation3 + $0x16b] sm:$0xff] %vm375_vm3, %v2063_v36  ;;  %v1582_v29 = vadd.f32 %v1548_v33, %v7985_v35  ;;  %v2719_v36 = vld [vmem:[#allocation2 + $0x143] sm:$0xff] }
 0x2c4   : > { %v1771_v41 = vpop.f32.mrf.mxu1 }
 0x2c5   : > { %v1805_v8 = vadd.f32 %v1771_v41, %v1582_v29  ;;  %v1994_v18 = vpop.f32.mrf.mxu2  ;;  %v2517_v41 = vpack.c.bf16 %v2495_v57, %v2494_v45 }
 0x2c7   : > { %v2028_v59 = vadd.f32 %v1994_v18, %v1805_v8  ;;  %v2938_v18 = vld [vmem:[#allocation2 + $0x124] sm:$0xff] }
 0x2c8   : > { %v8367_v19 = vpop.f32.mrf.mxu3 }
 0x2c9   : > { %v2064_v17 = vadd.f32 %v8346_v9, %v2028_v59 }
 0x2ca   : > { %7012 = vmatmul.msk.bf16.gmra.mxu2 %vm307_vm1, %v2738_v42  ;;  %v2396_v49 = vpop.f32.mrf.mxu0  ;;  %v2936_v42 = vld [vmem:[#allocation2 + $0x10c] sm:$0xff] }
 0x2cb   : > { %2096 = vst.msk [vmem:[#allocation3 + $0x173] sm:$0xff] %vm375_vm3, %v2064_v17  ;;  %v2397_v35 = vadd.f32 %v2396_v49, %v8014_v55  ;;  %v2960_v9 = vpack.c.bf16 %v2937_v2, %v2936_v42  ;;  %v2718_v55 = vld [vmem:[#allocation2 + $0x13b] sm:$0xff] }
 0x2cc   : > { %v2586_v47 = vpop.f32.mrf.mxu1  ;;  %v2740_v40 = vpack.c.bf16 %v2719_v36, %v2718_v55  ;;  %v2117_v49 = vld [vmem:[#allocation2 + $0x138] sm:$0xff] }
 0x2cd   : > { %7028 = vmatmul.msk.bf16.gmra.mxu3 %vm307_vm1, %v2959_v62  ;;  %v2666_v53 = vadd.f32 %v2586_v47, %v2397_v35  ;;  %v2808_v5 = vpop.f32.mrf.mxu2  ;;  %v2118_v47 = vld [vmem:[#allocation2 + $0x140] sm:$0xff] }
 0x2cf   : > { %6995 = vmatmul.msk.bf16.gmra.mxu1 %vm307_vm1, %v2516_v61  ;;  %v2888_v10 = vadd.f32 %v2808_v5, %v2666_v53  ;;  %v2939_v61 = vld [vmem:[#allocation2 + $0x12c] sm:$0xff]  ;;  %v2139_v53 = vpack.c.bf16 %v2118_v47, %v2117_v49 }
 0x2d0   : > { %v8374_v54 = vpop.f32.mrf.mxu3  ;;  %v2961_v2 = vpack.c.bf16 %v2939_v61, %v2938_v18  ;;  %v2498_v47 = vld [vmem:[#allocation2 + $0x152] sm:$0xff] }
 0x2d1   : > { %6979 = vmatmul.msk.bf16.gmra.mxu0 %vm307_vm1, %v2138_v43  ;;  %v2721_v43 = vld [vmem:[#allocation2 + $0x15b] sm:$0xff] }
 0x2d2   : > { %v2398_v28 = vpop.f32.mrf.mxu0 }
 0x2d3   : > { %v2399_v62 = vadd.f32 %v2398_v28, %v8044_v63 }
 0x2d4   : > { %v2588_v26 = vpop.f32.mrf.mxu1 }
 0x2d5   : > { %v2667_v4 = vadd.f32 %v2588_v26, %v2399_v62  ;;  %v2810_v33 = vpop.f32.mrf.mxu2 }
 0x2d7   : > { %v2889_v38 = vadd.f32 %v2810_v33, %v2667_v4 }
 0x2d8   : > { %v8381_v58 = vpop.f32.mrf.mxu3 }
 0x2da   : > { %7013 = vmatmul.msk.bf16.gmra.mxu2 %vm307_vm1, %v2739_v39  ;;  %v2401_v13 = vpop.f32.mrf.mxu0 }
 0x2db   : > { %v2402_v63 = vadd.f32 %v2401_v13, %v8071_v12  ;;  %v2720_v12 = vld [vmem:[#allocation2 + $0x153] sm:$0xff] }
 0x2dc   : > { %v2591_v8 = vpop.f32.mrf.mxu1  ;;  %v2741_v62 = vpack.c.bf16 %v2721_v43, %v2720_v12 }
 0x2dd   : > { %7029 = vmatmul.msk.bf16.gmra.mxu3 %vm307_vm1, %v2960_v9  ;;  %v2668_v39 = vadd.f32 %v2591_v8, %v2402_v63  ;;  %v2813_v59 = vpop.f32.mrf.mxu2  ;;  %v2119_v8 = vld [vmem:[#allocation2 + $0x150] sm:$0xff]  ;;  %v2120_v63 = vld [vmem:[#allocation2 + $0x158] sm:$0xff] }
 0x2df   : > { %6996 = vmatmul.msk.bf16.gmra.mxu1 %vm307_vm1, %v2517_v41  ;;  %v2890_v42 = vadd.f32 %v2813_v59, %v2668_v39  ;;  %v2940_v41 = vld [vmem:[#allocation2 + $0x13c] sm:$0xff]  ;;  %v2140_v59 = vpack.c.bf16 %v2120_v63, %v2119_v8  ;;  %v2500_v63 = vld [vmem:[#allocation2 + $0x16a] sm:$0xff] }
 0x2e0   : > { %v3030_v16 = vpop.f32.mrf.mxu3 }
 0x2e1   : > { %v8386_v29 = vadd.f32 %v3030_v16, %v2888_v10  ;;  %v2497_v10 = vld [vmem:[#allocation2 + $0x142] sm:$0xff]  ;;  %6980 = vmatmul.msk.bf16.gmra.mxu0 %vm307_vm1, %v2139_v53  ;;  %v2723_v53 = vld [vmem:[#allocation2 + $0x173] sm:$0xff] }
 0x2e2   : > { %v2403_v5 = vpop.f32.mrf.mxu0  ;;  %v2518_v45 = vpack.c.bf16 %v2497_v10, %v2496_v31  ;;  %v2941_v16 = vld [vmem:[#allocation2 + $0x144] sm:$0xff] }
 0x2e3   : > { %v2404_v9 = vadd.f32 %v2403_v5, %v8096_v27  ;;  %v2962_v39 = vpack.c.bf16 %v2941_v16, %v2940_v41 }
 0x2e4   : > { %v2593_v3 = vpop.f32.mrf.mxu1 }
 0x2e5   : > { %v2669_v28 = vadd.f32 %v2593_v3, %v2404_v9  ;;  %v2815_v26 = vpop.f32.mrf.mxu2 }
 0x2e7   : > { %v2891_v36 = vadd.f32 %v2815_v26, %v2669_v28 }
 0x2e8   : > { %v3032_v17 = vpop.f32.mrf.mxu3 }
 0x2e9   : > { %v8391_v35 = vadd.f32 %v3032_v17, %v2889_v38 }
 0x2ea   : > { %7014 = vmatmul.msk.bf16.gmra.mxu2 %vm307_vm1, %v2740_v40  ;;  %v2406_v4 = vpop.f32.mrf.mxu0 }
 0x2eb   : > { %v2407_v27 = vadd.f32 %v2406_v4, %v8115_v44  ;;  %v2722_v44 = vld [vmem:[#allocation2 + $0x16b] sm:$0xff] }
 0x2ec   : > { %v2596_v33 = vpop.f32.mrf.mxu1  ;;  %v2742_v9 = vpack.c.bf16 %v2723_v53, %v2722_v44 }
 0x2ed   : > { %7030 = vmatmul.msk.bf16.gmra.mxu3 %vm307_vm1, %v2961_v2  ;;  %v2670_v40 = vadd.f32 %v2596_v33, %v2407_v27  ;;  %v2818_v38 = vpop.f32.mrf.mxu2  ;;  %v2121_v33 = vld [vmem:[#allocation2 + $0x168] sm:$0xff]  ;;  %v2122_v27 = vld [vmem:[#allocation2 + $0x170] sm:$0xff] }
 0x2ef   : > { %6997 = vmatmul.msk.bf16.gmra.mxu1 %vm307_vm1, %v2518_v45  ;;  %v2892_v61 = vadd.f32 %v2818_v38, %v2670_v40  ;;  %v2942_v45 = vld [vmem:[#allocation2 + $0x154] sm:$0xff]  ;;  %v2141_v38 = vpack.c.bf16 %v2122_v27, %v2121_v33  ;;  %v2502_v27 = vld [vmem:[#allocation2 + $0x182] sm:$0xff] }
 0x2f0   : > { %v3035_v57 = vpop.f32.mrf.mxu3 }
 0x2f1   : > { %v8396_v55 = vadd.f32 %v3035_v57, %v2890_v42  ;;  %v2499_v42 = vld [vmem:[#allocation2 + $0x15a] sm:$0xff]  ;;  %6981 = vmatmul.msk.bf16.gmra.mxu0 %vm307_vm1, %v2140_v59  ;;  %v2725_v59 = vld [vmem:[#allocation2 + $0x18b] sm:$0xff] }
 0x2f2   : > { %v2408_v17 = vpop.f32.mrf.mxu0  ;;  %v2519_v31 = vpack.c.bf16 %v2499_v42, %v2498_v47  ;;  %v2943_v57 = vld [vmem:[#allocation2 + $0x15c] sm:$0xff] }
 0x2f3   : > { %v2409_v2 = vadd.f32 %v2408_v17, %v8146_v32  ;;  %v2963_v40 = vpack.c.bf16 %v2943_v57, %v2942_v45 }
 0x2f4   : > { %v2598_v49 = vpop.f32.mrf.mxu1 }
 0x2f5   : > { %v2671_v5 = vadd.f32 %v2598_v49, %v2409_v2  ;;  %v2820_v3 = vpop.f32.mrf.mxu2 }
 0x2f7   : > { %v2893_v43 = vadd.f32 %v2820_v3, %v2671_v5 }
 0x2f8   : > { %v3037_v13 = vpop.f32.mrf.mxu3 }
 0x2f9   : > { %v8401_v18 = vadd.f32 %v3037_v13, %v2891_v36 }
 0x2fa   : > { %7015 = vmatmul.msk.bf16.gmra.mxu2 %vm307_vm1, %v2741_v62  ;;  %v2411_v28 = vpop.f32.mrf.mxu0 }
 0x2fb   : > { %v2412_v32 = vadd.f32 %v2411_v28, %v8171_v22  ;;  %v2724_v22 = vld [vmem:[#allocation2 + $0x183] sm:$0xff] }
 0x2fc   : > { %v2601_v26 = vpop.f32.mrf.mxu1  ;;  %v2743_v2 = vpack.c.bf16 %v2725_v59, %v2724_v22 }
 0x2fd   : > { %7031 = vmatmul.msk.bf16.gmra.mxu3 %vm307_vm1, %v2962_v39  ;;  %v2672_v62 = vadd.f32 %v2601_v26, %v2412_v32  ;;  %v2823_v36 = vpop.f32.mrf.mxu2  ;;  %v2123_v26 = vld [vmem:[#allocation2 + $0x180] sm:$0xff]  ;;  %v2124_v32 = vld [vmem:[#allocation2 + $0x188] sm:$0xff] }
 0x2ff   : > { %6998 = vmatmul.msk.bf16.gmra.mxu1 %vm307_vm1, %v2519_v31  ;;  %v2894_v16 = vadd.f32 %v2823_v36, %v2672_v62  ;;  %v2944_v31 = vld [vmem:[#allocation2 + $0x16c] sm:$0xff]  ;;  %v2142_v36 = vpack.c.bf16 %v2124_v32, %v2123_v26  ;;  %v2504_v32 = vld [vmem:[#allocation2 + $0x19a] sm:$0xff] }
 0x300   : > { %v3040_v10 = vpop.f32.mrf.mxu3 }
 0x301   : > { %v8406_v12 = vadd.f32 %v3040_v10, %v2892_v61  ;;  %v2501_v61 = vld [vmem:[#allocation2 + $0x172] sm:$0xff]  ;;  %6982 = vmatmul.msk.bf16.gmra.mxu0 %vm307_vm1, %v2141_v38  ;;  %v2727_v38 = vld [vmem:[#allocation2 + $0x1a3] sm:$0xff] }
 0x302   : > { %v2413_v13 = vpop.f32.mrf.mxu0  ;;  %v2520_v47 = vpack.c.bf16 %v2501_v61, %v2500_v63  ;;  %v2945_v10 = vld [vmem:[#allocation2 + $0x174] sm:$0xff] }
 0x303   : > { %v2414_v39 = vadd.f32 %v2413_v13, %v8186_v34  ;;  %v2964_v62 = vpack.c.bf16 %v2945_v10, %v2944_v31 }
 0x304   : > { %v2603_v8 = vpop.f32.mrf.mxu1 }
 0x305   : > { %v2673_v17 = vadd.f32 %v2603_v8, %v2414_v39  ;;  %v2825_v49 = vpop.f32.mrf.mxu2 }
 0x307   : > { %v2895_v53 = vadd.f32 %v2825_v49, %v2673_v17 }
 0x308   : > { %v3042_v4 = vpop.f32.mrf.mxu3 }
 0x309   : > { %v8411_v41 = vadd.f32 %v3042_v4, %v2893_v43 }
 0x30a   : > { %7016 = vmatmul.msk.bf16.gmra.mxu2 %vm307_vm1, %v2742_v9  ;;  %v2416_v5 = vpop.f32.mrf.mxu0 }
 0x30b   : > { %v2417_v34 = vadd.f32 %v2416_v5, %v8192_v7  ;;  %v2726_v7 = vld [vmem:[#allocation2 + $0x19b] sm:$0xff] }
 0x30c   : > { %v2606_v3 = vpop.f32.mrf.mxu1  ;;  %v2744_v39 = vpack.c.bf16 %v2727_v38, %v2726_v7 }
 0x30d   : > { %7032 = vmatmul.msk.bf16.gmra.mxu3 %vm307_vm1, %v2963_v40  ;;  %v2674_v9 = vadd.f32 %v2606_v3, %v2417_v34  ;;  %v2828_v43 = vpop.f32.mrf.mxu2  ;;  %v2125_v3 = vld [vmem:[#allocation2 + $0x198] sm:$0xff]  ;;  %v2126_v34 = vld [vmem:[#allocation2 + $0x1a0] sm:$0xff] }
 0x30f   : > { %6999 = vmatmul.msk.bf16.gmra.mxu1 %vm307_vm1, %v2520_v47  ;;  %v2896_v57 = vadd.f32 %v2828_v43, %v2674_v9  ;;  %v2946_v47 = vld [vmem:[#allocation2 + $0x184] sm:$0xff]  ;;  %v2143_v43 = vpack.c.bf16 %v2126_v34, %v2125_v3 }
 0x310   : > { %v3045_v42 = vpop.f32.mrf.mxu3 }
 0x311   : > { %v8416_v44 = vadd.f32 %v3045_v42, %v2894_v16  ;;  %v2503_v16 = vld [vmem:[#allocation2 + $0x18a] sm:$0xff]  ;;  %6983 = vmatmul.msk.bf16.gmra.mxu0 %vm307_vm1, %v2142_v36  ;;  %v2729_v36 = vld [vmem:[#allocation2 + $0x1bb] sm:$0xff] }
 0x312   : > { %v2418_v4 = vpop.f32.mrf.mxu0  ;;  %v2521_v63 = vpack.c.bf16 %v2503_v16, %v2502_v27  ;;  %v2947_v42 = vld [vmem:[#allocation2 + $0x18c] sm:$0xff] }
 0x313   : > { %v2419_v40 = vadd.f32 %v2418_v4, %v8203_v6  ;;  %v2965_v9 = vpack.c.bf16 %v2947_v42, %v2946_v47 }
 0x314   : > { %v2608_v33 = vpop.f32.mrf.mxu1 }
 0x315   : > { %v2675_v13 = vadd.f32 %v2608_v33, %v2419_v40  ;;  %v2830_v8 = vpop.f32.mrf.mxu2 }
 0x317   : > { %v2897_v59 = vadd.f32 %v2830_v8, %v2675_v13 }
 0x318   : > { %v3047_v28 = vpop.f32.mrf.mxu3 }
 0x319   : > { %v8421_v45 = vadd.f32 %v3047_v28, %v2895_v53 }
 0x31a   : > { %7017 = vmatmul.msk.bf16.gmra.mxu2 %vm307_vm1, %v2743_v2  ;;  %v2421_v17 = vpop.f32.mrf.mxu0 }
 0x31b   : > { %v2422_v6 = vadd.f32 %v2421_v17, %v8209_v11  ;;  %v2728_v11 = vld [vmem:[#allocation2 + $0x1b3] sm:$0xff] }
 0x31c   : > { %v2611_v49 = vpop.f32.mrf.mxu1  ;;  %v2745_v40 = vpack.c.bf16 %v2729_v36, %v2728_v11  ;;  %v7155_v11 = vld [vmem:[%s9449_s3 + $0x14] sm:$0xf] }
 0x31d   : > { %7033 = vmatmul.msk.bf16.gmra.mxu3 %vm307_vm1, %v2964_v62  ;;  %v2676_v2 = vadd.f32 %v2611_v49, %v2422_v6  ;;  %v2833_v53 = vpop.f32.mrf.mxu2  ;;  %v2127_v49 = vld [vmem:[#allocation2 + $0x1b0] sm:$0xff]  ;;  %v2128_v6 = vld [vmem:[#allocation2 + $0x1b8] sm:$0xff] }
 0x31e   : > { %v2144_v3 = vpack.c.bf16 %v2128_v6, %v2127_v49  ;;  %v3142_v6 = vld [vmem:[#allocation2 + $0x4d] sm:$0xff] }
 0x31f   : > { %7000 = vmatmul.msk.bf16.gmra.mxu1 %vm307_vm1, %v2521_v63  ;;  %v2898_v10 = vadd.f32 %v2833_v53, %v2676_v2  ;;  %v2948_v63 = vld [vmem:[#allocation2 + $0x19c] sm:$0xff]  ;;  %v7138_v53 = vld [vmem:[%s9449_s3 + $0x10] sm:$0xf] }
 0x320   : > { %v3050_v61 = vpop.f32.mrf.mxu3 }
 0x321   : > { %v8426_v22 = vadd.f32 %v3050_v61, %v2896_v57  ;;  %v2505_v57 = vld [vmem:[#allocation2 + $0x1a2] sm:$0xff]  ;;  %6984 = vmatmul.msk.bf16.gmra.mxu0 %vm307_vm1, %v2143_v43 }
 0x322   : > { %v2423_v28 = vpop.f32.mrf.mxu0  ;;  %v2522_v27 = vpack.c.bf16 %v2505_v57, %v2504_v32  ;;  %v2949_v61 = vld [vmem:[#allocation2 + $0x1a4] sm:$0xff] }
 0x323   : > { %v2424_v62 = vadd.f32 %v2423_v28, %v8218_v48  ;;  %v2966_v2 = vpack.c.bf16 %v2949_v61, %v2948_v63  ;;  %v3705_v28 = vld [vmem:[#allocation3 + $0x9] sm:$0xff] }
 0x324   : > { %v2613_v26 = vpop.f32.mrf.mxu1  ;;  %v2950_v61 = vld [vmem:[#allocation2 + $0x1b4] sm:$0xff] }
 0x325   : > { %v2677_v4 = vadd.f32 %v2613_v26, %v2424_v62  ;;  %v2835_v33 = vpop.f32.mrf.mxu2  ;;  %v7104_v62 = vld [vmem:[%s9449_s3 + $0x8] sm:$0xf] }
 0x327   : > { %v2899_v38 = vadd.f32 %v2835_v33, %v2677_v4  ;;  %v4134_v4 = vsel %vm3802_vm5, %v7104_v62, 0  ;;  %v4800_v33 = vsel %vm3802_vm5, %v7155_v11, 0 }
 0x328   : > { %v3052_v5 = vpop.f32.mrf.mxu3  ;;  %4143 = vmatpush.bf16.msra.mxu0 %v4134_v4  ;;  %4809 = vmatpush.bf16.msra.mxu3 %v4800_v33 }
 0x329   : > { %v8431_v31 = vadd.f32 %v3052_v5, %v2897_v59  ;;  %v4578_v5 = vsel %vm3802_vm5, %v7138_v53, 0 }
 0x32a   : > { %7018 = vmatmul.msk.bf16.gmra.mxu2 %vm307_vm1, %v2744_v39  ;;  %v2426_v13 = vpop.f32.mrf.mxu0 }
 0x32b   : > { %v2427_v48 = vadd.f32 %v2426_v13, %v8228_v56  ;;  %4587 = vmatpush.bf16.msra.mxu2 %v4578_v5 }
 0x32c   : > { %v2616_v8 = vpop.f32.mrf.mxu1 }
 0x32d   : > { %7034 = vmatmul.msk.bf16.gmra.mxu3 %vm307_vm1, %v2965_v9  ;;  %v2678_v39 = vadd.f32 %v2616_v8, %v2427_v48  ;;  %v2838_v59 = vpop.f32.mrf.mxu2  ;;  %v2507_v9 = vld [vmem:[#allocation2 + $0x1ba] sm:$0xff] }
 0x32f   : > { %7001 = vmatmul.msk.bf16.gmra.mxu1 %vm307_vm1, %v2522_v27  ;;  %v2900_v42 = vadd.f32 %v2838_v59, %v2678_v39  ;;  %v2951_v39 = vld [vmem:[#allocation2 + $0x1bc] sm:$0xff] }
 0x330   : > { %v3055_v16 = vpop.f32.mrf.mxu3  ;;  %v2967_v5 = vpack.c.bf16 %v2951_v39, %v2950_v61  ;;  %v3655_v39 = vld [vmem:[#allocation3] sm:$0xff] }
 0x331   : > { %v8436_v7 = vadd.f32 %v3055_v16, %v2898_v10  ;;  %v2506_v10 = vld [vmem:[#allocation2 + $0x1b2] sm:$0xff]  ;;  %6985 = vmatmul.msk.bf16.gmra.mxu0 %vm307_vm1, %v2144_v3 }
 0x332   : > { %v2428_v56 = vpop.f32.mrf.mxu0  ;;  %v2523_v57 = vpack.c.bf16 %v2507_v9, %v2506_v10  ;;  %v3364_v10 = vld [vmem:[#allocation2 + $0x4e] sm:$0xff]  ;;  %v3365_v9 = vld [vmem:[#allocation2 + $0x56] sm:$0xff] }
 0x333   : > { %v2429_v43 = vadd.f32 %v2428_v56, %v8250_v0  ;;  %v7121_v0 = vld [vmem:[%s9449_s3 + $0xc] sm:$0xf] }
 0x334   : > { %v2618_v34 = vpop.f32.mrf.mxu1  ;;  %v4356_v27 = vsel %vm3802_vm5, %v7121_v0, 0  ;;  %v3706_v0 = vld [vmem:[#allocation3 + $0x19] sm:$0xff] }
 0x335   : > { %v2679_v26 = vadd.f32 %v2618_v34, %v2429_v43  ;;  %v2840_v32 = vpop.f32.mrf.mxu2  ;;  %4365 = vmatpush.bf16.msra.mxu1 %v4356_v27 }
 0x338   : > { %v3057_v17 = vpop.f32.mrf.mxu3 }
 0x339   : > { %v8441_v47 = vadd.f32 %v3057_v17, %v2899_v38  ;;  %v3704_v38 = vld [vmem:[#allocation3 + $0x1] sm:$0xff] }
 0x33a   : > { %7019 = vmatmul.msk.bf16.gmra.mxu2 %vm307_vm1, %v2745_v40  ;;  %v2901_v40 = vadd.f32 %v2840_v32, %v2679_v26  ;;  %v3736_v13 = vpack.c.bf16 %v3705_v28, %v3704_v38  ;;  %v2431_v8 = vpop.f32.mrf.mxu0  ;;  %v3396_v26 = vpack.c.bf16 %v3365_v9, %v3364_v10  ;;  %v3707_v32 = vld [vmem:[#allocation3 + $0x21] sm:$0xff] }
 0x33b   : > { %v2432_v63 = vadd.f32 %v2431_v8, %v8256_v15  ;;  %v3144_v8 = vld [vmem:[#allocation2 + $0x65] sm:$0xff] }
 0x33c   : > { %v2621_v48 = vpop.f32.mrf.mxu1 }
 0x33d   : > { %7035 = vmatmul.msk.bf16.gmra.mxu3 %vm307_vm1, %v2966_v2  ;;  %v2680_v59 = vadd.f32 %v2621_v48, %v2432_v63  ;;  %v2843_v17 = vpop.f32.mrf.mxu2  ;;  %v3145_v48 = vld [vmem:[#allocation2 + $0x6d] sm:$0xff] }
 0x33f   : > { %7002 = vmatmul.msk.bf16.gmra.mxu1 %vm307_vm1, %v2523_v57  ;;  %v2902_v53 = vadd.f32 %v2843_v17, %v2680_v59  ;;  %v3175_v17 = vpack.c.bf16 %v3145_v48, %v3144_v8 }
 0x340   : > { %v3060_v36 = vpop.f32.mrf.mxu3 }
 0x341   : > { %v8462_v16 = vadd.f32 %v3060_v36, %v2900_v42  ;;  %v3143_v42 = vld [vmem:[#allocation2 + $0x55] sm:$0xff]  ;;  %v3737_v36 = vpack.c.bf16 %v3707_v32, %v3706_v0 }
 0x342   : > { %v3174_v3 = vpack.c.bf16 %v3143_v42, %v3142_v6  ;;  %v2433_v56 = vpop.f32.mrf.mxu0  ;;  %v3366_v42 = vld [vmem:[#allocation2 + $0x66] sm:$0xff] }
 0x343   : > { %v2434_v43 = vadd.f32 %v2433_v56, %v8264_v46 }
 0x344   : > { %v2623_v34 = vpop.f32.mrf.mxu1  ;;  %7038 = vmatmul.msk.bf16.vlgmr.msrb.gmra.mxu0 %vm307_vm1, %v3174_v3 }
 0x345   : > { %v2681_v15 = vadd.f32 %v2623_v34, %v2434_v43  ;;  %v2845_v28 = vpop.f32.mrf.mxu2  ;;  %v3709_v34 = vld [vmem:[#allocation3 + $0x39] sm:$0xff] }
 0x347   : > { %v2903_v11 = vadd.f32 %v2845_v28, %v2681_v15  ;;  %v3708_v15 = vld [vmem:[#allocation3 + $0x31] sm:$0xff] }
 0x348   : > { %v3062_v49 = vpop.f32.mrf.mxu3  ;;  %v3738_v28 = vpack.c.bf16 %v3709_v34, %v3708_v15 }
 0x349   : > { %v8467_v2 = vadd.f32 %v3062_v49, %v2901_v40 }
 0x34a   : > { %7072 = vmatmul.msk.bf16.vlgmr.msrb.gmra.mxu2 %vm375_vm3, %v3736_v13  ;;  %v2436_v4 = vpop.f32.mrf.mxu0  ;;  %v3656_v13 = vld [vmem:[#allocation3 + $0x8] sm:$0xff] }
 0x34b   : > { %v2437_v46 = vadd.f32 %v2436_v4, %v8270_v21  ;;  %v3687_v59 = vpack.c.bf16 %v3656_v13, %v3655_v39  ;;  %v3146_v4 = vld [vmem:[#allocation2 + $0x7d] sm:$0xff]  ;;  %v3369_v39 = vld [vmem:[#allocation2 + $0x86] sm:$0xff] }
 0x34c   : > { %v2626_v33 = vpop.f32.mrf.mxu1 }
 0x34d   : > { %7036 = vmatmul.msk.bf16.gmra.mxu3 %vm307_vm1, %v2967_v5  ;;  %v2682_v27 = vadd.f32 %v2626_v33, %v2437_v46  ;;  %v2848_v40 = vpop.f32.mrf.mxu2  ;;  %v3147_v33 = vld [vmem:[#allocation2 + $0x85] sm:$0xff] }
 0x34e   : > { %v3176_v13 = vpack.c.bf16 %v3147_v33, %v3146_v4 }
 0x34f   : > { %7055 = vmatmul.msk.bf16.vlgmr.msrb.gmra.mxu1 %vm307_vm1, %v3396_v26  ;;  %v2904_v61 = vadd.f32 %v2848_v40, %v2682_v27  ;;  %v3657_v40 = vld [vmem:[#allocation3 + $0x18] sm:$0xff] }
 0x350   : > { %v3065_v57 = vpop.f32.mrf.mxu3 }
 0x351   : > { %v8472_v62 = vadd.f32 %v3065_v57, %v2902_v53  ;;  %v3367_v53 = vld [vmem:[#allocation2 + $0x6e] sm:$0xff] }
 0x352   : > { %v2438_v49 = vpop.f32.mrf.mxu0  ;;  %v3397_v56 = vpack.c.bf16 %v3367_v53, %v3366_v42 }
 0x353   : > { %v2439_v5 = vadd.f32 %v2438_v49, %v8278_v37 }
 0x354   : > { %v2628_v6 = vpop.f32.mrf.mxu1  ;;  %7039 = vmatmul.msk.bf16.gmra.mxu0 %vm307_vm1, %v3175_v17 }
 0x355   : > { %v2683_v21 = vadd.f32 %v2628_v6, %v2439_v5  ;;  %v2850_v3 = vpop.f32.mrf.mxu2  ;;  %v3711_v6 = vld [vmem:[#allocation3 + $0x51] sm:$0xff] }
 0x357   : > { %v2905_v43 = vadd.f32 %v2850_v3, %v2683_v21  ;;  %v3710_v21 = vld [vmem:[#allocation3 + $0x49] sm:$0xff] }
 0x358   : > { %v3067_v38 = vpop.f32.mrf.mxu3  ;;  %v3739_v3 = vpack.c.bf16 %v3711_v6, %v3710_v21 }
 0x359   : > { %v8477_v63 = vadd.f32 %v3067_v38, %v2903_v11 }
 0x35a   : > { %7073 = vmatmul.msk.bf16.gmra.mxu2 %vm375_vm3, %v3737_v36  ;;  %v2441_v26 = vpop.f32.mrf.mxu0  ;;  %v3658_v36 = vld [vmem:[#allocation3 + $0x20] sm:$0xff] }
 0x35b   : > { %v2442_v37 = vadd.f32 %v2441_v26, %v8285_v60  ;;  %v3688_v38 = vpack.c.bf16 %v3658_v36, %v3657_v40  ;;  %v3148_v26 = vld [vmem:[#allocation2 + $0x95] sm:$0xff]  ;;  %v3371_v40 = vld [vmem:[#allocation2 + $0x9e] sm:$0xff] }
 0x35c   : > { %v2631_v32 = vpop.f32.mrf.mxu1 }
 0x35d   : > { %7088 = vmatmul.msk.bf16.vlgmr.msrb.gmra.mxu3 %vm375_vm3, %v3687_v59  ;;  %v2684_v57 = vadd.f32 %v2631_v32, %v2442_v37  ;;  %v2853_v11 = vpop.f32.mrf.mxu2  ;;  %v3149_v32 = vld [vmem:[#allocation2 + $0x9d] sm:$0xff] }
 0x35e   : > { %v3177_v36 = vpack.c.bf16 %v3149_v32, %v3148_v26 }
 0x35f   : > { %7056 = vmatmul.msk.bf16.gmra.mxu1 %vm307_vm1, %v3397_v56  ;;  %v2906_v27 = vadd.f32 %v2853_v11, %v2684_v57  ;;  %v3659_v11 = vld [vmem:[#allocation3 + $0x30] sm:$0xff] }
 0x360   : > { %v3070_v10 = vpop.f32.mrf.mxu3 }
 0x361   : > { %v8482_v9 = vadd.f32 %v3070_v10, %v2904_v61  ;;  %v3368_v61 = vld [vmem:[#allocation2 + $0x7e] sm:$0xff] }
 0x362   : > { %v2443_v8 = vpop.f32.mrf.mxu0  ;;  %v3398_v49 = vpack.c.bf16 %v3369_v39, %v3368_v61 }
 0x363   : > { %v2444_v59 = vadd.f32 %v2443_v8, %v8292_v14 }
 0x364   : > { %v2633_v48 = vpop.f32.mrf.mxu1  ;;  %7040 = vmatmul.msk.bf16.gmra.mxu0 %vm307_vm1, %v3176_v13 }
 0x365   : > { %v2685_v60 = vadd.f32 %v2633_v48, %v2444_v59  ;;  %v2855_v17 = vpop.f32.mrf.mxu2  ;;  %v3713_v48 = vld [vmem:[#allocation3 + $0x69] sm:$0xff] }
 0x367   : > { %v2907_v5 = vadd.f32 %v2855_v17, %v2685_v60  ;;  %v3712_v60 = vld [vmem:[#allocation3 + $0x61] sm:$0xff] }
 0x368   : > { %v3072_v0 = vpop.f32.mrf.mxu3  ;;  %v3740_v17 = vpack.c.bf16 %v3713_v48, %v3712_v60 }
 0x369   : > { %v8487_v46 = vadd.f32 %v3072_v0, %v2905_v43 }
 0x36a   : > { %7074 = vmatmul.msk.bf16.gmra.mxu2 %vm375_vm3, %v3738_v28  ;;  %v2446_v56 = vpop.f32.mrf.mxu0  ;;  %v3660_v28 = vld [vmem:[#allocation3 + $0x38] sm:$0xff] }
 0x36b   : > { %v2447_v14 = vadd.f32 %v2446_v56, %v8299_v24  ;;  %v3689_v0 = vpack.c.bf16 %v3660_v28, %v3659_v11  ;;  %v3150_v56 = vld [vmem:[#allocation2 + $0xad] sm:$0xff]  ;;  %v3373_v11 = vld [vmem:[#allocation2 + $0xb6] sm:$0xff] }
 0x36c   : > { %v2636_v34 = vpop.f32.mrf.mxu1 }
 0x36d   : > { %7089 = vmatmul.msk.bf16.gmra.mxu3 %vm375_vm3, %v3688_v38  ;;  %v2686_v10 = vadd.f32 %v2636_v34, %v2447_v14  ;;  %v2858_v43 = vpop.f32.mrf.mxu2  ;;  %v3151_v34 = vld [vmem:[#allocation2 + $0xb5] sm:$0xff] }
 0x36e   : > { %v3178_v28 = vpack.c.bf16 %v3151_v34, %v3150_v56 }
 0x36f   : > { %7057 = vmatmul.msk.bf16.gmra.mxu1 %vm307_vm1, %v3398_v49  ;;  %v2908_v57 = vadd.f32 %v2858_v43, %v2686_v10  ;;  %v3661_v43 = vld [vmem:[#allocation3 + $0x48] sm:$0xff] }
 0x370   : > { %v3075_v42 = vpop.f32.mrf.mxu3 }
 0x371   : > { %v8492_v53 = vadd.f32 %v3075_v42, %v2906_v27  ;;  %v3370_v27 = vld [vmem:[#allocation2 + $0x96] sm:$0xff] }
 0x372   : > { %v2448_v4 = vpop.f32.mrf.mxu0  ;;  %v3399_v8 = vpack.c.bf16 %v3371_v40, %v3370_v27 }
 0x373   : > { %v2449_v38 = vadd.f32 %v2448_v4, %v8306_v30 }
 0x374   : > { %v2638_v33 = vpop.f32.mrf.mxu1  ;;  %7041 = vmatmul.msk.bf16.gmra.mxu0 %vm307_vm1, %v3177_v36 }
 0x375   : > { %v2687_v24 = vadd.f32 %v2638_v33, %v2449_v38  ;;  %v2860_v13 = vpop.f32.mrf.mxu2  ;;  %v3715_v33 = vld [vmem:[#allocation3 + $0x81] sm:$0xff] }
 0x377   : > { %v2909_v59 = vadd.f32 %v2860_v13, %v2687_v24  ;;  %v3714_v24 = vld [vmem:[#allocation3 + $0x79] sm:$0xff] }
 0x378   : > { %v3077_v15 = vpop.f32.mrf.mxu3  ;;  %v3741_v13 = vpack.c.bf16 %v3715_v33, %v3714_v24 }
 0x379   : > { %v8497_v37 = vadd.f32 %v3077_v15, %v2907_v5 }
 0x37a   : > { %7075 = vmatmul.msk.bf16.gmra.mxu2 %vm375_vm3, %v3739_v3  ;;  %v2451_v49 = vpop.f32.mrf.mxu0  ;;  %v3662_v3 = vld [vmem:[#allocation3 + $0x50] sm:$0xff] }
 0x37b   : > { %v2452_v30 = vadd.f32 %v2451_v49, %v8313_v51  ;;  %v3690_v15 = vpack.c.bf16 %v3662_v3, %v3661_v43  ;;  %v3152_v49 = vld [vmem:[#allocation2 + $0xc5] sm:$0xff]  ;;  %v3375_v43 = vld [vmem:[#allocation2 + $0xce] sm:$0xff] }
 0x37c   : > { %v2641_v6 = vpop.f32.mrf.mxu1 }
 0x37d   : > { %7090 = vmatmul.msk.bf16.gmra.mxu3 %vm375_vm3, %v3689_v0  ;;  %v2688_v42 = vadd.f32 %v2641_v6, %v2452_v30  ;;  %v2863_v5 = vpop.f32.mrf.mxu2  ;;  %v3153_v6 = vld [vmem:[#allocation2 + $0xcd] sm:$0xff] }
 0x37e   : > { %v3179_v3 = vpack.c.bf16 %v3153_v6, %v3152_v49 }
 0x37f   : > { %7058 = vmatmul.msk.bf16.gmra.mxu1 %vm307_vm1, %v3399_v8  ;;  %v2910_v10 = vadd.f32 %v2863_v5, %v2688_v42  ;;  %v3663_v5 = vld [vmem:[#allocation3 + $0x60] sm:$0xff] }
 0x380   : > { %v3080_v61 = vpop.f32.mrf.mxu3 }
 0x381   : > { %v8502_v39 = vadd.f32 %v3080_v61, %v2908_v57  ;;  %v3372_v57 = vld [vmem:[#allocation2 + $0xae] sm:$0xff] }
 0x382   : > { %v2453_v26 = vpop.f32.mrf.mxu0  ;;  %v3400_v4 = vpack.c.bf16 %v3373_v11, %v3372_v57 }
 0x383   : > { %v2454_v0 = vadd.f32 %v2453_v26, %v8320_v50 }
 0x384   : > { %v2643_v32 = vpop.f32.mrf.mxu1  ;;  %7042 = vmatmul.msk.bf16.gmra.mxu0 %vm307_vm1, %v3178_v28 }
 0x385   : > { %v2689_v51 = vadd.f32 %v2643_v32, %v2454_v0  ;;  %v2865_v36 = vpop.f32.mrf.mxu2  ;;  %v3717_v32 = vld [vmem:[#allocation3 + $0x99] sm:$0xff] }
 0x387   : > { %v2911_v38 = vadd.f32 %v2865_v36, %v2689_v51  ;;  %v3716_v51 = vld [vmem:[#allocation3 + $0x91] sm:$0xff] }
 0x388   : > { %v3082_v21 = vpop.f32.mrf.mxu3  ;;  %v3742_v36 = vpack.c.bf16 %v3717_v32, %v3716_v51 }
 0x389   : > { %v8507_v14 = vadd.f32 %v3082_v21, %v2909_v59 }
 0x38a   : > { %7076 = vmatmul.msk.bf16.gmra.mxu2 %vm375_vm3, %v3740_v17  ;;  %v2456_v8 = vpop.f32.mrf.mxu0  ;;  %v3664_v17 = vld [vmem:[#allocation3 + $0x68] sm:$0xff] }
 0x38b   : > { %v2457_v50 = vadd.f32 %v2456_v8, %v8327_v23  ;;  %v3691_v21 = vpack.c.bf16 %v3664_v17, %v3663_v5  ;;  %v3154_v8 = vld [vmem:[#allocation2 + $0xdd] sm:$0xff]  ;;  %v3377_v5 = vld [vmem:[#allocation2 + $0xe6] sm:$0xff] }
 0x38c   : > { %v2646_v48 = vpop.f32.mrf.mxu1 }
 0x38d   : > { %7091 = vmatmul.msk.bf16.gmra.mxu3 %vm375_vm3, %v3690_v15  ;;  %v2690_v61 = vadd.f32 %v2646_v48, %v2457_v50  ;;  %v2868_v59 = vpop.f32.mrf.mxu2  ;;  %v3155_v48 = vld [vmem:[#allocation2 + $0xe5] sm:$0xff] }
 0x38e   : > { %v3180_v17 = vpack.c.bf16 %v3155_v48, %v3154_v8 }
 0x38f   : > { %7059 = vmatmul.msk.bf16.gmra.mxu1 %vm307_vm1, %v3400_v4  ;;  %v2912_v42 = vadd.f32 %v2868_v59, %v2690_v61  ;;  %v3665_v59 = vld [vmem:[#allocation3 + $0x78] sm:$0xff] }
 0x390   : > { %v3085_v27 = vpop.f32.mrf.mxu3 }
 0x391   : > { %v8512_v40 = vadd.f32 %v3085_v27, %v2910_v10  ;;  %v3374_v10 = vld [vmem:[#allocation2 + $0xc6] sm:$0xff] }
 0x392   : > { %v2458_v56 = vpop.f32.mrf.mxu0  ;;  %v3401_v26 = vpack.c.bf16 %v3375_v43, %v3374_v10 }
 0x393   : > { %v2459_v15 = vadd.f32 %v2458_v56, %v8334_v25 }
 0x394   : > { %v2648_v34 = vpop.f32.mrf.mxu1  ;;  %7043 = vmatmul.msk.bf16.gmra.mxu0 %vm307_vm1, %v3179_v3 }
 0x395   : > { %v2691_v23 = vadd.f32 %v2648_v34, %v2459_v15  ;;  %v2870_v28 = vpop.f32.mrf.mxu2  ;;  %v3719_v34 = vld [vmem:[#allocation3 + $0xb1] sm:$0xff] }
 0x397   : > { %v2913_v0 = vadd.f32 %v2870_v28, %v2691_v23  ;;  %v3718_v23 = vld [vmem:[#allocation3 + $0xa9] sm:$0xff] }
 0x398   : > { %v3087_v60 = vpop.f32.mrf.mxu3  ;;  %v3743_v28 = vpack.c.bf16 %v3719_v34, %v3718_v23 }
 0x399   : > { %v8517_v30 = vadd.f32 %v3087_v60, %v2911_v38 }
 0x39a   : > { %7077 = vmatmul.msk.bf16.gmra.mxu2 %vm375_vm3, %v3741_v13  ;;  %v2461_v4 = vpop.f32.mrf.mxu0  ;;  %v3666_v13 = vld [vmem:[#allocation3 + $0x80] sm:$0xff] }
 0x39b   : > { %v2462_v25 = vadd.f32 %v2461_v4, %v8341_v52  ;;  %v3692_v60 = vpack.c.bf16 %v3666_v13, %v3665_v59  ;;  %v3156_v4 = vld [vmem:[#allocation2 + $0xf5] sm:$0xff]  ;;  %v3379_v59 = vld [vmem:[#allocation2 + $0xfe] sm:$0xff] }
 0x39c   : > { %v2651_v33 = vpop.f32.mrf.mxu1 }
 0x39d   : > { %7092 = vmatmul.msk.bf16.gmra.mxu3 %vm375_vm3, %v3691_v21  ;;  %v2692_v27 = vadd.f32 %v2651_v33, %v2462_v25  ;;  %v2873_v38 = vpop.f32.mrf.mxu2  ;;  %v3157_v33 = vld [vmem:[#allocation2 + $0xfd] sm:$0xff] }
 0x39e   : > { %v3181_v13 = vpack.c.bf16 %v3157_v33, %v3156_v4 }
 0x39f   : > { %7060 = vmatmul.msk.bf16.gmra.mxu1 %vm307_vm1, %v3401_v26  ;;  %v2914_v61 = vadd.f32 %v2873_v38, %v2692_v27  ;;  %v3667_v38 = vld [vmem:[#allocation3 + $0x90] sm:$0xff] }
 0x3a0   : > { %v3090_v57 = vpop.f32.mrf.mxu3 }
 0x3a1   : > { %v8522_v11 = vadd.f32 %v3090_v57, %v2912_v42  ;;  %v3376_v42 = vld [vmem:[#allocation2 + $0xde] sm:$0xff] }
 0x3a2   : > { %v2463_v49 = vpop.f32.mrf.mxu0  ;;  %v3402_v56 = vpack.c.bf16 %v3377_v5, %v3376_v42 }
 0x3a3   : > { %v2464_v21 = vadd.f32 %v2463_v49, %v8353_v1 }
 0x3a4   : > { %v2653_v6 = vpop.f32.mrf.mxu1  ;;  %7044 = vmatmul.msk.bf16.gmra.mxu0 %vm307_vm1, %v3180_v17 }
 0x3a5   : > { %v2693_v52 = vadd.f32 %v2653_v6, %v2464_v21  ;;  %v2875_v3 = vpop.f32.mrf.mxu2  ;;  %v3721_v6 = vld [vmem:[#allocation3 + $0xc9] sm:$0xff] }
 0x3a7   : > { %v2915_v15 = vadd.f32 %v2875_v3, %v2693_v52  ;;  %v3720_v52 = vld [vmem:[#allocation3 + $0xc1] sm:$0xff] }
 0x3a8   : > { %v3092_v24 = vpop.f32.mrf.mxu3  ;;  %v3744_v3 = vpack.c.bf16 %v3721_v6, %v3720_v52 }
 0x3a9   : > { %v8527_v50 = vadd.f32 %v3092_v24, %v2913_v0 }
 0x3aa   : > { %7078 = vmatmul.msk.bf16.gmra.mxu2 %vm375_vm3, %v3742_v36  ;;  %v2466_v26 = vpop.f32.mrf.mxu0  ;;  %v3668_v36 = vld [vmem:[#allocation3 + $0x98] sm:$0xff] }
 0x3ab   : > { %v2467_v1 = vadd.f32 %v2466_v26, %v8360_v20  ;;  %v3693_v24 = vpack.c.bf16 %v3668_v36, %v3667_v38  ;;  %v3158_v26 = vld [vmem:[#allocation2 + $0x10d] sm:$0xff]  ;;  %v3381_v38 = vld [vmem:[#allocation2 + $0x116] sm:$0xff] }
 0x3ac   : > { %v2656_v32 = vpop.f32.mrf.mxu1 }
 0x3ad   : > { %7093 = vmatmul.msk.bf16.gmra.mxu3 %vm375_vm3, %v3692_v60  ;;  %v2694_v57 = vadd.f32 %v2656_v32, %v2467_v1  ;;  %v2878_v0 = vpop.f32.mrf.mxu2  ;;  %v3159_v32 = vld [vmem:[#allocation2 + $0x115] sm:$0xff] }
 0x3ae   : > { %v3182_v36 = vpack.c.bf16 %v3159_v32, %v3158_v26 }
 0x3af   : > { %7061 = vmatmul.msk.bf16.gmra.mxu1 %vm307_vm1, %v3402_v56  ;;  %v2916_v27 = vadd.f32 %v2878_v0, %v2694_v57  ;;  %v3669_v0 = vld [vmem:[#allocation3 + $0xa8] sm:$0xff] }
 0x3b0   : > { %v3095_v10 = vpop.f32.mrf.mxu3 }
 0x3b1   : > { %v8532_v43 = vadd.f32 %v3095_v10, %v2914_v61  ;;  %v3378_v61 = vld [vmem:[#allocation2 + $0xf6] sm:$0xff] }
 0x3b2   : > { %v2468_v8 = vpop.f32.mrf.mxu0  ;;  %v3403_v49 = vpack.c.bf16 %v3379_v59, %v3378_v61 }
 0x3b3   : > { %v2469_v60 = vadd.f32 %v2468_v8, %v8367_v19 }
 0x3b4   : > { %v2658_v48 = vpop.f32.mrf.mxu1  ;;  %7045 = vmatmul.msk.bf16.gmra.mxu0 %vm307_vm1, %v3181_v13 }
 0x3b5   : > { %v2695_v20 = vadd.f32 %v2658_v48, %v2469_v60  ;;  %v2880_v17 = vpop.f32.mrf.mxu2  ;;  %v3723_v48 = vld [vmem:[#allocation3 + $0xe1] sm:$0xff] }
 0x3b7   : > { %v2917_v21 = vadd.f32 %v2880_v17, %v2695_v20  ;;  %v3722_v20 = vld [vmem:[#allocation3 + $0xd9] sm:$0xff] }
 0x3b8   : > { %v3097_v51 = vpop.f32.mrf.mxu3  ;;  %v3745_v17 = vpack.c.bf16 %v3723_v48, %v3722_v20 }
 0x3b9   : > { %v8537_v25 = vadd.f32 %v3097_v51, %v2915_v15 }
 0x3ba   : > { %7079 = vmatmul.msk.bf16.gmra.mxu2 %vm375_vm3, %v3743_v28  ;;  %v2471_v56 = vpop.f32.mrf.mxu0  ;;  %v3670_v28 = vld [vmem:[#allocation3 + $0xb0] sm:$0xff] }
 0x3bb   : > { %v2472_v19 = vadd.f32 %v2471_v56, %v8374_v54  ;;  %v3694_v51 = vpack.c.bf16 %v3670_v28, %v3669_v0  ;;  %v3672_v56 = vld [vmem:[#allocation3 + $0xc8] sm:$0xff]  ;;  %v3383_v0 = vld [vmem:[#allocation2 + $0x12e] sm:$0xff] }
 0x3bc   : > { %v2661_v34 = vpop.f32.mrf.mxu1 }
 0x3bd   : > { %7094 = vmatmul.msk.bf16.gmra.mxu3 %vm375_vm3, %v3693_v24  ;;  %v2696_v10 = vadd.f32 %v2661_v34, %v2472_v19  ;;  %v2883_v15 = vpop.f32.mrf.mxu2  ;;  %v3160_v34 = vld [vmem:[#allocation2 + $0x125] sm:$0xff]  ;;  %v3161_v19 = vld [vmem:[#allocation2 + $0x12d] sm:$0xff] }
 0x3bf   : > { %7062 = vmatmul.msk.bf16.gmra.mxu1 %vm307_vm1, %v3403_v49  ;;  %v2918_v57 = vadd.f32 %v2883_v15, %v2696_v10 }
 0x3c0   : > { %v3100_v42 = vpop.f32.mrf.mxu3 }
 0x3c1   : > { %v8542_v5 = vadd.f32 %v3100_v42, %v2916_v27  ;;  %v3380_v27 = vld [vmem:[#allocation2 + $0x10e] sm:$0xff]  ;;  %v8560_v42 = vld [vmem:[%s9452_s6] ss:$0 sm:$0xff] }
 0x3c2   : > { %v2473_v4 = vpop.f32.mrf.mxu0  ;;  %v3404_v8 = vpack.c.bf16 %v3381_v38, %v3380_v27  ;;  %v3725_v27 = vld [vmem:[#allocation3 + $0xf9] sm:$0xff] }
 0x3c3   : > { %v2474_v24 = vadd.f32 %v2473_v4, %v8381_v58 }
 0x3c4   : > { %v2663_v33 = vpop.f32.mrf.mxu1  ;;  %7046 = vmatmul.msk.bf16.gmra.mxu0 %vm307_vm1, %v3182_v36 }
 0x3c5   : > { %v2697_v54 = vadd.f32 %v2663_v33, %v2474_v24  ;;  %v2885_v13 = vpop.f32.mrf.mxu2 }
 0x3c7   : > { %v2919_v60 = vadd.f32 %v2885_v13, %v2697_v54  ;;  %v3724_v13 = vld [vmem:[#allocation3 + $0xf1] sm:$0xff] }
 0x3c8   : > { %v3102_v23 = vpop.f32.mrf.mxu3 }
 0x3c9   : > { %v8547_v1 = vadd.f32 %v3102_v23, %v2917_v21  ;;  %v3671_v23 = vld [vmem:[#allocation3 + $0xc0] sm:$0xff] }
 0x3ca   : > { %7080 = vmatmul.msk.bf16.gmra.mxu2 %vm375_vm3, %v3744_v3  ;;  %v3252_v49 = vpop.f32.mrf.mxu0  ;;  %v3695_v28 = vpack.c.bf16 %v3672_v56, %v3671_v23  ;;  %v3384_v23 = vld [vmem:[#allocation2 + $0x13e] sm:$0xff] }
 0x3cb   : > { %v3332_v58 = vadd.f32 %v3252_v49, %v8386_v29  ;;  %v3183_v29 = vpack.c.bf16 %v3161_v19, %v3160_v34  ;;  %v3674_v49 = vld [vmem:[#allocation3 + $0xe0] sm:$0xff] }
 0x3cc   : > { %v3474_v6 = vpop.f32.mrf.mxu1 }
 0x3cd   : > { %7095 = vmatmul.msk.bf16.gmra.mxu3 %vm375_vm3, %v3694_v51  ;;  %v3554_v21 = vadd.f32 %v3474_v6, %v3332_v58  ;;  %v3815_v52 = vpop.f32.mrf.mxu2  ;;  %v3162_v6 = vld [vmem:[#allocation2 + $0x13d] sm:$0xff]  ;;  %v3163_v58 = vld [vmem:[#allocation2 + $0x145] sm:$0xff] }
 0x3ce   : > { %v3184_v34 = vpack.c.bf16 %v3163_v58, %v3162_v6 }
 0x3cf   : > { %7063 = vmatmul.msk.bf16.gmra.mxu1 %vm307_vm1, %v3404_v8  ;;  %v3590_v10 = vadd.f32 %v8560_v42, %v3554_v21  ;;  %v3746_v8 = vpack.c.bf16 %v3725_v27, %v3724_v13 }
 0x3d0   : > { %v3105_v61 = vpop.f32.mrf.mxu3 }
 0x3d1   : > { %v8552_v59 = vadd.f32 %v3105_v61, %v2918_v57  ;;  %3623 = vst.msk [vmem:[#allocation4 + $0x30] sm:$0xff] %vm375_vm3, %v3590_v10  ;;  %v3382_v57 = vld [vmem:[#allocation2 + $0x126] sm:$0xff] }
 0x3d2   : > { %v3254_v26 = vpop.f32.mrf.mxu0  ;;  %v3405_v33 = vpack.c.bf16 %v3383_v0, %v3382_v57  ;;  %v3727_v57 = vld [vmem:[#allocation3 + $0x111] sm:$0xff] }
 0x3d3   : > { %v3333_v51 = vadd.f32 %v3254_v26, %v8391_v35 }
 0x3d4   : > { %v3476_v32 = vpop.f32.mrf.mxu1  ;;  %7047 = vmatmul.msk.bf16.gmra.mxu0 %vm307_vm1, %v3183_v29 }
 0x3d5   : > { %v3555_v36 = vadd.f32 %v3476_v32, %v3333_v51  ;;  %v3817_v4 = vpop.f32.mrf.mxu2 }
 0x3d7   : > { %v3591_v24 = vadd.f32 %v8560_v42, %v3555_v36 }
 0x3d8   : > { %v3107_v3 = vpop.f32.mrf.mxu3 }
 0x3d9   : > { %v8563_v15 = vadd.f32 %v3107_v3, %v2919_v60  ;;  %3624 = vst.msk [vmem:[#allocation4 + $0x38] sm:$0xff] %vm375_vm3, %v3591_v24  ;;  %v3673_v3 = vld [vmem:[#allocation3 + $0xd8] sm:$0xff] }
 0x3da   : > { %7081 = vmatmul.msk.bf16.gmra.mxu2 %vm375_vm3, %v3745_v17  ;;  %v3257_v35 = vpop.f32.mrf.mxu0  ;;  %v3696_v56 = vpack.c.bf16 %v3674_v49, %v3673_v3  ;;  %v3386_v3 = vld [vmem:[#allocation2 + $0x156] sm:$0xff] }
 0x3db   : > { %v3334_v61 = vadd.f32 %v3257_v35, %v8396_v55  ;;  %v3676_v35 = vld [vmem:[#allocation3 + $0xf8] sm:$0xff] }
 0x3dc   : > { %v3479_v48 = vpop.f32.mrf.mxu1 }
 0x3dd   : > { %7096 = vmatmul.msk.bf16.gmra.mxu3 %vm375_vm3, %v3695_v28  ;;  %v3556_v60 = vadd.f32 %v3479_v48, %v3334_v61  ;;  %v3820_v20 = vpop.f32.mrf.mxu2  ;;  %v3385_v28 = vld [vmem:[#allocation2 + $0x146] sm:$0xff]  ;;  %v3164_v48 = vld [vmem:[#allocation2 + $0x155] sm:$0xff]  ;;  %v3165_v61 = vld [vmem:[#allocation2 + $0x15d] sm:$0xff] }
 0x3de   : > { %v3406_v32 = vpack.c.bf16 %v3385_v28, %v3384_v23  ;;  %v3185_v6 = vpack.c.bf16 %v3165_v61, %v3164_v48  ;;  %v3729_v23 = vld [vmem:[#allocation3 + $0x129] sm:$0xff] }
 0x3df   : > { %7064 = vmatmul.msk.bf16.gmra.mxu1 %vm307_vm1, %v3405_v33  ;;  %v3592_v21 = vadd.f32 %v8560_v42, %v3556_v60 }
 0x3e0   : > { %v3955_v38 = vpop.f32.mrf.mxu3 }
 0x3e1   : > { %v8570_v54 = vadd.f32 %v3955_v38, %v3815_v52  ;;  %3625 = vst.msk [vmem:[#allocation4 + $0x40] sm:$0xff] %vm375_vm3, %v3592_v21 }
 0x3e2   : > { %v3259_v19 = vpop.f32.mrf.mxu0 }
 0x3e3   : > { %v3335_v55 = vadd.f32 %v3259_v19, %v8401_v18 }
 0x3e4   : > { %v3481_v10 = vpop.f32.mrf.mxu1  ;;  %7048 = vmatmul.msk.bf16.gmra.mxu0 %vm307_vm1, %v3184_v34 }
 0x3e5   : > { %v3557_v29 = vadd.f32 %v3481_v10, %v3335_v55  ;;  %v3822_v26 = vpop.f32.mrf.mxu2 }
 0x3e7   : > { %v3593_v51 = vadd.f32 %v8560_v42, %v3557_v29 }
 0x3e8   : > { %v3957_v17 = vpop.f32.mrf.mxu3 }
 0x3e9   : > { %v8577_v52 = vadd.f32 %v3957_v17, %v3817_v4  ;;  %v3726_v4 = vld [vmem:[#allocation3 + $0x109] sm:$0xff]  ;;  %3626 = vst.msk [vmem:[#allocation4 + $0x48] sm:$0xff] %vm375_vm3, %v3593_v51 }
 0x3ea   : > { %7082 = vmatmul.msk.bf16.gmra.mxu2 %vm375_vm3, %v3746_v8  ;;  %v3747_v33 = vpack.c.bf16 %v3727_v57, %v3726_v4  ;;  %v3262_v18 = vpop.f32.mrf.mxu0  ;;  %v3675_v17 = vld [vmem:[#allocation3 + $0xf0] sm:$0xff] }
 0x3eb   : > { %v3336_v38 = vadd.f32 %v3262_v18, %v8406_v12  ;;  %v3697_v49 = vpack.c.bf16 %v3676_v35, %v3675_v17  ;;  %v3678_v18 = vld [vmem:[#allocation3 + $0x110] sm:$0xff]  ;;  %v3388_v17 = vld [vmem:[#allocation2 + $0x16e] sm:$0xff] }
 0x3ec   : > { %v3484_v27 = vpop.f32.mrf.mxu1 }
 0x3ed   : > { %7097 = vmatmul.msk.bf16.gmra.mxu3 %vm375_vm3, %v3696_v56  ;;  %v3558_v24 = vadd.f32 %v3484_v27, %v3336_v38  ;;  %v3825_v13 = vpop.f32.mrf.mxu2  ;;  %v3387_v56 = vld [vmem:[#allocation2 + $0x15e] sm:$0xff]  ;;  %v3166_v27 = vld [vmem:[#allocation2 + $0x16d] sm:$0xff]  ;;  %v3167_v38 = vld [vmem:[#allocation2 + $0x175] sm:$0xff] }
 0x3ee   : > { %v3407_v10 = vpack.c.bf16 %v3387_v56, %v3386_v3  ;;  %v3186_v48 = vpack.c.bf16 %v3167_v38, %v3166_v27  ;;  %v3731_v3 = vld [vmem:[#allocation3 + $0x141] sm:$0xff] }
 0x3ef   : > { %7065 = vmatmul.msk.bf16.gmra.mxu1 %vm307_vm1, %v3406_v32  ;;  %v3594_v60 = vadd.f32 %v8560_v42, %v3558_v24 }
 0x3f0   : > { %v3960_v0 = vpop.f32.mrf.mxu3 }
 0x3f1   : > { %v8584_v36 = vadd.f32 %v3960_v0, %v3820_v20  ;;  %3627 = vst.msk [vmem:[#allocation4 + $0x50] sm:$0xff] %vm375_vm3, %v3594_v60 }
 0x3f2   : > { %v3264_v58 = vpop.f32.mrf.mxu0 }
 0x3f3   : > { %v3337_v12 = vadd.f32 %v3264_v58, %v8411_v41 }
 0x3f4   : > { %v3486_v21 = vpop.f32.mrf.mxu1  ;;  %7049 = vmatmul.msk.bf16.gmra.mxu0 %vm307_vm1, %v3185_v6 }
 0x3f5   : > { %v3559_v34 = vadd.f32 %v3486_v21, %v3337_v12  ;;  %v3827_v19 = vpop.f32.mrf.mxu2 }
 0x3f7   : > { %v3595_v55 = vadd.f32 %v8560_v42, %v3559_v34 }
 0x3f8   : > { %v3962_v8 = vpop.f32.mrf.mxu3 }
 0x3f9   : > { %v8591_v20 = vadd.f32 %v3962_v8, %v3822_v26  ;;  %v3728_v26 = vld [vmem:[#allocation3 + $0x121] sm:$0xff]  ;;  %3628 = vst.msk [vmem:[#allocation4 + $0x58] sm:$0xff] %vm375_vm3, %v3595_v55 }
 0x3fa   : > { %7083 = vmatmul.msk.bf16.gmra.mxu2 %vm375_vm3, %v3747_v33  ;;  %v3748_v32 = vpack.c.bf16 %v3729_v23, %v3728_v26  ;;  %v3267_v41 = vpop.f32.mrf.mxu0  ;;  %v3677_v8 = vld [vmem:[#allocation3 + $0x108] sm:$0xff] }
 0x3fb   : > { %v3338_v0 = vadd.f32 %v3267_v41, %v8416_v44  ;;  %v3698_v35 = vpack.c.bf16 %v3678_v18, %v3677_v8  ;;  %v3680_v41 = vld [vmem:[#allocation3 + $0x128] sm:$0xff]  ;;  %v3390_v8 = vld [vmem:[#allocation2 + $0x186] sm:$0xff] }
 0x3fc   : > { %v3489_v57 = vpop.f32.mrf.mxu1 }
 0x3fd   : > { %7098 = vmatmul.msk.bf16.gmra.mxu3 %vm375_vm3, %v3697_v49  ;;  %v3560_v51 = vadd.f32 %v3489_v57, %v3338_v0  ;;  %v3830_v4 = vpop.f32.mrf.mxu2  ;;  %v3389_v49 = vld [vmem:[#allocation2 + $0x176] sm:$0xff]  ;;  %v3168_v57 = vld [vmem:[#allocation2 + $0x185] sm:$0xff]  ;;  %v3169_v0 = vld [vmem:[#allocation2 + $0x18d] sm:$0xff] }
 0x3fe   : > { %v3408_v21 = vpack.c.bf16 %v3389_v49, %v3388_v17  ;;  %v3187_v27 = vpack.c.bf16 %v3169_v0, %v3168_v57  ;;  %v3733_v17 = vld [vmem:[#allocation3 + $0x159] sm:$0xff] }
 0x3ff   : > { %7066 = vmatmul.msk.bf16.gmra.mxu1 %vm307_vm1, %v3407_v10  ;;  %v3596_v24 = vadd.f32 %v8560_v42, %v3560_v51 }
 0x400   : > { %v3965_v28 = vpop.f32.mrf.mxu3 }
 0x401   : > { %v8598_v29 = vadd.f32 %v3965_v28, %v3825_v13  ;;  %3629 = vst.msk [vmem:[#allocation4 + $0x60] sm:$0xff] %vm375_vm3, %v3596_v24 }
 0x402   : > { %v3269_v61 = vpop.f32.mrf.mxu0 }
 0x403   : > { %v3339_v44 = vadd.f32 %v3269_v61, %v8421_v45 }
 0x404   : > { %v3491_v60 = vpop.f32.mrf.mxu1  ;;  %7050 = vmatmul.msk.bf16.gmra.mxu0 %vm307_vm1, %v3186_v48 }
 0x405   : > { %v3561_v6 = vadd.f32 %v3491_v60, %v3339_v44  ;;  %v3832_v58 = vpop.f32.mrf.mxu2 }
 0x407   : > { %v3597_v12 = vadd.f32 %v8560_v42, %v3561_v6 }
 0x408   : > { %v3967_v33 = vpop.f32.mrf.mxu3 }
 0x409   : > { %v8605_v13 = vadd.f32 %v3967_v33, %v3827_v19  ;;  %v3730_v19 = vld [vmem:[#allocation3 + $0x139] sm:$0xff]  ;;  %3630 = vst.msk [vmem:[#allocation4 + $0x68] sm:$0xff] %vm375_vm3, %v3597_v12 }
 0x40a   : > { %7084 = vmatmul.msk.bf16.gmra.mxu2 %vm375_vm3, %v3748_v32  ;;  %v3749_v10 = vpack.c.bf16 %v3731_v3, %v3730_v19  ;;  %v3272_v45 = vpop.f32.mrf.mxu0  ;;  %v3679_v33 = vld [vmem:[#allocation3 + $0x120] sm:$0xff] }
 0x40b   : > { %v3340_v28 = vadd.f32 %v3272_v45, %v8426_v22  ;;  %v3699_v18 = vpack.c.bf16 %v3680_v41, %v3679_v33  ;;  %v3682_v45 = vld [vmem:[#allocation3 + $0x140] sm:$0xff]  ;;  %v3392_v33 = vld [vmem:[#allocation2 + $0x19e] sm:$0xff] }
 0x40c   : > { %v3494_v23 = vpop.f32.mrf.mxu1 }
 0x40d   : > { %7099 = vmatmul.msk.bf16.gmra.mxu3 %vm375_vm3, %v3698_v35  ;;  %v3562_v55 = vadd.f32 %v3494_v23, %v3340_v28  ;;  %v3835_v26 = vpop.f32.mrf.mxu2  ;;  %v3391_v35 = vld [vmem:[#allocation2 + $0x18e] sm:$0xff]  ;;  %v3170_v23 = vld [vmem:[#allocation2 + $0x19d] sm:$0xff]  ;;  %v3171_v28 = vld [vmem:[#allocation2 + $0x1a5] sm:$0xff] }
 0x40e   : > { %v3409_v60 = vpack.c.bf16 %v3391_v35, %v3390_v8  ;;  %v3188_v57 = vpack.c.bf16 %v3171_v28, %v3170_v23  ;;  %v3735_v8 = vld [vmem:[#allocation3 + $0x171] sm:$0xff] }
 0x40f   : > { %7067 = vmatmul.msk.bf16.gmra.mxu1 %vm307_vm1, %v3408_v21  ;;  %v3598_v51 = vadd.f32 %v8560_v42, %v3562_v55  ;;  %v7205_v28 = vld [vmem:[%s9450_s4 + $0x4] sm:$0xf] }
 0x410   : > { %v3970_v56 = vpop.f32.mrf.mxu3 }
 0x411   : > { %v8612_v34 = vadd.f32 %v3970_v56, %v3830_v4  ;;  %3631 = vst.msk [vmem:[#allocation4 + $0x70] sm:$0xff] %vm375_vm3, %v3598_v51 }
 0x412   : > { %v3274_v38 = vpop.f32.mrf.mxu0 }
 0x413   : > { %v3341_v22 = vadd.f32 %v3274_v38, %v8431_v31 }
 0x414   : > { %v3496_v24 = vpop.f32.mrf.mxu1  ;;  %7051 = vmatmul.msk.bf16.gmra.mxu0 %vm307_vm1, %v3187_v27 }
 0x415   : > { %v3563_v48 = vadd.f32 %v3496_v24, %v3341_v22  ;;  %v3837_v61 = vpop.f32.mrf.mxu2 }
 0x417   : > { %v3599_v44 = vadd.f32 %v8560_v42, %v3563_v48 }
 0x418   : > { %v3972_v32 = vpop.f32.mrf.mxu3 }
 0x419   : > { %v8619_v4 = vadd.f32 %v3972_v32, %v3832_v58  ;;  %v3732_v58 = vld [vmem:[#allocation3 + $0x151] sm:$0xff]  ;;  %3632 = vst.msk [vmem:[#allocation4 + $0x78] sm:$0xff] %vm375_vm3, %v3599_v44 }
 0x41a   : > { %7085 = vmatmul.msk.bf16.gmra.mxu2 %vm375_vm3, %v3749_v10  ;;  %v3750_v21 = vpack.c.bf16 %v3733_v17, %v3732_v58  ;;  %v3277_v31 = vpop.f32.mrf.mxu0  ;;  %v3681_v32 = vld [vmem:[#allocation3 + $0x138] sm:$0xff] }
 0x41b   : > { %v3342_v56 = vadd.f32 %v3277_v31, %v8436_v7  ;;  %v3700_v41 = vpack.c.bf16 %v3682_v45, %v3681_v32  ;;  %v3684_v31 = vld [vmem:[#allocation3 + $0x158] sm:$0xff]  ;;  %v3394_v32 = vld [vmem:[#allocation2 + $0x1b6] sm:$0xff] }
 0x41c   : > { %v3499_v3 = vpop.f32.mrf.mxu1 }
 0x41d   : > { %7100 = vmatmul.msk.bf16.gmra.mxu3 %vm375_vm3, %v3699_v18  ;;  %v3564_v12 = vadd.f32 %v3499_v3, %v3342_v56  ;;  %v3840_v19 = vpop.f32.mrf.mxu2  ;;  %v3393_v18 = vld [vmem:[#allocation2 + $0x1a6] sm:$0xff]  ;;  %v3172_v3 = vld [vmem:[#allocation2 + $0x1b5] sm:$0xff]  ;;  %v3173_v56 = vld [vmem:[#allocation2 + $0x1bd] sm:$0xff] }
 0x41e   : > { %v3410_v24 = vpack.c.bf16 %v3393_v18, %v3392_v33  ;;  %v3189_v23 = vpack.c.bf16 %v3173_v56, %v3172_v3  ;;  %v3686_v56 = vld [vmem:[#allocation3 + $0x170] sm:$0xff] }
 0x41f   : > { %7068 = vmatmul.msk.bf16.gmra.mxu1 %vm307_vm1, %v3409_v60  ;;  %v3600_v55 = vadd.f32 %v8560_v42, %v3564_v12 }
 0x420   : > { %v3975_v49 = vpop.f32.mrf.mxu3 }
 0x421   : > { %v8626_v6 = vadd.f32 %v3975_v49, %v3835_v26  ;;  %3633 = vst.msk [vmem:[#allocation4 + $0x80] sm:$0xff] %vm375_vm3, %v3600_v55 }
 0x422   : > { %v3279_v0 = vpop.f32.mrf.mxu0 }
 0x423   : > { %v3343_v7 = vadd.f32 %v3279_v0, %v8441_v47 }
 0x424   : > { %v3501_v51 = vpop.f32.mrf.mxu1  ;;  %7052 = vmatmul.msk.bf16.gmra.mxu0 %vm307_vm1, %v3188_v57  ;;  %v5466_v57 = vsel %vm3802_vm5, %v7205_v28, 0 }
 0x425   : > { %v3565_v27 = vadd.f32 %v3501_v51, %v3343_v7  ;;  %v3842_v38 = vpop.f32.mrf.mxu2  ;;  %5475 = vmatpush.bf16.msrb.mxu2 %v5466_v57  ;;  %v4479_v7 = vld [vmem:[#allocation3 + $0x4] sm:$0xff] }
 0x426   : > { %v4258_v57 = vld [vmem:[#allocation3 + $0xb] sm:$0xff] }
 0x427   : > { %v3601_v22 = vadd.f32 %v8560_v42, %v3565_v27  ;;  %v4480_v27 = vld [vmem:[#allocation3 + $0xc] sm:$0xff] }
 0x428   : > { %v3977_v10 = vpop.f32.mrf.mxu3 }
 0x429   : > { %v8633_v26 = vadd.f32 %v3977_v10, %v3837_v61  ;;  %v3734_v61 = vld [vmem:[#allocation3 + $0x169] sm:$0xff]  ;;  %3634 = vst.msk [vmem:[#allocation4 + $0x88] sm:$0xff] %vm375_vm3, %v3601_v22  ;;  %v7222_v22 = vld [vmem:[%s9450_s4 + $0x8] sm:$0xf] }
 0x42a   : > { %7086 = vmatmul.msk.bf16.gmra.mxu2 %vm375_vm3, %v3750_v21  ;;  %v3751_v60 = vpack.c.bf16 %v3735_v8, %v3734_v61  ;;  %v3282_v47 = vpop.f32.mrf.mxu0  ;;  %v3683_v10 = vld [vmem:[#allocation3 + $0x150] sm:$0xff] }
 0x42b   : > { %v3344_v49 = vadd.f32 %v3282_v47, %v8462_v16  ;;  %v3701_v45 = vpack.c.bf16 %v3684_v31, %v3683_v10 }
 0x42c   : > { %v3504_v17 = vpop.f32.mrf.mxu1 }
 0x42d   : > { %7101 = vmatmul.msk.bf16.gmra.mxu3 %vm375_vm3, %v3700_v41  ;;  %v3566_v44 = vadd.f32 %v3504_v17, %v3344_v49  ;;  %v3845_v58 = vpop.f32.mrf.mxu2  ;;  %v3395_v41 = vld [vmem:[#allocation2 + $0x1be] sm:$0xff]  ;;  %v5689_v17 = vsel %vm3802_vm5, %v7222_v22, 0 }
 0x42e   : > { %v3411_v18 = vpack.c.bf16 %v3395_v41, %v3394_v32  ;;  %v5193_v49 = vld [vmem:[%s9450_s4] sm:$0xf]  ;;  %5698 = vmatpush.bf16.msrb.mxu3 %v5689_v17 }
 0x42f   : > { %7069 = vmatmul.msk.bf16.gmra.mxu1 %vm307_vm1, %v3410_v24  ;;  %v3602_v12 = vadd.f32 %v8560_v42, %v3566_v44 }
 0x430   : > { %v3980_v35 = vpop.f32.mrf.mxu3 }
 0x431   : > { %v8640_v48 = vadd.f32 %v3980_v35, %v3840_v19  ;;  %3635 = vst.msk [vmem:[#allocation4 + $0x90] sm:$0xff] %vm375_vm3, %v3602_v12  ;;  %v4511_v35 = vpack.c.bf16 %v4480_v27, %v4479_v7  ;;  %v4257_v27 = vld [vmem:[#allocation3 + $0x3] sm:$0xff] }
 0x432   : > { %v3284_v16 = vpop.f32.mrf.mxu0 }
 0x433   : > { %v3345_v0 = vadd.f32 %v3284_v16, %v8467_v2  ;;  %v7172_v2 = vld [vmem:[%s9449_s3 + $0x18] sm:$0xf] }
 0x434   : > { %v3506_v55 = vpop.f32.mrf.mxu1  ;;  %7053 = vmatmul.msk.bf16.gmra.mxu0 %vm307_vm1, %v3189_v23  ;;  %v5022_v47 = vsel %vm3802_vm5, %v7172_v2, 0  ;;  %v4036_v23 = vld [vmem:[#allocation3 + $0xa] sm:$0xff] }
 0x435   : > { %v3567_v51 = vadd.f32 %v3506_v55, %v3345_v0  ;;  %v3847_v33 = vpop.f32.mrf.mxu2  ;;  %5031 = vmatpush.bf16.msrb.mxu0 %v5022_v47  ;;  %v4035_v55 = vld [vmem:[#allocation3 + $0x2] sm:$0xff] }
 0x436   : > { %v4067_v41 = vpack.c.bf16 %v4036_v23, %v4035_v55  ;;  %v4483_v55 = vld [vmem:[#allocation3 + $0x34] sm:$0xff] }
 0x437   : > { %v3603_v24 = vadd.f32 %v8560_v42, %v3567_v51 }
 0x438   : > { %v3982_v21 = vpop.f32.mrf.mxu3 }
 0x439   : > { %v8647_v19 = vadd.f32 %v3982_v21, %v3842_v38  ;;  %3636 = vst.msk [vmem:[#allocation4 + $0x98] sm:$0xff] %vm375_vm3, %v3603_v24 }
 0x43a   : > { %7087 = vmatmul.msk.bf16.gmra.mxu2 %vm375_vm3, %v3751_v60  ;;  %v3287_v61 = vpop.f32.mrf.mxu0 }
 0x43b   : > { %v3346_v44 = vadd.f32 %v3287_v61, %v8472_v62 }
 0x43c   : > { %v3509_v60 = vpop.f32.mrf.mxu1 }
 0x43d   : > { %7102 = vmatmul.msk.bf16.gmra.mxu3 %vm375_vm3, %v3701_v45  ;;  %v3568_v21 = vadd.f32 %v3509_v60, %v3346_v44  ;;  %v3850_v31 = vpop.f32.mrf.mxu2  ;;  %v3685_v45 = vld [vmem:[#allocation3 + $0x168] sm:$0xff] }
 0x43e   : > { %v3702_v28 = vpack.c.bf16 %v3686_v56, %v3685_v45  ;;  %v4702_v44 = vld [vmem:[#allocation3 + $0xd] sm:$0xff]  ;;  %v4037_v45 = vld [vmem:[#allocation3 + $0x1a] sm:$0xff] }
 0x43f   : > { %7070 = vmatmul.msk.bf16.gmra.mxu1 %vm307_vm1, %v3411_v18  ;;  %v3604_v12 = vadd.f32 %v8560_v42, %v3568_v21  ;;  %v4482_v18 = vld [vmem:[#allocation3 + $0x24] sm:$0xff] }
 0x440   : > { %v3985_v38 = vpop.f32.mrf.mxu3 }
 0x441   : > { %v8658_v8 = vadd.f32 %v3985_v38, %v3845_v58  ;;  %v5243_v58 = vsel %vm3802_vm5, %v5193_v49, 0  ;;  %3637 = vst.msk [vmem:[#allocation4 + $0xa0] sm:$0xff] %vm375_vm3, %v3604_v12  ;;  %v4701_v49 = vld [vmem:[#allocation3 + $0x5] sm:$0xff] }
 0x442   : > { %5252 = vmatpush.bf16.msrb.mxu1 %v5243_v58  ;;  %v3289_v16 = vpop.f32.mrf.mxu0 }
 0x443   : > { %v3347_v32 = vadd.f32 %v3289_v16, %v8477_v63 }
 0x444   : > { %v3511_v62 = vpop.f32.mrf.mxu1  ;;  %7105 = vmatmul.msk.bf16.vlgmr.msra.gmra.mxu0 %vm375_vm3, %v4067_v41 }
 0x445   : > { %v3569_v0 = vadd.f32 %v3511_v62, %v3347_v32  ;;  %v3852_v51 = vpop.f32.mrf.mxu2  ;;  %v4484_v32 = vld [vmem:[#allocation3 + $0x3c] sm:$0xff] }
 0x447   : > { %v3605_v38 = vadd.f32 %v8560_v42, %v3569_v0 }
 0x448   : > { %v3987_v3 = vpop.f32.mrf.mxu3 }
 0x449   : > { %v8677_v10 = vadd.f32 %v3987_v3, %v3847_v33  ;;  %v4481_v33 = vld [vmem:[#allocation3 + $0x1c] sm:$0xff]  ;;  %3638 = vst.msk [vmem:[#allocation4 + $0xa8] sm:$0xff] %vm375_vm3, %v3605_v38  ;;  %v4733_v3 = vpack.c.bf16 %v4702_v44, %v4701_v49 }
 0x44a   : > { %7139 = vmatmul.msk.bf16.vlgmr.msra.gmra.mxu2 %vm375_vm3, %v4511_v35  ;;  %v4289_v35 = vpack.c.bf16 %v4258_v57, %v4257_v27  ;;  %v4512_v2 = vpack.c.bf16 %v4482_v18, %v4481_v33  ;;  %v3292_v63 = vpop.f32.mrf.mxu0  ;;  %v4259_v57 = vld [vmem:[#allocation3 + $0x1b] sm:$0xff]  ;;  %v4513_v18 = vpack.c.bf16 %v4484_v32, %v4483_v55 }
 0x44b   : > { %v3348_v61 = vadd.f32 %v3292_v63, %v8482_v9  ;;  %v4703_v63 = vld [vmem:[#allocation3 + $0x1d] sm:$0xff] }
 0x44c   : > { %v3514_v22 = vpop.f32.mrf.mxu1 }
 0x44d   : > { %7103 = vmatmul.msk.bf16.gmra.mxu3 %vm375_vm3, %v3702_v28  ;;  %v3570_v60 = vadd.f32 %v3514_v22, %v3348_v61  ;;  %v3855_v47 = vpop.f32.mrf.mxu2  ;;  %v4260_v28 = vld [vmem:[#allocation3 + $0x23] sm:$0xff] }
 0x44e   : > { %v4290_v33 = vpack.c.bf16 %v4260_v28, %v4259_v57  ;;  %v4704_v22 = vld [vmem:[#allocation3 + $0x25] sm:$0xff]  ;;  %v4261_v28 = vld [vmem:[#allocation3 + $0x33] sm:$0xff] }
 0x44f   : > { %7122 = vmatmul.msk.bf16.vlgmr.msra.gmra.mxu1 %vm375_vm3, %v4289_v35  ;;  %v3606_v58 = vadd.f32 %v8560_v42, %v3570_v60 }
 0x450   : > { %v3990_v7 = vpop.f32.mrf.mxu3 }
 0x451   : > { %v8684_v24 = vadd.f32 %v3990_v7, %v3850_v31  ;;  %v4038_v31 = vld [vmem:[#allocation3 + $0x22] sm:$0xff]  ;;  %3639 = vst.msk [vmem:[#allocation4 + $0xb0] sm:$0xff] %vm375_vm3, %v3606_v58  ;;  %v4039_v58 = vld [vmem:[#allocation3 + $0x32] sm:$0xff] }
 0x452   : > { %v3294_v56 = vpop.f32.mrf.mxu0  ;;  %v4068_v9 = vpack.c.bf16 %v4038_v31, %v4037_v45  ;;  %v4485_v45 = vld [vmem:[#allocation3 + $0x4c] sm:$0xff] }
 0x453   : > { %v3349_v23 = vadd.f32 %v3294_v56, %v8487_v46 }
 0x454   : > { %v3516_v12 = vpop.f32.mrf.mxu1  ;;  %7106 = vmatmul.msk.bf16.gmra.mxu0 %vm375_vm3, %v4068_v9 }
 0x455   : > { %v3571_v16 = vadd.f32 %v3516_v12, %v3349_v23  ;;  %v3857_v62 = vpop.f32.mrf.mxu2  ;;  %v4486_v23 = vld [vmem:[#allocation3 + $0x54] sm:$0xff] }
 0x456   : > { %v4514_v32 = vpack.c.bf16 %v4486_v23, %v4485_v45 }
 0x457   : > { %v3607_v0 = vadd.f32 %v8560_v42, %v3571_v16 }
 0x458   : > { %v3992_v17 = vpop.f32.mrf.mxu3 }
 0x459   : > { %v8691_v21 = vadd.f32 %v3992_v17, %v3852_v51  ;;  %3640 = vst.msk [vmem:[#allocation4 + $0xb8] sm:$0xff] %vm375_vm3, %v3607_v0  ;;  %v4734_v17 = vpack.c.bf16 %v4704_v22, %v4703_v63 }
 0x45a   : > { %7140 = vmatmul.msk.bf16.gmra.mxu2 %vm375_vm3, %v4512_v2  ;;  %v3297_v46 = vpop.f32.mrf.mxu0 }
 0x45b   : > { %v3350_v27 = vadd.f32 %v3297_v46, %v8492_v53  ;;  %v4705_v46 = vld [vmem:[#allocation3 + $0x35] sm:$0xff] }
 0x45c   : > { %v3519_v7 = vpop.f32.mrf.mxu1 }
 0x45d   : > { %7156 = vmatmul.msk.bf16.vlgmr.msra.gmra.mxu3 %vm375_vm3, %v4733_v3  ;;  %v3572_v38 = vadd.f32 %v3519_v7, %v3350_v27  ;;  %v3860_v35 = vpop.f32.mrf.mxu2  ;;  %v4262_v3 = vld [vmem:[#allocation3 + $0x3b] sm:$0xff] }
 0x45e   : > { %v4291_v55 = vpack.c.bf16 %v4262_v3, %v4261_v28  ;;  %v4706_v7 = vld [vmem:[#allocation3 + $0x3d] sm:$0xff]  ;;  %v4263_v3 = vld [vmem:[#allocation3 + $0x4b] sm:$0xff] }
 0x45f   : > { %7123 = vmatmul.msk.bf16.gmra.mxu1 %vm375_vm3, %v4290_v33  ;;  %v3608_v61 = vadd.f32 %v8560_v42, %v3572_v38 }
 0x460   : > { %v3995_v41 = vpop.f32.mrf.mxu3 }
 0x461   : > { %v8698_v51 = vadd.f32 %v3995_v41, %v3855_v47  ;;  %v4040_v47 = vld [vmem:[#allocation3 + $0x3a] sm:$0xff]  ;;  %3641 = vst.msk [vmem:[#allocation4 + $0xc0] sm:$0xff] %vm375_vm3, %v3608_v61  ;;  %v4041_v61 = vld [vmem:[#allocation3 + $0x4a] sm:$0xff] }
 0x462   : > { %v3299_v49 = vpop.f32.mrf.mxu0  ;;  %v4069_v53 = vpack.c.bf16 %v4040_v47, %v4039_v58  ;;  %v4487_v58 = vld [vmem:[#allocation3 + $0x64] sm:$0xff] }
 0x463   : > { %v3351_v31 = vadd.f32 %v3299_v49, %v8497_v37 }
 0x464   : > { %v3521_v44 = vpop.f32.mrf.mxu1  ;;  %7107 = vmatmul.msk.bf16.gmra.mxu0 %vm375_vm3, %v4069_v53 }
 0x465   : > { %v3573_v56 = vadd.f32 %v3521_v44, %v3351_v31  ;;  %v3862_v12 = vpop.f32.mrf.mxu2  ;;  %v4488_v31 = vld [vmem:[#allocation3 + $0x6c] sm:$0xff] }
 0x466   : > { %v4515_v23 = vpack.c.bf16 %v4488_v31, %v4487_v58 }
 0x467   : > { %v3609_v16 = vadd.f32 %v8560_v42, %v3573_v56 }
 0x468   : > { %v3997_v2 = vpop.f32.mrf.mxu3 }
 0x469   : > { %v8705_v60 = vadd.f32 %v3997_v2, %v3857_v62  ;;  %3642 = vst.msk [vmem:[#allocation4 + $0xc8] sm:$0xff] %vm375_vm3, %v3609_v16  ;;  %v4735_v2 = vpack.c.bf16 %v4706_v7, %v4705_v46 }
 0x46a   : > { %7141 = vmatmul.msk.bf16.gmra.mxu2 %vm375_vm3, %v4513_v18  ;;  %v3302_v37 = vpop.f32.mrf.mxu0 }
 0x46b   : > { %v3352_v57 = vadd.f32 %v3302_v37, %v8502_v39  ;;  %v4707_v37 = vld [vmem:[#allocation3 + $0x4d] sm:$0xff] }
 0x46c   : > { %v3524_v41 = vpop.f32.mrf.mxu1 }
 0x46d   : > { %7157 = vmatmul.msk.bf16.gmra.mxu3 %vm375_vm3, %v4734_v17  ;;  %v3574_v0 = vadd.f32 %v3524_v41, %v3352_v57  ;;  %v3865_v33 = vpop.f32.mrf.mxu2  ;;  %v4264_v17 = vld [vmem:[#allocation3 + $0x53] sm:$0xff] }
 0x46e   : > { %v4292_v45 = vpack.c.bf16 %v4264_v17, %v4263_v3  ;;  %v4708_v41 = vld [vmem:[#allocation3 + $0x55] sm:$0xff]  ;;  %v4265_v17 = vld [vmem:[#allocation3 + $0x63] sm:$0xff] }
 0x46f   : > { %7124 = vmatmul.msk.bf16.gmra.mxu1 %vm375_vm3, %v4291_v55  ;;  %v3610_v27 = vadd.f32 %v8560_v42, %v3574_v0 }
 0x470   : > { %v4000_v9 = vpop.f32.mrf.mxu3 }
 0x471   : > { %v8712_v62 = vadd.f32 %v4000_v9, %v3860_v35  ;;  %v4042_v35 = vld [vmem:[#allocation3 + $0x52] sm:$0xff]  ;;  %3643 = vst.msk [vmem:[#allocation4 + $0xd0] sm:$0xff] %vm375_vm3, %v3610_v27  ;;  %v4043_v27 = vld [vmem:[#allocation3 + $0x62] sm:$0xff] }
 0x472   : > { %v3304_v63 = vpop.f32.mrf.mxu0  ;;  %v4070_v39 = vpack.c.bf16 %v4042_v35, %v4041_v61  ;;  %v4489_v61 = vld [vmem:[#allocation3 + $0x7c] sm:$0xff] }
 0x473   : > { %v3353_v47 = vadd.f32 %v3304_v63, %v8507_v14 }
 0x474   : > { %v3526_v22 = vpop.f32.mrf.mxu1  ;;  %7108 = vmatmul.msk.bf16.gmra.mxu0 %vm375_vm3, %v4070_v39 }
 0x475   : > { %v3575_v49 = vadd.f32 %v3526_v22, %v3353_v47  ;;  %v3867_v44 = vpop.f32.mrf.mxu2  ;;  %v4490_v47 = vld [vmem:[#allocation3 + $0x84] sm:$0xff] }
 0x476   : > { %v4516_v31 = vpack.c.bf16 %v4490_v47, %v4489_v61 }
 0x477   : > { %v3611_v56 = vadd.f32 %v8560_v42, %v3575_v49 }
 0x478   : > { %v4002_v18 = vpop.f32.mrf.mxu3 }
 0x479   : > { %v8719_v38 = vadd.f32 %v4002_v18, %v3862_v12  ;;  %3644 = vst.msk [vmem:[#allocation4 + $0xd8] sm:$0xff] %vm375_vm3, %v3611_v56  ;;  %v4736_v18 = vpack.c.bf16 %v4708_v41, %v4707_v37 }
 0x47a   : > { %7142 = vmatmul.msk.bf16.gmra.mxu2 %vm375_vm3, %v4514_v32  ;;  %v3307_v14 = vpop.f32.mrf.mxu0 }
 0x47b   : > { %v3354_v28 = vadd.f32 %v3307_v14, %v8512_v40  ;;  %v4709_v14 = vld [vmem:[#allocation3 + $0x65] sm:$0xff] }
 0x47c   : > { %v3529_v9 = vpop.f32.mrf.mxu1 }
 0x47d   : > { %7158 = vmatmul.msk.bf16.gmra.mxu3 %vm375_vm3, %v4735_v2  ;;  %v3576_v16 = vadd.f32 %v3529_v9, %v3354_v28  ;;  %v3870_v55 = vpop.f32.mrf.mxu2  ;;  %v4266_v2 = vld [vmem:[#allocation3 + $0x6b] sm:$0xff] }
 0x47e   : > { %v4293_v58 = vpack.c.bf16 %v4266_v2, %v4265_v17  ;;  %v4710_v9 = vld [vmem:[#allocation3 + $0x6d] sm:$0xff]  ;;  %v4267_v2 = vld [vmem:[#allocation3 + $0x7b] sm:$0xff] }
 0x47f   : > { %7125 = vmatmul.msk.bf16.gmra.mxu1 %vm375_vm3, %v4292_v45  ;;  %v3612_v57 = vadd.f32 %v8560_v42, %v3576_v16 }
 0x480   : > { %v4005_v53 = vpop.f32.mrf.mxu3 }
 0x481   : > { %v8726_v12 = vadd.f32 %v4005_v53, %v3865_v33  ;;  %v4044_v33 = vld [vmem:[#allocation3 + $0x6a] sm:$0xff]  ;;  %3645 = vst.msk [vmem:[#allocation4 + $0xe0] sm:$0xff] %vm375_vm3, %v3612_v57  ;;  %v4045_v57 = vld [vmem:[#allocation3 + $0x7a] sm:$0xff] }
 0x482   : > { %v3309_v46 = vpop.f32.mrf.mxu0  ;;  %v4071_v40 = vpack.c.bf16 %v4044_v33, %v4043_v27  ;;  %v4491_v27 = vld [vmem:[#allocation3 + $0x94] sm:$0xff] }
 0x483   : > { %v3355_v35 = vadd.f32 %v3309_v46, %v8517_v30 }
 0x484   : > { %v3531_v7 = vpop.f32.mrf.mxu1  ;;  %7109 = vmatmul.msk.bf16.gmra.mxu0 %vm375_vm3, %v4071_v40 }
 0x485   : > { %v3577_v63 = vadd.f32 %v3531_v7, %v3355_v35  ;;  %v3872_v22 = vpop.f32.mrf.mxu2  ;;  %v4492_v35 = vld [vmem:[#allocation3 + $0x9c] sm:$0xff] }
 0x486   : > { %v4517_v47 = vpack.c.bf16 %v4492_v35, %v4491_v27 }
 0x487   : > { %v3613_v49 = vadd.f32 %v8560_v42, %v3577_v63 }
 0x488   : > { %v4007_v32 = vpop.f32.mrf.mxu3 }
 0x489   : > { %v8733_v0 = vadd.f32 %v4007_v32, %v3867_v44  ;;  %3646 = vst.msk [vmem:[#allocation4 + $0xe8] sm:$0xff] %vm375_vm3, %v3613_v49  ;;  %v4737_v32 = vpack.c.bf16 %v4710_v9, %v4709_v14 }
 0x48a   : > { %7143 = vmatmul.msk.bf16.gmra.mxu2 %vm375_vm3, %v4515_v23  ;;  %v3312_v30 = vpop.f32.mrf.mxu0 }
 0x48b   : > { %v3356_v3 = vadd.f32 %v3312_v30, %v8522_v11  ;;  %v4711_v30 = vld [vmem:[#allocation3 + $0x7d] sm:$0xff] }
 0x48c   : > { %v3534_v53 = vpop.f32.mrf.mxu1 }
 0x48d   : > { %7159 = vmatmul.msk.bf16.gmra.mxu3 %vm375_vm3, %v4736_v18  ;;  %v3578_v56 = vadd.f32 %v3534_v53, %v3356_v3  ;;  %v3875_v45 = vpop.f32.mrf.mxu2  ;;  %v4268_v18 = vld [vmem:[#allocation3 + $0x83] sm:$0xff] }
 0x48e   : > { %v4294_v61 = vpack.c.bf16 %v4268_v18, %v4267_v2  ;;  %v4712_v53 = vld [vmem:[#allocation3 + $0x85] sm:$0xff]  ;;  %v4269_v18 = vld [vmem:[#allocation3 + $0x93] sm:$0xff] }
 0x48f   : > { %7126 = vmatmul.msk.bf16.gmra.mxu1 %vm375_vm3, %v4293_v58  ;;  %v3614_v28 = vadd.f32 %v8560_v42, %v3578_v56 }
 0x490   : > { %v4010_v39 = vpop.f32.mrf.mxu3 }
 0x491   : > { %v8740_v44 = vadd.f32 %v4010_v39, %v3870_v55  ;;  %v4046_v55 = vld [vmem:[#allocation3 + $0x82] sm:$0xff]  ;;  %3647 = vst.msk [vmem:[#allocation4 + $0xf0] sm:$0xff] %vm375_vm3, %v3614_v28  ;;  %v4047_v28 = vld [vmem:[#allocation3 + $0x92] sm:$0xff] }
 0x492   : > { %v3314_v37 = vpop.f32.mrf.mxu0  ;;  %v4072_v11 = vpack.c.bf16 %v4046_v55, %v4045_v57  ;;  %v4493_v57 = vld [vmem:[#allocation3 + $0xac] sm:$0xff] }
 0x493   : > { %v3357_v33 = vadd.f32 %v3314_v37, %v8527_v50 }
 0x494   : > { %v3536_v41 = vpop.f32.mrf.mxu1  ;;  %7110 = vmatmul.msk.bf16.gmra.mxu0 %vm375_vm3, %v4072_v11 }
 0x495   : > { %v3579_v46 = vadd.f32 %v3536_v41, %v3357_v33  ;;  %v3877_v7 = vpop.f32.mrf.mxu2  ;;  %v4494_v33 = vld [vmem:[#allocation3 + $0xb4] sm:$0xff] }
 0x496   : > { %v4518_v35 = vpack.c.bf16 %v4494_v33, %v4493_v57 }
 0x497   : > { %v3615_v63 = vadd.f32 %v8560_v42, %v3579_v46 }
 0x498   : > { %v4012_v23 = vpop.f32.mrf.mxu3 }
 0x499   : > { %v8747_v16 = vadd.f32 %v4012_v23, %v3872_v22  ;;  %3648 = vst.msk [vmem:[#allocation4 + $0xf8] sm:$0xff] %vm375_vm3, %v3615_v63  ;;  %v4738_v23 = vpack.c.bf16 %v4712_v53, %v4711_v30 }
 0x49a   : > { %7144 = vmatmul.msk.bf16.gmra.mxu2 %vm375_vm3, %v4516_v31  ;;  %v3317_v50 = vpop.f32.mrf.mxu0 }
 0x49b   : > { %v3358_v17 = vadd.f32 %v3317_v50, %v8532_v43  ;;  %v4713_v50 = vld [vmem:[#allocation3 + $0x95] sm:$0xff] }
 0x49c   : > { %v3539_v39 = vpop.f32.mrf.mxu1 }
 0x49d   : > { %7160 = vmatmul.msk.bf16.gmra.mxu3 %vm375_vm3, %v4737_v32  ;;  %v3580_v49 = vadd.f32 %v3539_v39, %v3358_v17  ;;  %v3880_v58 = vpop.f32.mrf.mxu2  ;;  %v4270_v32 = vld [vmem:[#allocation3 + $0x9b] sm:$0xff] }
 0x49e   : > { %v4295_v27 = vpack.c.bf16 %v4270_v32, %v4269_v18  ;;  %v4714_v39 = vld [vmem:[#allocation3 + $0x9d] sm:$0xff]  ;;  %v7324_v32 = vld [vmem:[%s9452_s6] ss:$0 sm:$0xff] }
 0x49f   : > { %7127 = vmatmul.msk.bf16.gmra.mxu1 %vm375_vm3, %v4294_v61  ;;  %v3616_v3 = vadd.f32 %v8560_v42, %v3580_v49 }
 0x4a0   : > { %v4015_v40 = vpop.f32.mrf.mxu3 }
 0x4a1   : > { %v8754_v22 = vadd.f32 %v4015_v40, %v3875_v45  ;;  %v4048_v45 = vld [vmem:[#allocation3 + $0x9a] sm:$0xff]  ;;  %3649 = vst.msk [vmem:[#allocation4 + $0x100] sm:$0xff] %vm375_vm3, %v3616_v3  ;;  %v4049_v3 = vld [vmem:[#allocation3 + $0xaa] sm:$0xff] }
 0x4a2   : > { %v3319_v14 = vpop.f32.mrf.mxu0  ;;  %v4073_v43 = vpack.c.bf16 %v4048_v45, %v4047_v28  ;;  %v4496_v28 = vld [vmem:[#allocation3 + $0xcc] sm:$0xff] }
 0x4a3   : > { %v3359_v55 = vadd.f32 %v3319_v14, %v8537_v25 }
 0x4a4   : > { %v3541_v9 = vpop.f32.mrf.mxu1  ;;  %7111 = vmatmul.msk.bf16.gmra.mxu0 %vm375_vm3, %v4073_v43  ;;  %v4271_v43 = vld [vmem:[#allocation3 + $0xab] sm:$0xff] }
 0x4a5   : > { %v3581_v37 = vadd.f32 %v3541_v9, %v3359_v55  ;;  %v3882_v41 = vpop.f32.mrf.mxu2 }
 0x4a7   : > { %v3617_v46 = vadd.f32 %v8560_v42, %v3581_v37 }
 0x4a8   : > { %v4017_v31 = vpop.f32.mrf.mxu3 }
 0x4a9   : > { %v8761_v56 = vadd.f32 %v4017_v31, %v3877_v7  ;;  %3650 = vst.msk [vmem:[#allocation4 + $0x108] sm:$0xff] %vm375_vm3, %v3617_v46  ;;  %v4739_v31 = vpack.c.bf16 %v4714_v39, %v4713_v50 }
 0x4aa   : > { %7145 = vmatmul.msk.bf16.gmra.mxu2 %vm375_vm3, %v4517_v47  ;;  %v3322_v25 = vpop.f32.mrf.mxu0 }
 0x4ab   : > { %v3360_v2 = vadd.f32 %v3322_v25, %v8542_v5  ;;  %v4715_v25 = vld [vmem:[#allocation3 + $0xad] sm:$0xff] }
 0x4ac   : > { %v3544_v40 = vpop.f32.mrf.mxu1 }
 0x4ad   : > { %7161 = vmatmul.msk.bf16.gmra.mxu3 %vm375_vm3, %v4738_v23  ;;  %v3582_v63 = vadd.f32 %v3544_v40, %v3360_v2  ;;  %v3885_v61 = vpop.f32.mrf.mxu2  ;;  %v4272_v23 = vld [vmem:[#allocation3 + $0xb3] sm:$0xff] }
 0x4ae   : > { %v4716_v40 = vld [vmem:[#allocation3 + $0xb5] sm:$0xff] }
 0x4af   : > { %7128 = vmatmul.msk.bf16.gmra.mxu1 %vm375_vm3, %v4295_v27  ;;  %v3618_v17 = vadd.f32 %v8560_v42, %v3582_v63  ;;  %v4495_v42 = vld [vmem:[#allocation3 + $0xc4] sm:$0xff] }
 0x4b0   : > { %v4020_v11 = vpop.f32.mrf.mxu3  ;;  %v4519_v57 = vpack.c.bf16 %v4496_v28, %v4495_v42 }
 0x4b1   : > { %v8768_v7 = vadd.f32 %v4020_v11, %v3880_v58  ;;  %v4050_v58 = vld [vmem:[#allocation3 + $0xb2] sm:$0xff]  ;;  %3651 = vst.msk [vmem:[#allocation4 + $0x110] sm:$0xff] %vm375_vm3, %v3618_v17  ;;  %v4051_v17 = vld [vmem:[#allocation3 + $0xc2] sm:$0xff] }
 0x4b2   : > { %v3324_v30 = vpop.f32.mrf.mxu0  ;;  %v4074_v5 = vpack.c.bf16 %v4050_v58, %v4049_v3  ;;  %v4497_v3 = vld [vmem:[#allocation3 + $0xdc] sm:$0xff] }
 0x4b3   : > { %v3361_v45 = vadd.f32 %v3324_v30, %v8547_v1  ;;  %v4296_v1 = vpack.c.bf16 %v4272_v23, %v4271_v43  ;;  %v4273_v23 = vld [vmem:[#allocation3 + $0xc3] sm:$0xff] }
 0x4b4   : > { %v3546_v53 = vpop.f32.mrf.mxu1  ;;  %7112 = vmatmul.msk.bf16.gmra.mxu0 %vm375_vm3, %v4074_v5 }
 0x4b5   : > { %v3583_v14 = vadd.f32 %v3546_v53, %v3361_v45  ;;  %v3887_v9 = vpop.f32.mrf.mxu2  ;;  %v4498_v45 = vld [vmem:[#allocation3 + $0xe4] sm:$0xff] }
 0x4b6   : > { %v4520_v28 = vpack.c.bf16 %v4498_v45, %v4497_v3 }
 0x4b7   : > { %v3619_v37 = vadd.f32 %v7324_v32, %v3583_v14 }
 0x4b8   : > { %v4022_v47 = vpop.f32.mrf.mxu3 }
 0x4b9   : > { %v8775_v49 = vadd.f32 %v4022_v47, %v3882_v41  ;;  %3652 = vst.msk [vmem:[#allocation4 + $0x118] sm:$0xff] %vm375_vm3, %v3619_v37  ;;  %v4740_v47 = vpack.c.bf16 %v4716_v40, %v4715_v25  ;;  %v4053_v40 = vld [vmem:[#allocation3 + $0xda] sm:$0xff] }
 0x4ba   : > { %7146 = vmatmul.msk.bf16.gmra.mxu2 %vm375_vm3, %v4518_v35  ;;  %v3327_v33 = vpop.f32.mrf.mxu0 }
 0x4bb   : > { %v3362_v18 = vadd.f32 %v3327_v33, %v8552_v59  ;;  %v4717_v33 = vld [vmem:[#allocation3 + $0xc5] sm:$0xff] }
 0x4bc   : > { %v3549_v11 = vpop.f32.mrf.mxu1 }
 0x4bd   : > { %7162 = vmatmul.msk.bf16.gmra.mxu3 %vm375_vm3, %v4739_v31  ;;  %v3584_v46 = vadd.f32 %v3549_v11, %v3362_v18  ;;  %v3890_v27 = vpop.f32.mrf.mxu2  ;;  %v4274_v31 = vld [vmem:[#allocation3 + $0xcb] sm:$0xff] }
 0x4be   : > { %v4297_v42 = vpack.c.bf16 %v4274_v31, %v4273_v23  ;;  %v4718_v11 = vld [vmem:[#allocation3 + $0xcd] sm:$0xff] }
 0x4bf   : > { %7129 = vmatmul.msk.bf16.gmra.mxu1 %vm375_vm3, %v4296_v1  ;;  %v3620_v2 = vadd.f32 %v7324_v32, %v3584_v46  ;;  %v4054_v46 = vld [vmem:[#allocation3 + $0xe2] sm:$0xff] }
 0x4c0   : > { %v4025_v55 = vpop.f32.mrf.mxu3 }
 0x4c1   : > { %v8784_v41 = vadd.f32 %v4025_v55, %v3885_v61  ;;  %v4052_v61 = vld [vmem:[#allocation3 + $0xca] sm:$0xff]  ;;  %3653 = vst.msk [vmem:[#allocation4 + $0x120] sm:$0xff] %vm375_vm3, %v3620_v2 }
 0x4c2   : > { %v3329_v50 = vpop.f32.mrf.mxu0  ;;  %v4075_v59 = vpack.c.bf16 %v4052_v61, %v4051_v17  ;;  %v4076_v61 = vpack.c.bf16 %v4054_v46, %v4053_v40  ;;  %v4500_v17 = vld [vmem:[#allocation3 + $0xfc] sm:$0xff]  ;;  %v4502_v40 = vld [vmem:[#allocation3 + $0x114] sm:$0xff] }
 0x4c3   : > { %v3363_v58 = vadd.f32 %v3329_v50, %v8563_v15 }
 0x4c4   : > { %v3551_v39 = vpop.f32.mrf.mxu1  ;;  %7113 = vmatmul.msk.bf16.gmra.mxu0 %vm375_vm3, %v4075_v59  ;;  %v4275_v59 = vld [vmem:[#allocation3 + $0xdb] sm:$0xff] }
 0x4c5   : > { %v3585_v30 = vadd.f32 %v3551_v39, %v3363_v58  ;;  %v3892_v53 = vpop.f32.mrf.mxu2  ;;  %v4499_v39 = vld [vmem:[#allocation3 + $0xf4] sm:$0xff] }
 0x4c6   : > { %v4521_v3 = vpack.c.bf16 %v4500_v17, %v4499_v39 }
 0x4c7   : > { %v3621_v14 = vadd.f32 %v7324_v32, %v3585_v30 }
 0x4c8   : > { %v4027_v35 = vpop.f32.mrf.mxu3 }
 0x4c9   : > { %v8790_v63 = vadd.f32 %v4027_v35, %v3887_v9  ;;  %3654 = vst.msk [vmem:[#allocation4 + $0x128] sm:$0xff] %vm375_vm3, %v3621_v14 }
 0x4ca   : > { %7147 = vmatmul.msk.bf16.gmra.mxu2 %vm375_vm3, %v4519_v57  ;;  %v4145_v15 = vpop.f32.mrf.mxu0 }
 0x4cb   : > { %v4225_v43 = vadd.f32 %v4145_v15, %v8570_v54  ;;  %v4720_v15 = vld [vmem:[#allocation3 + $0xe5] sm:$0xff] }
 0x4cc   : > { %v4367_v55 = vpop.f32.mrf.mxu1 }
 0x4cd   : > { %7163 = vmatmul.msk.bf16.gmra.mxu3 %vm375_vm3, %v4740_v47  ;;  %v4447_v37 = vadd.f32 %v4367_v55, %v4225_v43  ;;  %v4589_v1 = vpop.f32.mrf.mxu2  ;;  %v4276_v47 = vld [vmem:[#allocation3 + $0xe3] sm:$0xff] }
 0x4cf   : > { %7130 = vmatmul.msk.bf16.gmra.mxu1 %vm375_vm3, %v4297_v42  ;;  %v4669_v18 = vadd.f32 %v4589_v1, %v4447_v37  ;;  %v4056_v37 = vld [vmem:[#allocation3 + $0xfa] sm:$0xff] }
 0x4d0   : > { %v4030_v5 = vpop.f32.mrf.mxu3 }
 0x4d1   : > { %v8796_v9 = vadd.f32 %v4030_v5, %v3890_v27  ;;  %v4741_v27 = vpack.c.bf16 %v4718_v11, %v4717_v33  ;;  %v4055_v11 = vld [vmem:[#allocation3 + $0xf2] sm:$0xff] }
 0x4d2   : > { %v4147_v35 = vpop.f32.mrf.mxu0  ;;  %v4077_v46 = vpack.c.bf16 %v4056_v37, %v4055_v11  ;;  %v4504_v11 = vld [vmem:[#allocation3 + $0x12c] sm:$0xff] }
 0x4d3   : > { %v4226_v2 = vadd.f32 %v4147_v35, %v8577_v52 }
 0x4d4   : > { %v4369_v25 = vpop.f32.mrf.mxu1  ;;  %7114 = vmatmul.msk.bf16.gmra.mxu0 %vm375_vm3, %v4076_v61  ;;  %v4277_v61 = vld [vmem:[#allocation3 + $0xf3] sm:$0xff] }
 0x4d5   : > { %v4448_v54 = vadd.f32 %v4369_v25, %v4226_v2  ;;  %v4591_v50 = vpop.f32.mrf.mxu2  ;;  %v4501_v25 = vld [vmem:[#allocation3 + $0x10c] sm:$0xff] }
 0x4d6   : > { %v4522_v39 = vpack.c.bf16 %v4502_v40, %v4501_v25 }
 0x4d7   : > { %v4670_v30 = vadd.f32 %v4591_v50, %v4448_v54 }
 0x4d8   : > { %v4032_v57 = vpop.f32.mrf.mxu3 }
 0x4d9   : > { %v8802_v32 = vadd.f32 %v4032_v57, %v3892_v53  ;;  %v4298_v53 = vpack.c.bf16 %v4276_v47, %v4275_v59 }
 0x4da   : > { %7148 = vmatmul.msk.bf16.gmra.mxu2 %vm375_vm3, %v4520_v28  ;;  %v4150_v52 = vpop.f32.mrf.mxu0  ;;  %v4719_v28 = vld [vmem:[#allocation3 + $0xdd] sm:$0xff] }
 0x4db   : > { %v4227_v5 = vadd.f32 %v4150_v52, %v8584_v36  ;;  %v4742_v1 = vpack.c.bf16 %v4720_v15, %v4719_v28  ;;  %v4722_v52 = vld [vmem:[#allocation3 + $0xfd] sm:$0xff]  ;;  %v4057_v15 = vld [vmem:[#allocation3 + $0x10a] sm:$0xff] }
 0x4dc   : > { %v4372_v45 = vpop.f32.mrf.mxu1 }
 0x4dd   : > { %7164 = vmatmul.msk.bf16.gmra.mxu3 %vm375_vm3, %v4741_v27  ;;  %v4449_v23 = vadd.f32 %v4372_v45, %v4227_v5  ;;  %v4594_v14 = vpop.f32.mrf.mxu2  ;;  %v4278_v27 = vld [vmem:[#allocation3 + $0xfb] sm:$0xff] }
 0x4de   : > { %v4299_v50 = vpack.c.bf16 %v4278_v27, %v4277_v61 }
 0x4df   : > { %7131 = vmatmul.msk.bf16.gmra.mxu1 %vm375_vm3, %v4298_v53  ;;  %v4671_v43 = vadd.f32 %v4594_v14, %v4449_v23  ;;  %v4058_v23 = vld [vmem:[#allocation3 + $0x112] sm:$0xff] }
 0x4e0   : > { %v4811_v58 = vpop.f32.mrf.mxu3  ;;  %v4078_v37 = vpack.c.bf16 %v4058_v23, %v4057_v15  ;;  %v4506_v15 = vld [vmem:[#allocation3 + $0x144] sm:$0xff] }
 0x4e1   : > { %v8807_v31 = vadd.f32 %v4811_v58, %v4669_v18 }
 0x4e2   : > { %v4152_v57 = vpop.f32.mrf.mxu0 }
 0x4e3   : > { %v4228_v18 = vadd.f32 %v4152_v57, %v8591_v20 }
 0x4e4   : > { %v4374_v33 = vpop.f32.mrf.mxu1  ;;  %7115 = vmatmul.msk.bf16.gmra.mxu0 %vm375_vm3, %v4077_v46  ;;  %v4279_v46 = vld [vmem:[#allocation3 + $0x10b] sm:$0xff] }
 0x4e5   : > { %v4450_v36 = vadd.f32 %v4374_v33, %v4228_v18  ;;  %v4596_v35 = vpop.f32.mrf.mxu2  ;;  %v4503_v33 = vld [vmem:[#allocation3 + $0x124] sm:$0xff] }
 0x4e6   : > { %v4523_v25 = vpack.c.bf16 %v4504_v11, %v4503_v33 }
 0x4e7   : > { %v4672_v54 = vadd.f32 %v4596_v35, %v4450_v36 }
 0x4e8   : > { %v4813_v42 = vpop.f32.mrf.mxu3 }
 0x4e9   : > { %v8812_v55 = vadd.f32 %v4813_v42, %v4670_v30 }
 0x4ea   : > { %7149 = vmatmul.msk.bf16.gmra.mxu2 %vm375_vm3, %v4521_v3  ;;  %v4155_v20 = vpop.f32.mrf.mxu0  ;;  %v4721_v3 = vld [vmem:[#allocation3 + $0xf5] sm:$0xff] }
 0x4eb   : > { %v4229_v58 = vadd.f32 %v4155_v20, %v8598_v29  ;;  %v4743_v14 = vpack.c.bf16 %v4722_v52, %v4721_v3  ;;  %v4724_v20 = vld [vmem:[#allocation3 + $0x115] sm:$0xff]  ;;  %v4059_v52 = vld [vmem:[#allocation3 + $0x122] sm:$0xff] }
 0x4ec   : > { %v4377_v17 = vpop.f32.mrf.mxu1 }
 0x4ed   : > { %7165 = vmatmul.msk.bf16.gmra.mxu3 %vm375_vm3, %v4742_v1  ;;  %v4451_v59 = vadd.f32 %v4377_v17, %v4229_v58  ;;  %v4599_v30 = vpop.f32.mrf.mxu2  ;;  %v4280_v1 = vld [vmem:[#allocation3 + $0x113] sm:$0xff] }
 0x4ee   : > { %v4300_v35 = vpack.c.bf16 %v4280_v1, %v4279_v46 }
 0x4ef   : > { %7132 = vmatmul.msk.bf16.gmra.mxu1 %vm375_vm3, %v4299_v50  ;;  %v4673_v5 = vadd.f32 %v4599_v30, %v4451_v59  ;;  %v4060_v59 = vld [vmem:[#allocation3 + $0x12a] sm:$0xff] }
 0x4f0   : > { %v4816_v2 = vpop.f32.mrf.mxu3  ;;  %v4079_v23 = vpack.c.bf16 %v4060_v59, %v4059_v52  ;;  %v4508_v52 = vld [vmem:[#allocation3 + $0x15c] sm:$0xff] }
 0x4f1   : > { %v8817_v47 = vadd.f32 %v4816_v2, %v4671_v43 }
 0x4f2   : > { %v4157_v42 = vpop.f32.mrf.mxu0 }
 0x4f3   : > { %v4230_v43 = vadd.f32 %v4157_v42, %v8605_v13 }
 0x4f4   : > { %v4379_v28 = vpop.f32.mrf.mxu1  ;;  %7116 = vmatmul.msk.bf16.gmra.mxu0 %vm375_vm3, %v4078_v37  ;;  %v4281_v37 = vld [vmem:[#allocation3 + $0x123] sm:$0xff] }
 0x4f5   : > { %v4452_v29 = vadd.f32 %v4379_v28, %v4230_v43  ;;  %v4601_v57 = vpop.f32.mrf.mxu2  ;;  %v4505_v28 = vld [vmem:[#allocation3 + $0x13c] sm:$0xff] }
 0x4f6   : > { %v4524_v33 = vpack.c.bf16 %v4506_v15, %v4505_v28 }
 0x4f7   : > { %v4674_v36 = vadd.f32 %v4601_v57, %v4452_v29 }
 0x4f8   : > { %v4818_v53 = vpop.f32.mrf.mxu3 }
 0x4f9   : > { %v8822_v45 = vadd.f32 %v4818_v53, %v4672_v54 }
 0x4fa   : > { %7150 = vmatmul.msk.bf16.gmra.mxu2 %vm375_vm3, %v4522_v39  ;;  %v4160_v13 = vpop.f32.mrf.mxu0  ;;  %v4723_v39 = vld [vmem:[#allocation3 + $0x10d] sm:$0xff] }
 0x4fb   : > { %v4231_v2 = vadd.f32 %v4160_v13, %v8612_v34  ;;  %v4744_v30 = vpack.c.bf16 %v4724_v20, %v4723_v39  ;;  %v4726_v13 = vld [vmem:[#allocation3 + $0x12d] sm:$0xff]  ;;  %v4061_v20 = vld [vmem:[#allocation3 + $0x13a] sm:$0xff] }
 0x4fc   : > { %v4382_v40 = vpop.f32.mrf.mxu1 }
 0x4fd   : > { %7166 = vmatmul.msk.bf16.gmra.mxu3 %vm375_vm3, %v4743_v14  ;;  %v4453_v61 = vadd.f32 %v4382_v40, %v4231_v2  ;;  %v4604_v54 = vpop.f32.mrf.mxu2  ;;  %v4282_v14 = vld [vmem:[#allocation3 + $0x12b] sm:$0xff] }
 0x4fe   : > { %v4301_v57 = vpack.c.bf16 %v4282_v14, %v4281_v37 }
 0x4ff   : > { %7133 = vmatmul.msk.bf16.gmra.mxu1 %vm375_vm3, %v4300_v35  ;;  %v4675_v58 = vadd.f32 %v4604_v54, %v4453_v61  ;;  %v4062_v61 = vld [vmem:[#allocation3 + $0x142] sm:$0xff] }
 0x500   : > { %v4821_v18 = vpop.f32.mrf.mxu3  ;;  %v4080_v59 = vpack.c.bf16 %v4062_v61, %v4061_v20  ;;  %v4510_v20 = vld [vmem:[#allocation3 + $0x174] sm:$0xff] }
 0x501   : > { %v8827_v27 = vadd.f32 %v4821_v18, %v4673_v5 }
 0x502   : > { %v4162_v53 = vpop.f32.mrf.mxu0 }
 0x503   : > { %v4232_v5 = vadd.f32 %v4162_v53, %v8619_v4 }
 0x504   : > { %v4384_v3 = vpop.f32.mrf.mxu1  ;;  %7117 = vmatmul.msk.bf16.gmra.mxu0 %vm375_vm3, %v4079_v23  ;;  %v4283_v23 = vld [vmem:[#allocation3 + $0x13b] sm:$0xff] }
 0x505   : > { %v4454_v34 = vadd.f32 %v4384_v3, %v4232_v5  ;;  %v4606_v42 = vpop.f32.mrf.mxu2  ;;  %v4507_v3 = vld [vmem:[#allocation3 + $0x154] sm:$0xff] }
 0x506   : > { %v4525_v28 = vpack.c.bf16 %v4508_v52, %v4507_v3 }
 0x507   : > { %v4676_v29 = vadd.f32 %v4606_v42, %v4454_v34 }
 0x508   : > { %v4823_v50 = vpop.f32.mrf.mxu3 }
 0x509   : > { %v8832_v17 = vadd.f32 %v4823_v50, %v4674_v36 }
 0x50a   : > { %7151 = vmatmul.msk.bf16.gmra.mxu2 %vm375_vm3, %v4523_v25  ;;  %v4165_v4 = vpop.f32.mrf.mxu0  ;;  %v4725_v25 = vld [vmem:[#allocation3 + $0x125] sm:$0xff] }
 0x50b   : > { %v4233_v18 = vadd.f32 %v4165_v4, %v8626_v6  ;;  %v4745_v54 = vpack.c.bf16 %v4726_v13, %v4725_v25  ;;  %v4728_v4 = vld [vmem:[#allocation3 + $0x145] sm:$0xff]  ;;  %v4063_v13 = vld [vmem:[#allocation3 + $0x152] sm:$0xff] }
 0x50c   : > { %v4387_v11 = vpop.f32.mrf.mxu1 }
 0x50d   : > { %7167 = vmatmul.msk.bf16.gmra.mxu3 %vm375_vm3, %v4744_v30  ;;  %v4455_v46 = vadd.f32 %v4387_v11, %v4233_v18  ;;  %v4609_v36 = vpop.f32.mrf.mxu2  ;;  %v4284_v30 = vld [vmem:[#allocation3 + $0x143] sm:$0xff] }
 0x50e   : > { %v4302_v42 = vpack.c.bf16 %v4284_v30, %v4283_v23 }
 0x50f   : > { %7134 = vmatmul.msk.bf16.gmra.mxu1 %vm375_vm3, %v4301_v57  ;;  %v4677_v2 = vadd.f32 %v4609_v36, %v4455_v46  ;;  %v4064_v46 = vld [vmem:[#allocation3 + $0x15a] sm:$0xff] }
 0x510   : > { %v4826_v43 = vpop.f32.mrf.mxu3  ;;  %v4081_v61 = vpack.c.bf16 %v4064_v46, %v4063_v13  ;;  %v5368_v13 = vld [vmem:[#allocation4 + $0x18] sm:$0xff] }
 0x511   : > { %v8837_v1 = vadd.f32 %v4826_v43, %v4675_v58 }
 0x512   : > { %v4167_v50 = vpop.f32.mrf.mxu0 }
 0x513   : > { %v4234_v58 = vadd.f32 %v4167_v50, %v8633_v26 }
 0x514   : > { %v4389_v39 = vpop.f32.mrf.mxu1  ;;  %7118 = vmatmul.msk.bf16.gmra.mxu0 %vm375_vm3, %v4080_v59  ;;  %v4285_v59 = vld [vmem:[#allocation3 + $0x153] sm:$0xff] }
 0x515   : > { %v4456_v6 = vadd.f32 %v4389_v39, %v4234_v58  ;;  %v4611_v53 = vpop.f32.mrf.mxu2  ;;  %v4509_v39 = vld [vmem:[#allocation3 + $0x16c] sm:$0xff] }
 0x516   : > { %v4526_v3 = vpack.c.bf16 %v4510_v20, %v4509_v39 }
 0x517   : > { %v4678_v34 = vadd.f32 %v4611_v53, %v4456_v6 }
 0x518   : > { %v4828_v35 = vpop.f32.mrf.mxu3 }
 0x519   : > { %v8842_v40 = vadd.f32 %v4828_v35, %v4676_v29 }
 0x51a   : > { %7152 = vmatmul.msk.bf16.gmra.mxu2 %vm375_vm3, %v4524_v33  ;;  %v4170_v26 = vpop.f32.mrf.mxu0  ;;  %v4727_v33 = vld [vmem:[#allocation3 + $0x13d] sm:$0xff] }
 0x51b   : > { %v4235_v43 = vadd.f32 %v4170_v26, %v8640_v48  ;;  %v4746_v36 = vpack.c.bf16 %v4728_v4, %v4727_v33  ;;  %v4730_v26 = vld [vmem:[#allocation3 + $0x15d] sm:$0xff] }
 0x51c   : > { %v4392_v15 = vpop.f32.mrf.mxu1 }
 0x51d   : > { %7168 = vmatmul.msk.bf16.gmra.mxu3 %vm375_vm3, %v4745_v54  ;;  %v4457_v37 = vadd.f32 %v4392_v15, %v4235_v43  ;;  %v4614_v29 = vpop.f32.mrf.mxu2  ;;  %v4286_v54 = vld [vmem:[#allocation3 + $0x15b] sm:$0xff] }
 0x51e   : > { %v4303_v53 = vpack.c.bf16 %v4286_v54, %v4285_v59  ;;  %v4287_v54 = vld [vmem:[#allocation3 + $0x16b] sm:$0xff]  ;;  %v7256_v59 = vld [vmem:[%s9450_s4 + $0x10] sm:$0xf] }
 0x51f   : > { %7135 = vmatmul.msk.bf16.gmra.mxu1 %vm375_vm3, %v4302_v42  ;;  %v4679_v18 = vadd.f32 %v4614_v29, %v4457_v37  ;;  %v7273_v37 = vld [vmem:[%s9450_s4 + $0x14] sm:$0xf]  ;;  %v4066_v29 = vld [vmem:[#allocation3 + $0x172] sm:$0xff] }
 0x520   : > { %v4831_v5 = vpop.f32.mrf.mxu3 }
 0x521   : > { %v8847_v14 = vadd.f32 %v4831_v5, %v4677_v2 }
 0x522   : > { %v4172_v35 = vpop.f32.mrf.mxu0 }
 0x523   : > { %v4236_v2 = vadd.f32 %v4172_v35, %v8647_v19  ;;  %v4288_v35 = vld [vmem:[#allocation3 + $0x173] sm:$0xff] }
 0x524   : > { %v4394_v25 = vpop.f32.mrf.mxu1  ;;  %7119 = vmatmul.msk.bf16.gmra.mxu0 %vm375_vm3, %v4081_v61  ;;  %v4304_v39 = vpack.c.bf16 %v4288_v35, %v4287_v54  ;;  %v5591_v54 = vld [vmem:[#allocation4 + $0x28] sm:$0xff] }
 0x525   : > { %v4458_v48 = vadd.f32 %v4394_v25, %v4236_v2  ;;  %v4616_v50 = vpop.f32.mrf.mxu2  ;;  %v5367_v25 = vld [vmem:[#allocation4 + $0x10] sm:$0xff] }
 0x526   : > { %v8874_v20 = vpack.c.bf16 %v5368_v13, %v5367_v25 }
 0x527   : > { %v4680_v6 = vadd.f32 %v4616_v50, %v4458_v48  ;;  %v7239_v48 = vld [vmem:[%s9450_s4 + $0xc] sm:$0xf] }
 0x528   : > { %v4833_v57 = vpop.f32.mrf.mxu3 }
 0x529   : > { %v8852_v11 = vadd.f32 %v4833_v57, %v4678_v34  ;;  %v6357_v57 = vsel %vm3802_vm5, %v7273_v37, 0 }
 0x52a   : > { %7153 = vmatmul.msk.bf16.gmra.mxu2 %vm375_vm3, %v4525_v28  ;;  %v4175_v19 = vpop.f32.mrf.mxu0  ;;  %v4729_v28 = vld [vmem:[#allocation3 + $0x155] sm:$0xff] }
 0x52b   : > { %v4237_v5 = vadd.f32 %v4175_v19, %v8658_v8  ;;  %v4747_v33 = vpack.c.bf16 %v4730_v26, %v4729_v28  ;;  %6366 = vmatpush.bf16.msra.mxu2 %v6357_v57  ;;  %v4065_v8 = vld [vmem:[#allocation3 + $0x16a] sm:$0xff]  ;;  %v6134_v19 = vsel %vm3802_vm5, %v7256_v59, 0 }
 0x52c   : > { %v4397_v52 = vpop.f32.mrf.mxu1  ;;  %6143 = vmatpush.bf16.msra.mxu1 %v6134_v19  ;;  %v4731_v26 = vld [vmem:[#allocation3 + $0x16d] sm:$0xff] }
 0x52d   : > { %7169 = vmatmul.msk.bf16.gmra.mxu3 %vm375_vm3, %v4746_v36  ;;  %v4459_v23 = vadd.f32 %v4397_v52, %v4237_v5  ;;  %v4619_v34 = vpop.f32.mrf.mxu2  ;;  %v4082_v36 = vpack.c.bf16 %v4066_v29, %v4065_v8  ;;  %v4923_v57 = vld [vmem:[#allocation3 + $0x6] sm:$0xff] }
 0x52f   : > { %7136 = vmatmul.msk.bf16.gmra.mxu1 %vm375_vm3, %v4303_v53  ;;  %v4681_v43 = vadd.f32 %v4619_v34, %v4459_v23 }
 0x530   : > { %v4836_v58 = vpop.f32.mrf.mxu3 }
 0x531   : > { %v8857_v30 = vadd.f32 %v4836_v58, %v4679_v18  ;;  %v7290_v58 = vld [vmem:[%s9450_s4 + $0x18] sm:$0xf] }
 0x532   : > { %v4177_v4 = vpop.f32.mrf.mxu0 }
 0x533   : > { %v4238_v46 = vadd.f32 %v4177_v4, %v8677_v10  ;;  %v5911_v10 = vsel %vm3802_vm5, %v7239_v48, 0 }
 0x534   : > { %v4399_v18 = vpop.f32.mrf.mxu1  ;;  %7120 = vmatmul.msk.bf16.gmra.mxu0 %vm375_vm3, %v4082_v36  ;;  %v5146_v36 = vld [vmem:[#allocation4 + $0x8] sm:$0xff] }
 0x535   : > { %v4460_v2 = vadd.f32 %v4399_v18, %v4238_v46  ;;  %v4621_v61 = vpop.f32.mrf.mxu2  ;;  %5920 = vmatpush.bf16.msra.mxu0 %v5911_v10  ;;  %v5145_v46 = vld [vmem:[#allocation4] sm:$0xff] }
 0x537   : > { %v4682_v53 = vadd.f32 %v4621_v61, %v4460_v2  ;;  %v5177_v2 = vpack.c.bf16 %v5146_v36, %v5145_v46  ;;  %v5590_v61 = vld [vmem:[#allocation4 + $0x20] sm:$0xff] }
 0x538   : > { %v4838_v42 = vpop.f32.mrf.mxu3  ;;  %v5622_v10 = vpack.c.bf16 %v5591_v54, %v5590_v61  ;;  %v4927_v54 = vld [vmem:[#allocation3 + $0x36] sm:$0xff] }
 0x539   : > { %v8862_v15 = vadd.f32 %v4838_v42, %v4680_v6 }
 0x53a   : > { %7154 = vmatmul.msk.bf16.gmra.mxu2 %vm375_vm3, %v4526_v3  ;;  %v6580_v3 = vsel %vm3802_vm5, %v7290_v58, 0  ;;  %v4180_v52 = vpop.f32.mrf.mxu0 }
 0x53b   : > { %6589 = vmatpush.bf16.msra.mxu3 %v6580_v3  ;;  %v4239_v23 = vadd.f32 %v4180_v52, %v8684_v24 }
 0x53c   : > { %v4402_v5 = vpop.f32.mrf.mxu1 }
 0x53d   : > { %7170 = vmatmul.msk.bf16.gmra.mxu3 %vm375_vm3, %v4747_v33  ;;  %v4461_v34 = vadd.f32 %v4402_v5, %v4239_v23  ;;  %v4624_v42 = vpop.f32.mrf.mxu2  ;;  %v4924_v33 = vld [vmem:[#allocation3 + $0xe] sm:$0xff]  ;;  %v4925_v23 = vld [vmem:[#allocation3 + $0x1e] sm:$0xff] }
 0x53e   : > { %v4955_v24 = vpack.c.bf16 %v4924_v33, %v4923_v57 }
 0x53f   : > { %7137 = vmatmul.msk.bf16.gmra.mxu1 %vm375_vm3, %v4304_v39  ;;  %v4683_v29 = vadd.f32 %v4624_v42, %v4461_v34  ;;  %v4926_v34 = vld [vmem:[#allocation3 + $0x26] sm:$0xff] }
 0x540   : > { %v4841_v50 = vpop.f32.mrf.mxu3 }
 0x541   : > { %v8883_v6 = vadd.f32 %v4841_v50, %v4681_v43  ;;  %v4732_v43 = vld [vmem:[#allocation3 + $0x175] sm:$0xff] }
 0x542   : > { %v4748_v4 = vpack.c.bf16 %v4732_v43, %v4731_v26  ;;  %v4182_v18 = vpop.f32.mrf.mxu0  ;;  %v4956_v43 = vpack.c.bf16 %v4926_v34, %v4925_v23  ;;  %v5594_v23 = vld [vmem:[#allocation4 + $0x40] sm:$0xff] }
 0x543   : > { %v4240_v35 = vadd.f32 %v4182_v18, %v8691_v21 }
 0x544   : > { %v4404_v8 = vpop.f32.mrf.mxu1  ;;  %7173 = vmatmul.msk.bf16.vlgmr.msrb.gmra.mxu0 %vm375_vm3, %v4955_v24 }
 0x545   : > { %v4462_v25 = vadd.f32 %v4404_v8, %v4240_v35  ;;  %v4626_v13 = vpop.f32.mrf.mxu2  ;;  %v5592_v8 = vld [vmem:[#allocation4 + $0x30] sm:$0xff] }
 0x547   : > { %v4684_v39 = vadd.f32 %v4626_v13, %v4462_v25 }
 0x548   : > { %v4843_v28 = vpop.f32.mrf.mxu3 }
 0x549   : > { %v8891_v37 = vadd.f32 %v4843_v28, %v4682_v53 }
 0x54a   : > { %7206 = vmatmul.msk.bf16.vlgmr.msrb.gmra.mxu2 %vm375_vm3, %v8874_v20  ;;  %v4185_v58 = vpop.f32.mrf.mxu0 }
 0x54b   : > { %v4241_v21 = vadd.f32 %v4185_v58, %v8698_v51  ;;  %v5593_v51 = vld [vmem:[#allocation4 + $0x38] sm:$0xff] }
 0x54c   : > { %v4407_v59 = vpop.f32.mrf.mxu1  ;;  %v8908_v46 = vpack.c.bf16 %v5593_v51, %v5592_v8 }
 0x54d   : > { %7171 = vmatmul.msk.bf16.gmra.mxu3 %vm375_vm3, %v4748_v4  ;;  %v4463_v53 = vadd.f32 %v4407_v59, %v4241_v21  ;;  %v4629_v3 = vpop.f32.mrf.mxu2 }
 0x54f   : > { %7189 = vmatmul.msk.bf16.vlgmr.msrb.gmra.mxu1 %vm375_vm3, %v5177_v2  ;;  %v4685_v5 = vadd.f32 %v4629_v3, %v4463_v53 }
 0x550   : > { %v4846_v48 = vpop.f32.mrf.mxu3 }
 0x551   : > { %v8896_v50 = vadd.f32 %v4846_v48, %v4683_v29  ;;  %v4928_v48 = vld [vmem:[#allocation3 + $0x3e] sm:$0xff] }
 0x552   : > { %v4187_v42 = vpop.f32.mrf.mxu0 }
 0x553   : > { %v4242_v26 = vadd.f32 %v4187_v42, %v8705_v60 }
 0x554   : > { %v4409_v28 = vpop.f32.mrf.mxu1  ;;  %7174 = vmatmul.msk.bf16.gmra.mxu0 %vm375_vm3, %v4956_v43 }
 0x555   : > { %v4464_v29 = vadd.f32 %v4409_v28, %v4242_v26  ;;  %v4631_v57 = vpop.f32.mrf.mxu2 }
 0x557   : > { %v4686_v18 = vadd.f32 %v4631_v57, %v4464_v29 }
 0x558   : > { %v4848_v19 = vpop.f32.mrf.mxu3 }
 0x559   : > { %v8901_v52 = vadd.f32 %v4848_v19, %v4684_v39 }
 0x55a   : > { %7207 = vmatmul.msk.bf16.gmra.mxu2 %vm375_vm3, %v5622_v10  ;;  %v4190_v36 = vpop.f32.mrf.mxu0 }
 0x55b   : > { %v4243_v35 = vadd.f32 %v4190_v36, %v8712_v62  ;;  %v5595_v62 = vld [vmem:[#allocation4 + $0x48] sm:$0xff] }
 0x55c   : > { %v4412_v60 = vpop.f32.mrf.mxu1  ;;  %v8923_v34 = vpack.c.bf16 %v5595_v62, %v5594_v23 }
 0x55d   : > { %7223 = vmatmul.msk.bf16.vlgmr.msrb.gmra.mxu3 %vm375_vm3, %v5622_v10  ;;  %v4465_v24 = vadd.f32 %v4412_v60, %v4243_v35  ;;  %v4634_v25 = vpop.f32.mrf.mxu2 }
 0x55f   : > { %7190 = vmatmul.msk.bf16.gmra.mxu1 %vm375_vm3, %v8874_v20  ;;  %v4687_v61 = vadd.f32 %v4634_v25, %v4465_v24  ;;  %v4957_v20 = vpack.c.bf16 %v4928_v48, %v4927_v54  ;;  %v5596_v54 = vld [vmem:[#allocation4 + $0x50] sm:$0xff] }
 0x560   : > { %v4851_v33 = vpop.f32.mrf.mxu3 }
 0x561   : > { %v8906_v4 = vadd.f32 %v4851_v33, %v4685_v5  ;;  %v4929_v33 = vld [vmem:[#allocation3 + $0x4e] sm:$0xff] }
 0x562   : > { %v4192_v39 = vpop.f32.mrf.mxu0 }
 0x563   : > { %v4244_v59 = vadd.f32 %v4192_v39, %v8719_v38 }
 0x564   : > { %v4414_v58 = vpop.f32.mrf.mxu1  ;;  %7175 = vmatmul.msk.bf16.gmra.mxu0 %vm375_vm3, %v4957_v20 }
 0x565   : > { %v4466_v21 = vadd.f32 %v4414_v58, %v4244_v59  ;;  %v4636_v53 = vpop.f32.mrf.mxu2 }
 0x567   : > { %v4688_v5 = vadd.f32 %v4636_v53, %v4466_v21 }
 0x568   : > { %v4853_v13 = vpop.f32.mrf.mxu3 }
 0x569   : > { %v8915_v2 = vadd.f32 %v4853_v13, %v4686_v18  ;;  %v4930_v18 = vld [vmem:[#allocation3 + $0x56] sm:$0xff] }
 0x56a   : > { %7208 = vmatmul.msk.bf16.gmra.mxu2 %vm375_vm3, %v8908_v46  ;;  %v4195_v42 = vpop.f32.mrf.mxu0 }
 0x56b   : > { %v4245_v28 = vadd.f32 %v4195_v42, %v8726_v12  ;;  %v5597_v12 = vld [vmem:[#allocation4 + $0x58] sm:$0xff] }
 0x56c   : > { %v4417_v38 = vpop.f32.mrf.mxu1  ;;  %v8937_v48 = vpack.c.bf16 %v5597_v12, %v5596_v54  ;;  %v4934_v54 = vld [vmem:[#allocation3 + $0x86] sm:$0xff] }
 0x56d   : > { %7224 = vmatmul.msk.bf16.gmra.mxu3 %vm375_vm3, %v8908_v46  ;;  %v4467_v26 = vadd.f32 %v4417_v38, %v4245_v28  ;;  %v4639_v43 = vpop.f32.mrf.mxu2 }
 0x56f   : > { %7191 = vmatmul.msk.bf16.gmra.mxu1 %vm375_vm3, %v5622_v10  ;;  %v4689_v51 = vadd.f32 %v4639_v43, %v4467_v26  ;;  %v4958_v10 = vpack.c.bf16 %v4930_v18, %v4929_v33  ;;  %v5598_v18 = vld [vmem:[#allocation4 + $0x60] sm:$0xff] }
 0x570   : > { %v4856_v3 = vpop.f32.mrf.mxu3 }
 0x571   : > { %v8921_v19 = vadd.f32 %v4856_v3, %v4687_v61  ;;  %v4931_v3 = vld [vmem:[#allocation3 + $0x66] sm:$0xff] }
 0x572   : > { %v4197_v8 = vpop.f32.mrf.mxu0 }
 0x573   : > { %v4246_v60 = vadd.f32 %v4197_v8, %v8733_v0 }
 0x574   : > { %v4419_v36 = vpop.f32.mrf.mxu1  ;;  %7176 = vmatmul.msk.bf16.gmra.mxu0 %vm375_vm3, %v4958_v10 }
 0x575   : > { %v4468_v35 = vadd.f32 %v4419_v36, %v4246_v60  ;;  %v4641_v24 = vpop.f32.mrf.mxu2 }
 0x577   : > { %v4690_v61 = vadd.f32 %v4641_v24, %v4468_v35 }
 0x578   : > { %v4858_v29 = vpop.f32.mrf.mxu3 }
 0x579   : > { %v8929_v57 = vadd.f32 %v4858_v29, %v4688_v5  ;;  %v4932_v5 = vld [vmem:[#allocation3 + $0x6e] sm:$0xff] }
 0x57a   : > { %7209 = vmatmul.msk.bf16.gmra.mxu2 %vm375_vm3, %v8923_v34  ;;  %v4200_v0 = vpop.f32.mrf.mxu0  ;;  %v4959_v28 = vpack.c.bf16 %v4932_v5, %v4931_v3 }
 0x57b   : > { %v4247_v58 = vadd.f32 %v4200_v0, %v8740_v44  ;;  %v5599_v44 = vld [vmem:[#allocation4 + $0x68] sm:$0xff] }
 0x57c   : > { %v4422_v39 = vpop.f32.mrf.mxu1  ;;  %v8952_v8 = vpack.c.bf16 %v5599_v44, %v5598_v18  ;;  %v4935_v18 = vld [vmem:[#allocation3 + $0x96] sm:$0xff] }
 0x57d   : > { %7225 = vmatmul.msk.bf16.gmra.mxu3 %vm375_vm3, %v8923_v34  ;;  %v4469_v59 = vadd.f32 %v4422_v39, %v4247_v58  ;;  %v4644_v20 = vpop.f32.mrf.mxu2 }
 0x57f   : > { %7192 = vmatmul.msk.bf16.gmra.mxu1 %vm375_vm3, %v8908_v46  ;;  %v4691_v62 = vadd.f32 %v4644_v20, %v4469_v59 }
 0x580   : > { %v4861_v25 = vpop.f32.mrf.mxu3 }
 0x581   : > { %v8935_v13 = vadd.f32 %v4861_v25, %v4689_v51 }
 0x582   : > { %v4202_v23 = vpop.f32.mrf.mxu0 }
 0x583   : > { %v4248_v38 = vadd.f32 %v4202_v23, %v8747_v16  ;;  %v5600_v23 = vld [vmem:[#allocation4 + $0x70] sm:$0xff] }
 0x584   : > { %v4424_v42 = vpop.f32.mrf.mxu1  ;;  %7177 = vmatmul.msk.bf16.gmra.mxu0 %vm375_vm3, %v4959_v28 }
 0x585   : > { %v4470_v26 = vadd.f32 %v4424_v42, %v4248_v38  ;;  %v4646_v43 = vpop.f32.mrf.mxu2 }
 0x587   : > { %v4692_v33 = vadd.f32 %v4646_v43, %v4470_v26 }
 0x588   : > { %v4863_v21 = vpop.f32.mrf.mxu3 }
 0x589   : > { %v8944_v53 = vadd.f32 %v4863_v21, %v4690_v61  ;;  %v4933_v61 = vld [vmem:[#allocation3 + $0x7e] sm:$0xff] }
 0x58a   : > { %7210 = vmatmul.msk.bf16.gmra.mxu2 %vm375_vm3, %v8937_v48  ;;  %v4205_v16 = vpop.f32.mrf.mxu0  ;;  %v4960_v59 = vpack.c.bf16 %v4934_v54, %v4933_v61 }
 0x58b   : > { %v4249_v60 = vadd.f32 %v4205_v16, %v8754_v22  ;;  %v5601_v22 = vld [vmem:[#allocation4 + $0x78] sm:$0xff] }
 0x58c   : > { %v4427_v36 = vpop.f32.mrf.mxu1  ;;  %v8967_v42 = vpack.c.bf16 %v5601_v22, %v5600_v23  ;;  %v4936_v16 = vld [vmem:[#allocation3 + $0x9e] sm:$0xff] }
 0x58d   : > { %7226 = vmatmul.msk.bf16.gmra.mxu3 %vm375_vm3, %v8937_v48  ;;  %v4471_v10 = vadd.f32 %v4427_v36, %v4249_v60  ;;  %v4649_v35 = vpop.f32.mrf.mxu2 }
 0x58f   : > { %7193 = vmatmul.msk.bf16.gmra.mxu1 %vm375_vm3, %v8923_v34  ;;  %v4693_v25 = vadd.f32 %v4649_v35, %v4471_v10  ;;  %v4961_v35 = vpack.c.bf16 %v4936_v16, %v4935_v18 }
 0x590   : > { %v4866_v29 = vpop.f32.mrf.mxu3 }
 0x591   : > { %v8950_v51 = vadd.f32 %v4866_v29, %v4691_v62 }
 0x592   : > { %v4207_v0 = vpop.f32.mrf.mxu0 }
 0x593   : > { %v4250_v58 = vadd.f32 %v4207_v0, %v8761_v56 }
 0x594   : > { %v4429_v39 = vpop.f32.mrf.mxu1  ;;  %7178 = vmatmul.msk.bf16.gmra.mxu0 %vm375_vm3, %v4960_v59 }
 0x595   : > { %v4472_v20 = vadd.f32 %v4429_v39, %v4250_v58  ;;  %v4651_v21 = vpop.f32.mrf.mxu2  ;;  %v5602_v39 = vld [vmem:[#allocation4 + $0x80] sm:$0xff] }
 0x597   : > { %v4694_v5 = vadd.f32 %v4651_v21, %v4472_v20 }
 0x598   : > { %v4868_v24 = vpop.f32.mrf.mxu3 }
 0x599   : > { %v8959_v12 = vadd.f32 %v4868_v24, %v4692_v33 }
 0x59a   : > { %7211 = vmatmul.msk.bf16.gmra.mxu2 %vm375_vm3, %v8952_v8  ;;  %v4210_v56 = vpop.f32.mrf.mxu0 }
 0x59b   : > { %v4251_v28 = vadd.f32 %v4210_v56, %v8768_v7  ;;  %v5603_v7 = vld [vmem:[#allocation4 + $0x88] sm:$0xff] }
 0x59c   : > { %v4432_v38 = vpop.f32.mrf.mxu1  ;;  %v8982_v58 = vpack.c.bf16 %v5603_v7, %v5602_v39  ;;  %v4937_v56 = vld [vmem:[#allocation3 + $0xae] sm:$0xff] }
 0x59d   : > { %7227 = vmatmul.msk.bf16.gmra.mxu3 %vm375_vm3, %v8952_v8  ;;  %v4473_v26 = vadd.f32 %v4432_v38, %v4251_v28  ;;  %v4654_v43 = vpop.f32.mrf.mxu2  ;;  %v4938_v38 = vld [vmem:[#allocation3 + $0xb6] sm:$0xff] }
 0x59f   : > { %7194 = vmatmul.msk.bf16.gmra.mxu1 %vm375_vm3, %v8937_v48  ;;  %v4695_v33 = vadd.f32 %v4654_v43, %v4473_v26 }
 0x5a0   : > { %v4871_v62 = vpop.f32.mrf.mxu3 }
 0x5a1   : > { %v8965_v3 = vadd.f32 %v4871_v62, %v4693_v25 }
 0x5a2   : > { %v4212_v36 = vpop.f32.mrf.mxu0 }
 0x5a3   : > { %v4252_v10 = vadd.f32 %v4212_v36, %v8775_v49 }
 0x5a4   : > { %v4434_v60 = vpop.f32.mrf.mxu1  ;;  %7179 = vmatmul.msk.bf16.gmra.mxu0 %vm375_vm3, %v4961_v35 }
 0x5a5   : > { %v4474_v24 = vadd.f32 %v4434_v60, %v4252_v10  ;;  %v4656_v25 = vpop.f32.mrf.mxu2  ;;  %v5604_v10 = vld [vmem:[#allocation4 + $0x90] sm:$0xff] }
 0x5a7   : > { %v4696_v0 = vadd.f32 %v4656_v25, %v4474_v24 }
 0x5a8   : > { %v4873_v44 = vpop.f32.mrf.mxu3 }
 0x5a9   : > { %v8974_v29 = vadd.f32 %v4873_v44, %v4694_v5  ;;  %v4962_v44 = vpack.c.bf16 %v4938_v38, %v4937_v56 }
 0x5aa   : > { %7212 = vmatmul.msk.bf16.gmra.mxu2 %vm375_vm3, %v8967_v42  ;;  %v4215_v49 = vpop.f32.mrf.mxu0 }
 0x5ab   : > { %v4253_v20 = vadd.f32 %v4215_v49, %v8784_v41  ;;  %v5605_v41 = vld [vmem:[#allocation4 + $0x98] sm:$0xff] }
 0x5ac   : > { %v4437_v59 = vpop.f32.mrf.mxu1  ;;  %v8997_v35 = vpack.c.bf16 %v5605_v41, %v5604_v10 }
 0x5ad   : > { %7228 = vmatmul.msk.bf16.gmra.mxu3 %vm375_vm3, %v8967_v42  ;;  %v4475_v21 = vadd.f32 %v4437_v59, %v4253_v20  ;;  %v4659_v22 = vpop.f32.mrf.mxu2  ;;  %v4939_v59 = vld [vmem:[#allocation3 + $0xc6] sm:$0xff]  ;;  %v4940_v20 = vld [vmem:[#allocation3 + $0xce] sm:$0xff] }
 0x5af   : > { %7195 = vmatmul.msk.bf16.gmra.mxu1 %vm375_vm3, %v8952_v8  ;;  %v4697_v23 = vadd.f32 %v4659_v22, %v4475_v21 }
 0x5b0   : > { %v4876_v61 = vpop.f32.mrf.mxu3 }
 0x5b1   : > { %v8980_v54 = vadd.f32 %v4876_v61, %v4695_v33 }
 0x5b2   : > { %v4217_v28 = vpop.f32.mrf.mxu0 }
 0x5b3   : > { %v4254_v43 = vadd.f32 %v4217_v28, %v8790_v63 }
 0x5b4   : > { %v4439_v26 = vpop.f32.mrf.mxu1  ;;  %7180 = vmatmul.msk.bf16.gmra.mxu0 %vm375_vm3, %v4962_v44  ;;  %v5606_v44 = vld [vmem:[#allocation4 + $0xa0] sm:$0xff] }
 0x5b5   : > { %v4476_v33 = vadd.f32 %v4439_v26, %v4254_v43  ;;  %v4661_v18 = vpop.f32.mrf.mxu2 }
 0x5b7   : > { %v4698_v60 = vadd.f32 %v4661_v18, %v4476_v33 }
 0x5b8   : > { %v4878_v62 = vpop.f32.mrf.mxu3 }
 0x5b9   : > { %v8989_v5 = vadd.f32 %v4878_v62, %v4696_v0 }
 0x5ba   : > { %7213 = vmatmul.msk.bf16.gmra.mxu2 %vm375_vm3, %v8982_v58  ;;  %v4220_v63 = vpop.f32.mrf.mxu0 }
 0x5bb   : > { %v4255_v25 = vadd.f32 %v4220_v63, %v8796_v9  ;;  %v5607_v9 = vld [vmem:[#allocation4 + $0xa8] sm:$0xff] }
 0x5bc   : > { %v4442_v24 = vpop.f32.mrf.mxu1  ;;  %v9012_v33 = vpack.c.bf16 %v5607_v9, %v5606_v44 }
 0x5bd   : > { %7229 = vmatmul.msk.bf16.gmra.mxu3 %vm375_vm3, %v8982_v58  ;;  %v4477_v7 = vadd.f32 %v4442_v24, %v4255_v25  ;;  %v4664_v61 = vpop.f32.mrf.mxu2  ;;  %v4941_v25 = vld [vmem:[#allocation3 + $0xde] sm:$0xff] }
 0x5bf   : > { %7196 = vmatmul.msk.bf16.gmra.mxu1 %vm375_vm3, %v8967_v42  ;;  %v4699_v49 = vadd.f32 %v4664_v61, %v4477_v7  ;;  %v4942_v7 = vld [vmem:[#allocation3 + $0xe6] sm:$0xff] }
 0x5c0   : > { %v4881_v16 = vpop.f32.mrf.mxu3 }
 0x5c1   : > { %v8995_v36 = vadd.f32 %v4881_v16, %v4697_v23  ;;  %v4963_v23 = vpack.c.bf16 %v4940_v20, %v4939_v59  ;;  %v4964_v59 = vpack.c.bf16 %v4942_v7, %v4941_v25 }
 0x5c2   : > { %v4222_v21 = vpop.f32.mrf.mxu0 }
 0x5c3   : > { %v4256_v62 = vadd.f32 %v4222_v21, %v8802_v32 }
 0x5c4   : > { %v4444_v22 = vpop.f32.mrf.mxu1  ;;  %7181 = vmatmul.msk.bf16.gmra.mxu0 %vm375_vm3, %v4963_v23 }
 0x5c5   : > { %v4478_v56 = vadd.f32 %v4444_v22, %v4256_v62  ;;  %v4666_v38 = vpop.f32.mrf.mxu2 }
 0x5c7   : > { %v4700_v43 = vadd.f32 %v4666_v38, %v4478_v56  ;;  %v5608_v56 = vld [vmem:[#allocation4 + $0xb0] sm:$0xff] }
 0x5c8   : > { %v4883_v0 = vpop.f32.mrf.mxu3 }
 0x5c9   : > { %v9004_v39 = vadd.f32 %v4883_v0, %v4698_v60 }
 0x5ca   : > { %7214 = vmatmul.msk.bf16.gmra.mxu2 %vm375_vm3, %v8997_v35  ;;  %v5033_v32 = vpop.f32.mrf.mxu0 }
 0x5cb   : > { %v5113_v41 = vadd.f32 %v5033_v32, %v8807_v31  ;;  %v5609_v31 = vld [vmem:[#allocation4 + $0xb8] sm:$0xff] }
 0x5cc   : > { %v5254_v18 = vpop.f32.mrf.mxu1  ;;  %v9027_v38 = vpack.c.bf16 %v5609_v31, %v5608_v56 }
 0x5cd   : > { %7230 = vmatmul.msk.bf16.gmra.mxu3 %vm375_vm3, %v8997_v35  ;;  %v5334_v16 = vadd.f32 %v5254_v18, %v5113_v41  ;;  %v5477_v60 = vpop.f32.mrf.mxu2 }
 0x5cf   : > { %7197 = vmatmul.msk.bf16.gmra.mxu1 %vm375_vm3, %v8982_v58  ;;  %v5557_v24 = vadd.f32 %v5477_v60, %v5334_v16  ;;  %v4943_v16 = vld [vmem:[#allocation3 + $0xf6] sm:$0xff]  ;;  %v4944_v60 = vld [vmem:[#allocation3 + $0xfe] sm:$0xff] }
 0x5d0   : > { %v4886_v28 = vpop.f32.mrf.mxu3  ;;  %v4965_v7 = vpack.c.bf16 %v4944_v60, %v4943_v16 }
 0x5d1   : > { %v9010_v26 = vadd.f32 %v4886_v28, %v4699_v49 }
 0x5d2   : > { %v5035_v61 = vpop.f32.mrf.mxu0 }
 0x5d3   : > { %v5114_v49 = vadd.f32 %v5035_v61, %v8812_v55 }
 0x5d4   : > { %v5256_v0 = vpop.f32.mrf.mxu1  ;;  %7182 = vmatmul.msk.bf16.gmra.mxu0 %vm375_vm3, %v4964_v59 }
 0x5d5   : > { %v5335_v20 = vadd.f32 %v5256_v0, %v5114_v49  ;;  %v5479_v21 = vpop.f32.mrf.mxu2 }
 0x5d7   : > { %v5558_v23 = vadd.f32 %v5479_v21, %v5335_v20  ;;  %v5610_v21 = vld [vmem:[#allocation4 + $0xc0] sm:$0xff] }
 0x5d8   : > { %v4888_v10 = vpop.f32.mrf.mxu3 }
 0x5d9   : > { %v9019_v63 = vadd.f32 %v4888_v10, %v4700_v43 }
 0x5da   : > { %7215 = vmatmul.msk.bf16.gmra.mxu2 %vm375_vm3, %v9012_v33  ;;  %v5038_v55 = vpop.f32.mrf.mxu0 }
 0x5db   : > { %v5115_v28 = vadd.f32 %v5038_v55, %v8817_v47  ;;  %v5611_v47 = vld [vmem:[#allocation4 + $0xc8] sm:$0xff] }
 0x5dc   : > { %v5259_v9 = vpop.f32.mrf.mxu1  ;;  %v9042_v31 = vpack.c.bf16 %v5611_v47, %v5610_v21  ;;  %v5612_v47 = vld [vmem:[#allocation4 + $0xd0] sm:$0xff] }
 0x5dd   : > { %7231 = vmatmul.msk.bf16.gmra.mxu3 %vm375_vm3, %v9012_v33  ;;  %v5336_v43 = vadd.f32 %v5259_v9, %v5115_v28  ;;  %v5482_v44 = vpop.f32.mrf.mxu2 }
 0x5df   : > { %7198 = vmatmul.msk.bf16.gmra.mxu1 %vm375_vm3, %v8997_v35  ;;  %v5559_v41 = vadd.f32 %v5482_v44, %v5336_v43  ;;  %v4945_v44 = vld [vmem:[#allocation3 + $0x10e] sm:$0xff] }
 0x5e0   : > { %v5700_v22 = vpop.f32.mrf.mxu3 }
 0x5e1   : > { %v9025_v62 = vadd.f32 %v5700_v22, %v5557_v24 }
 0x5e2   : > { %v5040_v10 = vpop.f32.mrf.mxu0 }
 0x5e3   : > { %v5116_v25 = vadd.f32 %v5040_v10, %v8822_v45 }
 0x5e4   : > { %v5261_v24 = vpop.f32.mrf.mxu1  ;;  %7183 = vmatmul.msk.bf16.gmra.mxu0 %vm375_vm3, %v4965_v7 }
 0x5e5   : > { %v5337_v61 = vadd.f32 %v5261_v24, %v5116_v25  ;;  %v5484_v0 = vpop.f32.mrf.mxu2 }
 0x5e7   : > { %v5560_v20 = vadd.f32 %v5484_v0, %v5337_v61 }
 0x5e8   : > { %v5702_v32 = vpop.f32.mrf.mxu3 }
 0x5e9   : > { %v9034_v18 = vadd.f32 %v5702_v32, %v5558_v23  ;;  %v4946_v32 = vld [vmem:[#allocation3 + $0x116] sm:$0xff] }
 0x5ea   : > { %7216 = vmatmul.msk.bf16.gmra.mxu2 %vm375_vm3, %v9027_v38  ;;  %v5043_v45 = vpop.f32.mrf.mxu0  ;;  %v4966_v10 = vpack.c.bf16 %v4946_v32, %v4945_v44 }
 0x5eb   : > { %v5117_v23 = vadd.f32 %v5043_v45, %v8827_v27  ;;  %v5613_v27 = vld [vmem:[#allocation4 + $0xd8] sm:$0xff] }
 0x5ec   : > { %v5264_v22 = vpop.f32.mrf.mxu1 }
 0x5ed   : > { %7232 = vmatmul.msk.bf16.gmra.mxu3 %vm375_vm3, %v9027_v38  ;;  %v5338_v56 = vadd.f32 %v5264_v22, %v5117_v23  ;;  %v5487_v55 = vpop.f32.mrf.mxu2 }
 0x5ef   : > { %7199 = vmatmul.msk.bf16.gmra.mxu1 %vm375_vm3, %v9012_v33  ;;  %v5561_v43 = vadd.f32 %v5487_v55, %v5338_v56 }
 0x5f0   : > { %v5705_v49 = vpop.f32.mrf.mxu3 }
 0x5f1   : > { %v9040_v59 = vadd.f32 %v5705_v49, %v5559_v41  ;;  %v9057_v49 = vpack.c.bf16 %v5613_v27, %v5612_v47 }
 0x5f2   : > { %v5045_v41 = vpop.f32.mrf.mxu0 }
 0x5f3   : > { %v5118_v60 = vadd.f32 %v5045_v41, %v8832_v17 }
 0x5f4   : > { %v5266_v16 = vpop.f32.mrf.mxu1  ;;  %7184 = vmatmul.msk.bf16.gmra.mxu0 %vm375_vm3, %v4966_v10 }
 0x5f5   : > { %v5339_v24 = vadd.f32 %v5266_v16, %v5118_v60  ;;  %v5489_v25 = vpop.f32.mrf.mxu2 }
 0x5f7   : > { %v5562_v0 = vadd.f32 %v5489_v25, %v5339_v24 }
 0x5f8   : > { %v5707_v9 = vpop.f32.mrf.mxu3 }
 0x5f9   : > { %v9049_v28 = vadd.f32 %v5707_v9, %v5560_v20  ;;  %v4947_v9 = vld [vmem:[#allocation3 + $0x126] sm:$0xff] }
 0x5fa   : > { %7217 = vmatmul.msk.bf16.gmra.mxu2 %vm375_vm3, %v9042_v31  ;;  %v5048_v17 = vpop.f32.mrf.mxu0 }
 0x5fb   : > { %v5119_v21 = vadd.f32 %v5048_v17, %v8837_v1  ;;  %v5615_v1 = vld [vmem:[#allocation4 + $0xe8] sm:$0xff] }
 0x5fc   : > { %v5269_v20 = vpop.f32.mrf.mxu1 }
 0x5fd   : > { %7233 = vmatmul.msk.bf16.gmra.mxu3 %vm375_vm3, %v9042_v31  ;;  %v5340_v45 = vadd.f32 %v5269_v20, %v5119_v21  ;;  %v5492_v22 = vpop.f32.mrf.mxu2 }
 0x5ff   : > { %7200 = vmatmul.msk.bf16.gmra.mxu1 %vm375_vm3, %v9027_v38  ;;  %v5563_v55 = vadd.f32 %v5492_v22, %v5340_v45 }
 0x600   : > { %v5710_v7 = vpop.f32.mrf.mxu3 }
 0x601   : > { %v9055_v61 = vadd.f32 %v5710_v7, %v5561_v43  ;;  %v4948_v43 = vld [vmem:[#allocation3 + $0x12e] sm:$0xff]  ;;  %v5614_v7 = vld [vmem:[#allocation4 + $0xe0] sm:$0xff] }
 0x602   : > { %v5050_v44 = vpop.f32.mrf.mxu0  ;;  %v4967_v16 = vpack.c.bf16 %v4948_v43, %v4947_v9  ;;  %v4950_v9 = vld [vmem:[#allocation3 + $0x146] sm:$0xff] }
 0x603   : > { %v5120_v41 = vadd.f32 %v5050_v44, %v8842_v40 }
 0x604   : > { %v5271_v32 = vpop.f32.mrf.mxu1  ;;  %7185 = vmatmul.msk.bf16.gmra.mxu0 %vm375_vm3, %v4967_v16 }
 0x605   : > { %v5341_v60 = vadd.f32 %v5271_v32, %v5120_v41  ;;  %v5494_v10 = vpop.f32.mrf.mxu2 }
 0x607   : > { %v5564_v27 = vadd.f32 %v5494_v10, %v5341_v60 }
 0x608   : > { %v5712_v23 = vpop.f32.mrf.mxu3 }
 0x609   : > { %v9064_v56 = vadd.f32 %v5712_v23, %v5562_v0  ;;  %v9072_v0 = vpack.c.bf16 %v5615_v1, %v5614_v7 }
 0x60a   : > { %7218 = vmatmul.msk.bf16.gmra.mxu2 %vm375_vm3, %v9057_v49  ;;  %v5053_v40 = vpop.f32.mrf.mxu0 }
 0x60b   : > { %v5121_v17 = vadd.f32 %v5053_v40, %v8847_v14  ;;  %v5617_v14 = vld [vmem:[#allocation4 + $0xf8] sm:$0xff] }
 0x60c   : > { %v5274_v47 = vpop.f32.mrf.mxu1 }
 0x60d   : > { %7234 = vmatmul.msk.bf16.gmra.mxu3 %vm375_vm3, %v9057_v49  ;;  %v5342_v20 = vadd.f32 %v5274_v47, %v5121_v17  ;;  %v5497_v21 = vpop.f32.mrf.mxu2 }
 0x60f   : > { %7201 = vmatmul.msk.bf16.gmra.mxu1 %vm375_vm3, %v9042_v31  ;;  %v5565_v23 = vadd.f32 %v5497_v21, %v5342_v20 }
 0x610   : > { %v5715_v24 = vpop.f32.mrf.mxu3 }
 0x611   : > { %v9070_v25 = vadd.f32 %v5715_v24, %v5563_v55  ;;  %v4949_v55 = vld [vmem:[#allocation3 + $0x13e] sm:$0xff] }
 0x612   : > { %v5055_v43 = vpop.f32.mrf.mxu0  ;;  %v4968_v41 = vpack.c.bf16 %v4950_v9, %v4949_v55  ;;  %v4951_v55 = vld [vmem:[#allocation3 + $0x156] sm:$0xff]  ;;  %v4952_v9 = vld [vmem:[#allocation3 + $0x15e] sm:$0xff] }
 0x613   : > { %v5122_v32 = vadd.f32 %v5055_v43, %v8852_v11 }
 0x614   : > { %v5276_v44 = vpop.f32.mrf.mxu1  ;;  %7186 = vmatmul.msk.bf16.gmra.mxu0 %vm375_vm3, %v4968_v41  ;;  %v4969_v41 = vpack.c.bf16 %v4952_v9, %v4951_v55  ;;  %v4953_v9 = vld [vmem:[#allocation3 + $0x16e] sm:$0xff] }
 0x615   : > { %v5343_v16 = vadd.f32 %v5276_v44, %v5122_v32  ;;  %v5499_v60 = vpop.f32.mrf.mxu2 }
 0x617   : > { %v5566_v24 = vadd.f32 %v5499_v60, %v5343_v16 }
 0x618   : > { %v5717_v45 = vpop.f32.mrf.mxu3 }
 0x619   : > { %v9079_v22 = vadd.f32 %v5717_v45, %v5564_v27  ;;  %v5616_v27 = vld [vmem:[#allocation4 + $0xf0] sm:$0xff] }
 0x61a   : > { %7219 = vmatmul.msk.bf16.gmra.mxu2 %vm375_vm3, %v9072_v0  ;;  %v9087_v7 = vpack.c.bf16 %v5617_v14, %v5616_v27  ;;  %v5058_v11 = vpop.f32.mrf.mxu0  ;;  %v5618_v27 = vld [vmem:[#allocation4 + $0x100] sm:$0xff] }
 0x61b   : > { %v5123_v47 = vadd.f32 %v5058_v11, %v8857_v30  ;;  %v5619_v30 = vld [vmem:[#allocation4 + $0x108] sm:$0xff] }
 0x61c   : > { %v5279_v40 = vpop.f32.mrf.mxu1  ;;  %v9102_v11 = vpack.c.bf16 %v5619_v30, %v5618_v27 }
 0x61d   : > { %7235 = vmatmul.msk.bf16.gmra.mxu3 %vm375_vm3, %v9072_v0  ;;  %v5344_v17 = vadd.f32 %v5279_v40, %v5123_v47  ;;  %v5502_v20 = vpop.f32.mrf.mxu2 }
 0x61f   : > { %7202 = vmatmul.msk.bf16.gmra.mxu1 %vm375_vm3, %v9057_v49 }
 0x620   : > { %v5720_v10 = vpop.f32.mrf.mxu3 }
 0x621   : > { %v9085_v1 = vadd.f32 %v5720_v10, %v5565_v23  ;;  %v5567_v23 = vadd.f32 %v5502_v20, %v5344_v17 }
 0x622   : > { %v5060_v43 = vpop.f32.mrf.mxu0 }
 0x623   : > { %v5124_v32 = vadd.f32 %v5060_v43, %v8862_v15  ;;  %v4954_v43 = vld [vmem:[#allocation3 + $0x176] sm:$0xff] }
 0x624   : > { %v5281_v44 = vpop.f32.mrf.mxu1  ;;  %7187 = vmatmul.msk.bf16.gmra.mxu0 %vm375_vm3, %v4969_v41 }
 0x625   : > { %v5345_v16 = vadd.f32 %v5281_v44, %v5124_v32  ;;  %v5504_v60 = vpop.f32.mrf.mxu2 }
 0x628   : > { %v5722_v21 = vpop.f32.mrf.mxu3 }
 0x629   : > { %v9094_v45 = vadd.f32 %v5722_v21, %v5566_v24  ;;  %v5568_v24 = vadd.f32 %v5504_v60, %v5345_v16  ;;  %v4970_v16 = vpack.c.bf16 %v4954_v43, %v4953_v9 }
 0x62a   : > { %7220 = vmatmul.msk.bf16.gmra.mxu2 %vm375_vm3, %v9087_v7  ;;  %v5063_v15 = vpop.f32.mrf.mxu0 }
 0x62b   : > { %v5125_v47 = vadd.f32 %v5063_v15, %v8883_v6 }
 0x62c   : > { %v5284_v40 = vpop.f32.mrf.mxu1 }
 0x62d   : > { %7236 = vmatmul.msk.bf16.gmra.mxu3 %vm375_vm3, %v9087_v7  ;;  %v5346_v17 = vadd.f32 %v5284_v40, %v5125_v47  ;;  %v5507_v20 = vpop.f32.mrf.mxu2 }
 0x62f   : > { %7203 = vmatmul.msk.bf16.gmra.mxu1 %vm375_vm3, %v9072_v0 }
 0x630   : > { %v5725_v14 = vpop.f32.mrf.mxu3 }
 0x631   : > { %v9100_v10 = vadd.f32 %v5725_v14, %v5567_v23  ;;  %v5569_v23 = vadd.f32 %v5507_v20, %v5346_v17  ;;  %v5621_v20 = vld [vmem:[#allocation4 + $0x118] sm:$0xff] }
 0x632   : > { %v5065_v44 = vpop.f32.mrf.mxu0 }
 0x633   : > { %v5126_v41 = vadd.f32 %v5065_v44, %v8891_v37 }
 0x634   : > { %v5286_v32 = vpop.f32.mrf.mxu1  ;;  %7188 = vmatmul.msk.bf16.gmra.mxu0 %vm375_vm3, %v4970_v16 }
 0x635   : > { %v5347_v60 = vadd.f32 %v5286_v32, %v5126_v41  ;;  %v5509_v30 = vpop.f32.mrf.mxu2 }
 0x638   : > { %v5727_v21 = vpop.f32.mrf.mxu3 }
 0x639   : > { %v9109_v55 = vadd.f32 %v5727_v21, %v5568_v24  ;;  %v5570_v24 = vadd.f32 %v5509_v30, %v5347_v60 }
 0x63a   : > { %7221 = vmatmul.msk.bf16.gmra.mxu2 %vm375_vm3, %v9102_v11  ;;  %v5068_v27 = vpop.f32.mrf.mxu0 }
 0x63b   : > { %v5127_v37 = vadd.f32 %v5068_v27, %v8896_v50 }
 0x63c   : > { %v5289_v15 = vpop.f32.mrf.mxu1 }
 0x63d   : > { %7237 = vmatmul.msk.bf16.gmra.mxu3 %vm375_vm3, %v9102_v11  ;;  %v5348_v40 = vadd.f32 %v5289_v15, %v5127_v37  ;;  %v5512_v47 = vpop.f32.mrf.mxu2 }
 0x63f   : > { %7204 = vmatmul.msk.bf16.gmra.mxu1 %vm375_vm3, %v9087_v7  ;;  %v5571_v9 = vadd.f32 %v5512_v47, %v5348_v40 }
 0x640   : > { %v5730_v6 = vpop.f32.mrf.mxu3 }
 0x641   : > { %v9115_v14 = vadd.f32 %v5730_v6, %v5569_v23  ;;  %v5620_v23 = vld [vmem:[#allocation4 + $0x110] sm:$0xff] }
 0x642   : > { %v9124_v43 = vpack.c.bf16 %v5621_v20, %v5620_v23  ;;  %v5070_v44 = vpop.f32.mrf.mxu0 }
 0x643   : > { %v5128_v41 = vadd.f32 %v5070_v44, %v8901_v52 }
 0x644   : > { %v5291_v32 = vpop.f32.mrf.mxu1  ;;  %7240 = vmatmul.msk.bf16.vlgmr.msra.gmra.mxu0 %vm375_vm3, %v8908_v46 }
 0x645   : > { %v5349_v16 = vadd.f32 %v5291_v32, %v5128_v41  ;;  %v5514_v60 = vpop.f32.mrf.mxu2 }
 0x647   : > { %v5572_v6 = vadd.f32 %v5514_v60, %v5349_v16 }
 0x648   : > { %v5732_v17 = vpop.f32.mrf.mxu3 }
 0x649   : > { %v9122_v21 = vadd.f32 %v5732_v17, %v5570_v24 }
 0x64a   : > { %7274 = vmatmul.msk.bf16.vlgmr.msra.gmra.mxu2 %vm375_vm3, %v8937_v48  ;;  %v5073_v24 = vpop.f32.mrf.mxu0 }
 0x64b   : > { %v5129_v52 = vadd.f32 %v5073_v24, %v8906_v4 }
 0x64c   : > { %v5294_v27 = vpop.f32.mrf.mxu1 }
 0x64d   : > { %7238 = vmatmul.msk.bf16.gmra.mxu3 %vm375_vm3, %v9124_v43  ;;  %v5350_v15 = vadd.f32 %v5294_v27, %v5129_v52  ;;  %v5517_v37 = vpop.f32.mrf.mxu2 }
 0x64f   : > { %7257 = vmatmul.msk.bf16.vlgmr.msra.gmra.mxu1 %vm375_vm3, %v8923_v34  ;;  %v5573_v46 = vadd.f32 %v5517_v37, %v5350_v15 }
 0x650   : > { %v5735_v50 = vpop.f32.mrf.mxu3 }
 0x651   : > { %v9131_v30 = vadd.f32 %v5735_v50, %v5571_v9 }
 0x652   : > { %v5075_v17 = vpop.f32.mrf.mxu0 }
 0x653   : > { %v5130_v9 = vadd.f32 %v5075_v17, %v8915_v2 }
 0x654   : > { %v5296_v20 = vpop.f32.mrf.mxu1  ;;  %7241 = vmatmul.msk.bf16.gmra.mxu0 %vm375_vm3, %v8923_v34 }
 0x655   : > { %v5351_v23 = vadd.f32 %v5296_v20, %v5130_v9  ;;  %v5519_v44 = vpop.f32.mrf.mxu2 }
 0x657   : > { %v5574_v41 = vadd.f32 %v5519_v44, %v5351_v23 }
 0x658   : > { %v5737_v40 = vpop.f32.mrf.mxu3 }
 0x659   : > { %v9138_v47 = vadd.f32 %v5737_v40, %v5572_v6 }
 0x65a   : > { %7275 = vmatmul.msk.bf16.gmra.mxu2 %vm375_vm3, %v8952_v8  ;;  %v5078_v16 = vpop.f32.mrf.mxu0 }
 0x65b   : > { %v5131_v2 = vadd.f32 %v5078_v16, %v8921_v19 }
 0x65c   : > { %v5299_v60 = vpop.f32.mrf.mxu1 }
 0x65d   : > { %7291 = vmatmul.msk.bf16.vlgmr.msra.gmra.mxu3 %vm375_vm3, %v8952_v8  ;;  %v5352_v50 = vadd.f32 %v5299_v60, %v5131_v2  ;;  %v5522_v6 = vpop.f32.mrf.mxu2 }
 0x65f   : > { %7258 = vmatmul.msk.bf16.gmra.mxu1 %vm375_vm3, %v8937_v48  ;;  %v5575_v34 = vadd.f32 %v5522_v6, %v5352_v50 }
 0x660   : > { %v5740_v32 = vpop.f32.mrf.mxu3 }
 0x661   : > { %v9145_v4 = vadd.f32 %v5740_v32, %v5573_v46 }
 0x662   : > { %v5080_v52 = vpop.f32.mrf.mxu0 }
 0x663   : > { %v5132_v37 = vadd.f32 %v5080_v52, %v8929_v57 }
 0x664   : > { %v5301_v15 = vpop.f32.mrf.mxu1  ;;  %7242 = vmatmul.msk.bf16.gmra.mxu0 %vm375_vm3, %v8937_v48 }
 0x665   : > { %v5353_v40 = vadd.f32 %v5301_v15, %v5132_v37  ;;  %v5524_v46 = vpop.f32.mrf.mxu2 }
 0x667   : > { %v5576_v20 = vadd.f32 %v5524_v46, %v5353_v40 }
 0x668   : > { %v5742_v24 = vpop.f32.mrf.mxu3 }
 0x669   : > { %v9152_v27 = vadd.f32 %v5742_v24, %v5574_v41 }
 0x66a   : > { %7276 = vmatmul.msk.bf16.gmra.mxu2 %vm375_vm3, %v8967_v42  ;;  %v5083_v9 = vpop.f32.mrf.mxu0 }
 0x66b   : > { %v5133_v57 = vadd.f32 %v5083_v9, %v8935_v13 }
 0x66c   : > { %v5304_v23 = vpop.f32.mrf.mxu1 }
 0x66d   : > { %7292 = vmatmul.msk.bf16.gmra.mxu3 %vm375_vm3, %v8967_v42  ;;  %v5354_v44 = vadd.f32 %v5304_v23, %v5133_v57  ;;  %v5527_v32 = vpop.f32.mrf.mxu2 }
 0x66f   : > { %7259 = vmatmul.msk.bf16.gmra.mxu1 %vm375_vm3, %v8952_v8  ;;  %v5577_v48 = vadd.f32 %v5527_v32, %v5354_v44 }
 0x670   : > { %v5745_v17 = vpop.f32.mrf.mxu3 }
 0x671   : > { %v9159_v19 = vadd.f32 %v5745_v17, %v5575_v34 }
 0x672   : > { %v5085_v60 = vpop.f32.mrf.mxu0 }
 0x673   : > { %v5134_v50 = vadd.f32 %v5085_v60, %v8944_v53 }
 0x674   : > { %v5306_v2 = vpop.f32.mrf.mxu1  ;;  %7243 = vmatmul.msk.bf16.gmra.mxu0 %vm375_vm3, %v8952_v8 }
 0x675   : > { %v5355_v6 = vadd.f32 %v5306_v2, %v5134_v50  ;;  %v5529_v24 = vpop.f32.mrf.mxu2 }
 0x677   : > { %v5578_v52 = vadd.f32 %v5529_v24, %v5355_v6 }
 0x678   : > { %v5747_v41 = vpop.f32.mrf.mxu3 }
 0x679   : > { %v9166_v16 = vadd.f32 %v5747_v41, %v5576_v20 }
 0x67a   : > { %7277 = vmatmul.msk.bf16.gmra.mxu2 %vm375_vm3, %v8982_v58  ;;  %v5088_v15 = vpop.f32.mrf.mxu0 }
 0x67b   : > { %v5135_v53 = vadd.f32 %v5088_v15, %v8950_v51 }
 0x67c   : > { %v5309_v37 = vpop.f32.mrf.mxu1 }
 0x67d   : > { %7293 = vmatmul.msk.bf16.gmra.mxu3 %vm375_vm3, %v8982_v58  ;;  %v5356_v40 = vadd.f32 %v5309_v37, %v5135_v53  ;;  %v5532_v46 = vpop.f32.mrf.mxu2 }
 0x67f   : > { %7260 = vmatmul.msk.bf16.gmra.mxu1 %vm375_vm3, %v8967_v42  ;;  %v5579_v8 = vadd.f32 %v5532_v46, %v5356_v40 }
 0x680   : > { %v5750_v34 = vpop.f32.mrf.mxu3 }
 0x681   : > { %v9173_v13 = vadd.f32 %v5750_v34, %v5577_v48 }
 0x682   : > { %v5090_v9 = vpop.f32.mrf.mxu0 }
 0x683   : > { %v5136_v57 = vadd.f32 %v5090_v9, %v8959_v12 }
 0x684   : > { %v5311_v23 = vpop.f32.mrf.mxu1  ;;  %7244 = vmatmul.msk.bf16.gmra.mxu0 %vm375_vm3, %v8967_v42 }
 0x685   : > { %v5357_v44 = vadd.f32 %v5311_v23, %v5136_v57  ;;  %v5534_v32 = vpop.f32.mrf.mxu2 }
 0x687   : > { %v5580_v48 = vadd.f32 %v5534_v32, %v5357_v44 }
 0x688   : > { %v5752_v17 = vpop.f32.mrf.mxu3 }
 0x689   : > { %v9180_v20 = vadd.f32 %v5752_v17, %v5578_v52 }
 0x68a   : > { %7278 = vmatmul.msk.bf16.gmra.mxu2 %vm375_vm3, %v8997_v35  ;;  %v5093_v60 = vpop.f32.mrf.mxu0 }
 0x68b   : > { %v5137_v12 = vadd.f32 %v5093_v60, %v8965_v3 }
 0x68c   : > { %v5314_v2 = vpop.f32.mrf.mxu1 }
 0x68d   : > { %7294 = vmatmul.msk.bf16.gmra.mxu3 %vm375_vm3, %v8997_v35  ;;  %v5358_v50 = vadd.f32 %v5314_v2, %v5137_v12  ;;  %v5537_v6 = vpop.f32.mrf.mxu2 }
 0x68f   : > { %7261 = vmatmul.msk.bf16.gmra.mxu1 %vm375_vm3, %v8982_v58  ;;  %v5581_v42 = vadd.f32 %v5537_v6, %v5358_v50 }
 0x690   : > { %v5755_v41 = vpop.f32.mrf.mxu3 }
 0x691   : > { %v9187_v51 = vadd.f32 %v5755_v41, %v5579_v8 }
 0x692   : > { %v5095_v52 = vpop.f32.mrf.mxu0 }
 0x693   : > { %v5138_v37 = vadd.f32 %v5095_v52, %v8974_v29 }
 0x694   : > { %v5316_v15 = vpop.f32.mrf.mxu1  ;;  %7245 = vmatmul.msk.bf16.gmra.mxu0 %vm375_vm3, %v8982_v58 }
 0x695   : > { %v5359_v53 = vadd.f32 %v5316_v15, %v5138_v37  ;;  %v5539_v40 = vpop.f32.mrf.mxu2 }
 0x697   : > { %v5582_v17 = vadd.f32 %v5539_v40, %v5359_v53 }
 0x698   : > { %v5757_v24 = vpop.f32.mrf.mxu3 }
 0x699   : > { %v9194_v34 = vadd.f32 %v5757_v24, %v5580_v48 }
 0x69a   : > { %7279 = vmatmul.msk.bf16.gmra.mxu2 %vm375_vm3, %v9012_v33  ;;  %v5098_v8 = vpop.f32.mrf.mxu0 }
 0x69b   : > { %v5139_v29 = vadd.f32 %v5098_v8, %v8980_v54 }
 0x69c   : > { %v5319_v9 = vpop.f32.mrf.mxu1 }
 0x69d   : > { %7295 = vmatmul.msk.bf16.gmra.mxu3 %vm375_vm3, %v9012_v33  ;;  %v5360_v23 = vadd.f32 %v5319_v9, %v5139_v29  ;;  %v5542_v57 = vpop.f32.mrf.mxu2 }
 0x69f   : > { %7262 = vmatmul.msk.bf16.gmra.mxu1 %vm375_vm3, %v8997_v35  ;;  %v5583_v58 = vadd.f32 %v5542_v57, %v5360_v23 }
 0x6a0   : > { %v5760_v46 = vpop.f32.mrf.mxu3 }
 0x6a1   : > { %v9201_v3 = vadd.f32 %v5760_v46, %v5581_v42 }
 0x6a2   : > { %v5100_v41 = vpop.f32.mrf.mxu0 }
 0x6a3   : > { %v5140_v60 = vadd.f32 %v5100_v41, %v8989_v5 }
 0x6a4   : > { %v5321_v48 = vpop.f32.mrf.mxu1  ;;  %7246 = vmatmul.msk.bf16.gmra.mxu0 %vm375_vm3, %v8997_v35 }
 0x6a5   : > { %v5361_v2 = vadd.f32 %v5321_v48, %v5140_v60  ;;  %v5544_v12 = vpop.f32.mrf.mxu2 }
 0x6a7   : > { %v5584_v6 = vadd.f32 %v5544_v12, %v5361_v2 }
 0x6a8   : > { %v5762_v44 = vpop.f32.mrf.mxu3 }
 0x6a9   : > { %v9208_v32 = vadd.f32 %v5762_v44, %v5582_v17 }
 0x6aa   : > { %7280 = vmatmul.msk.bf16.gmra.mxu2 %vm375_vm3, %v9027_v38  ;;  %v5103_v24 = vpop.f32.mrf.mxu0 }
 0x6ab   : > { %v5141_v5 = vadd.f32 %v5103_v24, %v8995_v36 }
 0x6ac   : > { %v5324_v42 = vpop.f32.mrf.mxu1 }
 0x6ad   : > { %7296 = vmatmul.msk.bf16.gmra.mxu3 %vm375_vm3, %v9027_v38  ;;  %v5362_v52 = vadd.f32 %v5324_v42, %v5141_v5  ;;  %v5547_v15 = vpop.f32.mrf.mxu2 }
 0x6af   : > { %7263 = vmatmul.msk.bf16.gmra.mxu1 %vm375_vm3, %v9012_v33  ;;  %v5585_v35 = vadd.f32 %v5547_v15, %v5362_v52 }
 0x6b0   : > { %v5765_v50 = vpop.f32.mrf.mxu3 }
 0x6b1   : > { %v9215_v54 = vadd.f32 %v5765_v50, %v5583_v58 }
 0x6b2   : > { %v5105_v40 = vpop.f32.mrf.mxu0 }
 0x6b3   : > { %v5142_v17 = vadd.f32 %v5105_v40, %v9004_v39 }
 0x6b4   : > { %v5326_v46 = vpop.f32.mrf.mxu1  ;;  %7247 = vmatmul.msk.bf16.gmra.mxu0 %vm375_vm3, %v9012_v33 }
 0x6b5   : > { %v5363_v8 = vadd.f32 %v5326_v46, %v5142_v17  ;;  %v5549_v9 = vpop.f32.mrf.mxu2 }
 0x6b7   : > { %v5586_v23 = vadd.f32 %v5549_v9, %v5363_v8  ;;  %v9257_v9 = vld [vmem:[%s9453_s7] ss:$0 sm:$0xff] }
 0x6b8   : > { %v5767_v37 = vpop.f32.mrf.mxu3 }
 0x6b9   : > { %v9222_v53 = vadd.f32 %v5767_v37, %v5584_v6 }
 0x6ba   : > { %7281 = vmatmul.msk.bf16.gmra.mxu2 %vm375_vm3, %v9042_v31  ;;  %v5108_v57 = vpop.f32.mrf.mxu0 }
 0x6bb   : > { %v5143_v39 = vadd.f32 %v5108_v57, %v9010_v26 }
 0x6bc   : > { %v5329_v44 = vpop.f32.mrf.mxu1 }
 0x6bd   : > { %7297 = vmatmul.msk.bf16.gmra.mxu3 %vm375_vm3, %v9042_v31  ;;  %v5364_v58 = vadd.f32 %v5329_v44, %v5143_v39  ;;  %v5552_v41 = vpop.f32.mrf.mxu2 }
 0x6bf   : > { %7264 = vmatmul.msk.bf16.gmra.mxu1 %vm375_vm3, %v9027_v38  ;;  %v5587_v33 = vadd.f32 %v5552_v41, %v5364_v58 }
 0x6c0   : > { %v5770_v29 = vpop.f32.mrf.mxu3 }
 0x6c1   : > { %v9229_v36 = vadd.f32 %v5770_v29, %v5585_v35 }
 0x6c2   : > { %v5110_v2 = vpop.f32.mrf.mxu0 }
 0x6c3   : > { %v5144_v50 = vadd.f32 %v5110_v2, %v9019_v63 }
 0x6c4   : > { %v5331_v12 = vpop.f32.mrf.mxu1  ;;  %7248 = vmatmul.msk.bf16.gmra.mxu0 %vm375_vm3, %v9027_v38 }
 0x6c5   : > { %v5365_v6 = vadd.f32 %v5331_v12, %v5144_v50  ;;  %v5554_v24 = vpop.f32.mrf.mxu2 }
 0x6c7   : > { %v5588_v5 = vadd.f32 %v5554_v24, %v5365_v6 }
 0x6c8   : > { %v5772_v48 = vpop.f32.mrf.mxu3 }
 0x6c9   : > { %v9236_v60 = vadd.f32 %v5772_v48, %v5586_v23 }
 0x6ca   : > { %7282 = vmatmul.msk.bf16.gmra.mxu2 %vm375_vm3, %v9057_v49  ;;  %v5922_v52 = vpop.f32.mrf.mxu0 }
 0x6cb   : > { %v6002_v35 = vadd.f32 %v5922_v52, %v9025_v62 }
 0x6cc   : > { %v6145_v15 = vpop.f32.mrf.mxu1 }
 0x6cd   : > { %7298 = vmatmul.msk.bf16.gmra.mxu3 %vm375_vm3, %v9057_v49  ;;  %v6368_v63 = vpop.f32.mrf.mxu2  ;;  %v6225_v17 = vadd.f32 %v6145_v15, %v6002_v35 }
 0x6cf   : > { %7265 = vmatmul.msk.bf16.gmra.mxu1 %vm375_vm3, %v9042_v31  ;;  %v6448_v8 = vadd.f32 %v6368_v63, %v6225_v17 }
 0x6d0   : > { %v5775_v42 = vpop.f32.mrf.mxu3 }
 0x6d1   : > { %v9243_v26 = vadd.f32 %v5775_v42, %v5587_v33 }
 0x6d2   : > { %v5924_v38 = vpop.f32.mrf.mxu0 }
 0x6d3   : > { %v6003_v62 = vadd.f32 %v5924_v38, %v9034_v18 }
 0x6d4   : > { %v6147_v46 = vpop.f32.mrf.mxu1  ;;  %7249 = vmatmul.msk.bf16.gmra.mxu0 %vm375_vm3, %v9042_v31 }
 0x6d5   : > { %v6370_v29 = vpop.f32.mrf.mxu2  ;;  %v6226_v18 = vadd.f32 %v6147_v46, %v6003_v62 }
 0x6d7   : > { %v6449_v31 = vadd.f32 %v6370_v29, %v6226_v18 }
 0x6d8   : > { %v5777_v37 = vpop.f32.mrf.mxu3 }
 0x6d9   : > { %v9250_v40 = vadd.f32 %v5777_v37, %v5588_v5 }
 0x6da   : > { %7283 = vmatmul.msk.bf16.gmra.mxu2 %vm375_vm3, %v9072_v0  ;;  %v5927_v39 = vpop.f32.mrf.mxu0 }
 0x6db   : > { %v6004_v33 = vadd.f32 %v5927_v39, %v9040_v59 }
 0x6dc   : > { %v6150_v58 = vpop.f32.mrf.mxu1 }
 0x6dd   : > { %7299 = vmatmul.msk.bf16.gmra.mxu3 %vm375_vm3, %v9072_v0  ;;  %v6373_v41 = vpop.f32.mrf.mxu2  ;;  %v6227_v24 = vadd.f32 %v6150_v58, %v6004_v33 }
 0x6df   : > { %7266 = vmatmul.msk.bf16.gmra.mxu1 %vm375_vm3, %v9057_v49  ;;  %v6450_v42 = vadd.f32 %v6373_v41, %v6227_v24 }
 0x6e0   : > { %v6591_v23 = vpop.f32.mrf.mxu3 }
 0x6e1   : > { %v6671_v57 = vadd.f32 %v6591_v23, %v6448_v8 }
 0x6e2   : > { %v5929_v50 = vpop.f32.mrf.mxu0 }
 0x6e3   : > { %v6707_v44 = vadd.f32 %v9257_v9, %v6671_v57  ;;  %v6005_v59 = vadd.f32 %v5929_v50, %v9049_v28 }
 0x6e4   : > { %v6152_v6 = vpop.f32.mrf.mxu1  ;;  %7250 = vmatmul.msk.bf16.gmra.mxu0 %vm375_vm3, %v9057_v49 }
 0x6e5   : > { %6739 = vst.msk [vmem:[%s9267_s21] sm:$0xff] %vm375_vm3, %v6707_v44  ;;  %v6375_v5 = vpop.f32.mrf.mxu2  ;;  %v6228_v38 = vadd.f32 %v6152_v6, %v6005_v59 }
 0x6e7   : > { %v6451_v46 = vadd.f32 %v6375_v5, %v6228_v38 }
 0x6e8   : > { %v6593_v48 = vpop.f32.mrf.mxu3 }
 0x6e9   : > { %v6672_v2 = vadd.f32 %v6593_v48, %v6449_v31 }
 0x6ea   : > { %7284 = vmatmul.msk.bf16.gmra.mxu2 %vm375_vm3, %v9087_v7  ;;  %v5932_v37 = vpop.f32.mrf.mxu0 }
 0x6eb   : > { %v6708_v12 = vadd.f32 %v9257_v9, %v6672_v2  ;;  %v6006_v28 = vadd.f32 %v5932_v37, %v9055_v61 }
 0x6ec   : > { %v6155_v35 = vpop.f32.mrf.mxu1 }
 0x6ed   : > { %6740 = vst.msk [vmem:[%s9267_s21 + $0x8] sm:$0xff] %vm375_vm3, %v6708_v12  ;;  %7300 = vmatmul.msk.bf16.gmra.mxu3 %vm375_vm3, %v9087_v7  ;;  %v6378_v49 = vpop.f32.mrf.mxu2  ;;  %v6229_v57 = vadd.f32 %v6155_v35, %v6006_v28  ;;  %v6505_v35 = vld [vmem:[#allocation4 + $0x120] sm:$0xff] }
 0x6ef   : > { %7267 = vmatmul.msk.bf16.gmra.mxu1 %vm375_vm3, %v9072_v0  ;;  %v6452_v44 = vadd.f32 %v6378_v49, %v6229_v57 }
 0x6f0   : > { %v6596_v52 = vpop.f32.mrf.mxu3 }
 0x6f1   : > { %v6673_v15 = vadd.f32 %v6596_v52, %v6450_v42 }
 0x6f2   : > { %v5934_v23 = vpop.f32.mrf.mxu0 }
 0x6f3   : > { %v6709_v63 = vadd.f32 %v9257_v9, %v6673_v15  ;;  %v6007_v61 = vadd.f32 %v5934_v23, %v9064_v56  ;;  %v6506_v15 = vld [vmem:[#allocation4 + $0x128] sm:$0xff] }
 0x6f4   : > { %v6157_v62 = vpop.f32.mrf.mxu1  ;;  %7251 = vmatmul.msk.bf16.gmra.mxu0 %vm375_vm3, %v9072_v0  ;;  %v9317_v38 = vpack.c.bf16 %v6506_v15, %v6505_v35 }
 0x6f5   : > { %6741 = vst.msk [vmem:[%s9267_s21 + $0x10] sm:$0xff] %vm375_vm3, %v6709_v63  ;;  %v6380_v39 = vpop.f32.mrf.mxu2  ;;  %v6230_v33 = vadd.f32 %v6157_v62, %v6007_v61 }
 0x6f7   : > { %v6453_v2 = vadd.f32 %v6380_v39, %v6230_v33 }
 0x6f8   : > { %v6598_v17 = vpop.f32.mrf.mxu3 }
 0x6f9   : > { %v6674_v8 = vadd.f32 %v6598_v17, %v6451_v46 }
 0x6fa   : > { %7285 = vmatmul.msk.bf16.gmra.mxu2 %vm375_vm3, %v9102_v11  ;;  %v5937_v41 = vpop.f32.mrf.mxu0 }
 0x6fb   : > { %v6710_v29 = vadd.f32 %v9257_v9, %v6674_v8  ;;  %v6008_v56 = vadd.f32 %v5937_v41, %v9070_v25 }
 0x6fc   : > { %v6160_v48 = vpop.f32.mrf.mxu1 }
 0x6fd   : > { %6742 = vst.msk [vmem:[%s9267_s21 + $0x18] sm:$0xff] %vm375_vm3, %v6710_v29  ;;  %7301 = vmatmul.msk.bf16.gmra.mxu3 %vm375_vm3, %v9102_v11  ;;  %v6383_v0 = vpop.f32.mrf.mxu2  ;;  %v6231_v5 = vadd.f32 %v6160_v48, %v6008_v56 }
 0x6ff   : > { %7268 = vmatmul.msk.bf16.gmra.mxu1 %vm375_vm3, %v9087_v7  ;;  %v6454_v52 = vadd.f32 %v6383_v0, %v6231_v5 }
 0x700   : > { %v6601_v58 = vpop.f32.mrf.mxu3 }
 0x701   : > { %v6675_v18 = vadd.f32 %v6601_v58, %v6452_v44 }
 0x702   : > { %v5939_v24 = vpop.f32.mrf.mxu0 }
 0x703   : > { %v6711_v31 = vadd.f32 %v9257_v9, %v6675_v18  ;;  %v6009_v25 = vadd.f32 %v5939_v24, %v9079_v22  ;;  %v6507_v18 = vld [vmem:[#allocation4 + $0x130] sm:$0xff] }
 0x704   : > { %v6162_v42 = vpop.f32.mrf.mxu1  ;;  %7252 = vmatmul.msk.bf16.gmra.mxu0 %vm375_vm3, %v9087_v7 }
 0x705   : > { %6743 = vst.msk [vmem:[%s9267_s21 + $0x20] sm:$0xff] %vm375_vm3, %v6711_v31  ;;  %v6385_v59 = vpop.f32.mrf.mxu2  ;;  %v6232_v7 = vadd.f32 %v6162_v42, %v6009_v25  ;;  %v6508_v31 = vld [vmem:[#allocation4 + $0x138] sm:$0xff]  ;;  %v6509_v25 = vld [vmem:[#allocation4 + $0x140] sm:$0xff] }
 0x706   : > { %v6526_v33 = vpack.c.bf16 %v6508_v31, %v6507_v18 }
 0x707   : > { %v6455_v28 = vadd.f32 %v6385_v59, %v6232_v7 }
 0x708   : > { %v6603_v12 = vpop.f32.mrf.mxu3 }
 0x709   : > { %v6676_v50 = vadd.f32 %v6603_v12, %v6453_v2 }
 0x70a   : > { %7286 = vmatmul.msk.bf16.gmra.mxu2 %vm375_vm3, %v9124_v43  ;;  %v5942_v49 = vpop.f32.mrf.mxu0 }
 0x70b   : > { %v6712_v6 = vadd.f32 %v9257_v9, %v6676_v50  ;;  %v6010_v29 = vadd.f32 %v5942_v49, %v9085_v1 }
 0x70c   : > { %v6165_v17 = vpop.f32.mrf.mxu1 }
 0x70d   : > { %6744 = vst.msk [vmem:[%s9267_s21 + $0x28] sm:$0xff] %vm375_vm3, %v6712_v6  ;;  %7302 = vmatmul.msk.bf16.gmra.mxu3 %vm375_vm3, %v9124_v43  ;;  %v6388_v22 = vpop.f32.mrf.mxu2  ;;  %v6233_v39 = vadd.f32 %v6165_v17, %v6010_v29 }
 0x70f   : > { %7269 = vmatmul.msk.bf16.gmra.mxu1 %vm375_vm3, %v9102_v11  ;;  %v6456_v58 = vadd.f32 %v6388_v22, %v6233_v39 }
 0x710   : > { %v6606_v63 = vpop.f32.mrf.mxu3 }
 0x711   : > { %v6677_v37 = vadd.f32 %v6606_v63, %v6454_v52 }
 0x712   : > { %v5944_v57 = vpop.f32.mrf.mxu0 }
 0x713   : > { %v6713_v46 = vadd.f32 %v9257_v9, %v6677_v37  ;;  %v6011_v41 = vadd.f32 %v5944_v57, %v9094_v45  ;;  %v6510_v37 = vld [vmem:[#allocation4 + $0x148] sm:$0xff] }
 0x714   : > { %v6167_v44 = vpop.f32.mrf.mxu1  ;;  %7253 = vmatmul.msk.bf16.gmra.mxu0 %vm375_vm3, %v9102_v11  ;;  %v6527_v49 = vpack.c.bf16 %v6510_v37, %v6509_v25 }
 0x715   : > { %6745 = vst.msk [vmem:[%s9267_s21 + $0x30] sm:$0xff] %vm375_vm3, %v6713_v46  ;;  %v6390_v61 = vpop.f32.mrf.mxu2  ;;  %v6234_v56 = vadd.f32 %v6167_v44, %v6011_v41 }
 0x717   : > { %v6457_v11 = vadd.f32 %v6390_v61, %v6234_v56 }
 0x718   : > { %v6608_v8 = vpop.f32.mrf.mxu3 }
 0x719   : > { %v6678_v23 = vadd.f32 %v6608_v8, %v6455_v28 }
 0x71a   : > { %7287 = vmatmul.msk.bf16.gmra.mxu2 %vm375_vm3, %v9317_v38  ;;  %v5947_v0 = vpop.f32.mrf.mxu0 }
 0x71b   : > { %v6714_v62 = vadd.f32 %v9257_v9, %v6678_v23  ;;  %v6012_v45 = vadd.f32 %v5947_v0, %v9100_v10  ;;  %v6511_v0 = vld [vmem:[#allocation4 + $0x150] sm:$0xff] }
 0x71c   : > { %v6170_v12 = vpop.f32.mrf.mxu1 }
 0x71d   : > { %6746 = vst.msk [vmem:[%s9267_s21 + $0x38] sm:$0xff] %vm375_vm3, %v6714_v62  ;;  %7303 = vmatmul.msk.bf16.gmra.mxu3 %vm375_vm3, %v9317_v38  ;;  %v6393_v50 = vpop.f32.mrf.mxu2  ;;  %v6235_v59 = vadd.f32 %v6170_v12, %v6012_v45  ;;  %v6512_v12 = vld [vmem:[#allocation4 + $0x158] sm:$0xff] }
 0x71f   : > { %7270 = vmatmul.msk.bf16.gmra.mxu1 %vm375_vm3, %v9124_v43  ;;  %v6458_v15 = vadd.f32 %v6393_v50, %v6235_v59 }
 0x720   : > { %v6611_v1 = vpop.f32.mrf.mxu3 }
 0x721   : > { %v6679_v48 = vadd.f32 %v6611_v1, %v6456_v58 }
 0x722   : > { %v5949_v5 = vpop.f32.mrf.mxu0 }
 0x723   : > { %v6715_v2 = vadd.f32 %v9257_v9, %v6679_v48  ;;  %v6013_v10 = vadd.f32 %v5949_v5, %v9109_v55 }
 0x724   : > { %v6172_v52 = vpop.f32.mrf.mxu1  ;;  %7254 = vmatmul.msk.bf16.gmra.mxu0 %vm375_vm3, %v9124_v43 }
 0x725   : > { %6747 = vst.msk [vmem:[%s9267_s21 + $0x40] sm:$0xff] %vm375_vm3, %v6715_v2  ;;  %v6395_v63 = vpop.f32.mrf.mxu2  ;;  %v6236_v22 = vadd.f32 %v6172_v52, %v6013_v10 }
 0x727   : > { %v6459_v43 = vadd.f32 %v6395_v63, %v6236_v22 }
 0x728   : > { %v6613_v6 = vpop.f32.mrf.mxu3 }
 0x729   : > { %v6680_v24 = vadd.f32 %v6613_v6, %v6457_v11 }
 0x72a   : > { %7288 = vmatmul.msk.bf16.gmra.mxu2 %vm375_vm3, %v6526_v33  ;;  %v5952_v7 = vpop.f32.mrf.mxu0 }
 0x72b   : > { %v6716_v42 = vadd.f32 %v9257_v9, %v6680_v24  ;;  %v6014_v55 = vadd.f32 %v5952_v7, %v9115_v14 }
 0x72c   : > { %v6175_v28 = vpop.f32.mrf.mxu1 }
 0x72d   : > { %6748 = vst.msk [vmem:[%s9267_s21 + $0x48] sm:$0xff] %vm375_vm3, %v6716_v42  ;;  %7304 = vmatmul.msk.bf16.gmra.mxu3 %vm375_vm3, %v6526_v33  ;;  %v6398_v8 = vpop.f32.mrf.mxu2  ;;  %v6237_v39 = vadd.f32 %v6175_v28, %v6014_v55 }
 0x72f   : > { %7271 = vmatmul.msk.bf16.gmra.mxu1 %vm375_vm3, %v9317_v38  ;;  %v6460_v58 = vadd.f32 %v6398_v8, %v6237_v39 }
 0x730   : > { %v6616_v35 = vpop.f32.mrf.mxu3 }
 0x731   : > { %v6681_v46 = vadd.f32 %v6616_v35, %v6458_v15 }
 0x732   : > { %v5954_v57 = vpop.f32.mrf.mxu0 }
 0x733   : > { %v6717_v17 = vadd.f32 %v9257_v9, %v6681_v46  ;;  %v6015_v31 = vadd.f32 %v5954_v57, %v9122_v21  ;;  %v6528_v21 = vpack.c.bf16 %v6512_v12, %v6511_v0 }
 0x734   : > { %v6177_v44 = vpop.f32.mrf.mxu1  ;;  %7255 = vmatmul.msk.bf16.gmra.mxu0 %vm375_vm3, %v9317_v38 }
 0x735   : > { %6749 = vst.msk [vmem:[%s9267_s21 + $0x50] sm:$0xff] %vm375_vm3, %v6717_v17  ;;  %v6400_v61 = vpop.f32.mrf.mxu2  ;;  %v6238_v2 = vadd.f32 %v6177_v44, %v6015_v31 }
 0x737   : > { %v6461_v56 = vadd.f32 %v6400_v61, %v6238_v2 }
 0x738   : > { %v6618_v29 = vpop.f32.mrf.mxu3 }
 0x739   : > { %v6682_v23 = vadd.f32 %v6618_v29, %v6459_v43 }
 0x73a   : > { %7289 = vmatmul.msk.bf16.gmra.mxu2 %vm375_vm3, %v6527_v49  ;;  %v5957_v41 = vpop.f32.mrf.mxu0 }
 0x73b   : > { %v6718_v62 = vadd.f32 %v9257_v9, %v6682_v23  ;;  %v6016_v38 = vadd.f32 %v5957_v41, %v9131_v30 }
 0x73c   : > { %v6180_v48 = vpop.f32.mrf.mxu1 }
 0x73d   : > { %6750 = vst.msk [vmem:[%s9267_s21 + $0x58] sm:$0xff] %vm375_vm3, %v6718_v62  ;;  %7305 = vmatmul.msk.bf16.gmra.mxu3 %vm375_vm3, %v6527_v49  ;;  %v6403_v11 = vpop.f32.mrf.mxu2  ;;  %v6239_v42 = vadd.f32 %v6180_v48, %v6016_v38 }
 0x73f   : > { %7272 = vmatmul.msk.bf16.gmra.mxu1 %vm375_vm3, %v6526_v33  ;;  %v6462_v5 = vadd.f32 %v6403_v11, %v6239_v42 }
 0x740   : > { %v6621_v18 = vpop.f32.mrf.mxu3 }
 0x741   : > { %v6683_v14 = vadd.f32 %v6621_v18, %v6460_v58 }
 0x742   : > { %v5959_v24 = vpop.f32.mrf.mxu0 }
 0x743   : > { %v6719_v1 = vadd.f32 %v9257_v9, %v6683_v14  ;;  %v6017_v15 = vadd.f32 %v5959_v24, %v9138_v47 }
 0x744   : > { %v6182_v33 = vpop.f32.mrf.mxu1 }
 0x745   : > { %6751 = vst.msk [vmem:[%s9267_s21 + $0x60] sm:$0xff] %vm375_vm3, %v6719_v1  ;;  %v6405_v52 = vpop.f32.mrf.mxu2  ;;  %v6240_v35 = vadd.f32 %v6182_v33, %v6017_v15 }
 0x747   : > { %v6463_v10 = vadd.f32 %v6405_v52, %v6240_v35 }
 0x748   : > { %v6623_v50 = vpop.f32.mrf.mxu3 }
 0x749   : > { %v6684_v6 = vadd.f32 %v6623_v50, %v6461_v56 }
 0x74a   : > { %v5962_v25 = vpop.f32.mrf.mxu0 }
 0x74b   : > { %v6720_v45 = vadd.f32 %v9257_v9, %v6684_v6  ;;  %v6018_v17 = vadd.f32 %v5962_v25, %v9145_v4 }
 0x74c   : > { %v6185_v37 = vpop.f32.mrf.mxu1 }
 0x74d   : > { %6752 = vst.msk [vmem:[%s9267_s21 + $0x68] sm:$0xff] %vm375_vm3, %v6720_v45  ;;  %7306 = vmatmul.msk.bf16.gmra.mxu3 %vm375_vm3, %v6528_v21  ;;  %v6408_v46 = vpop.f32.mrf.mxu2  ;;  %v6241_v43 = vadd.f32 %v6185_v37, %v6018_v17 }
 0x74f   : > { %v6464_v8 = vadd.f32 %v6408_v46, %v6241_v43 }
 0x750   : > { %v6626_v59 = vpop.f32.mrf.mxu3 }
 0x751   : > { %v6685_v63 = vadd.f32 %v6626_v59, %v6462_v5 }
 0x752   : > { %v5964_v22 = vpop.f32.mrf.mxu0 }
 0x753   : > { %v6721_v30 = vadd.f32 %v9257_v9, %v6685_v63  ;;  %v6019_v23 = vadd.f32 %v5964_v22, %v9152_v27 }
 0x754   : > { %v6187_v47 = vpop.f32.mrf.mxu1 }
 0x755   : > { %6753 = vst.msk [vmem:[%s9267_s21 + $0x70] sm:$0xff] %vm375_vm3, %v6721_v30  ;;  %v6410_v29 = vpop.f32.mrf.mxu2  ;;  %v6242_v39 = vadd.f32 %v6187_v47, %v6019_v23 }
 0x757   : > { %v6465_v58 = vadd.f32 %v6410_v29, %v6242_v39 }
 0x758   : > { %v6628_v49 = vpop.f32.mrf.mxu3 }
 0x759   : > { %v6686_v7 = vadd.f32 %v6628_v49, %v6463_v10 }
 0x75a   : > { %v5967_v44 = vpop.f32.mrf.mxu0 }
 0x75b   : > { %v6722_v28 = vadd.f32 %v9257_v9, %v6686_v7  ;;  %v6020_v31 = vadd.f32 %v5967_v44, %v9159_v19 }
 0x75c   : > { %v6190_v4 = vpop.f32.mrf.mxu1 }
 0x75d   : > { %6754 = vst.msk [vmem:[%s9267_s21 + $0x78] sm:$0xff] %vm375_vm3, %v6722_v28  ;;  %v6413_v61 = vpop.f32.mrf.mxu2  ;;  %v6243_v48 = vadd.f32 %v6190_v4, %v6020_v31 }
 0x75f   : > { %v6466_v2 = vadd.f32 %v6413_v61, %v6243_v48 }
 0x760   : > { %v6631_v55 = vpop.f32.mrf.mxu3 }
 0x761   : > { %v6687_v62 = vadd.f32 %v6631_v55, %v6464_v8 }
 0x762   : > { %v5969_v41 = vpop.f32.mrf.mxu0 }
 0x763   : > { %v6723_v57 = vadd.f32 %v9257_v9, %v6687_v62  ;;  %v6021_v56 = vadd.f32 %v5969_v41, %v9166_v16 }
 0x764   : > { %v6192_v27 = vpop.f32.mrf.mxu1 }
 0x765   : > { %6755 = vst.msk [vmem:[%s9267_s21 + $0x80] sm:$0xff] %vm375_vm3, %v6723_v57  ;;  %v6415_v0 = vpop.f32.mrf.mxu2  ;;  %v6244_v6 = vadd.f32 %v6192_v27, %v6021_v56 }
 0x767   : > { %v6467_v21 = vadd.f32 %v6415_v0, %v6244_v6 }
 0x768   : > { %v6633_v18 = vpop.f32.mrf.mxu3 }
 0x769   : > { %v6688_v14 = vadd.f32 %v6633_v18, %v6465_v58 }
 0x76a   : > { %v5972_v38 = vpop.f32.mrf.mxu0 }
 0x76b   : > { %v6724_v1 = vadd.f32 %v9257_v9, %v6688_v14  ;;  %v6022_v33 = vadd.f32 %v5972_v38, %v9173_v13 }
 0x76c   : > { %v6195_v19 = vpop.f32.mrf.mxu1 }
 0x76d   : > { %6756 = vst.msk [vmem:[%s9267_s21 + $0x88] sm:$0xff] %vm375_vm3, %v6724_v1  ;;  %v6418_v45 = vpop.f32.mrf.mxu2  ;;  %v6245_v59 = vadd.f32 %v6195_v19, %v6022_v33 }
 0x76f   : > { %v6468_v15 = vadd.f32 %v6418_v45, %v6245_v59 }
 0x770   : > { %v6636_v12 = vpop.f32.mrf.mxu3 }
 0x771   : > { %v6689_v11 = vadd.f32 %v6636_v12, %v6466_v2 }
 0x772   : > { %v5974_v52 = vpop.f32.mrf.mxu0 }
 0x773   : > { %v6725_v50 = vadd.f32 %v9257_v9, %v6689_v11  ;;  %v6023_v25 = vadd.f32 %v5974_v52, %v9180_v20 }
 0x774   : > { %v6197_v16 = vpop.f32.mrf.mxu1 }
 0x775   : > { %6757 = vst.msk [vmem:[%s9267_s21 + $0x90] sm:$0xff] %vm375_vm3, %v6725_v50  ;;  %v6420_v63 = vpop.f32.mrf.mxu2  ;;  %v6246_v46 = vadd.f32 %v6197_v16, %v6023_v25 }
 0x777   : > { %v6469_v49 = vadd.f32 %v6420_v63, %v6246_v46 }
 0x778   : > { %v6638_v24 = vpop.f32.mrf.mxu3 }
 0x779   : > { %v6690_v42 = vadd.f32 %v6638_v24, %v6467_v21 }
 0x77a   : > { %v5977_v10 = vpop.f32.mrf.mxu0 }
 0x77b   : > { %v6726_v5 = vadd.f32 %v9257_v9, %v6690_v42  ;;  %v6024_v28 = vadd.f32 %v5977_v10, %v9187_v51 }
 0x77c   : > { %v6200_v13 = vpop.f32.mrf.mxu1 }
 0x77d   : > { %6758 = vst.msk [vmem:[%s9267_s21 + $0x98] sm:$0xff] %vm375_vm3, %v6726_v5  ;;  %v6423_v17 = vpop.f32.mrf.mxu2  ;;  %v6247_v8 = vadd.f32 %v6200_v13, %v6024_v28 }
 0x77f   : > { %v6470_v29 = vadd.f32 %v6423_v17, %v6247_v8 }
 0x780   : > { %v6641_v30 = vpop.f32.mrf.mxu3 }
 0x781   : > { %v6691_v37 = vadd.f32 %v6641_v30, %v6468_v15 }
 0x782   : > { %v5979_v43 = vpop.f32.mrf.mxu0 }
 0x783   : > { %v6727_v35 = vadd.f32 %v9257_v9, %v6691_v37  ;;  %v6025_v62 = vadd.f32 %v5979_v43, %v9194_v34 }
 0x784   : > { %v6202_v20 = vpop.f32.mrf.mxu1 }
 0x785   : > { %6759 = vst.msk [vmem:[%s9267_s21 + $0xa0] sm:$0xff] %vm375_vm3, %v6727_v35  ;;  %v6425_v55 = vpop.f32.mrf.mxu2  ;;  %v6248_v39 = vadd.f32 %v6202_v20, %v6025_v62 }
 0x787   : > { %v6471_v58 = vadd.f32 %v6425_v55, %v6248_v39 }
 0x788   : > { %v6643_v7 = vpop.f32.mrf.mxu3 }
 0x789   : > { %v6692_v22 = vadd.f32 %v6643_v7, %v6469_v49 }
 0x78a   : > { %v5982_v4 = vpop.f32.mrf.mxu0 }
 0x78b   : > { %v6728_v47 = vadd.f32 %v9257_v9, %v6692_v22  ;;  %v6026_v31 = vadd.f32 %v5982_v4, %v9201_v3 }
 0x78c   : > { %v6205_v51 = vpop.f32.mrf.mxu1 }
 0x78d   : > { %6760 = vst.msk [vmem:[%s9267_s21 + $0xa8] sm:$0xff] %vm375_vm3, %v6728_v47  ;;  %v6428_v61 = vpop.f32.mrf.mxu2  ;;  %v6249_v27 = vadd.f32 %v6205_v51, %v6026_v31 }
 0x78f   : > { %v6472_v48 = vadd.f32 %v6428_v61, %v6249_v27 }
 0x790   : > { %v6646_v23 = vpop.f32.mrf.mxu3 }
 0x791   : > { %v6693_v57 = vadd.f32 %v6646_v23, %v6470_v29 }
 0x792   : > { %v5984_v41 = vpop.f32.mrf.mxu0 }
 0x793   : > { %v6729_v44 = vadd.f32 %v9257_v9, %v6693_v57  ;;  %v6027_v12 = vadd.f32 %v5984_v41, %v9208_v32 }
 0x794   : > { %v6207_v34 = vpop.f32.mrf.mxu1 }
 0x795   : > { %6761 = vst.msk [vmem:[%s9267_s21 + $0xb0] sm:$0xff] %vm375_vm3, %v6729_v44  ;;  %v6430_v2 = vpop.f32.mrf.mxu2  ;;  %v6250_v38 = vadd.f32 %v6207_v34, %v6027_v12 }
 0x797   : > { %v6473_v19 = vadd.f32 %v6430_v2, %v6250_v38 }
 0x798   : > { %v6648_v18 = vpop.f32.mrf.mxu3 }
 0x799   : > { %v6694_v14 = vadd.f32 %v6648_v18, %v6471_v58 }
 0x79a   : > { %v5987_v50 = vpop.f32.mrf.mxu0 }
 0x79b   : > { %v6730_v1 = vadd.f32 %v9257_v9, %v6694_v14  ;;  %v6028_v45 = vadd.f32 %v5987_v50, %v9215_v54 }
 0x79c   : > { %v6210_v3 = vpop.f32.mrf.mxu1 }
 0x79d   : > { %6762 = vst.msk [vmem:[%s9267_s21 + $0xb8] sm:$0xff] %vm375_vm3, %v6730_v1  ;;  %v6433_v6 = vpop.f32.mrf.mxu2  ;;  %v6251_v5 = vadd.f32 %v6210_v3, %v6028_v45 }
 0x79f   : > { %v6474_v52 = vadd.f32 %v6433_v6, %v6251_v5 }
 0x7a0   : > { %v6651_v0 = vpop.f32.mrf.mxu3 }
 0x7a1   : > { %v6695_v56 = vadd.f32 %v6651_v0, %v6472_v48 }
 0x7a2   : > { %v5989_v42 = vpop.f32.mrf.mxu0 }
 0x7a3   : > { %v6731_v11 = vadd.f32 %v9257_v9, %v6695_v56  ;;  %v6029_v15 = vadd.f32 %v5989_v42, %v9222_v53 }
 0x7a4   : > { %v6212_v32 = vpop.f32.mrf.mxu1 }
 0x7a5   : > { %6763 = vst.msk [vmem:[%s9267_s21 + $0xc0] sm:$0xff] %vm375_vm3, %v6731_v11  ;;  %v6435_v16 = vpop.f32.mrf.mxu2  ;;  %v6252_v37 = vadd.f32 %v6212_v32, %v6029_v15 }
 0x7a7   : > { %v6475_v35 = vadd.f32 %v6435_v16, %v6252_v37 }
 0x7a8   : > { %v6653_v21 = vpop.f32.mrf.mxu3 }
 0x7a9   : > { %v6696_v24 = vadd.f32 %v6653_v21, %v6473_v19 }
 0x7aa   : > { %v5992_v25 = vpop.f32.mrf.mxu0 }
 0x7ab   : > { %v6732_v33 = vadd.f32 %v9257_v9, %v6696_v24  ;;  %v6030_v46 = vadd.f32 %v5992_v25, %v9229_v36 }
 0x7ac   : > { %v6215_v54 = vpop.f32.mrf.mxu1 }
 0x7ad   : > { %6764 = vst.msk [vmem:[%s9267_s21 + $0xc8] sm:$0xff] %vm375_vm3, %v6732_v33  ;;  %v6438_v10 = vpop.f32.mrf.mxu2  ;;  %v6253_v28 = vadd.f32 %v6215_v54, %v6030_v46 }
 0x7af   : > { %v6476_v53 = vadd.f32 %v6438_v10, %v6253_v28 }
 0x7b0   : > { %v6656_v59 = vpop.f32.mrf.mxu3 }
 0x7b1   : > { %v6697_v63 = vadd.f32 %v6656_v59, %v6474_v52 }
 0x7b2   : > { %v5994_v7 = vpop.f32.mrf.mxu0 }
 0x7b3   : > { %v6733_v30 = vadd.f32 %v9257_v9, %v6697_v63  ;;  %v6031_v20 = vadd.f32 %v5994_v7, %v9236_v60 }
 0x7b4   : > { %v6217_v22 = vpop.f32.mrf.mxu1 }
 0x7b5   : > { %6765 = vst.msk [vmem:[%s9267_s21 + $0xd0] sm:$0xff] %vm375_vm3, %v6733_v30  ;;  %v6440_v43 = vpop.f32.mrf.mxu2  ;;  %v6254_v23 = vadd.f32 %v6217_v22, %v6031_v20 }
 0x7b7   : > { %v6477_v36 = vadd.f32 %v6440_v43, %v6254_v23 }
 0x7b8   : > { %v6658_v13 = vpop.f32.mrf.mxu3 }
 0x7b9   : > { %v6698_v49 = vadd.f32 %v6658_v13, %v6475_v35 }
 0x7ba   : > { %v5997_v55 = vpop.f32.mrf.mxu0 }
 0x7bb   : > { %v6734_v17 = vadd.f32 %v9257_v9, %v6698_v49  ;;  %v6032_v57 = vadd.f32 %v5997_v55, %v9243_v26 }
 0x7bc   : > { %v6220_v4 = vpop.f32.mrf.mxu1 }
 0x7bd   : > { %6766 = vst.msk [vmem:[%s9267_s21 + $0xd8] sm:$0xff] %vm375_vm3, %v6734_v17  ;;  %v6443_v51 = vpop.f32.mrf.mxu2  ;;  %v6255_v58 = vadd.f32 %v6220_v4, %v6032_v57 }
 0x7bf   : > { %v6478_v61 = vadd.f32 %v6443_v51, %v6255_v58 }
 0x7c0   : > { %v6661_v47 = vpop.f32.mrf.mxu3 }
 0x7c1   : > { %v6699_v8 = vadd.f32 %v6661_v47, %v6476_v53 }
 0x7c2   : > { %v5999_v60 = vpop.f32.mrf.mxu0 }
 0x7c3   : > { %v6735_v29 = vadd.f32 %v9257_v9, %v6699_v8  ;;  %v6033_v31 = vadd.f32 %v5999_v60, %v9250_v40 }
 0x7c4   : > { %v6222_v41 = vpop.f32.mrf.mxu1 }
 0x7c5   : > { %6767 = vst.msk [vmem:[%s9267_s21 + $0xe0] sm:$0xff] %vm375_vm3, %v6735_v29  ;;  %v6445_v26 = vpop.f32.mrf.mxu2  ;;  %v6256_v34 = vadd.f32 %v6222_v41, %v6033_v31 }
 0x7c7   : > { %v6479_v27 = vadd.f32 %v6445_v26, %v6256_v34 }
 0x7c8   : > { %v6663_v62 = vpop.f32.mrf.mxu3 }
 0x7c9   : > { %v6700_v44 = vadd.f32 %v6663_v62, %v6477_v36 }
 0x7cb   : > { %v6736_v39 = vadd.f32 %v9257_v9, %v6700_v44 }
 0x7cd   : > { %6768 = vst.msk [vmem:[%s9267_s21 + $0xe8] sm:$0xff] %vm375_vm3, %v6736_v39 }
 0x7d0   : > { %v6666_v18 = vpop.f32.mrf.mxu3 }
 0x7d1   : > { %v6701_v14 = vadd.f32 %v6666_v18, %v6478_v61 }
 0x7d3   : > { %v6737_v1 = vadd.f32 %v9257_v9, %v6701_v14 }
 0x7d5   : > { %6769 = vst.msk [vmem:[%s9267_s21 + $0xf0] sm:$0xff] %vm375_vm3, %v6737_v1 }
 0x7d8   : > { %v6668_v48 = vpop.f32.mrf.mxu3 }
 0x7d9   : > { %v6702_v2 = vadd.f32 %v6668_v48, %v6479_v27 }
 0x7db   : > { %v6738_v0 = vadd.f32 %v9257_v9, %v6702_v2 }
 0x7dd   : > { %6770 = vst.msk [vmem:[%s9267_s21 + $0xf8] sm:$0xff] %vm375_vm3, %v6738_v0 }
 0x7de PF: > { %s18_s27 = sadd.s32 1, %s7331_s27  }
 0x7df   : > { %p15_p4 = scmp.ge.s32.totalorder %s18_s27, 4  }
 0x7e1   :  { %17 = sbr.rel (!%p15_p4) target bundleno = 1 (0x1), region = 118 }

</bundles_post_ra>
